<compile_context>
chip_gen: v5e
topology: v5e:2x2
jax: 0.10.0
libtpu: 0.0.40
codegen_flags: <defaults>
</compile_context>

<pallas_src>
import functools

import jax
import jax.numpy as jnp
from jax.experimental import pallas as pl
from jax.experimental.pallas import tpu as pltpu

BN_EPS = 1e-5
LANES = 128


def _round_up(x, m):
    return (x + m - 1) // m * m


def conv_pool_stats_kernel(x_ref, w_ref, pooled_ref, stats_ref):
    """One image x one Cout tile.

    x_ref:      (1, 16, M, Cin) bf16  -- 16 = (phase_a, phase_b, win_du, win_dv)
    w_ref:      (9, Cin, Tco)   bf16  -- 3x3 taps, one Cout tile
    pooled_ref: (1, M, Tco)     f32   -- max-pooled pre-BN conv output
    stats_ref:  (2, Tco)        f32   -- [sum; sumsq] over all 4*M conv positions,
                                         accumulated across the batch grid axis
    """
    i = pl.program_id(1)
    m, tco = pooled_ref.shape[1], pooled_ref.shape[2]

    taps = [w_ref[k] for k in range(9)]        # (Cin, Tco) each, loaded once

    pooled = None
    ch_sum = jnp.zeros((1, tco), jnp.float32)
    ch_sumsq = jnp.zeros((1, tco), jnp.float32)

    # Conv bias is omitted on purpose: train-mode BatchNorm subtracts the batch
    # mean, which cancels any per-channel bias exactly.
    for py in range(2):
        for px in range(2):
            acc = jnp.zeros((m, tco), jnp.float32)
            for ky in range(3):
                for kx in range(3):
                    t, s = py + ky, px + kx
                    idx = (t % 2) * 8 + (s % 2) * 4 + (t // 2) * 2 + (s // 2)
                    lhs = x_ref[0, idx]        # (M, Cin) bf16, unit stride
                    acc = acc + jnp.dot(lhs, taps[3 * ky + kx],
                                        preferred_element_type=jnp.float32)
            ch_sum = ch_sum + jnp.sum(acc, axis=0, keepdims=True)
            ch_sumsq = ch_sumsq + jnp.sum(acc * acc, axis=0, keepdims=True)
            # Max-pool before the BN affine (BN scale >= 0 with gamma ~ U[0,1)).
            pooled = acc if pooled is None else jnp.maximum(pooled, acc)

    pooled_ref[0] = pooled

    @pl.when(i == 0)
    def _init():
        stats_ref[...] = jnp.zeros_like(stats_ref)

    stats_ref[...] += jnp.concatenate([ch_sum, ch_sumsq], axis=0)


def bn_relu_kernel(pooled_ref, stats_ref, gamma_ref, beta_ref, o_ref, *, count):
    """Apply the BN affine (from batch stats) + ReLU to the pooled rows."""
    inv_n = 1.0 / count
    mean = stats_ref[0:1, :] * inv_n                            # (1, CoutP)
    var = jnp.maximum(stats_ref[1:2, :] * inv_n - mean * mean, 0.0)
    scale = gamma_ref[...] * jax.lax.rsqrt(var + BN_EPS)        # >= 0 by init
    shift = beta_ref[...] - mean * scale
    o_ref[...] = jnp.maximum(pooled_ref[...] * scale + shift, 0.0)


def conv_block_forward(x, w, gamma, beta, *, cout_tile=LANES):
    """x: (N, H, W, Cin) f32 NHWC; w: (3, 3, Cin, Cout); gamma/beta: (Cout,)."""
    nb, h, wd, cin = x.shape
    cout = w.shape[-1]
    hh, wh = h // 2, wd // 2
    hp, wp = hh + 1, wh + 1
    m = hh * wh
    coutp = _round_up(cout, cout_tile)
    nco = coutp // cout_tile

    # Weights (3,3,Cin,Cout) -> (9,Cin,CoutP) bf16, channel-padded with zeros.
    w9 = jnp.pad(w.reshape(9, cin, cout), ((0, 0), (0, 0), (0, coutp - cout)))
    w9 = w9.astype(jnp.bfloat16)
    g_p = jnp.pad(gamma.reshape(1, cout).astype(jnp.float32),
                  ((0, 0), (0, coutp - cout)))
    b_p = jnp.pad(beta.reshape(1, cout).astype(jnp.float32),
                  ((0, 0), (0, coutp - cout)))

    # Stride-2 phase split of the conv-padded input, then the 4 (du, dv) window
    # shifts, flattened to 16 unit-stride (M, Cin) matmul LHS views per image.
    # TODO(synk): for odd H/W the conv row/col that MaxPool2d floor-drops is also
    # excluded from the BN batch statistics (small deviation from PyTorch there).
    xpad = jnp.pad(x, ((0, 0), (1, 2 * hp - h - 1), (1, 2 * wp - wd - 1), (0, 0)))
    xph = xpad.reshape(nb, hp, 2, wp, 2, cin).transpose(0, 2, 4, 1, 3, 5)
    xwin = jnp.stack(
        [jnp.stack([xph[:, :, :, du:du + hh, dv:dv + wh, :] for dv in range(2)],
                   axis=3) for du in range(2)],
        axis=3)                                  # (N, 2, 2, 2, 2, Hh, Wh, Cin)
    xwin = xwin.reshape(nb, 16, m, cin).astype(jnp.bfloat16)

    # Explicit scoped-VMEM budget from the chosen blocks (double-buffered I/O plus
    # in-kernel quadrant accumulators), clamped to be safe on v5e / v6e / v7x.
    est = (2 * (16 * m * cin * 2 + 9 * cin * cout_tile * 2
                + m * cout_tile * 4 + 2 * cout_tile * 4)
           + 6 * m * cout_tile * 4)
    vmem_limit = int(min(max(est + (4 << 20), 32 << 20), 56 << 20))

    pooled, stats = pl.pallas_call(
        conv_pool_stats_kernel,
        grid=(nco, nb),
        in_specs=[
            pl.BlockSpec((1, 16, m, cin), lambda co, i: (i, 0, 0, 0)),
            pl.BlockSpec((9, cin, cout_tile), lambda co, i: (0, 0, co)),  # resident
        ],
        out_specs=(
            pl.BlockSpec((1, m, cout_tile), lambda co, i: (i, 0, co)),
            pl.BlockSpec((2, cout_tile), lambda co, i: (0, co)),          # accumulator
        ),
        out_shape=(
            jax.ShapeDtypeStruct((nb, m, coutp), jnp.float32),
            jax.ShapeDtypeStruct((2, coutp), jnp.float32),
        ),
        compiler_params=pltpu.CompilerParams(
            dimension_semantics=("parallel", "arbitrary"),
            vmem_limit_bytes=vmem_limit,
        ),
    )(xwin, w9)

    count = float(4 * nb * m)   # all conv positions feeding the BN batch statistics
    out = pl.pallas_call(
        functools.partial(bn_relu_kernel, count=count),
        grid=(nb,),
        in_specs=[
            pl.BlockSpec((1, m, coutp), lambda i: (i, 0, 0)),
            pl.BlockSpec((2, coutp), lambda i: (0, 0)),
            pl.BlockSpec((1, coutp), lambda i: (0, 0)),
            pl.BlockSpec((1, coutp), lambda i: (0, 0)),
        ],
        out_specs=pl.BlockSpec((1, m, coutp), lambda i: (i, 0, 0)),
        out_shape=jax.ShapeDtypeStruct((nb, m, coutp), jnp.float32),
        compiler_params=pltpu.CompilerParams(
            dimension_semantics=("parallel",)),
    )(pooled, stats, g_p, b_p)

    # Drop the lane-padding channels and restore NHWC spatial shape.
    return out[:, :, :cout].reshape(nb, hh, wh, cout)


def convnet_forward(x_nchw, params):
    """Forward pass of Convnet: 4 conv blocks, then flatten (PyTorch NCHW order)."""
    x = jnp.transpose(x_nchw, (0, 2, 3, 1)).astype(jnp.float32)   # NCHW -> NHWC
    for (w, gamma, beta) in params:
        x = conv_block_forward(x, w, gamma, beta)
    nb = x.shape[0]
    # Match PyTorch's x.view(B, -1) on an NCHW tensor.
    return jnp.transpose(x, (0, 3, 1, 2)).reshape(nb, -1)


def init_params(key, channels):
    """Per conv_block: conv weight (PyTorch-style uniform bound), BN weight ~ U[0,1)
    (nn.init.uniform_), BN bias = 0.  The Conv2d bias is omitted because train-mode
    BatchNorm's batch-mean subtraction cancels it exactly."""
    params = []
    for cin, cout in zip(channels[:-1], channels[1:]):
        key, k1, k2 = jax.random.split(key, 3)
        bound = 1.0 / (cin * 9) ** 0.5
        w = jax.random.uniform(k1, (3, 3, cin, cout), jnp.float32, -bound, bound)
        gamma = jax.random.uniform(k2, (cout,), jnp.float32, 0.0, 1.0)
        beta = jnp.zeros((cout,), jnp.float32)
        params.append((w, gamma, beta))
    return params


if __name__ == "__main__":
    key = jax.random.PRNGKey(0)
    kx, kp = jax.random.split(key)
    # Small shapes consistent with the module (real model: 3->64->64->320->1600 on
    # 84x84 inputs; here 3->16->16->32->64 on 16x16, so spatial is 1x1 after the
    # four 2x max-pools).
    x = jax.random.normal(kx, (2, 3, 16, 16), jnp.float32)   # NCHW, like PyTorch
    params = init_params(kp, (3, 16, 16, 32, 64))

    # NOTE: self.scale is only used in .loss(), not in forward().
    fwd = jax.jit(convnet_forward)
    out = jax.block_until_ready(fwd(x, params))
    assert out.shape == (2, 64), out.shape
    assert bool(jnp.all(jnp.isfinite(out)))
    print("KERNEL_OK")
</pallas_src>

<mosaic_0001>
module attributes {stable_mosaic.version = 11 : i64} {
  func.func @bn_relu_kernel(%arg0: i32, %arg1: memref<1x64x128xf32, #tpu.memory_space<vmem>>, %arg2: memref<2x128xf32, #tpu.memory_space<vmem>>, %arg3: memref<1x128xf32, #tpu.memory_space<vmem>>, %arg4: memref<1x128xf32, #tpu.memory_space<vmem>>, %arg5: memref<1x64x128xf32, #tpu.memory_space<vmem>>) attributes {dimension_semantics = [#tpu.dimension_semantics<parallel>], iteration_bounds = array<i64: 2>, scalar_prefetch = 0 : i64, scratch_operands = 0 : i64, tpu.core_type = #tpu.core_type<tc>, window_params = [{transform_indices = @transform_0, window_bounds = array<i64: 1, 64, 128>}, {pipeline_mode = #tpu.pipeline_mode<synchronous>, transform_indices = @transform_1, window_bounds = array<i64: 2, 128>}, {pipeline_mode = #tpu.pipeline_mode<synchronous>, transform_indices = @transform_2, window_bounds = array<i64: 1, 128>}, {pipeline_mode = #tpu.pipeline_mode<synchronous>, transform_indices = @transform_3, window_bounds = array<i64: 1, 128>}, {transform_indices = @transform_4, window_bounds = array<i64: 1, 64, 128>}]} {
    %c0 = arith.constant 0 : index
    %c0_0 = arith.constant 0 : index
    %0 = vector.load %arg2[%c0, %c0_0] : memref<2x128xf32, #tpu.memory_space<vmem>>, vector<1x128xf32>
    %cst = arith.constant 0.001953125 : f32
    %1 = vector.broadcast %cst : f32 to vector<1x128xf32>
    %2 = arith.mulf %0, %1 : vector<1x128xf32>
    %c1 = arith.constant 1 : index
    %c0_1 = arith.constant 0 : index
    %3 = vector.load %arg2[%c1, %c0_1] : memref<2x128xf32, #tpu.memory_space<vmem>>, vector<1x128xf32>
    %cst_2 = arith.constant 0.001953125 : f32
    %4 = vector.broadcast %cst_2 : f32 to vector<1x128xf32>
    %5 = arith.mulf %3, %4 : vector<1x128xf32>
    %6 = arith.mulf %2, %2 : vector<1x128xf32>
    %7 = arith.subf %5, %6 : vector<1x128xf32>
    %cst_3 = arith.constant 0.000000e+00 : f32
    %8 = vector.broadcast %cst_3 : f32 to vector<1x128xf32>
    %9 = arith.maximumf %7, %8 : vector<1x128xf32>
    %c0_4 = arith.constant 0 : index
    %c0_5 = arith.constant 0 : index
    %10 = vector.load %arg3[%c0_4, %c0_5] : memref<1x128xf32, #tpu.memory_space<vmem>>, vector<1x128xf32>
    %cst_6 = arith.constant 9.99999974E-6 : f32
    %11 = vector.broadcast %cst_6 : f32 to vector<1x128xf32>
    %12 = arith.addf %9, %11 : vector<1x128xf32>
    %13 = math.rsqrt %12 : vector<1x128xf32>
    %14 = arith.mulf %10, %13 : vector<1x128xf32>
    %c0_7 = arith.constant 0 : index
    %c0_8 = arith.constant 0 : index
    %15 = vector.load %arg4[%c0_7, %c0_8] : memref<1x128xf32, #tpu.memory_space<vmem>>, vector<1x128xf32>
    %16 = arith.mulf %2, %14 : vector<1x128xf32>
    %17 = arith.subf %15, %16 : vector<1x128xf32>
    %c0_9 = arith.constant 0 : index
    %c0_10 = arith.constant 0 : index
    %c0_11 = arith.constant 0 : index
    %18 = vector.load %arg1[%c0_9, %c0_10, %c0_11] : memref<1x64x128xf32, #tpu.memory_space<vmem>>, vector<1x64x128xf32>
    %19 = vector.shape_cast %14 : vector<1x128xf32> to vector<1x1x128xf32>
    %20 = vector.broadcast %19 : vector<1x1x128xf32> to vector<1x64x128xf32>
    %21 = arith.mulf %18, %20 : vector<1x64x128xf32>
    %22 = vector.shape_cast %17 : vector<1x128xf32> to vector<1x1x128xf32>
    %23 = vector.broadcast %22 : vector<1x1x128xf32> to vector<1x64x128xf32>
    %24 = arith.addf %21, %23 : vector<1x64x128xf32>
    %cst_12 = arith.constant 0.000000e+00 : f32
    %25 = vector.broadcast %cst_12 : f32 to vector<1x64x128xf32>
    %26 = arith.maximumf %24, %25 : vector<1x64x128xf32>
    %c0_13 = arith.constant 0 : index
    %c0_14 = arith.constant 0 : index
    %c0_15 = arith.constant 0 : index
    %27 = vector.load %arg5[%c0_13, %c0_14, %c0_15] : memref<1x64x128xf32, #tpu.memory_space<vmem>>, vector<1x64x128xf32>
    tpu.vector_store %arg5[%c0_13, %c0_14, %c0_15], %26 {strides = array<i32>} : memref<1x64x128xf32, #tpu.memory_space<vmem>>, vector<1x64x128xf32>,
    return
  }
  func.func @transform_0(%arg0: i32) -> (i32, i32, i32) {
    %c0_i32 = arith.constant 0 : i32
    %c0_i32_0 = arith.constant 0 : i32
    %c0_i32_1 = arith.constant 0 : i32
    return %arg0, %c0_i32, %c0_i32_0 : i32, i32, i32
  }
  func.func @transform_1(%arg0: i32) -> (i32, i32) {
    %c0_i32 = arith.constant 0 : i32
    %c0_i32_0 = arith.constant 0 : i32
    %c0_i32_1 = arith.constant 0 : i32
    return %c0_i32, %c0_i32_0 : i32, i32
  }
  func.func @transform_2(%arg0: i32) -> (i32, i32) {
    %c0_i32 = arith.constant 0 : i32
    %c0_i32_0 = arith.constant 0 : i32
    %c0_i32_1 = arith.constant 0 : i32
    return %c0_i32, %c0_i32_0 : i32, i32
  }
  func.func @transform_3(%arg0: i32) -> (i32, i32) {
    %c0_i32 = arith.constant 0 : i32
    %c0_i32_0 = arith.constant 0 : i32
    %c0_i32_1 = arith.constant 0 : i32
    return %c0_i32, %c0_i32_0 : i32, i32
  }
  func.func @transform_4(%arg0: i32) -> (i32, i32, i32) {
    %c0_i32 = arith.constant 0 : i32
    %c0_i32_0 = arith.constant 0 : i32
    %c0_i32_1 = arith.constant 0 : i32
    return %arg0, %c0_i32, %c0_i32_0 : i32, i32, i32
  }
}

module attributes {stable_mosaic.version = 11 : i64} {
  func.func @conv_pool_stats_kernel(%arg0: i32, %arg1: i32, %arg2: memref<1x16x64x3xbf16, #tpu.memory_space<vmem>>, %arg3: memref<9x3x128xbf16, #tpu.memory_space<vmem>>, %arg4: memref<1x64x128xf32, #tpu.memory_space<vmem>>, %arg5: memref<2x128xf32, #tpu.memory_space<vmem>>) attributes {dimension_semantics = [#tpu.dimension_semantics<parallel>, #tpu.dimension_semantics<arbitrary>], iteration_bounds = array<i64: 1, 2>, scalar_prefetch = 0 : i64, scratch_operands = 0 : i64, tpu.core_type = #tpu.core_type<tc>, window_params = [{transform_indices = @transform_0, window_bounds = array<i64: 1, 16, 64, 3>}, {transform_indices = @transform_1, window_bounds = array<i64: 9, 3, 128>}, {transform_indices = @transform_2, window_bounds = array<i64: 1, 64, 128>}, {transform_indices = @transform_3, window_bounds = array<i64: 2, 128>}]} {
    %c0 = arith.constant 0 : index
    %c0_0 = arith.constant 0 : index
    %c0_1 = arith.constant 0 : index
    %0 = vector.load %arg3[%c0, %c0_0, %c0_1] : memref<9x3x128xbf16, #tpu.memory_space<vmem>>, vector<1x3x128xbf16>
    %1 = vector.shape_cast %0 : vector<1x3x128xbf16> to vector<3x128xbf16>
    %c1 = arith.constant 1 : index
    %c0_2 = arith.constant 0 : index
    %c0_3 = arith.constant 0 : index
    %2 = vector.load %arg3[%c1, %c0_2, %c0_3] : memref<9x3x128xbf16, #tpu.memory_space<vmem>>, vector<1x3x128xbf16>
    %3 = vector.shape_cast %2 : vector<1x3x128xbf16> to vector<3x128xbf16>
    %c2 = arith.constant 2 : index
    %c0_4 = arith.constant 0 : index
    %c0_5 = arith.constant 0 : index
    %4 = vector.load %arg3[%c2, %c0_4, %c0_5] : memref<9x3x128xbf16, #tpu.memory_space<vmem>>, vector<1x3x128xbf16>
    %5 = vector.shape_cast %4 : vector<1x3x128xbf16> to vector<3x128xbf16>
    %c3 = arith.constant 3 : index
    %c0_6 = arith.constant 0 : index
    %c0_7 = arith.constant 0 : index
    %6 = vector.load %arg3[%c3, %c0_6, %c0_7] : memref<9x3x128xbf16, #tpu.memory_space<vmem>>, vector<1x3x128xbf16>
    %7 = vector.shape_cast %6 : vector<1x3x128xbf16> to vector<3x128xbf16>
    %c4 = arith.constant 4 : index
    %c0_8 = arith.constant 0 : index
    %c0_9 = arith.constant 0 : index
    %8 = vector.load %arg3[%c4, %c0_8, %c0_9] : memref<9x3x128xbf16, #tpu.memory_space<vmem>>, vector<1x3x128xbf16>
    %9 = vector.shape_cast %8 : vector<1x3x128xbf16> to vector<3x128xbf16>
    %c5 = arith.constant 5 : index
    %c0_10 = arith.constant 0 : index
    %c0_11 = arith.constant 0 : index
    %10 = vector.load %arg3[%c5, %c0_10, %c0_11] : memref<9x3x128xbf16, #tpu.memory_space<vmem>>, vector<1x3x128xbf16>
    %11 = vector.shape_cast %10 : vector<1x3x128xbf16> to vector<3x128xbf16>
    %c6 = arith.constant 6 : index
    %c0_12 = arith.constant 0 : index
    %c0_13 = arith.constant 0 : index
    %12 = vector.load %arg3[%c6, %c0_12, %c0_13] : memref<9x3x128xbf16, #tpu.memory_space<vmem>>, vector<1x3x128xbf16>
    %13 = vector.shape_cast %12 : vector<1x3x128xbf16> to vector<3x128xbf16>
    %c7 = arith.constant 7 : index
    %c0_14 = arith.constant 0 : index
    %c0_15 = arith.constant 0 : index
    %14 = vector.load %arg3[%c7, %c0_14, %c0_15] : memref<9x3x128xbf16, #tpu.memory_space<vmem>>, vector<1x3x128xbf16>
    %15 = vector.shape_cast %14 : vector<1x3x128xbf16> to vector<3x128xbf16>
    %c8 = arith.constant 8 : index
    %c0_16 = arith.constant 0 : index
    %c0_17 = arith.constant 0 : index
    %16 = vector.load %arg3[%c8, %c0_16, %c0_17] : memref<9x3x128xbf16, #tpu.memory_space<vmem>>, vector<1x3x128xbf16>
    %17 = vector.shape_cast %16 : vector<1x3x128xbf16> to vector<3x128xbf16>
    %cst = arith.constant 0.000000e+00 : f32
    %18 = vector.broadcast %cst : f32 to vector<1x128xf32>
    %cst_18 = arith.constant 0.000000e+00 : f32
    %19 = vector.broadcast %cst_18 : f32 to vector<1x128xf32>
    %cst_19 = arith.constant 0.000000e+00 : f32
    %20 = vector.broadcast %cst_19 : f32 to vector<64x128xf32>
    %c0_20 = arith.constant 0 : index
    %c0_21 = arith.constant 0 : index
    %c0_22 = arith.constant 0 : index
    %c0_23 = arith.constant 0 : index
    %21 = vector.load %arg2[%c0_20, %c0_21, %c0_22, %c0_23] : memref<1x16x64x3xbf16, #tpu.memory_space<vmem>>, vector<1x1x64x3xbf16>
    %22 = vector.shape_cast %21 : vector<1x1x64x3xbf16> to vector<64x3xbf16>
    %cst_24 = arith.constant dense<0.000000e+00> : vector<64x128xf32>
    %23 = tpu.matmul %22, %1, %cst_24 {dimension_numbers = #tpu.dot_dimension_numbers<[1], [0], [0], [1], [0, 0, 1, 1], [], []>} : vector<64x3xbf16>, vector<3x128xbf16>, vector<64x128xf32> -> vector<64x128xf32>
    %24 = arith.addf %20, %23 : vector<64x128xf32>
    %c0_25 = arith.constant 0 : index
    %c4_26 = arith.constant 4 : index
    %c0_27 = arith.constant 0 : index
    %c0_28 = arith.constant 0 : index
    %25 = vector.load %arg2[%c0_25, %c4_26, %c0_27, %c0_28] : memref<1x16x64x3xbf16, #tpu.memory_space<vmem>>, vector<1x1x64x3xbf16>
    %26 = vector.shape_cast %25 : vector<1x1x64x3xbf16> to vector<64x3xbf16>
    %cst_29 = arith.constant dense<0.000000e+00> : vector<64x128xf32>
    %27 = tpu.matmul %26, %3, %cst_29 {dimension_numbers = #tpu.dot_dimension_numbers<[1], [0], [0], [1], [0, 0, 1, 1], [], []>} : vector<64x3xbf16>, vector<3x128xbf16>, vector<64x128xf32> -> vector<64x128xf32>
    %28 = arith.addf %24, %27 : vector<64x128xf32>
    %c0_30 = arith.constant 0 : index
    %c1_31 = arith.constant 1 : index
    %c0_32 = arith.constant 0 : index
    %c0_33 = arith.constant 0 : index
    %29 = vector.load %arg2[%c0_30, %c1_31, %c0_32, %c0_33] : memref<1x16x64x3xbf16, #tpu.memory_space<vmem>>, vector<1x1x64x3xbf16>
    %30 = vector.shape_cast %29 : vector<1x1x64x3xbf16> to vector<64x3xbf16>
    %cst_34 = arith.constant dense<0.000000e+00> : vector<64x128xf32>
    %31 = tpu.matmul %30, %5, %cst_34 {dimension_numbers = #tpu.dot_dimension_numbers<[1], [0], [0], [1], [0, 0, 1, 1], [], []>} : vector<64x3xbf16>, vector<3x128xbf16>, vector<64x128xf32> -> vector<64x128xf32>
    %32 = arith.addf %28, %31 : vector<64x128xf32>
    %c0_35 = arith.constant 0 : index
    %c8_36 = arith.constant 8 : index
    %c0_37 = arith.constant 0 : index
    %c0_38 = arith.constant 0 : index
    %33 = vector.load %arg2[%c0_35, %c8_36, %c0_37, %c0_38] : memref<1x16x64x3xbf16, #tpu.memory_space<vmem>>, vector<1x1x64x3xbf16>
    %34 = vector.shape_cast %33 : vector<1x1x64x3xbf16> to vector<64x3xbf16>
    %cst_39 = arith.constant dense<0.000000e+00> : vector<64x128xf32>
    %35 = tpu.matmul %34, %7, %cst_39 {dimension_numbers = #tpu.dot_dimension_numbers<[1], [0], [0], [1], [0, 0, 1, 1], [], []>} : vector<64x3xbf16>, vector<3x128xbf16>, vector<64x128xf32> -> vector<64x128xf32>
    %36 = arith.addf %32, %35 : vector<64x128xf32>
    %c0_40 = arith.constant 0 : index
    %c12 = arith.constant 12 : index
    %c0_41 = arith.constant 0 : index
    %c0_42 = arith.constant 0 : index
    %37 = vector.load %arg2[%c0_40, %c12, %c0_41, %c0_42] : memref<1x16x64x3xbf16, #tpu.memory_space<vmem>>, vector<1x1x64x3xbf16>
    %38 = vector.shape_cast %37 : vector<1x1x64x3xbf16> to vector<64x3xbf16>
    %cst_43 = arith.constant dense<0.000000e+00> : vector<64x128xf32>
    %39 = tpu.matmul %38, %9, %cst_43 {dimension_numbers = #tpu.dot_dimension_numbers<[1], [0], [0], [1], [0, 0, 1, 1], [], []>} : vector<64x3xbf16>, vector<3x128xbf16>, vector<64x128xf32> -> vector<64x128xf32>
    %40 = arith.addf %36, %39 : vector<64x128xf32>
    %c0_44 = arith.constant 0 : index
    %c9 = arith.constant 9 : index
    %c0_45 = arith.constant 0 : index
    %c0_46 = arith.constant 0 : index
    %41 = vector.load %arg2[%c0_44, %c9, %c0_45, %c0_46] : memref<1x16x64x3xbf16, #tpu.memory_space<vmem>>, vector<1x1x64x3xbf16>
    %42 = vector.shape_cast %41 : vector<1x1x64x3xbf16> to vector<64x3xbf16>
    %cst_47 = arith.constant dense<0.000000e+00> : vector<64x128xf32>
    %43 = tpu.matmul %42, %11, %cst_47 {dimension_numbers = #tpu.dot_dimension_numbers<[1], [0], [0], [1], [0, 0, 1, 1], [], []>} : vector<64x3xbf16>, vector<3x128xbf16>, vector<64x128xf32> -> vector<64x128xf32>
    %44 = arith.addf %40, %43 : vector<64x128xf32>
    %c0_48 = arith.constant 0 : index
    %c2_49 = arith.constant 2 : index
    %c0_50 = arith.constant 0 : index
    %c0_51 = arith.constant 0 : index
    %45 = vector.load %arg2[%c0_48, %c2_49, %c0_50, %c0_51] : memref<1x16x64x3xbf16, #tpu.memory_space<vmem>>, vector<1x1x64x3xbf16>
    %46 = vector.shape_cast %45 : vector<1x1x64x3xbf16> to vector<64x3xbf16>
    %cst_52 = arith.constant dense<0.000000e+00> : vector<64x128xf32>
    %47 = tpu.matmul %46, %13, %cst_52 {dimension_numbers = #tpu.dot_dimension_numbers<[1], [0], [0], [1], [0, 0, 1, 1], [], []>} : vector<64x3xbf16>, vector<3x128xbf16>, vector<64x128xf32> -> vector<64x128xf32>
    %48 = arith.addf %44, %47 : vector<64x128xf32>
    %c0_53 = arith.constant 0 : index
    %c6_54 = arith.constant 6 : index
    %c0_55 = arith.constant 0 : index
    %c0_56 = arith.constant 0 : index
    %49 = vector.load %arg2[%c0_53, %c6_54, %c0_55, %c0_56] : memref<1x16x64x3xbf16, #tpu.memory_space<vmem>>, vector<1x1x64x3xbf16>
    %50 = vector.shape_cast %49 : vector<1x1x64x3xbf16> to vector<64x3xbf16>
    %cst_57 = arith.constant dense<0.000000e+00> : vector<64x128xf32>
    %51 = tpu.matmul %50, %15, %cst_57 {dimension_numbers = #tpu.dot_dimension_numbers<[1], [0], [0], [1], [0, 0, 1, 1], [], []>} : vector<64x3xbf16>, vector<3x128xbf16>, vector<64x128xf32> -> vector<64x128xf32>
    %52 = arith.addf %48, %51 : vector<64x128xf32>
    %c0_58 = arith.constant 0 : index
    %c3_59 = arith.constant 3 : index
    %c0_60 = arith.constant 0 : index
    %c0_61 = arith.constant 0 : index
    %53 = vector.load %arg2[%c0_58, %c3_59, %c0_60, %c0_61] : memref<1x16x64x3xbf16, #tpu.memory_space<vmem>>, vector<1x1x64x3xbf16>
    %54 = vector.shape_cast %53 : vector<1x1x64x3xbf16> to vector<64x3xbf16>
    %cst_62 = arith.constant dense<0.000000e+00> : vector<64x128xf32>
    %55 = tpu.matmul %54, %17, %cst_62 {dimension_numbers = #tpu.dot_dimension_numbers<[1], [0], [0], [1], [0, 0, 1, 1], [], []>} : vector<64x3xbf16>, vector<3x128xbf16>, vector<64x128xf32> -> vector<64x128xf32>
    %56 = arith.addf %52, %55 : vector<64x128xf32>
    %cst_63 = arith.constant dense<0.000000e+00> : vector<128xf32>
    %57 = vector.multi_reduction <add>, %56, %cst_63 [0] : vector<64x128xf32> to vector<128xf32>
    %58 = vector.shape_cast %57 : vector<128xf32> to vector<1x128xf32>
    %59 = arith.addf %18, %58 : vector<1x128xf32>
    %60 = arith.mulf %56, %56 : vector<64x128xf32>
    %cst_64 = arith.constant dense<0.000000e+00> : vector<128xf32>
    %61 = vector.multi_reduction <add>, %60, %cst_64 [0] : vector<64x128xf32> to vector<128xf32>
    %62 = vector.shape_cast %61 : vector<128xf32> to vector<1x128xf32>
    %63 = arith.addf %19, %62 : vector<1x128xf32>
    %cst_65 = arith.constant 0.000000e+00 : f32
    %64 = vector.broadcast %cst_65 : f32 to vector<64x128xf32>
    %c0_66 = arith.constant 0 : index
    %c4_67 = arith.constant 4 : index
    %c0_68 = arith.constant 0 : index
    %c0_69 = arith.constant 0 : index
    %65 = vector.load %arg2[%c0_66, %c4_67, %c0_68, %c0_69] : memref<1x16x64x3xbf16, #tpu.memory_space<vmem>>, vector<1x1x64x3xbf16>
    %66 = vector.shape_cast %65 : vector<1x1x64x3xbf16> to vector<64x3xbf16>
    %cst_70 = arith.constant dense<0.000000e+00> : vector<64x128xf32>
    %67 = tpu.matmul %66, %1, %cst_70 {dimension_numbers = #tpu.dot_dimension_numbers<[1], [0], [0], [1], [0, 0, 1, 1], [], []>} : vector<64x3xbf16>, vector<3x128xbf16>, vector<64x128xf32> -> vector<64x128xf32>
    %68 = arith.addf %64, %67 : vector<64x128xf32>
    %c0_71 = arith.constant 0 : index
    %c1_72 = arith.constant 1 : index
    %c0_73 = arith.constant 0 : index
    %c0_74 = arith.constant 0 : index
    %69 = vector.load %arg2[%c0_71, %c1_72, %c0_73, %c0_74] : memref<1x16x64x3xbf16, #tpu.memory_space<vmem>>, vector<1x1x64x3xbf16>
    %70 = vector.shape_cast %69 : vector<1x1x64x3xbf16> to vector<64x3xbf16>
    %cst_75 = arith.constant dense<0.000000e+00> : vector<64x128xf32>
    %71 = tpu.matmul %70, %3, %cst_75 {dimension_numbers = #tpu.dot_dimension_numbers<[1], [0], [0], [1], [0, 0, 1, 1], [], []>} : vector<64x3xbf16>, vector<3x128xbf16>, vector<64x128xf32> -> vector<64x128xf32>
    %72 = arith.addf %68, %71 : vector<64x128xf32>
    %c0_76 = arith.constant 0 : index
    %c5_77 = arith.constant 5 : index
    %c0_78 = arith.constant 0 : index
    %c0_79 = arith.constant 0 : index
    %73 = vector.load %arg2[%c0_76, %c5_77, %c0_78, %c0_79] : memref<1x16x64x3xbf16, #tpu.memory_space<vmem>>, vector<1x1x64x3xbf16>
    %74 = vector.shape_cast %73 : vector<1x1x64x3xbf16> to vector<64x3xbf16>
    %cst_80 = arith.constant dense<0.000000e+00> : vector<64x128xf32>
    %75 = tpu.matmul %74, %5, %cst_80 {dimension_numbers = #tpu.dot_dimension_numbers<[1], [0], [0], [1], [0, 0, 1, 1], [], []>} : vector<64x3xbf16>, vector<3x128xbf16>, vector<64x128xf32> -> vector<64x128xf32>
    %76 = arith.addf %72, %75 : vector<64x128xf32>
    %c0_81 = arith.constant 0 : index
    %c12_82 = arith.constant 12 : index
    %c0_83 = arith.constant 0 : index
    %c0_84 = arith.constant 0 : index
    %77 = vector.load %arg2[%c0_81, %c12_82, %c0_83, %c0_84] : memref<1x16x64x3xbf16, #tpu.memory_space<vmem>>, vector<1x1x64x3xbf16>
    %78 = vector.shape_cast %77 : vector<1x1x64x3xbf16> to vector<64x3xbf16>
    %cst_85 = arith.constant dense<0.000000e+00> : vector<64x128xf32>
    %79 = tpu.matmul %78, %7, %cst_85 {dimension_numbers = #tpu.dot_dimension_numbers<[1], [0], [0], [1], [0, 0, 1, 1], [], []>} : vector<64x3xbf16>, vector<3x128xbf16>, vector<64x128xf32> -> vector<64x128xf32>
    %80 = arith.addf %76, %79 : vector<64x128xf32>
    %c0_86 = arith.constant 0 : index
    %c9_87 = arith.constant 9 : index
    %c0_88 = arith.constant 0 : index
    %c0_89 = arith.constant 0 : index
    %81 = vector.load %arg2[%c0_86, %c9_87, %c0_88, %c0_89] : memref<1x16x64x3xbf16, #tpu.memory_space<vmem>>, vector<1x1x64x3xbf16>
    %82 = vector.shape_cast %81 : vector<1x1x64x3xbf16> to vector<64x3xbf16>
    %cst_90 = arith.constant dense<0.000000e+00> : vector<64x128xf32>
    %83 = tpu.matmul %82, %9, %cst_90 {dimension_numbers = #tpu.dot_dimension_numbers<[1], [0], [0], [1], [0, 0, 1, 1], [], []>} : vector<64x3xbf16>, vector<3x128xbf16>, vector<64x128xf32> -> vector<64x128xf32>
    %84 = arith.addf %80, %83 : vector<64x128xf32>
    %c0_91 = arith.constant 0 : index
    %c13 = arith.constant 13 : index
    %c0_92 = arith.constant 0 : index
    %c0_93 = arith.constant 0 : index
    %85 = vector.load %arg2[%c0_91, %c13, %c0_92, %c0_93] : memref<1x16x64x3xbf16, #tpu.memory_space<vmem>>, vector<1x1x64x3xbf16>
    %86 = vector.shape_cast %85 : vector<1x1x64x3xbf16> to vector<64x3xbf16>
    %cst_94 = arith.constant dense<0.000000e+00> : vector<64x128xf32>
    %87 = tpu.matmul %86, %11, %cst_94 {dimension_numbers = #tpu.dot_dimension_numbers<[1], [0], [0], [1], [0, 0, 1, 1], [], []>} : vector<64x3xbf16>, vector<3x128xbf16>, vector<64x128xf32> -> vector<64x128xf32>
    %88 = arith.addf %84, %87 : vector<64x128xf32>
    %c0_95 = arith.constant 0 : index
    %c6_96 = arith.constant 6 : index
    %c0_97 = arith.constant 0 : index
    %c0_98 = arith.constant 0 : index
    %89 = vector.load %arg2[%c0_95, %c6_96, %c0_97, %c0_98] : memref<1x16x64x3xbf16, #tpu.memory_space<vmem>>, vector<1x1x64x3xbf16>
    %90 = vector.shape_cast %89 : vector<1x1x64x3xbf16> to vector<64x3xbf16>
    %cst_99 = arith.constant dense<0.000000e+00> : vector<64x128xf32>
    %91 = tpu.matmul %90, %13, %cst_99 {dimension_numbers = #tpu.dot_dimension_numbers<[1], [0], [0], [1], [0, 0, 1, 1], [], []>} : vector<64x3xbf16>, vector<3x128xbf16>, vector<64x128xf32> -> vector<64x128xf32>
    %92 = arith.addf %88, %91 : vector<64x128xf32>
    %c0_100 = arith.constant 0 : index
    %c3_101 = arith.constant 3 : index
    %c0_102 = arith.constant 0 : index
    %c0_103 = arith.constant 0 : index
    %93 = vector.load %arg2[%c0_100, %c3_101, %c0_102, %c0_103] : memref<1x16x64x3xbf16, #tpu.memory_space<vmem>>, vector<1x1x64x3xbf16>
    %94 = vector.shape_cast %93 : vector<1x1x64x3xbf16> to vector<64x3xbf16>
    %cst_104 = arith.constant dense<0.000000e+00> : vector<64x128xf32>
    %95 = tpu.matmul %94, %15, %cst_104 {dimension_numbers = #tpu.dot_dimension_numbers<[1], [0], [0], [1], [0, 0, 1, 1], [], []>} : vector<64x3xbf16>, vector<3x128xbf16>, vector<64x128xf32> -> vector<64x128xf32>
    %96 = arith.addf %92, %95 : vector<64x128xf32>
    %c0_105 = arith.constant 0 : index
    %c7_106 = arith.constant 7 : index
    %c0_107 = arith.constant 0 : index
    %c0_108 = arith.constant 0 : index
    %97 = vector.load %arg2[%c0_105, %c7_106, %c0_107, %c0_108] : memref<1x16x64x3xbf16, #tpu.memory_space<vmem>>, vector<1x1x64x3xbf16>
    %98 = vector.shape_cast %97 : vector<1x1x64x3xbf16> to vector<64x3xbf16>
    %cst_109 = arith.constant dense<0.000000e+00> : vector<64x128xf32>
    %99 = tpu.matmul %98, %17, %cst_109 {dimension_numbers = #tpu.dot_dimension_numbers<[1], [0], [0], [1], [0, 0, 1, 1], [], []>} : vector<64x3xbf16>, vector<3x128xbf16>, vector<64x128xf32> -> vector<64x128xf32>
    %100 = arith.addf %96, %99 : vector<64x128xf32>
    %cst_110 = arith.constant dense<0.000000e+00> : vector<128xf32>
    %101 = vector.multi_reduction <add>, %100, %cst_110 [0] : vector<64x128xf32> to vector<128xf32>
    %102 = vector.shape_cast %101 : vector<128xf32> to vector<1x128xf32>
    %103 = arith.addf %59, %102 : vector<1x128xf32>
    %104 = arith.mulf %100, %100 : vector<64x128xf32>
    %cst_111 = arith.constant dense<0.000000e+00> : vector<128xf32>
    %105 = vector.multi_reduction <add>, %104, %cst_111 [0] : vector<64x128xf32> to vector<128xf32>
    %106 = vector.shape_cast %105 : vector<128xf32> to vector<1x128xf32>
    %107 = arith.addf %63, %106 : vector<1x128xf32>
    %108 = arith.maximumf %56, %100 : vector<64x128xf32>
    %cst_112 = arith.constant 0.000000e+00 : f32
    %109 = vector.broadcast %cst_112 : f32 to vector<64x128xf32>
    %c0_113 = arith.constant 0 : index
    %c8_114 = arith.constant 8 : index
    %c0_115 = arith.constant 0 : index
    %c0_116 = arith.constant 0 : index
    %110 = vector.load %arg2[%c0_113, %c8_114, %c0_115, %c0_116] : memref<1x16x64x3xbf16, #tpu.memory_space<vmem>>, vector<1x1x64x3xbf16>
    %111 = vector.shape_cast %110 : vector<1x1x64x3xbf16> to vector<64x3xbf16>
    %cst_117 = arith.constant dense<0.000000e+00> : vector<64x128xf32>
    %112 = tpu.matmul %111, %1, %cst_117 {dimension_numbers = #tpu.dot_dimension_numbers<[1], [0], [0], [1], [0, 0, 1, 1], [], []>} : vector<64x3xbf16>, vector<3x128xbf16>, vector<64x128xf32> -> vector<64x128xf32>
    %113 = arith.addf %109, %112 : vector<64x128xf32>
    %c0_118 = arith.constant 0 : index
    %c12_119 = arith.constant 12 : index
    %c0_120 = arith.constant 0 : index
    %c0_121 = arith.constant 0 : index
    %114 = vector.load %arg2[%c0_118, %c12_119, %c0_120, %c0_121] : memref<1x16x64x3xbf16, #tpu.memory_space<vmem>>, vector<1x1x64x3xbf16>
    %115 = vector.shape_cast %114 : vector<1x1x64x3xbf16> to vector<64x3xbf16>
    %cst_122 = arith.constant dense<0.000000e+00> : vector<64x128xf32>
    %116 = tpu.matmul %115, %3, %cst_122 {dimension_numbers = #tpu.dot_dimension_numbers<[1], [0], [0], [1], [0, 0, 1, 1], [], []>} : vector<64x3xbf16>, vector<3x128xbf16>, vector<64x128xf32> -> vector<64x128xf32>
    %117 = arith.addf %113, %116 : vector<64x128xf32>
    %c0_123 = arith.constant 0 : index
    %c9_124 = arith.constant 9 : index
    %c0_125 = arith.constant 0 : index
    %c0_126 = arith.constant 0 : index
    %118 = vector.load %arg2[%c0_123, %c9_124, %c0_125, %c0_126] : memref<1x16x64x3xbf16, #tpu.memory_space<vmem>>, vector<1x1x64x3xbf16>
    %119 = vector.shape_cast %118 : vector<1x1x64x3xbf16> to vector<64x3xbf16>
    %cst_127 = arith.constant dense<0.000000e+00> : vector<64x128xf32>
    %120 = tpu.matmul %119, %5, %cst_127 {dimension_numbers = #tpu.dot_dimension_numbers<[1], [0], [0], [1], [0, 0, 1, 1], [], []>} : vector<64x3xbf16>, vector<3x128xbf16>, vector<64x128xf32> -> vector<64x128xf32>
    %121 = arith.addf %117, %120 : vector<64x128xf32>
    %c0_128 = arith.constant 0 : index
    %c2_129 = arith.constant 2 : index
    %c0_130 = arith.constant 0 : index
    %c0_131 = arith.constant 0 : index
    %122 = vector.load %arg2[%c0_128, %c2_129, %c0_130, %c0_131] : memref<1x16x64x3xbf16, #tpu.memory_space<vmem>>, vector<1x1x64x3xbf16>
    %123 = vector.shape_cast %122 : vector<1x1x64x3xbf16> to vector<64x3xbf16>
    %cst_132 = arith.constant dense<0.000000e+00> : vector<64x128xf32>
    %124 = tpu.matmul %123, %7, %cst_132 {dimension_numbers = #tpu.dot_dimension_numbers<[1], [0], [0], [1], [0, 0, 1, 1], [], []>} : vector<64x3xbf16>, vector<3x128xbf16>, vector<64x128xf32> -> vector<64x128xf32>
    %125 = arith.addf %121, %124 : vector<64x128xf32>
    %c0_133 = arith.constant 0 : index
    %c6_134 = arith.constant 6 : index
    %c0_135 = arith.constant 0 : index
    %c0_136 = arith.constant 0 : index
    %126 = vector.load %arg2[%c0_133, %c6_134, %c0_135, %c0_136] : memref<1x16x64x3xbf16, #tpu.memory_space<vmem>>, vector<1x1x64x3xbf16>
    %127 = vector.shape_cast %126 : vector<1x1x64x3xbf16> to vector<64x3xbf16>
    %cst_137 = arith.constant dense<0.000000e+00> : vector<64x128xf32>
    %128 = tpu.matmul %127, %9, %cst_137 {dimension_numbers = #tpu.dot_dimension_numbers<[1], [0], [0], [1], [0, 0, 1, 1], [], []>} : vector<64x3xbf16>, vector<3x128xbf16>, vector<64x128xf32> -> vector<64x128xf32>
    %129 = arith.addf %125, %128 : vector<64x128xf32>
    %c0_138 = arith.constant 0 : index
    %c3_139 = arith.constant 3 : index
    %c0_140 = arith.constant 0 : index
    %c0_141 = arith.constant 0 : index
    %130 = vector.load %arg2[%c0_138, %c3_139, %c0_140, %c0_141] : memref<1x16x64x3xbf16, #tpu.memory_space<vmem>>, vector<1x1x64x3xbf16>
    %131 = vector.shape_cast %130 : vector<1x1x64x3xbf16> to vector<64x3xbf16>
    %cst_142 = arith.constant dense<0.000000e+00> : vector<64x128xf32>
    %132 = tpu.matmul %131, %11, %cst_142 {dimension_numbers = #tpu.dot_dimension_numbers<[1], [0], [0], [1], [0, 0, 1, 1], [], []>} : vector<64x3xbf16>, vector<3x128xbf16>, vector<64x128xf32> -> vector<64x128xf32>
    %133 = arith.addf %129, %132 : vector<64x128xf32>
    %c0_143 = arith.constant 0 : index
    %c10 = arith.constant 10 : index
    %c0_144 = arith.constant 0 : index
    %c0_145 = arith.constant 0 : index
    %134 = vector.load %arg2[%c0_143, %c10, %c0_144, %c0_145] : memref<1x16x64x3xbf16, #tpu.memory_space<vmem>>, vector<1x1x64x3xbf16>
    %135 = vector.shape_cast %134 : vector<1x1x64x3xbf16> to vector<64x3xbf16>
    %cst_146 = arith.constant dense<0.000000e+00> : vector<64x128xf32>
    %136 = tpu.matmul %135, %13, %cst_146 {dimension_numbers = #tpu.dot_dimension_numbers<[1], [0], [0], [1], [0, 0, 1, 1], [], []>} : vector<64x3xbf16>, vector<3x128xbf16>, vector<64x128xf32> -> vector<64x128xf32>
    %137 = arith.addf %133, %136 : vector<64x128xf32>
    %c0_147 = arith.constant 0 : index
    %c14 = arith.constant 14 : index
    %c0_148 = arith.constant 0 : index
    %c0_149 = arith.constant 0 : index
    %138 = vector.load %arg2[%c0_147, %c14, %c0_148, %c0_149] : memref<1x16x64x3xbf16, #tpu.memory_space<vmem>>, vector<1x1x64x3xbf16>
    %139 = vector.shape_cast %138 : vector<1x1x64x3xbf16> to vector<64x3xbf16>
    %cst_150 = arith.constant dense<0.000000e+00> : vector<64x128xf32>
    %140 = tpu.matmul %139, %15, %cst_150 {dimension_numbers = #tpu.dot_dimension_numbers<[1], [0], [0], [1], [0, 0, 1, 1], [], []>} : vector<64x3xbf16>, vector<3x128xbf16>, vector<64x128xf32> -> vector<64x128xf32>
    %141 = arith.addf %137, %140 : vector<64x128xf32>
    %c0_151 = arith.constant 0 : index
    %c11 = arith.constant 11 : index
    %c0_152 = arith.constant 0 : index
    %c0_153 = arith.constant 0 : index
    %142 = vector.load %arg2[%c0_151, %c11, %c0_152, %c0_153] : memref<1x16x64x3xbf16, #tpu.memory_space<vmem>>, vector<1x1x64x3xbf16>
    %143 = vector.shape_cast %142 : vector<1x1x64x3xbf16> to vector<64x3xbf16>
    %cst_154 = arith.constant dense<0.000000e+00> : vector<64x128xf32>
    %144 = tpu.matmul %143, %17, %cst_154 {dimension_numbers = #tpu.dot_dimension_numbers<[1], [0], [0], [1], [0, 0, 1, 1], [], []>} : vector<64x3xbf16>, vector<3x128xbf16>, vector<64x128xf32> -> vector<64x128xf32>
    %145 = arith.addf %141, %144 : vector<64x128xf32>
    %cst_155 = arith.constant dense<0.000000e+00> : vector<128xf32>
    %146 = vector.multi_reduction <add>, %145, %cst_155 [0] : vector<64x128xf32> to vector<128xf32>
    %147 = vector.shape_cast %146 : vector<128xf32> to vector<1x128xf32>
    %148 = arith.addf %103, %147 : vector<1x128xf32>
    %149 = arith.mulf %145, %145 : vector<64x128xf32>
    %cst_156 = arith.constant dense<0.000000e+00> : vector<128xf32>
    %150 = vector.multi_reduction <add>, %149, %cst_156 [0] : vector<64x128xf32> to vector<128xf32>
    %151 = vector.shape_cast %150 : vector<128xf32> to vector<1x128xf32>
    %152 = arith.addf %107, %151 : vector<1x128xf32>
    %153 = arith.maximumf %108, %145 : vector<64x128xf32>
    %cst_157 = arith.constant 0.000000e+00 : f32
    %154 = vector.broadcast %cst_157 : f32 to vector<64x128xf32>
    %c0_158 = arith.constant 0 : index
    %c12_159 = arith.constant 12 : index
    %c0_160 = arith.constant 0 : index
    %c0_161 = arith.constant 0 : index
    %155 = vector.load %arg2[%c0_158, %c12_159, %c0_160, %c0_161] : memref<1x16x64x3xbf16, #tpu.memory_space<vmem>>, vector<1x1x64x3xbf16>
    %156 = vector.shape_cast %155 : vector<1x1x64x3xbf16> to vector<64x3xbf16>
    %cst_162 = arith.constant dense<0.000000e+00> : vector<64x128xf32>
    %157 = tpu.matmul %156, %1, %cst_162 {dimension_numbers = #tpu.dot_dimension_numbers<[1], [0], [0], [1], [0, 0, 1, 1], [], []>} : vector<64x3xbf16>, vector<3x128xbf16>, vector<64x128xf32> -> vector<64x128xf32>
    %158 = arith.addf %154, %157 : vector<64x128xf32>
    %c0_163 = arith.constant 0 : index
    %c9_164 = arith.constant 9 : index
    %c0_165 = arith.constant 0 : index
    %c0_166 = arith.constant 0 : index
    %159 = vector.load %arg2[%c0_163, %c9_164, %c0_165, %c0_166] : memref<1x16x64x3xbf16, #tpu.memory_space<vmem>>, vector<1x1x64x3xbf16>
    %160 = vector.shape_cast %159 : vector<1x1x64x3xbf16> to vector<64x3xbf16>
    %cst_167 = arith.constant dense<0.000000e+00> : vector<64x128xf32>
    %161 = tpu.matmul %160, %3, %cst_167 {dimension_numbers = #tpu.dot_dimension_numbers<[1], [0], [0], [1], [0, 0, 1, 1], [], []>} : vector<64x3xbf16>, vector<3x128xbf16>, vector<64x128xf32> -> vector<64x128xf32>
    %162 = arith.addf %158, %161 : vector<64x128xf32>
    %c0_168 = arith.constant 0 : index
    %c13_169 = arith.constant 13 : index
    %c0_170 = arith.constant 0 : index
    %c0_171 = arith.constant 0 : index
    %163 = vector.load %arg2[%c0_168, %c13_169, %c0_170, %c0_171] : memref<1x16x64x3xbf16, #tpu.memory_space<vmem>>, vector<1x1x64x3xbf16>
    %164 = vector.shape_cast %163 : vector<1x1x64x3xbf16> to vector<64x3xbf16>
    %cst_172 = arith.constant dense<0.000000e+00> : vector<64x128xf32>
    %165 = tpu.matmul %164, %5, %cst_172 {dimension_numbers = #tpu.dot_dimension_numbers<[1], [0], [0], [1], [0, 0, 1, 1], [], []>} : vector<64x3xbf16>, vector<3x128xbf16>, vector<64x128xf32> -> vector<64x128xf32>
    %166 = arith.addf %162, %165 : vector<64x128xf32>
    %c0_173 = arith.constant 0 : index
    %c6_174 = arith.constant 6 : index
    %c0_175 = arith.constant 0 : index
    %c0_176 = arith.constant 0 : index
    %167 = vector.load %arg2[%c0_173, %c6_174, %c0_175, %c0_176] : memref<1x16x64x3xbf16, #tpu.memory_space<vmem>>, vector<1x1x64x3xbf16>
    %168 = vector.shape_cast %167 : vector<1x1x64x3xbf16> to vector<64x3xbf16>
    %cst_177 = arith.constant dense<0.000000e+00> : vector<64x128xf32>
    %169 = tpu.matmul %168, %7, %cst_177 {dimension_numbers = #tpu.dot_dimension_numbers<[1], [0], [0], [1], [0, 0, 1, 1], [], []>} : vector<64x3xbf16>, vector<3x128xbf16>, vector<64x128xf32> -> vector<64x128xf32>
    %170 = arith.addf %166, %169 : vector<64x128xf32>
    %c0_178 = arith.constant 0 : index
    %c3_179 = arith.constant 3 : index
    %c0_180 = arith.constant 0 : index
    %c0_181 = arith.constant 0 : index
    %171 = vector.load %arg2[%c0_178, %c3_179, %c0_180, %c0_181] : memref<1x16x64x3xbf16, #tpu.memory_space<vmem>>, vector<1x1x64x3xbf16>
    %172 = vector.shape_cast %171 : vector<1x1x64x3xbf16> to vector<64x3xbf16>
    %cst_182 = arith.constant dense<0.000000e+00> : vector<64x128xf32>
    %173 = tpu.matmul %172, %9, %cst_182 {dimension_numbers = #tpu.dot_dimension_numbers<[1], [0], [0], [1], [0, 0, 1, 1], [], []>} : vector<64x3xbf16>, vector<3x128xbf16>, vector<64x128xf32> -> vector<64x128xf32>
    %174 = arith.addf %170, %173 : vector<64x128xf32>
    %c0_183 = arith.constant 0 : index
    %c7_184 = arith.constant 7 : index
    %c0_185 = arith.constant 0 : index
    %c0_186 = arith.constant 0 : index
    %175 = vector.load %arg2[%c0_183, %c7_184, %c0_185, %c0_186] : memref<1x16x64x3xbf16, #tpu.memory_space<vmem>>, vector<1x1x64x3xbf16>
    %176 = vector.shape_cast %175 : vector<1x1x64x3xbf16> to vector<64x3xbf16>
    %cst_187 = arith.constant dense<0.000000e+00> : vector<64x128xf32>
    %177 = tpu.matmul %176, %11, %cst_187 {dimension_numbers = #tpu.dot_dimension_numbers<[1], [0], [0], [1], [0, 0, 1, 1], [], []>} : vector<64x3xbf16>, vector<3x128xbf16>, vector<64x128xf32> -> vector<64x128xf32>
    %178 = arith.addf %174, %177 : vector<64x128xf32>
    %c0_188 = arith.constant 0 : index
    %c14_189 = arith.constant 14 : index
    %c0_190 = arith.constant 0 : index
    %c0_191 = arith.constant 0 : index
    %179 = vector.load %arg2[%c0_188, %c14_189, %c0_190, %c0_191] : memref<1x16x64x3xbf16, #tpu.memory_space<vmem>>, vector<1x1x64x3xbf16>
    %180 = vector.shape_cast %179 : vector<1x1x64x3xbf16> to vector<64x3xbf16>
    %cst_192 = arith.constant dense<0.000000e+00> : vector<64x128xf32>
    %181 = tpu.matmul %180, %13, %cst_192 {dimension_numbers = #tpu.dot_dimension_numbers<[1], [0], [0], [1], [0, 0, 1, 1], [], []>} : vector<64x3xbf16>, vector<3x128xbf16>, vector<64x128xf32> -> vector<64x128xf32>
    %182 = arith.addf %178, %181 : vector<64x128xf32>
    %c0_193 = arith.constant 0 : index
    %c11_194 = arith.constant 11 : index
    %c0_195 = arith.constant 0 : index
    %c0_196 = arith.constant 0 : index
    %183 = vector.load %arg2[%c0_193, %c11_194, %c0_195, %c0_196] : memref<1x16x64x3xbf16, #tpu.memory_space<vmem>>, vector<1x1x64x3xbf16>
    %184 = vector.shape_cast %183 : vector<1x1x64x3xbf16> to vector<64x3xbf16>
    %cst_197 = arith.constant dense<0.000000e+00> : vector<64x128xf32>
    %185 = tpu.matmul %184, %15, %cst_197 {dimension_numbers = #tpu.dot_dimension_numbers<[1], [0], [0], [1], [0, 0, 1, 1], [], []>} : vector<64x3xbf16>, vector<3x128xbf16>, vector<64x128xf32> -> vector<64x128xf32>
    %186 = arith.addf %182, %185 : vector<64x128xf32>
    %c0_198 = arith.constant 0 : index
    %c15 = arith.constant 15 : index
    %c0_199 = arith.constant 0 : index
    %c0_200 = arith.constant 0 : index
    %187 = vector.load %arg2[%c0_198, %c15, %c0_199, %c0_200] : memref<1x16x64x3xbf16, #tpu.memory_space<vmem>>, vector<1x1x64x3xbf16>
    %188 = vector.shape_cast %187 : vector<1x1x64x3xbf16> to vector<64x3xbf16>
    %cst_201 = arith.constant dense<0.000000e+00> : vector<64x128xf32>
    %189 = tpu.matmul %188, %17, %cst_201 {dimension_numbers = #tpu.dot_dimension_numbers<[1], [0], [0], [1], [0, 0, 1, 1], [], []>} : vector<64x3xbf16>, vector<3x128xbf16>, vector<64x128xf32> -> vector<64x128xf32>
    %190 = arith.addf %186, %189 : vector<64x128xf32>
    %cst_202 = arith.constant dense<0.000000e+00> : vector<128xf32>
    %191 = vector.multi_reduction <add>, %190, %cst_202 [0] : vector<64x128xf32> to vector<128xf32>
    %192 = vector.shape_cast %191 : vector<128xf32> to vector<1x128xf32>
    %193 = arith.addf %148, %192 : vector<1x128xf32>
    %194 = arith.mulf %190, %190 : vector<64x128xf32>
    %cst_203 = arith.constant dense<0.000000e+00> : vector<128xf32>
    %195 = vector.multi_reduction <add>, %194, %cst_203 [0] : vector<64x128xf32> to vector<128xf32>
    %196 = vector.shape_cast %195 : vector<128xf32> to vector<1x128xf32>
    %197 = arith.addf %152, %196 : vector<1x128xf32>
    %198 = arith.maximumf %153, %190 : vector<64x128xf32>
    %c0_204 = arith.constant 0 : index
    %c0_205 = arith.constant 0 : index
    %c0_206 = arith.constant 0 : index
    %199 = vector.load %arg4[%c0_204, %c0_205, %c0_206] : memref<1x64x128xf32, #tpu.memory_space<vmem>>, vector<1x64x128xf32>
    %200 = vector.shape_cast %199 : vector<1x64x128xf32> to vector<64x128xf32>
    %201 = vector.shape_cast %198 : vector<64x128xf32> to vector<1x64x128xf32>
    tpu.vector_store %arg4[%c0_204, %c0_205, %c0_206], %201 {strides = array<i32>} : memref<1x64x128xf32, #tpu.memory_space<vmem>>, vector<1x64x128xf32>,
    %c0_i32 = arith.constant 0 : i32
    %202 = arith.cmpi eq, %arg1, %c0_i32 : i32
    %203 = arith.extui %202 : i1 to i32
    %c0_i32_207 = arith.constant 0 : i32
    %204 = arith.cmpi ne, %203, %c0_i32_207 : i32
    scf.if %204 {
      %cst_212 = arith.constant 0.000000e+00 : f32
      %209 = vector.broadcast %cst_212 : f32 to vector<2x128xf32>
      %c0_213 = arith.constant 0 : index
      %c0_214 = arith.constant 0 : index
      %210 = vector.load %arg5[%c0_213, %c0_214] : memref<2x128xf32, #tpu.memory_space<vmem>>, vector<2x128xf32>
      tpu.vector_store %arg5[%c0_213, %c0_214], %209 {strides = array<i32>} : memref<2x128xf32, #tpu.memory_space<vmem>>, vector<2x128xf32>,
    } else {
    }
    %c0_208 = arith.constant 0 : index
    %c0_209 = arith.constant 0 : index
    %205 = vector.load %arg5[%c0_208, %c0_209] : memref<2x128xf32, #tpu.memory_space<vmem>>, vector<2x128xf32>
    %206 = tpu.concatenate %193, %197 in 0 : vector<1x128xf32>, vector<1x128xf32> -> vector<2x128xf32>
    %207 = arith.addf %205, %206 : vector<2x128xf32>
    %c0_210 = arith.constant 0 : index
    %c0_211 = arith.constant 0 : index
    %208 = vector.load %arg5[%c0_210, %c0_211] : memref<2x128xf32, #tpu.memory_space<vmem>>, vector<2x128xf32>
    tpu.vector_store %arg5[%c0_210, %c0_211], %207 {strides = array<i32>} : memref<2x128xf32, #tpu.memory_space<vmem>>, vector<2x128xf32>,
    return
  }
  func.func @transform_0(%arg0: i32, %arg1: i32) -> (i32, i32, i32, i32) {
    %c0_i32 = arith.constant 0 : i32
    %c0_i32_0 = arith.constant 0 : i32
    %c0_i32_1 = arith.constant 0 : i32
    %c0_i32_2 = arith.constant 0 : i32
    return %arg1, %c0_i32, %c0_i32_0, %c0_i32_1 : i32, i32, i32, i32
  }
  func.func @transform_1(%arg0: i32, %arg1: i32) -> (i32, i32, i32) {
    %c0_i32 = arith.constant 0 : i32
    %c0_i32_0 = arith.constant 0 : i32
    %c0_i32_1 = arith.constant 0 : i32
    return %c0_i32, %c0_i32_0, %arg0 : i32, i32, i32
  }
  func.func @transform_2(%arg0: i32, %arg1: i32) -> (i32, i32, i32) {
    %c0_i32 = arith.constant 0 : i32
    %c0_i32_0 = arith.constant 0 : i32
    return %arg1, %c0_i32, %arg0 : i32, i32, i32
  }
  func.func @transform_3(%arg0: i32, %arg1: i32) -> (i32, i32) {
    %c0_i32 = arith.constant 0 : i32
    %c0_i32_0 = arith.constant 0 : i32
    return %c0_i32, %arg0 : i32, i32
  }
}

module attributes {stable_mosaic.version = 11 : i64} {
  func.func @bn_relu_kernel(%arg0: i32, %arg1: memref<1x16x128xf32, #tpu.memory_space<vmem>>, %arg2: memref<2x128xf32, #tpu.memory_space<vmem>>, %arg3: memref<1x128xf32, #tpu.memory_space<vmem>>, %arg4: memref<1x128xf32, #tpu.memory_space<vmem>>, %arg5: memref<1x16x128xf32, #tpu.memory_space<vmem>>) attributes {dimension_semantics = [#tpu.dimension_semantics<parallel>], iteration_bounds = array<i64: 2>, scalar_prefetch = 0 : i64, scratch_operands = 0 : i64, tpu.core_type = #tpu.core_type<tc>, window_params = [{transform_indices = @transform_0, window_bounds = array<i64: 1, 16, 128>}, {pipeline_mode = #tpu.pipeline_mode<synchronous>, transform_indices = @transform_1, window_bounds = array<i64: 2, 128>}, {pipeline_mode = #tpu.pipeline_mode<synchronous>, transform_indices = @transform_2, window_bounds = array<i64: 1, 128>}, {pipeline_mode = #tpu.pipeline_mode<synchronous>, transform_indices = @transform_3, window_bounds = array<i64: 1, 128>}, {transform_indices = @transform_4, window_bounds = array<i64: 1, 16, 128>}]} {
    %c0 = arith.constant 0 : index
    %c0_0 = arith.constant 0 : index
    %0 = vector.load %arg2[%c0, %c0_0] : memref<2x128xf32, #tpu.memory_space<vmem>>, vector<1x128xf32>
    %cst = arith.constant 7.812500e-03 : f32
    %1 = vector.broadcast %cst : f32 to vector<1x128xf32>
    %2 = arith.mulf %0, %1 : vector<1x128xf32>
    %c1 = arith.constant 1 : index
    %c0_1 = arith.constant 0 : index
    %3 = vector.load %arg2[%c1, %c0_1] : memref<2x128xf32, #tpu.memory_space<vmem>>, vector<1x128xf32>
    %cst_2 = arith.constant 7.812500e-03 : f32
    %4 = vector.broadcast %cst_2 : f32 to vector<1x128xf32>
    %5 = arith.mulf %3, %4 : vector<1x128xf32>
    %6 = arith.mulf %2, %2 : vector<1x128xf32>
    %7 = arith.subf %5, %6 : vector<1x128xf32>
    %cst_3 = arith.constant 0.000000e+00 : f32
    %8 = vector.broadcast %cst_3 : f32 to vector<1x128xf32>
    %9 = arith.maximumf %7, %8 : vector<1x128xf32>
    %c0_4 = arith.constant 0 : index
    %c0_5 = arith.constant 0 : index
    %10 = vector.load %arg3[%c0_4, %c0_5] : memref<1x128xf32, #tpu.memory_space<vmem>>, vector<1x128xf32>
    %cst_6 = arith.constant 9.99999974E-6 : f32
    %11 = vector.broadcast %cst_6 : f32 to vector<1x128xf32>
    %12 = arith.addf %9, %11 : vector<1x128xf32>
    %13 = math.rsqrt %12 : vector<1x128xf32>
    %14 = arith.mulf %10, %13 : vector<1x128xf32>
    %c0_7 = arith.constant 0 : index
    %c0_8 = arith.constant 0 : index
    %15 = vector.load %arg4[%c0_7, %c0_8] : memref<1x128xf32, #tpu.memory_space<vmem>>, vector<1x128xf32>
    %16 = arith.mulf %2, %14 : vector<1x128xf32>
    %17 = arith.subf %15, %16 : vector<1x128xf32>
    %c0_9 = arith.constant 0 : index
    %c0_10 = arith.constant 0 : index
    %c0_11 = arith.constant 0 : index
    %18 = vector.load %arg1[%c0_9, %c0_10, %c0_11] : memref<1x16x128xf32, #tpu.memory_space<vmem>>, vector<1x16x128xf32>
    %19 = vector.shape_cast %14 : vector<1x128xf32> to vector<1x1x128xf32>
    %20 = vector.broadcast %19 : vector<1x1x128xf32> to vector<1x16x128xf32>
    %21 = arith.mulf %18, %20 : vector<1x16x128xf32>
    %22 = vector.shape_cast %17 : vector<1x128xf32> to vector<1x1x128xf32>
    %23 = vector.broadcast %22 : vector<1x1x128xf32> to vector<1x16x128xf32>
    %24 = arith.addf %21, %23 : vector<1x16x128xf32>
    %cst_12 = arith.constant 0.000000e+00 : f32
    %25 = vector.broadcast %cst_12 : f32 to vector<1x16x128xf32>
    %26 = arith.maximumf %24, %25 : vector<1x16x128xf32>
    %c0_13 = arith.constant 0 : index
    %c0_14 = arith.constant 0 : index
    %c0_15 = arith.constant 0 : index
    %27 = vector.load %arg5[%c0_13, %c0_14, %c0_15] : memref<1x16x128xf32, #tpu.memory_space<vmem>>, vector<1x16x128xf32>
    tpu.vector_store %arg5[%c0_13, %c0_14, %c0_15], %26 {strides = array<i32>} : memref<1x16x128xf32, #tpu.memory_space<vmem>>, vector<1x16x128xf32>,
    return
  }
  func.func @transform_0(%arg0: i32) -> (i32, i32, i32) {
    %c0_i32 = arith.constant 0 : i32
    %c0_i32_0 = arith.constant 0 : i32
    %c0_i32_1 = arith.constant 0 : i32
    return %arg0, %c0_i32, %c0_i32_0 : i32, i32, i32
  }
  func.func @transform_1(%arg0: i32) -> (i32, i32) {
    %c0_i32 = arith.constant 0 : i32
    %c0_i32_0 = arith.constant 0 : i32
    %c0_i32_1 = arith.constant 0 : i32
    return %c0_i32, %c0_i32_0 : i32, i32
  }
  func.func @transform_2(%arg0: i32) -> (i32, i32) {
    %c0_i32 = arith.constant 0 : i32
    %c0_i32_0 = arith.constant 0 : i32
    %c0_i32_1 = arith.constant 0 : i32
    return %c0_i32, %c0_i32_0 : i32, i32
  }
  func.func @transform_3(%arg0: i32) -> (i32, i32) {
    %c0_i32 = arith.constant 0 : i32
    %c0_i32_0 = arith.constant 0 : i32
    %c0_i32_1 = arith.constant 0 : i32
    return %c0_i32, %c0_i32_0 : i32, i32
  }
  func.func @transform_4(%arg0: i32) -> (i32, i32, i32) {
    %c0_i32 = arith.constant 0 : i32
    %c0_i32_0 = arith.constant 0 : i32
    %c0_i32_1 = arith.constant 0 : i32
    return %arg0, %c0_i32, %c0_i32_0 : i32, i32, i32
  }
}

module attributes {stable_mosaic.version = 11 : i64} {
  func.func @conv_pool_stats_kernel(%arg0: i32, %arg1: i32, %arg2: memref<1x16x16x16xbf16, #tpu.memory_space<vmem>>, %arg3: memref<9x16x128xbf16, #tpu.memory_space<vmem>>, %arg4: memref<1x16x128xf32, #tpu.memory_space<vmem>>, %arg5: memref<2x128xf32, #tpu.memory_space<vmem>>) attributes {dimension_semantics = [#tpu.dimension_semantics<parallel>, #tpu.dimension_semantics<arbitrary>], iteration_bounds = array<i64: 1, 2>, scalar_prefetch = 0 : i64, scratch_operands = 0 : i64, tpu.core_type = #tpu.core_type<tc>, window_params = [{transform_indices = @transform_0, window_bounds = array<i64: 1, 16, 16, 16>}, {transform_indices = @transform_1, window_bounds = array<i64: 9, 16, 128>}, {transform_indices = @transform_2, window_bounds = array<i64: 1, 16, 128>}, {transform_indices = @transform_3, window_bounds = array<i64: 2, 128>}]} {
    %c0 = arith.constant 0 : index
    %c0_0 = arith.constant 0 : index
    %c0_1 = arith.constant 0 : index
    %0 = vector.load %arg3[%c0, %c0_0, %c0_1] : memref<9x16x128xbf16, #tpu.memory_space<vmem>>, vector<1x16x128xbf16>
    %1 = vector.shape_cast %0 : vector<1x16x128xbf16> to vector<16x128xbf16>
    %c1 = arith.constant 1 : index
    %c0_2 = arith.constant 0 : index
    %c0_3 = arith.constant 0 : index
    %2 = vector.load %arg3[%c1, %c0_2, %c0_3] : memref<9x16x128xbf16, #tpu.memory_space<vmem>>, vector<1x16x128xbf16>
    %3 = vector.shape_cast %2 : vector<1x16x128xbf16> to vector<16x128xbf16>
    %c2 = arith.constant 2 : index
    %c0_4 = arith.constant 0 : index
    %c0_5 = arith.constant 0 : index
    %4 = vector.load %arg3[%c2, %c0_4, %c0_5] : memref<9x16x128xbf16, #tpu.memory_space<vmem>>, vector<1x16x128xbf16>
    %5 = vector.shape_cast %4 : vector<1x16x128xbf16> to vector<16x128xbf16>
    %c3 = arith.constant 3 : index
    %c0_6 = arith.constant 0 : index
    %c0_7 = arith.constant 0 : index
    %6 = vector.load %arg3[%c3, %c0_6, %c0_7] : memref<9x16x128xbf16, #tpu.memory_space<vmem>>, vector<1x16x128xbf16>
    %7 = vector.shape_cast %6 : vector<1x16x128xbf16> to vector<16x128xbf16>
    %c4 = arith.constant 4 : index
    %c0_8 = arith.constant 0 : index
    %c0_9 = arith.constant 0 : index
    %8 = vector.load %arg3[%c4, %c0_8, %c0_9] : memref<9x16x128xbf16, #tpu.memory_space<vmem>>, vector<1x16x128xbf16>
    %9 = vector.shape_cast %8 : vector<1x16x128xbf16> to vector<16x128xbf16>
    %c5 = arith.constant 5 : index
    %c0_10 = arith.constant 0 : index
    %c0_11 = arith.constant 0 : index
    %10 = vector.load %arg3[%c5, %c0_10, %c0_11] : memref<9x16x128xbf16, #tpu.memory_space<vmem>>, vector<1x16x128xbf16>
    %11 = vector.shape_cast %10 : vector<1x16x128xbf16> to vector<16x128xbf16>
    %c6 = arith.constant 6 : index
    %c0_12 = arith.constant 0 : index
    %c0_13 = arith.constant 0 : index
    %12 = vector.load %arg3[%c6, %c0_12, %c0_13] : memref<9x16x128xbf16, #tpu.memory_space<vmem>>, vector<1x16x128xbf16>
    %13 = vector.shape_cast %12 : vector<1x16x128xbf16> to vector<16x128xbf16>
    %c7 = arith.constant 7 : index
    %c0_14 = arith.constant 0 : index
    %c0_15 = arith.constant 0 : index
    %14 = vector.load %arg3[%c7, %c0_14, %c0_15] : memref<9x16x128xbf16, #tpu.memory_space<vmem>>, vector<1x16x128xbf16>
    %15 = vector.shape_cast %14 : vector<1x16x128xbf16> to vector<16x128xbf16>
    %c8 = arith.constant 8 : index
    %c0_16 = arith.constant 0 : index
    %c0_17 = arith.constant 0 : index
    %16 = vector.load %arg3[%c8, %c0_16, %c0_17] : memref<9x16x128xbf16, #tpu.memory_space<vmem>>, vector<1x16x128xbf16>
    %17 = vector.shape_cast %16 : vector<1x16x128xbf16> to vector<16x128xbf16>
    %cst = arith.constant 0.000000e+00 : f32
    %18 = vector.broadcast %cst : f32 to vector<1x128xf32>
    %cst_18 = arith.constant 0.000000e+00 : f32
    %19 = vector.broadcast %cst_18 : f32 to vector<1x128xf32>
    %cst_19 = arith.constant 0.000000e+00 : f32
    %20 = vector.broadcast %cst_19 : f32 to vector<16x128xf32>
    %c0_20 = arith.constant 0 : index
    %c0_21 = arith.constant 0 : index
    %c0_22 = arith.constant 0 : index
    %c0_23 = arith.constant 0 : index
    %21 = vector.load %arg2[%c0_20, %c0_21, %c0_22, %c0_23] : memref<1x16x16x16xbf16, #tpu.memory_space<vmem>>, vector<1x1x16x16xbf16>
    %22 = vector.shape_cast %21 : vector<1x1x16x16xbf16> to vector<16x16xbf16>
    %cst_24 = arith.constant dense<0.000000e+00> : vector<16x128xf32>
    %23 = tpu.matmul %22, %1, %cst_24 {dimension_numbers = #tpu.dot_dimension_numbers<[1], [0], [0], [1], [0, 0, 1, 1], [], []>} : vector<16x16xbf16>, vector<16x128xbf16>, vector<16x128xf32> -> vector<16x128xf32>
    %24 = arith.addf %20, %23 : vector<16x128xf32>
    %c0_25 = arith.constant 0 : index
    %c4_26 = arith.constant 4 : index
    %c0_27 = arith.constant 0 : index
    %c0_28 = arith.constant 0 : index
    %25 = vector.load %arg2[%c0_25, %c4_26, %c0_27, %c0_28] : memref<1x16x16x16xbf16, #tpu.memory_space<vmem>>, vector<1x1x16x16xbf16>
    %26 = vector.shape_cast %25 : vector<1x1x16x16xbf16> to vector<16x16xbf16>
    %cst_29 = arith.constant dense<0.000000e+00> : vector<16x128xf32>
    %27 = tpu.matmul %26, %3, %cst_29 {dimension_numbers = #tpu.dot_dimension_numbers<[1], [0], [0], [1], [0, 0, 1, 1], [], []>} : vector<16x16xbf16>, vector<16x128xbf16>, vector<16x128xf32> -> vector<16x128xf32>
    %28 = arith.addf %24, %27 : vector<16x128xf32>
    %c0_30 = arith.constant 0 : index
    %c1_31 = arith.constant 1 : index
    %c0_32 = arith.constant 0 : index
    %c0_33 = arith.constant 0 : index
    %29 = vector.load %arg2[%c0_30, %c1_31, %c0_32, %c0_33] : memref<1x16x16x16xbf16, #tpu.memory_space<vmem>>, vector<1x1x16x16xbf16>
    %30 = vector.shape_cast %29 : vector<1x1x16x16xbf16> to vector<16x16xbf16>
    %cst_34 = arith.constant dense<0.000000e+00> : vector<16x128xf32>
    %31 = tpu.matmul %30, %5, %cst_34 {dimension_numbers = #tpu.dot_dimension_numbers<[1], [0], [0], [1], [0, 0, 1, 1], [], []>} : vector<16x16xbf16>, vector<16x128xbf16>, vector<16x128xf32> -> vector<16x128xf32>
    %32 = arith.addf %28, %31 : vector<16x128xf32>
    %c0_35 = arith.constant 0 : index
    %c8_36 = arith.constant 8 : index
    %c0_37 = arith.constant 0 : index
    %c0_38 = arith.constant 0 : index
    %33 = vector.load %arg2[%c0_35, %c8_36, %c0_37, %c0_38] : memref<1x16x16x16xbf16, #tpu.memory_space<vmem>>, vector<1x1x16x16xbf16>
    %34 = vector.shape_cast %33 : vector<1x1x16x16xbf16> to vector<16x16xbf16>
    %cst_39 = arith.constant dense<0.000000e+00> : vector<16x128xf32>
    %35 = tpu.matmul %34, %7, %cst_39 {dimension_numbers = #tpu.dot_dimension_numbers<[1], [0], [0], [1], [0, 0, 1, 1], [], []>} : vector<16x16xbf16>, vector<16x128xbf16>, vector<16x128xf32> -> vector<16x128xf32>
    %36 = arith.addf %32, %35 : vector<16x128xf32>
    %c0_40 = arith.constant 0 : index
    %c12 = arith.constant 12 : index
    %c0_41 = arith.constant 0 : index
    %c0_42 = arith.constant 0 : index
    %37 = vector.load %arg2[%c0_40, %c12, %c0_41, %c0_42] : memref<1x16x16x16xbf16, #tpu.memory_space<vmem>>, vector<1x1x16x16xbf16>
    %38 = vector.shape_cast %37 : vector<1x1x16x16xbf16> to vector<16x16xbf16>
    %cst_43 = arith.constant dense<0.000000e+00> : vector<16x128xf32>
    %39 = tpu.matmul %38, %9, %cst_43 {dimension_numbers = #tpu.dot_dimension_numbers<[1], [0], [0], [1], [0, 0, 1, 1], [], []>} : vector<16x16xbf16>, vector<16x128xbf16>, vector<16x128xf32> -> vector<16x128xf32>
    %40 = arith.addf %36, %39 : vector<16x128xf32>
    %c0_44 = arith.constant 0 : index
    %c9 = arith.constant 9 : index
    %c0_45 = arith.constant 0 : index
    %c0_46 = arith.constant 0 : index
    %41 = vector.load %arg2[%c0_44, %c9, %c0_45, %c0_46] : memref<1x16x16x16xbf16, #tpu.memory_space<vmem>>, vector<1x1x16x16xbf16>
    %42 = vector.shape_cast %41 : vector<1x1x16x16xbf16> to vector<16x16xbf16>
    %cst_47 = arith.constant dense<0.000000e+00> : vector<16x128xf32>
    %43 = tpu.matmul %42, %11, %cst_47 {dimension_numbers = #tpu.dot_dimension_numbers<[1], [0], [0], [1], [0, 0, 1, 1], [], []>} : vector<16x16xbf16>, vector<16x128xbf16>, vector<16x128xf32> -> vector<16x128xf32>
    %44 = arith.addf %40, %43 : vector<16x128xf32>
    %c0_48 = arith.constant 0 : index
    %c2_49 = arith.constant 2 : index
    %c0_50 = arith.constant 0 : index
    %c0_51 = arith.constant 0 : index
    %45 = vector.load %arg2[%c0_48, %c2_49, %c0_50, %c0_51] : memref<1x16x16x16xbf16, #tpu.memory_space<vmem>>, vector<1x1x16x16xbf16>
    %46 = vector.shape_cast %45 : vector<1x1x16x16xbf16> to vector<16x16xbf16>
    %cst_52 = arith.constant dense<0.000000e+00> : vector<16x128xf32>
    %47 = tpu.matmul %46, %13, %cst_52 {dimension_numbers = #tpu.dot_dimension_numbers<[1], [0], [0], [1], [0, 0, 1, 1], [], []>} : vector<16x16xbf16>, vector<16x128xbf16>, vector<16x128xf32> -> vector<16x128xf32>
    %48 = arith.addf %44, %47 : vector<16x128xf32>
    %c0_53 = arith.constant 0 : index
    %c6_54 = arith.constant 6 : index
    %c0_55 = arith.constant 0 : index
    %c0_56 = arith.constant 0 : index
    %49 = vector.load %arg2[%c0_53, %c6_54, %c0_55, %c0_56] : memref<1x16x16x16xbf16, #tpu.memory_space<vmem>>, vector<1x1x16x16xbf16>
    %50 = vector.shape_cast %49 : vector<1x1x16x16xbf16> to vector<16x16xbf16>
    %cst_57 = arith.constant dense<0.000000e+00> : vector<16x128xf32>
    %51 = tpu.matmul %50, %15, %cst_57 {dimension_numbers = #tpu.dot_dimension_numbers<[1], [0], [0], [1], [0, 0, 1, 1], [], []>} : vector<16x16xbf16>, vector<16x128xbf16>, vector<16x128xf32> -> vector<16x128xf32>
    %52 = arith.addf %48, %51 : vector<16x128xf32>
    %c0_58 = arith.constant 0 : index
    %c3_59 = arith.constant 3 : index
    %c0_60 = arith.constant 0 : index
    %c0_61 = arith.constant 0 : index
    %53 = vector.load %arg2[%c0_58, %c3_59, %c0_60, %c0_61] : memref<1x16x16x16xbf16, #tpu.memory_space<vmem>>, vector<1x1x16x16xbf16>
    %54 = vector.shape_cast %53 : vector<1x1x16x16xbf16> to vector<16x16xbf16>
    %cst_62 = arith.constant dense<0.000000e+00> : vector<16x128xf32>
    %55 = tpu.matmul %54, %17, %cst_62 {dimension_numbers = #tpu.dot_dimension_numbers<[1], [0], [0], [1], [0, 0, 1, 1], [], []>} : vector<16x16xbf16>, vector<16x128xbf16>, vector<16x128xf32> -> vector<16x128xf32>
    %56 = arith.addf %52, %55 : vector<16x128xf32>
    %cst_63 = arith.constant dense<0.000000e+00> : vector<128xf32>
    %57 = vector.multi_reduction <add>, %56, %cst_63 [0] : vector<16x128xf32> to vector<128xf32>
    %58 = vector.shape_cast %57 : vector<128xf32> to vector<1x128xf32>
    %59 = arith.addf %18, %58 : vector<1x128xf32>
    %60 = arith.mulf %56, %56 : vector<16x128xf32>
    %cst_64 = arith.constant dense<0.000000e+00> : vector<128xf32>
    %61 = vector.multi_reduction <add>, %60, %cst_64 [0] : vector<16x128xf32> to vector<128xf32>
    %62 = vector.shape_cast %61 : vector<128xf32> to vector<1x128xf32>
    %63 = arith.addf %19, %62 : vector<1x128xf32>
    %cst_65 = arith.constant 0.000000e+00 : f32
    %64 = vector.broadcast %cst_65 : f32 to vector<16x128xf32>
    %c0_66 = arith.constant 0 : index
    %c4_67 = arith.constant 4 : index
    %c0_68 = arith.constant 0 : index
    %c0_69 = arith.constant 0 : index
    %65 = vector.load %arg2[%c0_66, %c4_67, %c0_68, %c0_69] : memref<1x16x16x16xbf16, #tpu.memory_space<vmem>>, vector<1x1x16x16xbf16>
    %66 = vector.shape_cast %65 : vector<1x1x16x16xbf16> to vector<16x16xbf16>
    %cst_70 = arith.constant dense<0.000000e+00> : vector<16x128xf32>
    %67 = tpu.matmul %66, %1, %cst_70 {dimension_numbers = #tpu.dot_dimension_numbers<[1], [0], [0], [1], [0, 0, 1, 1], [], []>} : vector<16x16xbf16>, vector<16x128xbf16>, vector<16x128xf32> -> vector<16x128xf32>
    %68 = arith.addf %64, %67 : vector<16x128xf32>
    %c0_71 = arith.constant 0 : index
    %c1_72 = arith.constant 1 : index
    %c0_73 = arith.constant 0 : index
    %c0_74 = arith.constant 0 : index
    %69 = vector.load %arg2[%c0_71, %c1_72, %c0_73, %c0_74] : memref<1x16x16x16xbf16, #tpu.memory_space<vmem>>, vector<1x1x16x16xbf16>
    %70 = vector.shape_cast %69 : vector<1x1x16x16xbf16> to vector<16x16xbf16>
    %cst_75 = arith.constant dense<0.000000e+00> : vector<16x128xf32>
    %71 = tpu.matmul %70, %3, %cst_75 {dimension_numbers = #tpu.dot_dimension_numbers<[1], [0], [0], [1], [0, 0, 1, 1], [], []>} : vector<16x16xbf16>, vector<16x128xbf16>, vector<16x128xf32> -> vector<16x128xf32>
    %72 = arith.addf %68, %71 : vector<16x128xf32>
    %c0_76 = arith.constant 0 : index
    %c5_77 = arith.constant 5 : index
    %c0_78 = arith.constant 0 : index
    %c0_79 = arith.constant 0 : index
    %73 = vector.load %arg2[%c0_76, %c5_77, %c0_78, %c0_79] : memref<1x16x16x16xbf16, #tpu.memory_space<vmem>>, vector<1x1x16x16xbf16>
    %74 = vector.shape_cast %73 : vector<1x1x16x16xbf16> to vector<16x16xbf16>
    %cst_80 = arith.constant dense<0.000000e+00> : vector<16x128xf32>
    %75 = tpu.matmul %74, %5, %cst_80 {dimension_numbers = #tpu.dot_dimension_numbers<[1], [0], [0], [1], [0, 0, 1, 1], [], []>} : vector<16x16xbf16>, vector<16x128xbf16>, vector<16x128xf32> -> vector<16x128xf32>
    %76 = arith.addf %72, %75 : vector<16x128xf32>
    %c0_81 = arith.constant 0 : index
    %c12_82 = arith.constant 12 : index
    %c0_83 = arith.constant 0 : index
    %c0_84 = arith.constant 0 : index
    %77 = vector.load %arg2[%c0_81, %c12_82, %c0_83, %c0_84] : memref<1x16x16x16xbf16, #tpu.memory_space<vmem>>, vector<1x1x16x16xbf16>
    %78 = vector.shape_cast %77 : vector<1x1x16x16xbf16> to vector<16x16xbf16>
    %cst_85 = arith.constant dense<0.000000e+00> : vector<16x128xf32>
    %79 = tpu.matmul %78, %7, %cst_85 {dimension_numbers = #tpu.dot_dimension_numbers<[1], [0], [0], [1], [0, 0, 1, 1], [], []>} : vector<16x16xbf16>, vector<16x128xbf16>, vector<16x128xf32> -> vector<16x128xf32>
    %80 = arith.addf %76, %79 : vector<16x128xf32>
    %c0_86 = arith.constant 0 : index
    %c9_87 = arith.constant 9 : index
    %c0_88 = arith.constant 0 : index
    %c0_89 = arith.constant 0 : index
    %81 = vector.load %arg2[%c0_86, %c9_87, %c0_88, %c0_89] : memref<1x16x16x16xbf16, #tpu.memory_space<vmem>>, vector<1x1x16x16xbf16>
    %82 = vector.shape_cast %81 : vector<1x1x16x16xbf16> to vector<16x16xbf16>
    %cst_90 = arith.constant dense<0.000000e+00> : vector<16x128xf32>
    %83 = tpu.matmul %82, %9, %cst_90 {dimension_numbers = #tpu.dot_dimension_numbers<[1], [0], [0], [1], [0, 0, 1, 1], [], []>} : vector<16x16xbf16>, vector<16x128xbf16>, vector<16x128xf32> -> vector<16x128xf32>
    %84 = arith.addf %80, %83 : vector<16x128xf32>
    %c0_91 = arith.constant 0 : index
    %c13 = arith.constant 13 : index
    %c0_92 = arith.constant 0 : index
    %c0_93 = arith.constant 0 : index
    %85 = vector.load %arg2[%c0_91, %c13, %c0_92, %c0_93] : memref<1x16x16x16xbf16, #tpu.memory_space<vmem>>, vector<1x1x16x16xbf16>
    %86 = vector.shape_cast %85 : vector<1x1x16x16xbf16> to vector<16x16xbf16>
    %cst_94 = arith.constant dense<0.000000e+00> : vector<16x128xf32>
    %87 = tpu.matmul %86, %11, %cst_94 {dimension_numbers = #tpu.dot_dimension_numbers<[1], [0], [0], [1], [0, 0, 1, 1], [], []>} : vector<16x16xbf16>, vector<16x128xbf16>, vector<16x128xf32> -> vector<16x128xf32>
    %88 = arith.addf %84, %87 : vector<16x128xf32>
    %c0_95 = arith.constant 0 : index
    %c6_96 = arith.constant 6 : index
    %c0_97 = arith.constant 0 : index
    %c0_98 = arith.constant 0 : index
    %89 = vector.load %arg2[%c0_95, %c6_96, %c0_97, %c0_98] : memref<1x16x16x16xbf16, #tpu.memory_space<vmem>>, vector<1x1x16x16xbf16>
    %90 = vector.shape_cast %89 : vector<1x1x16x16xbf16> to vector<16x16xbf16>
    %cst_99 = arith.constant dense<0.000000e+00> : vector<16x128xf32>
    %91 = tpu.matmul %90, %13, %cst_99 {dimension_numbers = #tpu.dot_dimension_numbers<[1], [0], [0], [1], [0, 0, 1, 1], [], []>} : vector<16x16xbf16>, vector<16x128xbf16>, vector<16x128xf32> -> vector<16x128xf32>
    %92 = arith.addf %88, %91 : vector<16x128xf32>
    %c0_100 = arith.constant 0 : index
    %c3_101 = arith.constant 3 : index
    %c0_102 = arith.constant 0 : index
    %c0_103 = arith.constant 0 : index
    %93 = vector.load %arg2[%c0_100, %c3_101, %c0_102, %c0_103] : memref<1x16x16x16xbf16, #tpu.memory_space<vmem>>, vector<1x1x16x16xbf16>
    %94 = vector.shape_cast %93 : vector<1x1x16x16xbf16> to vector<16x16xbf16>
    %cst_104 = arith.constant dense<0.000000e+00> : vector<16x128xf32>
    %95 = tpu.matmul %94, %15, %cst_104 {dimension_numbers = #tpu.dot_dimension_numbers<[1], [0], [0], [1], [0, 0, 1, 1], [], []>} : vector<16x16xbf16>, vector<16x128xbf16>, vector<16x128xf32> -> vector<16x128xf32>
    %96 = arith.addf %92, %95 : vector<16x128xf32>
    %c0_105 = arith.constant 0 : index
    %c7_106 = arith.constant 7 : index
    %c0_107 = arith.constant 0 : index
    %c0_108 = arith.constant 0 : index
    %97 = vector.load %arg2[%c0_105, %c7_106, %c0_107, %c0_108] : memref<1x16x16x16xbf16, #tpu.memory_space<vmem>>, vector<1x1x16x16xbf16>
    %98 = vector.shape_cast %97 : vector<1x1x16x16xbf16> to vector<16x16xbf16>
    %cst_109 = arith.constant dense<0.000000e+00> : vector<16x128xf32>
    %99 = tpu.matmul %98, %17, %cst_109 {dimension_numbers = #tpu.dot_dimension_numbers<[1], [0], [0], [1], [0, 0, 1, 1], [], []>} : vector<16x16xbf16>, vector<16x128xbf16>, vector<16x128xf32> -> vector<16x128xf32>
    %100 = arith.addf %96, %99 : vector<16x128xf32>
    %cst_110 = arith.constant dense<0.000000e+00> : vector<128xf32>
    %101 = vector.multi_reduction <add>, %100, %cst_110 [0] : vector<16x128xf32> to vector<128xf32>
    %102 = vector.shape_cast %101 : vector<128xf32> to vector<1x128xf32>
    %103 = arith.addf %59, %102 : vector<1x128xf32>
    %104 = arith.mulf %100, %100 : vector<16x128xf32>
    %cst_111 = arith.constant dense<0.000000e+00> : vector<128xf32>
    %105 = vector.multi_reduction <add>, %104, %cst_111 [0] : vector<16x128xf32> to vector<128xf32>
    %106 = vector.shape_cast %105 : vector<128xf32> to vector<1x128xf32>
    %107 = arith.addf %63, %106 : vector<1x128xf32>
    %108 = arith.maximumf %56, %100 : vector<16x128xf32>
    %cst_112 = arith.constant 0.000000e+00 : f32
    %109 = vector.broadcast %cst_112 : f32 to vector<16x128xf32>
    %c0_113 = arith.constant 0 : index
    %c8_114 = arith.constant 8 : index
    %c0_115 = arith.constant 0 : index
    %c0_116 = arith.constant 0 : index
    %110 = vector.load %arg2[%c0_113, %c8_114, %c0_115, %c0_116] : memref<1x16x16x16xbf16, #tpu.memory_space<vmem>>, vector<1x1x16x16xbf16>
    %111 = vector.shape_cast %110 : vector<1x1x16x16xbf16> to vector<16x16xbf16>
    %cst_117 = arith.constant dense<0.000000e+00> : vector<16x128xf32>
    %112 = tpu.matmul %111, %1, %cst_117 {dimension_numbers = #tpu.dot_dimension_numbers<[1], [0], [0], [1], [0, 0, 1, 1], [], []>} : vector<16x16xbf16>, vector<16x128xbf16>, vector<16x128xf32> -> vector<16x128xf32>
    %113 = arith.addf %109, %112 : vector<16x128xf32>
    %c0_118 = arith.constant 0 : index
    %c12_119 = arith.constant 12 : index
    %c0_120 = arith.constant 0 : index
    %c0_121 = arith.constant 0 : index
    %114 = vector.load %arg2[%c0_118, %c12_119, %c0_120, %c0_121] : memref<1x16x16x16xbf16, #tpu.memory_space<vmem>>, vector<1x1x16x16xbf16>
    %115 = vector.shape_cast %114 : vector<1x1x16x16xbf16> to vector<16x16xbf16>
    %cst_122 = arith.constant dense<0.000000e+00> : vector<16x128xf32>
    %116 = tpu.matmul %115, %3, %cst_122 {dimension_numbers = #tpu.dot_dimension_numbers<[1], [0], [0], [1], [0, 0, 1, 1], [], []>} : vector<16x16xbf16>, vector<16x128xbf16>, vector<16x128xf32> -> vector<16x128xf32>
    %117 = arith.addf %113, %116 : vector<16x128xf32>
    %c0_123 = arith.constant 0 : index
    %c9_124 = arith.constant 9 : index
    %c0_125 = arith.constant 0 : index
    %c0_126 = arith.constant 0 : index
    %118 = vector.load %arg2[%c0_123, %c9_124, %c0_125, %c0_126] : memref<1x16x16x16xbf16, #tpu.memory_space<vmem>>, vector<1x1x16x16xbf16>
    %119 = vector.shape_cast %118 : vector<1x1x16x16xbf16> to vector<16x16xbf16>
    %cst_127 = arith.constant dense<0.000000e+00> : vector<16x128xf32>
    %120 = tpu.matmul %119, %5, %cst_127 {dimension_numbers = #tpu.dot_dimension_numbers<[1], [0], [0], [1], [0, 0, 1, 1], [], []>} : vector<16x16xbf16>, vector<16x128xbf16>, vector<16x128xf32> -> vector<16x128xf32>
    %121 = arith.addf %117, %120 : vector<16x128xf32>
    %c0_128 = arith.constant 0 : index
    %c2_129 = arith.constant 2 : index
    %c0_130 = arith.constant 0 : index
    %c0_131 = arith.constant 0 : index
    %122 = vector.load %arg2[%c0_128, %c2_129, %c0_130, %c0_131] : memref<1x16x16x16xbf16, #tpu.memory_space<vmem>>, vector<1x1x16x16xbf16>
    %123 = vector.shape_cast %122 : vector<1x1x16x16xbf16> to vector<16x16xbf16>
    %cst_132 = arith.constant dense<0.000000e+00> : vector<16x128xf32>
    %124 = tpu.matmul %123, %7, %cst_132 {dimension_numbers = #tpu.dot_dimension_numbers<[1], [0], [0], [1], [0, 0, 1, 1], [], []>} : vector<16x16xbf16>, vector<16x128xbf16>, vector<16x128xf32> -> vector<16x128xf32>
    %125 = arith.addf %121, %124 : vector<16x128xf32>
    %c0_133 = arith.constant 0 : index
    %c6_134 = arith.constant 6 : index
    %c0_135 = arith.constant 0 : index
    %c0_136 = arith.constant 0 : index
    %126 = vector.load %arg2[%c0_133, %c6_134, %c0_135, %c0_136] : memref<1x16x16x16xbf16, #tpu.memory_space<vmem>>, vector<1x1x16x16xbf16>
    %127 = vector.shape_cast %126 : vector<1x1x16x16xbf16> to vector<16x16xbf16>
    %cst_137 = arith.constant dense<0.000000e+00> : vector<16x128xf32>
    %128 = tpu.matmul %127, %9, %cst_137 {dimension_numbers = #tpu.dot_dimension_numbers<[1], [0], [0], [1], [0, 0, 1, 1], [], []>} : vector<16x16xbf16>, vector<16x128xbf16>, vector<16x128xf32> -> vector<16x128xf32>
    %129 = arith.addf %125, %128 : vector<16x128xf32>
    %c0_138 = arith.constant 0 : index
    %c3_139 = arith.constant 3 : index
    %c0_140 = arith.constant 0 : index
    %c0_141 = arith.constant 0 : index
    %130 = vector.load %arg2[%c0_138, %c3_139, %c0_140, %c0_141] : memref<1x16x16x16xbf16, #tpu.memory_space<vmem>>, vector<1x1x16x16xbf16>
    %131 = vector.shape_cast %130 : vector<1x1x16x16xbf16> to vector<16x16xbf16>
    %cst_142 = arith.constant dense<0.000000e+00> : vector<16x128xf32>
    %132 = tpu.matmul %131, %11, %cst_142 {dimension_numbers = #tpu.dot_dimension_numbers<[1], [0], [0], [1], [0, 0, 1, 1], [], []>} : vector<16x16xbf16>, vector<16x128xbf16>, vector<16x128xf32> -> vector<16x128xf32>
    %133 = arith.addf %129, %132 : vector<16x128xf32>
    %c0_143 = arith.constant 0 : index
    %c10 = arith.constant 10 : index
    %c0_144 = arith.constant 0 : index
    %c0_145 = arith.constant 0 : index
    %134 = vector.load %arg2[%c0_143, %c10, %c0_144, %c0_145] : memref<1x16x16x16xbf16, #tpu.memory_space<vmem>>, vector<1x1x16x16xbf16>
    %135 = vector.shape_cast %134 : vector<1x1x16x16xbf16> to vector<16x16xbf16>
    %cst_146 = arith.constant dense<0.000000e+00> : vector<16x128xf32>
    %136 = tpu.matmul %135, %13, %cst_146 {dimension_numbers = #tpu.dot_dimension_numbers<[1], [0], [0], [1], [0, 0, 1, 1], [], []>} : vector<16x16xbf16>, vector<16x128xbf16>, vector<16x128xf32> -> vector<16x128xf32>
    %137 = arith.addf %133, %136 : vector<16x128xf32>
    %c0_147 = arith.constant 0 : index
    %c14 = arith.constant 14 : index
    %c0_148 = arith.constant 0 : index
    %c0_149 = arith.constant 0 : index
    %138 = vector.load %arg2[%c0_147, %c14, %c0_148, %c0_149] : memref<1x16x16x16xbf16, #tpu.memory_space<vmem>>, vector<1x1x16x16xbf16>
    %139 = vector.shape_cast %138 : vector<1x1x16x16xbf16> to vector<16x16xbf16>
    %cst_150 = arith.constant dense<0.000000e+00> : vector<16x128xf32>
    %140 = tpu.matmul %139, %15, %cst_150 {dimension_numbers = #tpu.dot_dimension_numbers<[1], [0], [0], [1], [0, 0, 1, 1], [], []>} : vector<16x16xbf16>, vector<16x128xbf16>, vector<16x128xf32> -> vector<16x128xf32>
    %141 = arith.addf %137, %140 : vector<16x128xf32>
    %c0_151 = arith.constant 0 : index
    %c11 = arith.constant 11 : index
    %c0_152 = arith.constant 0 : index
    %c0_153 = arith.constant 0 : index
    %142 = vector.load %arg2[%c0_151, %c11, %c0_152, %c0_153] : memref<1x16x16x16xbf16, #tpu.memory_space<vmem>>, vector<1x1x16x16xbf16>
    %143 = vector.shape_cast %142 : vector<1x1x16x16xbf16> to vector<16x16xbf16>
    %cst_154 = arith.constant dense<0.000000e+00> : vector<16x128xf32>
    %144 = tpu.matmul %143, %17, %cst_154 {dimension_numbers = #tpu.dot_dimension_numbers<[1], [0], [0], [1], [0, 0, 1, 1], [], []>} : vector<16x16xbf16>, vector<16x128xbf16>, vector<16x128xf32> -> vector<16x128xf32>
    %145 = arith.addf %141, %144 : vector<16x128xf32>
    %cst_155 = arith.constant dense<0.000000e+00> : vector<128xf32>
    %146 = vector.multi_reduction <add>, %145, %cst_155 [0] : vector<16x128xf32> to vector<128xf32>
    %147 = vector.shape_cast %146 : vector<128xf32> to vector<1x128xf32>
    %148 = arith.addf %103, %147 : vector<1x128xf32>
    %149 = arith.mulf %145, %145 : vector<16x128xf32>
    %cst_156 = arith.constant dense<0.000000e+00> : vector<128xf32>
    %150 = vector.multi_reduction <add>, %149, %cst_156 [0] : vector<16x128xf32> to vector<128xf32>
    %151 = vector.shape_cast %150 : vector<128xf32> to vector<1x128xf32>
    %152 = arith.addf %107, %151 : vector<1x128xf32>
    %153 = arith.maximumf %108, %145 : vector<16x128xf32>
    %cst_157 = arith.constant 0.000000e+00 : f32
    %154 = vector.broadcast %cst_157 : f32 to vector<16x128xf32>
    %c0_158 = arith.constant 0 : index
    %c12_159 = arith.constant 12 : index
    %c0_160 = arith.constant 0 : index
    %c0_161 = arith.constant 0 : index
    %155 = vector.load %arg2[%c0_158, %c12_159, %c0_160, %c0_161] : memref<1x16x16x16xbf16, #tpu.memory_space<vmem>>, vector<1x1x16x16xbf16>
    %156 = vector.shape_cast %155 : vector<1x1x16x16xbf16> to vector<16x16xbf16>
    %cst_162 = arith.constant dense<0.000000e+00> : vector<16x128xf32>
    %157 = tpu.matmul %156, %1, %cst_162 {dimension_numbers = #tpu.dot_dimension_numbers<[1], [0], [0], [1], [0, 0, 1, 1], [], []>} : vector<16x16xbf16>, vector<16x128xbf16>, vector<16x128xf32> -> vector<16x128xf32>
    %158 = arith.addf %154, %157 : vector<16x128xf32>
    %c0_163 = arith.constant 0 : index
    %c9_164 = arith.constant 9 : index
    %c0_165 = arith.constant 0 : index
    %c0_166 = arith.constant 0 : index
    %159 = vector.load %arg2[%c0_163, %c9_164, %c0_165, %c0_166] : memref<1x16x16x16xbf16, #tpu.memory_space<vmem>>, vector<1x1x16x16xbf16>
    %160 = vector.shape_cast %159 : vector<1x1x16x16xbf16> to vector<16x16xbf16>
    %cst_167 = arith.constant dense<0.000000e+00> : vector<16x128xf32>
    %161 = tpu.matmul %160, %3, %cst_167 {dimension_numbers = #tpu.dot_dimension_numbers<[1], [0], [0], [1], [0, 0, 1, 1], [], []>} : vector<16x16xbf16>, vector<16x128xbf16>, vector<16x128xf32> -> vector<16x128xf32>
    %162 = arith.addf %158, %161 : vector<16x128xf32>
    %c0_168 = arith.constant 0 : index
    %c13_169 = arith.constant 13 : index
    %c0_170 = arith.constant 0 : index
    %c0_171 = arith.constant 0 : index
    %163 = vector.load %arg2[%c0_168, %c13_169, %c0_170, %c0_171] : memref<1x16x16x16xbf16, #tpu.memory_space<vmem>>, vector<1x1x16x16xbf16>
    %164 = vector.shape_cast %163 : vector<1x1x16x16xbf16> to vector<16x16xbf16>
    %cst_172 = arith.constant dense<0.000000e+00> : vector<16x128xf32>
    %165 = tpu.matmul %164, %5, %cst_172 {dimension_numbers = #tpu.dot_dimension_numbers<[1], [0], [0], [1], [0, 0, 1, 1], [], []>} : vector<16x16xbf16>, vector<16x128xbf16>, vector<16x128xf32> -> vector<16x128xf32>
    %166 = arith.addf %162, %165 : vector<16x128xf32>
    %c0_173 = arith.constant 0 : index
    %c6_174 = arith.constant 6 : index
    %c0_175 = arith.constant 0 : index
    %c0_176 = arith.constant 0 : index
    %167 = vector.load %arg2[%c0_173, %c6_174, %c0_175, %c0_176] : memref<1x16x16x16xbf16, #tpu.memory_space<vmem>>, vector<1x1x16x16xbf16>
    %168 = vector.shape_cast %167 : vector<1x1x16x16xbf16> to vector<16x16xbf16>
    %cst_177 = arith.constant dense<0.000000e+00> : vector<16x128xf32>
    %169 = tpu.matmul %168, %7, %cst_177 {dimension_numbers = #tpu.dot_dimension_numbers<[1], [0], [0], [1], [0, 0, 1, 1], [], []>} : vector<16x16xbf16>, vector<16x128xbf16>, vector<16x128xf32> -> vector<16x128xf32>
    %170 = arith.addf %166, %169 : vector<16x128xf32>
    %c0_178 = arith.constant 0 : index
    %c3_179 = arith.constant 3 : index
    %c0_180 = arith.constant 0 : index
    %c0_181 = arith.constant 0 : index
    %171 = vector.load %arg2[%c0_178, %c3_179, %c0_180, %c0_181] : memref<1x16x16x16xbf16, #tpu.memory_space<vmem>>, vector<1x1x16x16xbf16>
    %172 = vector.shape_cast %171 : vector<1x1x16x16xbf16> to vector<16x16xbf16>
    %cst_182 = arith.constant dense<0.000000e+00> : vector<16x128xf32>
    %173 = tpu.matmul %172, %9, %cst_182 {dimension_numbers = #tpu.dot_dimension_numbers<[1], [0], [0], [1], [0, 0, 1, 1], [], []>} : vector<16x16xbf16>, vector<16x128xbf16>, vector<16x128xf32> -> vector<16x128xf32>
    %174 = arith.addf %170, %173 : vector<16x128xf32>
    %c0_183 = arith.constant 0 : index
    %c7_184 = arith.constant 7 : index
    %c0_185 = arith.constant 0 : index
    %c0_186 = arith.constant 0 : index
    %175 = vector.load %arg2[%c0_183, %c7_184, %c0_185, %c0_186] : memref<1x16x16x16xbf16, #tpu.memory_space<vmem>>, vector<1x1x16x16xbf16>
    %176 = vector.shape_cast %175 : vector<1x1x16x16xbf16> to vector<16x16xbf16>
    %cst_187 = arith.constant dense<0.000000e+00> : vector<16x128xf32>
    %177 = tpu.matmul %176, %11, %cst_187 {dimension_numbers = #tpu.dot_dimension_numbers<[1], [0], [0], [1], [0, 0, 1, 1], [], []>} : vector<16x16xbf16>, vector<16x128xbf16>, vector<16x128xf32> -> vector<16x128xf32>
    %178 = arith.addf %174, %177 : vector<16x128xf32>
    %c0_188 = arith.constant 0 : index
    %c14_189 = arith.constant 14 : index
    %c0_190 = arith.constant 0 : index
    %c0_191 = arith.constant 0 : index
    %179 = vector.load %arg2[%c0_188, %c14_189, %c0_190, %c0_191] : memref<1x16x16x16xbf16, #tpu.memory_space<vmem>>, vector<1x1x16x16xbf16>
    %180 = vector.shape_cast %179 : vector<1x1x16x16xbf16> to vector<16x16xbf16>
    %cst_192 = arith.constant dense<0.000000e+00> : vector<16x128xf32>
    %181 = tpu.matmul %180, %13, %cst_192 {dimension_numbers = #tpu.dot_dimension_numbers<[1], [0], [0], [1], [0, 0, 1, 1], [], []>} : vector<16x16xbf16>, vector<16x128xbf16>, vector<16x128xf32> -> vector<16x128xf32>
    %182 = arith.addf %178, %181 : vector<16x128xf32>
    %c0_193 = arith.constant 0 : index
    %c11_194 = arith.constant 11 : index
    %c0_195 = arith.constant 0 : index
    %c0_196 = arith.constant 0 : index
    %183 = vector.load %arg2[%c0_193, %c11_194, %c0_195, %c0_196] : memref<1x16x16x16xbf16, #tpu.memory_space<vmem>>, vector<1x1x16x16xbf16>
    %184 = vector.shape_cast %183 : vector<1x1x16x16xbf16> to vector<16x16xbf16>
    %cst_197 = arith.constant dense<0.000000e+00> : vector<16x128xf32>
    %185 = tpu.matmul %184, %15, %cst_197 {dimension_numbers = #tpu.dot_dimension_numbers<[1], [0], [0], [1], [0, 0, 1, 1], [], []>} : vector<16x16xbf16>, vector<16x128xbf16>, vector<16x128xf32> -> vector<16x128xf32>
    %186 = arith.addf %182, %185 : vector<16x128xf32>
    %c0_198 = arith.constant 0 : index
    %c15 = arith.constant 15 : index
    %c0_199 = arith.constant 0 : index
    %c0_200 = arith.constant 0 : index
    %187 = vector.load %arg2[%c0_198, %c15, %c0_199, %c0_200] : memref<1x16x16x16xbf16, #tpu.memory_space<vmem>>, vector<1x1x16x16xbf16>
    %188 = vector.shape_cast %187 : vector<1x1x16x16xbf16> to vector<16x16xbf16>
    %cst_201 = arith.constant dense<0.000000e+00> : vector<16x128xf32>
    %189 = tpu.matmul %188, %17, %cst_201 {dimension_numbers = #tpu.dot_dimension_numbers<[1], [0], [0], [1], [0, 0, 1, 1], [], []>} : vector<16x16xbf16>, vector<16x128xbf16>, vector<16x128xf32> -> vector<16x128xf32>
    %190 = arith.addf %186, %189 : vector<16x128xf32>
    %cst_202 = arith.constant dense<0.000000e+00> : vector<128xf32>
    %191 = vector.multi_reduction <add>, %190, %cst_202 [0] : vector<16x128xf32> to vector<128xf32>
    %192 = vector.shape_cast %191 : vector<128xf32> to vector<1x128xf32>
    %193 = arith.addf %148, %192 : vector<1x128xf32>
    %194 = arith.mulf %190, %190 : vector<16x128xf32>
    %cst_203 = arith.constant dense<0.000000e+00> : vector<128xf32>
    %195 = vector.multi_reduction <add>, %194, %cst_203 [0] : vector<16x128xf32> to vector<128xf32>
    %196 = vector.shape_cast %195 : vector<128xf32> to vector<1x128xf32>
    %197 = arith.addf %152, %196 : vector<1x128xf32>
    %198 = arith.maximumf %153, %190 : vector<16x128xf32>
    %c0_204 = arith.constant 0 : index
    %c0_205 = arith.constant 0 : index
    %c0_206 = arith.constant 0 : index
    %199 = vector.load %arg4[%c0_204, %c0_205, %c0_206] : memref<1x16x128xf32, #tpu.memory_space<vmem>>, vector<1x16x128xf32>
    %200 = vector.shape_cast %199 : vector<1x16x128xf32> to vector<16x128xf32>
    %201 = vector.shape_cast %198 : vector<16x128xf32> to vector<1x16x128xf32>
    tpu.vector_store %arg4[%c0_204, %c0_205, %c0_206], %201 {strides = array<i32>} : memref<1x16x128xf32, #tpu.memory_space<vmem>>, vector<1x16x128xf32>,
    %c0_i32 = arith.constant 0 : i32
    %202 = arith.cmpi eq, %arg1, %c0_i32 : i32
    %203 = arith.extui %202 : i1 to i32
    %c0_i32_207 = arith.constant 0 : i32
    %204 = arith.cmpi ne, %203, %c0_i32_207 : i32
    scf.if %204 {
      %cst_212 = arith.constant 0.000000e+00 : f32
      %209 = vector.broadcast %cst_212 : f32 to vector<2x128xf32>
      %c0_213 = arith.constant 0 : index
      %c0_214 = arith.constant 0 : index
      %210 = vector.load %arg5[%c0_213, %c0_214] : memref<2x128xf32, #tpu.memory_space<vmem>>, vector<2x128xf32>
      tpu.vector_store %arg5[%c0_213, %c0_214], %209 {strides = array<i32>} : memref<2x128xf32, #tpu.memory_space<vmem>>, vector<2x128xf32>,
    } else {
    }
    %c0_208 = arith.constant 0 : index
    %c0_209 = arith.constant 0 : index
    %205 = vector.load %arg5[%c0_208, %c0_209] : memref<2x128xf32, #tpu.memory_space<vmem>>, vector<2x128xf32>
    %206 = tpu.concatenate %193, %197 in 0 : vector<1x128xf32>, vector<1x128xf32> -> vector<2x128xf32>
    %207 = arith.addf %205, %206 : vector<2x128xf32>
    %c0_210 = arith.constant 0 : index
    %c0_211 = arith.constant 0 : index
    %208 = vector.load %arg5[%c0_210, %c0_211] : memref<2x128xf32, #tpu.memory_space<vmem>>, vector<2x128xf32>
    tpu.vector_store %arg5[%c0_210, %c0_211], %207 {strides = array<i32>} : memref<2x128xf32, #tpu.memory_space<vmem>>, vector<2x128xf32>,
    return
  }
  func.func @transform_0(%arg0: i32, %arg1: i32) -> (i32, i32, i32, i32) {
    %c0_i32 = arith.constant 0 : i32
    %c0_i32_0 = arith.constant 0 : i32
    %c0_i32_1 = arith.constant 0 : i32
    %c0_i32_2 = arith.constant 0 : i32
    return %arg1, %c0_i32, %c0_i32_0, %c0_i32_1 : i32, i32, i32, i32
  }
  func.func @transform_1(%arg0: i32, %arg1: i32) -> (i32, i32, i32) {
    %c0_i32 = arith.constant 0 : i32
    %c0_i32_0 = arith.constant 0 : i32
    %c0_i32_1 = arith.constant 0 : i32
    return %c0_i32, %c0_i32_0, %arg0 : i32, i32, i32
  }
  func.func @transform_2(%arg0: i32, %arg1: i32) -> (i32, i32, i32) {
    %c0_i32 = arith.constant 0 : i32
    %c0_i32_0 = arith.constant 0 : i32
    return %arg1, %c0_i32, %arg0 : i32, i32, i32
  }
  func.func @transform_3(%arg0: i32, %arg1: i32) -> (i32, i32) {
    %c0_i32 = arith.constant 0 : i32
    %c0_i32_0 = arith.constant 0 : i32
    return %c0_i32, %arg0 : i32, i32
  }
}

module attributes {stable_mosaic.version = 11 : i64} {
  func.func @conv_pool_stats_kernel(%arg0: i32, %arg1: i32, %arg2: memref<1x16x4x16xbf16, #tpu.memory_space<vmem>>, %arg3: memref<9x16x128xbf16, #tpu.memory_space<vmem>>, %arg4: memref<1x4x128xf32, #tpu.memory_space<vmem>>, %arg5: memref<2x128xf32, #tpu.memory_space<vmem>>) attributes {dimension_semantics = [#tpu.dimension_semantics<parallel>, #tpu.dimension_semantics<arbitrary>], iteration_bounds = array<i64: 1, 2>, scalar_prefetch = 0 : i64, scratch_operands = 0 : i64, tpu.core_type = #tpu.core_type<tc>, window_params = [{transform_indices = @transform_0, window_bounds = array<i64: 1, 16, 4, 16>}, {transform_indices = @transform_1, window_bounds = array<i64: 9, 16, 128>}, {transform_indices = @transform_2, window_bounds = array<i64: 1, 4, 128>}, {transform_indices = @transform_3, window_bounds = array<i64: 2, 128>}]} {
    %c0 = arith.constant 0 : index
    %c0_0 = arith.constant 0 : index
    %c0_1 = arith.constant 0 : index
    %0 = vector.load %arg3[%c0, %c0_0, %c0_1] : memref<9x16x128xbf16, #tpu.memory_space<vmem>>, vector<1x16x128xbf16>
    %1 = vector.shape_cast %0 : vector<1x16x128xbf16> to vector<16x128xbf16>
    %c1 = arith.constant 1 : index
    %c0_2 = arith.constant 0 : index
    %c0_3 = arith.constant 0 : index
    %2 = vector.load %arg3[%c1, %c0_2, %c0_3] : memref<9x16x128xbf16, #tpu.memory_space<vmem>>, vector<1x16x128xbf16>
    %3 = vector.shape_cast %2 : vector<1x16x128xbf16> to vector<16x128xbf16>
    %c2 = arith.constant 2 : index
    %c0_4 = arith.constant 0 : index
    %c0_5 = arith.constant 0 : index
    %4 = vector.load %arg3[%c2, %c0_4, %c0_5] : memref<9x16x128xbf16, #tpu.memory_space<vmem>>, vector<1x16x128xbf16>
    %5 = vector.shape_cast %4 : vector<1x16x128xbf16> to vector<16x128xbf16>
    %c3 = arith.constant 3 : index
    %c0_6 = arith.constant 0 : index
    %c0_7 = arith.constant 0 : index
    %6 = vector.load %arg3[%c3, %c0_6, %c0_7] : memref<9x16x128xbf16, #tpu.memory_space<vmem>>, vector<1x16x128xbf16>
    %7 = vector.shape_cast %6 : vector<1x16x128xbf16> to vector<16x128xbf16>
    %c4 = arith.constant 4 : index
    %c0_8 = arith.constant 0 : index
    %c0_9 = arith.constant 0 : index
    %8 = vector.load %arg3[%c4, %c0_8, %c0_9] : memref<9x16x128xbf16, #tpu.memory_space<vmem>>, vector<1x16x128xbf16>
    %9 = vector.shape_cast %8 : vector<1x16x128xbf16> to vector<16x128xbf16>
    %c5 = arith.constant 5 : index
    %c0_10 = arith.constant 0 : index
    %c0_11 = arith.constant 0 : index
    %10 = vector.load %arg3[%c5, %c0_10, %c0_11] : memref<9x16x128xbf16, #tpu.memory_space<vmem>>, vector<1x16x128xbf16>
    %11 = vector.shape_cast %10 : vector<1x16x128xbf16> to vector<16x128xbf16>
    %c6 = arith.constant 6 : index
    %c0_12 = arith.constant 0 : index
    %c0_13 = arith.constant 0 : index
    %12 = vector.load %arg3[%c6, %c0_12, %c0_13] : memref<9x16x128xbf16, #tpu.memory_space<vmem>>, vector<1x16x128xbf16>
    %13 = vector.shape_cast %12 : vector<1x16x128xbf16> to vector<16x128xbf16>
    %c7 = arith.constant 7 : index
    %c0_14 = arith.constant 0 : index
    %c0_15 = arith.constant 0 : index
    %14 = vector.load %arg3[%c7, %c0_14, %c0_15] : memref<9x16x128xbf16, #tpu.memory_space<vmem>>, vector<1x16x128xbf16>
    %15 = vector.shape_cast %14 : vector<1x16x128xbf16> to vector<16x128xbf16>
    %c8 = arith.constant 8 : index
    %c0_16 = arith.constant 0 : index
    %c0_17 = arith.constant 0 : index
    %16 = vector.load %arg3[%c8, %c0_16, %c0_17] : memref<9x16x128xbf16, #tpu.memory_space<vmem>>, vector<1x16x128xbf16>
    %17 = vector.shape_cast %16 : vector<1x16x128xbf16> to vector<16x128xbf16>
    %cst = arith.constant 0.000000e+00 : f32
    %18 = vector.broadcast %cst : f32 to vector<1x128xf32>
    %cst_18 = arith.constant 0.000000e+00 : f32
    %19 = vector.broadcast %cst_18 : f32 to vector<1x128xf32>
    %cst_19 = arith.constant 0.000000e+00 : f32
    %20 = vector.broadcast %cst_19 : f32 to vector<4x128xf32>
    %c0_20 = arith.constant 0 : index
    %c0_21 = arith.constant 0 : index
    %c0_22 = arith.constant 0 : index
    %c0_23 = arith.constant 0 : index
    %21 = vector.load %arg2[%c0_20, %c0_21, %c0_22, %c0_23] : memref<1x16x4x16xbf16, #tpu.memory_space<vmem>>, vector<1x1x4x16xbf16>
    %22 = vector.shape_cast %21 : vector<1x1x4x16xbf16> to vector<4x16xbf16>
    %cst_24 = arith.constant dense<0.000000e+00> : vector<4x128xf32>
    %23 = tpu.matmul %22, %1, %cst_24 {dimension_numbers = #tpu.dot_dimension_numbers<[1], [0], [0], [1], [0, 0, 1, 1], [], []>} : vector<4x16xbf16>, vector<16x128xbf16>, vector<4x128xf32> -> vector<4x128xf32>
    %24 = arith.addf %20, %23 : vector<4x128xf32>
    %c0_25 = arith.constant 0 : index
    %c4_26 = arith.constant 4 : index
    %c0_27 = arith.constant 0 : index
    %c0_28 = arith.constant 0 : index
    %25 = vector.load %arg2[%c0_25, %c4_26, %c0_27, %c0_28] : memref<1x16x4x16xbf16, #tpu.memory_space<vmem>>, vector<1x1x4x16xbf16>
    %26 = vector.shape_cast %25 : vector<1x1x4x16xbf16> to vector<4x16xbf16>
    %cst_29 = arith.constant dense<0.000000e+00> : vector<4x128xf32>
    %27 = tpu.matmul %26, %3, %cst_29 {dimension_numbers = #tpu.dot_dimension_numbers<[1], [0], [0], [1], [0, 0, 1, 1], [], []>} : vector<4x16xbf16>, vector<16x128xbf16>, vector<4x128xf32> -> vector<4x128xf32>
    %28 = arith.addf %24, %27 : vector<4x128xf32>
    %c0_30 = arith.constant 0 : index
    %c1_31 = arith.constant 1 : index
    %c0_32 = arith.constant 0 : index
    %c0_33 = arith.constant 0 : index
    %29 = vector.load %arg2[%c0_30, %c1_31, %c0_32, %c0_33] : memref<1x16x4x16xbf16, #tpu.memory_space<vmem>>, vector<1x1x4x16xbf16>
    %30 = vector.shape_cast %29 : vector<1x1x4x16xbf16> to vector<4x16xbf16>
    %cst_34 = arith.constant dense<0.000000e+00> : vector<4x128xf32>
    %31 = tpu.matmul %30, %5, %cst_34 {dimension_numbers = #tpu.dot_dimension_numbers<[1], [0], [0], [1], [0, 0, 1, 1], [], []>} : vector<4x16xbf16>, vector<16x128xbf16>, vector<4x128xf32> -> vector<4x128xf32>
    %32 = arith.addf %28, %31 : vector<4x128xf32>
    %c0_35 = arith.constant 0 : index
    %c8_36 = arith.constant 8 : index
    %c0_37 = arith.constant 0 : index
    %c0_38 = arith.constant 0 : index
    %33 = vector.load %arg2[%c0_35, %c8_36, %c0_37, %c0_38] : memref<1x16x4x16xbf16, #tpu.memory_space<vmem>>, vector<1x1x4x16xbf16>
    %34 = vector.shape_cast %33 : vector<1x1x4x16xbf16> to vector<4x16xbf16>
    %cst_39 = arith.constant dense<0.000000e+00> : vector<4x128xf32>
    %35 = tpu.matmul %34, %7, %cst_39 {dimension_numbers = #tpu.dot_dimension_numbers<[1], [0], [0], [1], [0, 0, 1, 1], [], []>} : vector<4x16xbf16>, vector<16x128xbf16>, vector<4x128xf32> -> vector<4x128xf32>
    %36 = arith.addf %32, %35 : vector<4x128xf32>
    %c0_40 = arith.constant 0 : index
    %c12 = arith.constant 12 : index
    %c0_41 = arith.constant 0 : index
    %c0_42 = arith.constant 0 : index
    %37 = vector.load %arg2[%c0_40, %c12, %c0_41, %c0_42] : memref<1x16x4x16xbf16, #tpu.memory_space<vmem>>, vector<1x1x4x16xbf16>
    %38 = vector.shape_cast %37 : vector<1x1x4x16xbf16> to vector<4x16xbf16>
    %cst_43 = arith.constant dense<0.000000e+00> : vector<4x128xf32>
    %39 = tpu.matmul %38, %9, %cst_43 {dimension_numbers = #tpu.dot_dimension_numbers<[1], [0], [0], [1], [0, 0, 1, 1], [], []>} : vector<4x16xbf16>, vector<16x128xbf16>, vector<4x128xf32> -> vector<4x128xf32>
    %40 = arith.addf %36, %39 : vector<4x128xf32>
    %c0_44 = arith.constant 0 : index
    %c9 = arith.constant 9 : index
    %c0_45 = arith.constant 0 : index
    %c0_46 = arith.constant 0 : index
    %41 = vector.load %arg2[%c0_44, %c9, %c0_45, %c0_46] : memref<1x16x4x16xbf16, #tpu.memory_space<vmem>>, vector<1x1x4x16xbf16>
    %42 = vector.shape_cast %41 : vector<1x1x4x16xbf16> to vector<4x16xbf16>
    %cst_47 = arith.constant dense<0.000000e+00> : vector<4x128xf32>
    %43 = tpu.matmul %42, %11, %cst_47 {dimension_numbers = #tpu.dot_dimension_numbers<[1], [0], [0], [1], [0, 0, 1, 1], [], []>} : vector<4x16xbf16>, vector<16x128xbf16>, vector<4x128xf32> -> vector<4x128xf32>
    %44 = arith.addf %40, %43 : vector<4x128xf32>
    %c0_48 = arith.constant 0 : index
    %c2_49 = arith.constant 2 : index
    %c0_50 = arith.constant 0 : index
    %c0_51 = arith.constant 0 : index
    %45 = vector.load %arg2[%c0_48, %c2_49, %c0_50, %c0_51] : memref<1x16x4x16xbf16, #tpu.memory_space<vmem>>, vector<1x1x4x16xbf16>
    %46 = vector.shape_cast %45 : vector<1x1x4x16xbf16> to vector<4x16xbf16>
    %cst_52 = arith.constant dense<0.000000e+00> : vector<4x128xf32>
    %47 = tpu.matmul %46, %13, %cst_52 {dimension_numbers = #tpu.dot_dimension_numbers<[1], [0], [0], [1], [0, 0, 1, 1], [], []>} : vector<4x16xbf16>, vector<16x128xbf16>, vector<4x128xf32> -> vector<4x128xf32>
    %48 = arith.addf %44, %47 : vector<4x128xf32>
    %c0_53 = arith.constant 0 : index
    %c6_54 = arith.constant 6 : index
    %c0_55 = arith.constant 0 : index
    %c0_56 = arith.constant 0 : index
    %49 = vector.load %arg2[%c0_53, %c6_54, %c0_55, %c0_56] : memref<1x16x4x16xbf16, #tpu.memory_space<vmem>>, vector<1x1x4x16xbf16>
    %50 = vector.shape_cast %49 : vector<1x1x4x16xbf16> to vector<4x16xbf16>
    %cst_57 = arith.constant dense<0.000000e+00> : vector<4x128xf32>
    %51 = tpu.matmul %50, %15, %cst_57 {dimension_numbers = #tpu.dot_dimension_numbers<[1], [0], [0], [1], [0, 0, 1, 1], [], []>} : vector<4x16xbf16>, vector<16x128xbf16>, vector<4x128xf32> -> vector<4x128xf32>
    %52 = arith.addf %48, %51 : vector<4x128xf32>
    %c0_58 = arith.constant 0 : index
    %c3_59 = arith.constant 3 : index
    %c0_60 = arith.constant 0 : index
    %c0_61 = arith.constant 0 : index
    %53 = vector.load %arg2[%c0_58, %c3_59, %c0_60, %c0_61] : memref<1x16x4x16xbf16, #tpu.memory_space<vmem>>, vector<1x1x4x16xbf16>
    %54 = vector.shape_cast %53 : vector<1x1x4x16xbf16> to vector<4x16xbf16>
    %cst_62 = arith.constant dense<0.000000e+00> : vector<4x128xf32>
    %55 = tpu.matmul %54, %17, %cst_62 {dimension_numbers = #tpu.dot_dimension_numbers<[1], [0], [0], [1], [0, 0, 1, 1], [], []>} : vector<4x16xbf16>, vector<16x128xbf16>, vector<4x128xf32> -> vector<4x128xf32>
    %56 = arith.addf %52, %55 : vector<4x128xf32>
    %cst_63 = arith.constant dense<0.000000e+00> : vector<128xf32>
    %57 = vector.multi_reduction <add>, %56, %cst_63 [0] : vector<4x128xf32> to vector<128xf32>
    %58 = vector.shape_cast %57 : vector<128xf32> to vector<1x128xf32>
    %59 = arith.addf %18, %58 : vector<1x128xf32>
    %60 = arith.mulf %56, %56 : vector<4x128xf32>
    %cst_64 = arith.constant dense<0.000000e+00> : vector<128xf32>
    %61 = vector.multi_reduction <add>, %60, %cst_64 [0] : vector<4x128xf32> to vector<128xf32>
    %62 = vector.shape_cast %61 : vector<128xf32> to vector<1x128xf32>
    %63 = arith.addf %19, %62 : vector<1x128xf32>
    %cst_65 = arith.constant 0.000000e+00 : f32
    %64 = vector.broadcast %cst_65 : f32 to vector<4x128xf32>
    %c0_66 = arith.constant 0 : index
    %c4_67 = arith.constant 4 : index
    %c0_68 = arith.constant 0 : index
    %c0_69 = arith.constant 0 : index
    %65 = vector.load %arg2[%c0_66, %c4_67, %c0_68, %c0_69] : memref<1x16x4x16xbf16, #tpu.memory_space<vmem>>, vector<1x1x4x16xbf16>
    %66 = vector.shape_cast %65 : vector<1x1x4x16xbf16> to vector<4x16xbf16>
    %cst_70 = arith.constant dense<0.000000e+00> : vector<4x128xf32>
    %67 = tpu.matmul %66, %1, %cst_70 {dimension_numbers = #tpu.dot_dimension_numbers<[1], [0], [0], [1], [0, 0, 1, 1], [], []>} : vector<4x16xbf16>, vector<16x128xbf16>, vector<4x128xf32> -> vector<4x128xf32>
    %68 = arith.addf %64, %67 : vector<4x128xf32>
    %c0_71 = arith.constant 0 : index
    %c1_72 = arith.constant 1 : index
    %c0_73 = arith.constant 0 : index
    %c0_74 = arith.constant 0 : index
    %69 = vector.load %arg2[%c0_71, %c1_72, %c0_73, %c0_74] : memref<1x16x4x16xbf16, #tpu.memory_space<vmem>>, vector<1x1x4x16xbf16>
    %70 = vector.shape_cast %69 : vector<1x1x4x16xbf16> to vector<4x16xbf16>
    %cst_75 = arith.constant dense<0.000000e+00> : vector<4x128xf32>
    %71 = tpu.matmul %70, %3, %cst_75 {dimension_numbers = #tpu.dot_dimension_numbers<[1], [0], [0], [1], [0, 0, 1, 1], [], []>} : vector<4x16xbf16>, vector<16x128xbf16>, vector<4x128xf32> -> vector<4x128xf32>
    %72 = arith.addf %68, %71 : vector<4x128xf32>
    %c0_76 = arith.constant 0 : index
    %c5_77 = arith.constant 5 : index
    %c0_78 = arith.constant 0 : index
    %c0_79 = arith.constant 0 : index
    %73 = vector.load %arg2[%c0_76, %c5_77, %c0_78, %c0_79] : memref<1x16x4x16xbf16, #tpu.memory_space<vmem>>, vector<1x1x4x16xbf16>
    %74 = vector.shape_cast %73 : vector<1x1x4x16xbf16> to vector<4x16xbf16>
    %cst_80 = arith.constant dense<0.000000e+00> : vector<4x128xf32>
    %75 = tpu.matmul %74, %5, %cst_80 {dimension_numbers = #tpu.dot_dimension_numbers<[1], [0], [0], [1], [0, 0, 1, 1], [], []>} : vector<4x16xbf16>, vector<16x128xbf16>, vector<4x128xf32> -> vector<4x128xf32>
    %76 = arith.addf %72, %75 : vector<4x128xf32>
    %c0_81 = arith.constant 0 : index
    %c12_82 = arith.constant 12 : index
    %c0_83 = arith.constant 0 : index
    %c0_84 = arith.constant 0 : index
    %77 = vector.load %arg2[%c0_81, %c12_82, %c0_83, %c0_84] : memref<1x16x4x16xbf16, #tpu.memory_space<vmem>>, vector<1x1x4x16xbf16>
    %78 = vector.shape_cast %77 : vector<1x1x4x16xbf16> to vector<4x16xbf16>
    %cst_85 = arith.constant dense<0.000000e+00> : vector<4x128xf32>
    %79 = tpu.matmul %78, %7, %cst_85 {dimension_numbers = #tpu.dot_dimension_numbers<[1], [0], [0], [1], [0, 0, 1, 1], [], []>} : vector<4x16xbf16>, vector<16x128xbf16>, vector<4x128xf32> -> vector<4x128xf32>
    %80 = arith.addf %76, %79 : vector<4x128xf32>
    %c0_86 = arith.constant 0 : index
    %c9_87 = arith.constant 9 : index
    %c0_88 = arith.constant 0 : index
    %c0_89 = arith.constant 0 : index
    %81 = vector.load %arg2[%c0_86, %c9_87, %c0_88, %c0_89] : memref<1x16x4x16xbf16, #tpu.memory_space<vmem>>, vector<1x1x4x16xbf16>
    %82 = vector.shape_cast %81 : vector<1x1x4x16xbf16> to vector<4x16xbf16>
    %cst_90 = arith.constant dense<0.000000e+00> : vector<4x128xf32>
    %83 = tpu.matmul %82, %9, %cst_90 {dimension_numbers = #tpu.dot_dimension_numbers<[1], [0], [0], [1], [0, 0, 1, 1], [], []>} : vector<4x16xbf16>, vector<16x128xbf16>, vector<4x128xf32> -> vector<4x128xf32>
    %84 = arith.addf %80, %83 : vector<4x128xf32>
    %c0_91 = arith.constant 0 : index
    %c13 = arith.constant 13 : index
    %c0_92 = arith.constant 0 : index
    %c0_93 = arith.constant 0 : index
    %85 = vector.load %arg2[%c0_91, %c13, %c0_92, %c0_93] : memref<1x16x4x16xbf16, #tpu.memory_space<vmem>>, vector<1x1x4x16xbf16>
    %86 = vector.shape_cast %85 : vector<1x1x4x16xbf16> to vector<4x16xbf16>
    %cst_94 = arith.constant dense<0.000000e+00> : vector<4x128xf32>
    %87 = tpu.matmul %86, %11, %cst_94 {dimension_numbers = #tpu.dot_dimension_numbers<[1], [0], [0], [1], [0, 0, 1, 1], [], []>} : vector<4x16xbf16>, vector<16x128xbf16>, vector<4x128xf32> -> vector<4x128xf32>
    %88 = arith.addf %84, %87 : vector<4x128xf32>
    %c0_95 = arith.constant 0 : index
    %c6_96 = arith.constant 6 : index
    %c0_97 = arith.constant 0 : index
    %c0_98 = arith.constant 0 : index
    %89 = vector.load %arg2[%c0_95, %c6_96, %c0_97, %c0_98] : memref<1x16x4x16xbf16, #tpu.memory_space<vmem>>, vector<1x1x4x16xbf16>
    %90 = vector.shape_cast %89 : vector<1x1x4x16xbf16> to vector<4x16xbf16>
    %cst_99 = arith.constant dense<0.000000e+00> : vector<4x128xf32>
    %91 = tpu.matmul %90, %13, %cst_99 {dimension_numbers = #tpu.dot_dimension_numbers<[1], [0], [0], [1], [0, 0, 1, 1], [], []>} : vector<4x16xbf16>, vector<16x128xbf16>, vector<4x128xf32> -> vector<4x128xf32>
    %92 = arith.addf %88, %91 : vector<4x128xf32>
    %c0_100 = arith.constant 0 : index
    %c3_101 = arith.constant 3 : index
    %c0_102 = arith.constant 0 : index
    %c0_103 = arith.constant 0 : index
    %93 = vector.load %arg2[%c0_100, %c3_101, %c0_102, %c0_103] : memref<1x16x4x16xbf16, #tpu.memory_space<vmem>>, vector<1x1x4x16xbf16>
    %94 = vector.shape_cast %93 : vector<1x1x4x16xbf16> to vector<4x16xbf16>
    %cst_104 = arith.constant dense<0.000000e+00> : vector<4x128xf32>
    %95 = tpu.matmul %94, %15, %cst_104 {dimension_numbers = #tpu.dot_dimension_numbers<[1], [0], [0], [1], [0, 0, 1, 1], [], []>} : vector<4x16xbf16>, vector<16x128xbf16>, vector<4x128xf32> -> vector<4x128xf32>
    %96 = arith.addf %92, %95 : vector<4x128xf32>
    %c0_105 = arith.constant 0 : index
    %c7_106 = arith.constant 7 : index
    %c0_107 = arith.constant 0 : index
    %c0_108 = arith.constant 0 : index
    %97 = vector.load %arg2[%c0_105, %c7_106, %c0_107, %c0_108] : memref<1x16x4x16xbf16, #tpu.memory_space<vmem>>, vector<1x1x4x16xbf16>
    %98 = vector.shape_cast %97 : vector<1x1x4x16xbf16> to vector<4x16xbf16>
    %cst_109 = arith.constant dense<0.000000e+00> : vector<4x128xf32>
    %99 = tpu.matmul %98, %17, %cst_109 {dimension_numbers = #tpu.dot_dimension_numbers<[1], [0], [0], [1], [0, 0, 1, 1], [], []>} : vector<4x16xbf16>, vector<16x128xbf16>, vector<4x128xf32> -> vector<4x128xf32>
    %100 = arith.addf %96, %99 : vector<4x128xf32>
    %cst_110 = arith.constant dense<0.000000e+00> : vector<128xf32>
    %101 = vector.multi_reduction <add>, %100, %cst_110 [0] : vector<4x128xf32> to vector<128xf32>
    %102 = vector.shape_cast %101 : vector<128xf32> to vector<1x128xf32>
    %103 = arith.addf %59, %102 : vector<1x128xf32>
    %104 = arith.mulf %100, %100 : vector<4x128xf32>
    %cst_111 = arith.constant dense<0.000000e+00> : vector<128xf32>
    %105 = vector.multi_reduction <add>, %104, %cst_111 [0] : vector<4x128xf32> to vector<128xf32>
    %106 = vector.shape_cast %105 : vector<128xf32> to vector<1x128xf32>
    %107 = arith.addf %63, %106 : vector<1x128xf32>
    %108 = arith.maximumf %56, %100 : vector<4x128xf32>
    %cst_112 = arith.constant 0.000000e+00 : f32
    %109 = vector.broadcast %cst_112 : f32 to vector<4x128xf32>
    %c0_113 = arith.constant 0 : index
    %c8_114 = arith.constant 8 : index
    %c0_115 = arith.constant 0 : index
    %c0_116 = arith.constant 0 : index
    %110 = vector.load %arg2[%c0_113, %c8_114, %c0_115, %c0_116] : memref<1x16x4x16xbf16, #tpu.memory_space<vmem>>, vector<1x1x4x16xbf16>
    %111 = vector.shape_cast %110 : vector<1x1x4x16xbf16> to vector<4x16xbf16>
    %cst_117 = arith.constant dense<0.000000e+00> : vector<4x128xf32>
    %112 = tpu.matmul %111, %1, %cst_117 {dimension_numbers = #tpu.dot_dimension_numbers<[1], [0], [0], [1], [0, 0, 1, 1], [], []>} : vector<4x16xbf16>, vector<16x128xbf16>, vector<4x128xf32> -> vector<4x128xf32>
    %113 = arith.addf %109, %112 : vector<4x128xf32>
    %c0_118 = arith.constant 0 : index
    %c12_119 = arith.constant 12 : index
    %c0_120 = arith.constant 0 : index
    %c0_121 = arith.constant 0 : index
    %114 = vector.load %arg2[%c0_118, %c12_119, %c0_120, %c0_121] : memref<1x16x4x16xbf16, #tpu.memory_space<vmem>>, vector<1x1x4x16xbf16>
    %115 = vector.shape_cast %114 : vector<1x1x4x16xbf16> to vector<4x16xbf16>
    %cst_122 = arith.constant dense<0.000000e+00> : vector<4x128xf32>
    %116 = tpu.matmul %115, %3, %cst_122 {dimension_numbers = #tpu.dot_dimension_numbers<[1], [0], [0], [1], [0, 0, 1, 1], [], []>} : vector<4x16xbf16>, vector<16x128xbf16>, vector<4x128xf32> -> vector<4x128xf32>
    %117 = arith.addf %113, %116 : vector<4x128xf32>
    %c0_123 = arith.constant 0 : index
    %c9_124 = arith.constant 9 : index
    %c0_125 = arith.constant 0 : index
    %c0_126 = arith.constant 0 : index
    %118 = vector.load %arg2[%c0_123, %c9_124, %c0_125, %c0_126] : memref<1x16x4x16xbf16, #tpu.memory_space<vmem>>, vector<1x1x4x16xbf16>
    %119 = vector.shape_cast %118 : vector<1x1x4x16xbf16> to vector<4x16xbf16>
    %cst_127 = arith.constant dense<0.000000e+00> : vector<4x128xf32>
    %120 = tpu.matmul %119, %5, %cst_127 {dimension_numbers = #tpu.dot_dimension_numbers<[1], [0], [0], [1], [0, 0, 1, 1], [], []>} : vector<4x16xbf16>, vector<16x128xbf16>, vector<4x128xf32> -> vector<4x128xf32>
    %121 = arith.addf %117, %120 : vector<4x128xf32>
    %c0_128 = arith.constant 0 : index
    %c2_129 = arith.constant 2 : index
    %c0_130 = arith.constant 0 : index
    %c0_131 = arith.constant 0 : index
    %122 = vector.load %arg2[%c0_128, %c2_129, %c0_130, %c0_131] : memref<1x16x4x16xbf16, #tpu.memory_space<vmem>>, vector<1x1x4x16xbf16>
    %123 = vector.shape_cast %122 : vector<1x1x4x16xbf16> to vector<4x16xbf16>
    %cst_132 = arith.constant dense<0.000000e+00> : vector<4x128xf32>
    %124 = tpu.matmul %123, %7, %cst_132 {dimension_numbers = #tpu.dot_dimension_numbers<[1], [0], [0], [1], [0, 0, 1, 1], [], []>} : vector<4x16xbf16>, vector<16x128xbf16>, vector<4x128xf32> -> vector<4x128xf32>
    %125 = arith.addf %121, %124 : vector<4x128xf32>
    %c0_133 = arith.constant 0 : index
    %c6_134 = arith.constant 6 : index
    %c0_135 = arith.constant 0 : index
    %c0_136 = arith.constant 0 : index
    %126 = vector.load %arg2[%c0_133, %c6_134, %c0_135, %c0_136] : memref<1x16x4x16xbf16, #tpu.memory_space<vmem>>, vector<1x1x4x16xbf16>
    %127 = vector.shape_cast %126 : vector<1x1x4x16xbf16> to vector<4x16xbf16>
    %cst_137 = arith.constant dense<0.000000e+00> : vector<4x128xf32>
    %128 = tpu.matmul %127, %9, %cst_137 {dimension_numbers = #tpu.dot_dimension_numbers<[1], [0], [0], [1], [0, 0, 1, 1], [], []>} : vector<4x16xbf16>, vector<16x128xbf16>, vector<4x128xf32> -> vector<4x128xf32>
    %129 = arith.addf %125, %128 : vector<4x128xf32>
    %c0_138 = arith.constant 0 : index
    %c3_139 = arith.constant 3 : index
    %c0_140 = arith.constant 0 : index
    %c0_141 = arith.constant 0 : index
    %130 = vector.load %arg2[%c0_138, %c3_139, %c0_140, %c0_141] : memref<1x16x4x16xbf16, #tpu.memory_space<vmem>>, vector<1x1x4x16xbf16>
    %131 = vector.shape_cast %130 : vector<1x1x4x16xbf16> to vector<4x16xbf16>
    %cst_142 = arith.constant dense<0.000000e+00> : vector<4x128xf32>
    %132 = tpu.matmul %131, %11, %cst_142 {dimension_numbers = #tpu.dot_dimension_numbers<[1], [0], [0], [1], [0, 0, 1, 1], [], []>} : vector<4x16xbf16>, vector<16x128xbf16>, vector<4x128xf32> -> vector<4x128xf32>
    %133 = arith.addf %129, %132 : vector<4x128xf32>
    %c0_143 = arith.constant 0 : index
    %c10 = arith.constant 10 : index
    %c0_144 = arith.constant 0 : index
    %c0_145 = arith.constant 0 : index
    %134 = vector.load %arg2[%c0_143, %c10, %c0_144, %c0_145] : memref<1x16x4x16xbf16, #tpu.memory_space<vmem>>, vector<1x1x4x16xbf16>
    %135 = vector.shape_cast %134 : vector<1x1x4x16xbf16> to vector<4x16xbf16>
    %cst_146 = arith.constant dense<0.000000e+00> : vector<4x128xf32>
    %136 = tpu.matmul %135, %13, %cst_146 {dimension_numbers = #tpu.dot_dimension_numbers<[1], [0], [0], [1], [0, 0, 1, 1], [], []>} : vector<4x16xbf16>, vector<16x128xbf16>, vector<4x128xf32> -> vector<4x128xf32>
    %137 = arith.addf %133, %136 : vector<4x128xf32>
    %c0_147 = arith.constant 0 : index
    %c14 = arith.constant 14 : index
    %c0_148 = arith.constant 0 : index
    %c0_149 = arith.constant 0 : index
    %138 = vector.load %arg2[%c0_147, %c14, %c0_148, %c0_149] : memref<1x16x4x16xbf16, #tpu.memory_space<vmem>>, vector<1x1x4x16xbf16>
    %139 = vector.shape_cast %138 : vector<1x1x4x16xbf16> to vector<4x16xbf16>
    %cst_150 = arith.constant dense<0.000000e+00> : vector<4x128xf32>
    %140 = tpu.matmul %139, %15, %cst_150 {dimension_numbers = #tpu.dot_dimension_numbers<[1], [0], [0], [1], [0, 0, 1, 1], [], []>} : vector<4x16xbf16>, vector<16x128xbf16>, vector<4x128xf32> -> vector<4x128xf32>
    %141 = arith.addf %137, %140 : vector<4x128xf32>
    %c0_151 = arith.constant 0 : index
    %c11 = arith.constant 11 : index
    %c0_152 = arith.constant 0 : index
    %c0_153 = arith.constant 0 : index
    %142 = vector.load %arg2[%c0_151, %c11, %c0_152, %c0_153] : memref<1x16x4x16xbf16, #tpu.memory_space<vmem>>, vector<1x1x4x16xbf16>
    %143 = vector.shape_cast %142 : vector<1x1x4x16xbf16> to vector<4x16xbf16>
    %cst_154 = arith.constant dense<0.000000e+00> : vector<4x128xf32>
    %144 = tpu.matmul %143, %17, %cst_154 {dimension_numbers = #tpu.dot_dimension_numbers<[1], [0], [0], [1], [0, 0, 1, 1], [], []>} : vector<4x16xbf16>, vector<16x128xbf16>, vector<4x128xf32> -> vector<4x128xf32>
    %145 = arith.addf %141, %144 : vector<4x128xf32>
    %cst_155 = arith.constant dense<0.000000e+00> : vector<128xf32>
    %146 = vector.multi_reduction <add>, %145, %cst_155 [0] : vector<4x128xf32> to vector<128xf32>
    %147 = vector.shape_cast %146 : vector<128xf32> to vector<1x128xf32>
    %148 = arith.addf %103, %147 : vector<1x128xf32>
    %149 = arith.mulf %145, %145 : vector<4x128xf32>
    %cst_156 = arith.constant dense<0.000000e+00> : vector<128xf32>
    %150 = vector.multi_reduction <add>, %149, %cst_156 [0] : vector<4x128xf32> to vector<128xf32>
    %151 = vector.shape_cast %150 : vector<128xf32> to vector<1x128xf32>
    %152 = arith.addf %107, %151 : vector<1x128xf32>
    %153 = arith.maximumf %108, %145 : vector<4x128xf32>
    %cst_157 = arith.constant 0.000000e+00 : f32
    %154 = vector.broadcast %cst_157 : f32 to vector<4x128xf32>
    %c0_158 = arith.constant 0 : index
    %c12_159 = arith.constant 12 : index
    %c0_160 = arith.constant 0 : index
    %c0_161 = arith.constant 0 : index
    %155 = vector.load %arg2[%c0_158, %c12_159, %c0_160, %c0_161] : memref<1x16x4x16xbf16, #tpu.memory_space<vmem>>, vector<1x1x4x16xbf16>
    %156 = vector.shape_cast %155 : vector<1x1x4x16xbf16> to vector<4x16xbf16>
    %cst_162 = arith.constant dense<0.000000e+00> : vector<4x128xf32>
    %157 = tpu.matmul %156, %1, %cst_162 {dimension_numbers = #tpu.dot_dimension_numbers<[1], [0], [0], [1], [0, 0, 1, 1], [], []>} : vector<4x16xbf16>, vector<16x128xbf16>, vector<4x128xf32> -> vector<4x128xf32>
    %158 = arith.addf %154, %157 : vector<4x128xf32>
    %c0_163 = arith.constant 0 : index
    %c9_164 = arith.constant 9 : index
    %c0_165 = arith.constant 0 : index
    %c0_166 = arith.constant 0 : index
    %159 = vector.load %arg2[%c0_163, %c9_164, %c0_165, %c0_166] : memref<1x16x4x16xbf16, #tpu.memory_space<vmem>>, vector<1x1x4x16xbf16>
    %160 = vector.shape_cast %159 : vector<1x1x4x16xbf16> to vector<4x16xbf16>
    %cst_167 = arith.constant dense<0.000000e+00> : vector<4x128xf32>
    %161 = tpu.matmul %160, %3, %cst_167 {dimension_numbers = #tpu.dot_dimension_numbers<[1], [0], [0], [1], [0, 0, 1, 1], [], []>} : vector<4x16xbf16>, vector<16x128xbf16>, vector<4x128xf32> -> vector<4x128xf32>
    %162 = arith.addf %158, %161 : vector<4x128xf32>
    %c0_168 = arith.constant 0 : index
    %c13_169 = arith.constant 13 : index
    %c0_170 = arith.constant 0 : index
    %c0_171 = arith.constant 0 : index
    %163 = vector.load %arg2[%c0_168, %c13_169, %c0_170, %c0_171] : memref<1x16x4x16xbf16, #tpu.memory_space<vmem>>, vector<1x1x4x16xbf16>
    %164 = vector.shape_cast %163 : vector<1x1x4x16xbf16> to vector<4x16xbf16>
    %cst_172 = arith.constant dense<0.000000e+00> : vector<4x128xf32>
    %165 = tpu.matmul %164, %5, %cst_172 {dimension_numbers = #tpu.dot_dimension_numbers<[1], [0], [0], [1], [0, 0, 1, 1], [], []>} : vector<4x16xbf16>, vector<16x128xbf16>, vector<4x128xf32> -> vector<4x128xf32>
    %166 = arith.addf %162, %165 : vector<4x128xf32>
    %c0_173 = arith.constant 0 : index
    %c6_174 = arith.constant 6 : index
    %c0_175 = arith.constant 0 : index
    %c0_176 = arith.constant 0 : index
    %167 = vector.load %arg2[%c0_173, %c6_174, %c0_175, %c0_176] : memref<1x16x4x16xbf16, #tpu.memory_space<vmem>>, vector<1x1x4x16xbf16>
    %168 = vector.shape_cast %167 : vector<1x1x4x16xbf16> to vector<4x16xbf16>
    %cst_177 = arith.constant dense<0.000000e+00> : vector<4x128xf32>
    %169 = tpu.matmul %168, %7, %cst_177 {dimension_numbers = #tpu.dot_dimension_numbers<[1], [0], [0], [1], [0, 0, 1, 1], [], []>} : vector<4x16xbf16>, vector<16x128xbf16>, vector<4x128xf32> -> vector<4x128xf32>
    %170 = arith.addf %166, %169 : vector<4x128xf32>
    %c0_178 = arith.constant 0 : index
    %c3_179 = arith.constant 3 : index
    %c0_180 = arith.constant 0 : index
    %c0_181 = arith.constant 0 : index
    %171 = vector.load %arg2[%c0_178, %c3_179, %c0_180, %c0_181] : memref<1x16x4x16xbf16, #tpu.memory_space<vmem>>, vector<1x1x4x16xbf16>
    %172 = vector.shape_cast %171 : vector<1x1x4x16xbf16> to vector<4x16xbf16>
    %cst_182 = arith.constant dense<0.000000e+00> : vector<4x128xf32>
    %173 = tpu.matmul %172, %9, %cst_182 {dimension_numbers = #tpu.dot_dimension_numbers<[1], [0], [0], [1], [0, 0, 1, 1], [], []>} : vector<4x16xbf16>, vector<16x128xbf16>, vector<4x128xf32> -> vector<4x128xf32>
    %174 = arith.addf %170, %173 : vector<4x128xf32>
    %c0_183 = arith.constant 0 : index
    %c7_184 = arith.constant 7 : index
    %c0_185 = arith.constant 0 : index
    %c0_186 = arith.constant 0 : index
    %175 = vector.load %arg2[%c0_183, %c7_184, %c0_185, %c0_186] : memref<1x16x4x16xbf16, #tpu.memory_space<vmem>>, vector<1x1x4x16xbf16>
    %176 = vector.shape_cast %175 : vector<1x1x4x16xbf16> to vector<4x16xbf16>
    %cst_187 = arith.constant dense<0.000000e+00> : vector<4x128xf32>
    %177 = tpu.matmul %176, %11, %cst_187 {dimension_numbers = #tpu.dot_dimension_numbers<[1], [0], [0], [1], [0, 0, 1, 1], [], []>} : vector<4x16xbf16>, vector<16x128xbf16>, vector<4x128xf32> -> vector<4x128xf32>
    %178 = arith.addf %174, %177 : vector<4x128xf32>
    %c0_188 = arith.constant 0 : index
    %c14_189 = arith.constant 14 : index
    %c0_190 = arith.constant 0 : index
    %c0_191 = arith.constant 0 : index
    %179 = vector.load %arg2[%c0_188, %c14_189, %c0_190, %c0_191] : memref<1x16x4x16xbf16, #tpu.memory_space<vmem>>, vector<1x1x4x16xbf16>
    %180 = vector.shape_cast %179 : vector<1x1x4x16xbf16> to vector<4x16xbf16>
    %cst_192 = arith.constant dense<0.000000e+00> : vector<4x128xf32>
    %181 = tpu.matmul %180, %13, %cst_192 {dimension_numbers = #tpu.dot_dimension_numbers<[1], [0], [0], [1], [0, 0, 1, 1], [], []>} : vector<4x16xbf16>, vector<16x128xbf16>, vector<4x128xf32> -> vector<4x128xf32>
    %182 = arith.addf %178, %181 : vector<4x128xf32>
    %c0_193 = arith.constant 0 : index
    %c11_194 = arith.constant 11 : index
    %c0_195 = arith.constant 0 : index
    %c0_196 = arith.constant 0 : index
    %183 = vector.load %arg2[%c0_193, %c11_194, %c0_195, %c0_196] : memref<1x16x4x16xbf16, #tpu.memory_space<vmem>>, vector<1x1x4x16xbf16>
    %184 = vector.shape_cast %183 : vector<1x1x4x16xbf16> to vector<4x16xbf16>
    %cst_197 = arith.constant dense<0.000000e+00> : vector<4x128xf32>
    %185 = tpu.matmul %184, %15, %cst_197 {dimension_numbers = #tpu.dot_dimension_numbers<[1], [0], [0], [1], [0, 0, 1, 1], [], []>} : vector<4x16xbf16>, vector<16x128xbf16>, vector<4x128xf32> -> vector<4x128xf32>
    %186 = arith.addf %182, %185 : vector<4x128xf32>
    %c0_198 = arith.constant 0 : index
    %c15 = arith.constant 15 : index
    %c0_199 = arith.constant 0 : index
    %c0_200 = arith.constant 0 : index
    %187 = vector.load %arg2[%c0_198, %c15, %c0_199, %c0_200] : memref<1x16x4x16xbf16, #tpu.memory_space<vmem>>, vector<1x1x4x16xbf16>
    %188 = vector.shape_cast %187 : vector<1x1x4x16xbf16> to vector<4x16xbf16>
    %cst_201 = arith.constant dense<0.000000e+00> : vector<4x128xf32>
    %189 = tpu.matmul %188, %17, %cst_201 {dimension_numbers = #tpu.dot_dimension_numbers<[1], [0], [0], [1], [0, 0, 1, 1], [], []>} : vector<4x16xbf16>, vector<16x128xbf16>, vector<4x128xf32> -> vector<4x128xf32>
    %190 = arith.addf %186, %189 : vector<4x128xf32>
    %cst_202 = arith.constant dense<0.000000e+00> : vector<128xf32>
    %191 = vector.multi_reduction <add>, %190, %cst_202 [0] : vector<4x128xf32> to vector<128xf32>
    %192 = vector.shape_cast %191 : vector<128xf32> to vector<1x128xf32>
    %193 = arith.addf %148, %192 : vector<1x128xf32>
    %194 = arith.mulf %190, %190 : vector<4x128xf32>
    %cst_203 = arith.constant dense<0.000000e+00> : vector<128xf32>
    %195 = vector.multi_reduction <add>, %194, %cst_203 [0] : vector<4x128xf32> to vector<128xf32>
    %196 = vector.shape_cast %195 : vector<128xf32> to vector<1x128xf32>
    %197 = arith.addf %152, %196 : vector<1x128xf32>
    %198 = arith.maximumf %153, %190 : vector<4x128xf32>
    %c0_204 = arith.constant 0 : index
    %c0_205 = arith.constant 0 : index
    %c0_206 = arith.constant 0 : index
    %199 = vector.load %arg4[%c0_204, %c0_205, %c0_206] : memref<1x4x128xf32, #tpu.memory_space<vmem>>, vector<1x4x128xf32>
    %200 = vector.shape_cast %199 : vector<1x4x128xf32> to vector<4x128xf32>
    %201 = vector.shape_cast %198 : vector<4x128xf32> to vector<1x4x128xf32>
    tpu.vector_store %arg4[%c0_204, %c0_205, %c0_206], %201 {strides = array<i32>} : memref<1x4x128xf32, #tpu.memory_space<vmem>>, vector<1x4x128xf32>,
    %c0_i32 = arith.constant 0 : i32
    %202 = arith.cmpi eq, %arg1, %c0_i32 : i32
    %203 = arith.extui %202 : i1 to i32
    %c0_i32_207 = arith.constant 0 : i32
    %204 = arith.cmpi ne, %203, %c0_i32_207 : i32
    scf.if %204 {
      %cst_212 = arith.constant 0.000000e+00 : f32
      %209 = vector.broadcast %cst_212 : f32 to vector<2x128xf32>
      %c0_213 = arith.constant 0 : index
      %c0_214 = arith.constant 0 : index
      %210 = vector.load %arg5[%c0_213, %c0_214] : memref<2x128xf32, #tpu.memory_space<vmem>>, vector<2x128xf32>
      tpu.vector_store %arg5[%c0_213, %c0_214], %209 {strides = array<i32>} : memref<2x128xf32, #tpu.memory_space<vmem>>, vector<2x128xf32>,
    } else {
    }
    %c0_208 = arith.constant 0 : index
    %c0_209 = arith.constant 0 : index
    %205 = vector.load %arg5[%c0_208, %c0_209] : memref<2x128xf32, #tpu.memory_space<vmem>>, vector<2x128xf32>
    %206 = tpu.concatenate %193, %197 in 0 : vector<1x128xf32>, vector<1x128xf32> -> vector<2x128xf32>
    %207 = arith.addf %205, %206 : vector<2x128xf32>
    %c0_210 = arith.constant 0 : index
    %c0_211 = arith.constant 0 : index
    %208 = vector.load %arg5[%c0_210, %c0_211] : memref<2x128xf32, #tpu.memory_space<vmem>>, vector<2x128xf32>
    tpu.vector_store %arg5[%c0_210, %c0_211], %207 {strides = array<i32>} : memref<2x128xf32, #tpu.memory_space<vmem>>, vector<2x128xf32>,
    return
  }
  func.func @transform_0(%arg0: i32, %arg1: i32) -> (i32, i32, i32, i32) {
    %c0_i32 = arith.constant 0 : i32
    %c0_i32_0 = arith.constant 0 : i32
    %c0_i32_1 = arith.constant 0 : i32
    %c0_i32_2 = arith.constant 0 : i32
    return %arg1, %c0_i32, %c0_i32_0, %c0_i32_1 : i32, i32, i32, i32
  }
  func.func @transform_1(%arg0: i32, %arg1: i32) -> (i32, i32, i32) {
    %c0_i32 = arith.constant 0 : i32
    %c0_i32_0 = arith.constant 0 : i32
    %c0_i32_1 = arith.constant 0 : i32
    return %c0_i32, %c0_i32_0, %arg0 : i32, i32, i32
  }
  func.func @transform_2(%arg0: i32, %arg1: i32) -> (i32, i32, i32) {
    %c0_i32 = arith.constant 0 : i32
    %c0_i32_0 = arith.constant 0 : i32
    return %arg1, %c0_i32, %arg0 : i32, i32, i32
  }
  func.func @transform_3(%arg0: i32, %arg1: i32) -> (i32, i32) {
    %c0_i32 = arith.constant 0 : i32
    %c0_i32_0 = arith.constant 0 : i32
    return %c0_i32, %arg0 : i32, i32
  }
}

module attributes {stable_mosaic.version = 11 : i64} {
  func.func @bn_relu_kernel(%arg0: i32, %arg1: memref<1x4x128xf32, #tpu.memory_space<vmem>>, %arg2: memref<2x128xf32, #tpu.memory_space<vmem>>, %arg3: memref<1x128xf32, #tpu.memory_space<vmem>>, %arg4: memref<1x128xf32, #tpu.memory_space<vmem>>, %arg5: memref<1x4x128xf32, #tpu.memory_space<vmem>>) attributes {dimension_semantics = [#tpu.dimension_semantics<parallel>], iteration_bounds = array<i64: 2>, scalar_prefetch = 0 : i64, scratch_operands = 0 : i64, tpu.core_type = #tpu.core_type<tc>, window_params = [{transform_indices = @transform_0, window_bounds = array<i64: 1, 4, 128>}, {pipeline_mode = #tpu.pipeline_mode<synchronous>, transform_indices = @transform_1, window_bounds = array<i64: 2, 128>}, {pipeline_mode = #tpu.pipeline_mode<synchronous>, transform_indices = @transform_2, window_bounds = array<i64: 1, 128>}, {pipeline_mode = #tpu.pipeline_mode<synchronous>, transform_indices = @transform_3, window_bounds = array<i64: 1, 128>}, {transform_indices = @transform_4, window_bounds = array<i64: 1, 4, 128>}]} {
    %c0 = arith.constant 0 : index
    %c0_0 = arith.constant 0 : index
    %0 = vector.load %arg2[%c0, %c0_0] : memref<2x128xf32, #tpu.memory_space<vmem>>, vector<1x128xf32>
    %cst = arith.constant 3.125000e-02 : f32
    %1 = vector.broadcast %cst : f32 to vector<1x128xf32>
    %2 = arith.mulf %0, %1 : vector<1x128xf32>
    %c1 = arith.constant 1 : index
    %c0_1 = arith.constant 0 : index
    %3 = vector.load %arg2[%c1, %c0_1] : memref<2x128xf32, #tpu.memory_space<vmem>>, vector<1x128xf32>
    %cst_2 = arith.constant 3.125000e-02 : f32
    %4 = vector.broadcast %cst_2 : f32 to vector<1x128xf32>
    %5 = arith.mulf %3, %4 : vector<1x128xf32>
    %6 = arith.mulf %2, %2 : vector<1x128xf32>
    %7 = arith.subf %5, %6 : vector<1x128xf32>
    %cst_3 = arith.constant 0.000000e+00 : f32
    %8 = vector.broadcast %cst_3 : f32 to vector<1x128xf32>
    %9 = arith.maximumf %7, %8 : vector<1x128xf32>
    %c0_4 = arith.constant 0 : index
    %c0_5 = arith.constant 0 : index
    %10 = vector.load %arg3[%c0_4, %c0_5] : memref<1x128xf32, #tpu.memory_space<vmem>>, vector<1x128xf32>
    %cst_6 = arith.constant 9.99999974E-6 : f32
    %11 = vector.broadcast %cst_6 : f32 to vector<1x128xf32>
    %12 = arith.addf %9, %11 : vector<1x128xf32>
    %13 = math.rsqrt %12 : vector<1x128xf32>
    %14 = arith.mulf %10, %13 : vector<1x128xf32>
    %c0_7 = arith.constant 0 : index
    %c0_8 = arith.constant 0 : index
    %15 = vector.load %arg4[%c0_7, %c0_8] : memref<1x128xf32, #tpu.memory_space<vmem>>, vector<1x128xf32>
    %16 = arith.mulf %2, %14 : vector<1x128xf32>
    %17 = arith.subf %15, %16 : vector<1x128xf32>
    %c0_9 = arith.constant 0 : index
    %c0_10 = arith.constant 0 : index
    %c0_11 = arith.constant 0 : index
    %18 = vector.load %arg1[%c0_9, %c0_10, %c0_11] : memref<1x4x128xf32, #tpu.memory_space<vmem>>, vector<1x4x128xf32>
    %19 = vector.shape_cast %14 : vector<1x128xf32> to vector<1x1x128xf32>
    %20 = vector.broadcast %19 : vector<1x1x128xf32> to vector<1x4x128xf32>
    %21 = arith.mulf %18, %20 : vector<1x4x128xf32>
    %22 = vector.shape_cast %17 : vector<1x128xf32> to vector<1x1x128xf32>
    %23 = vector.broadcast %22 : vector<1x1x128xf32> to vector<1x4x128xf32>
    %24 = arith.addf %21, %23 : vector<1x4x128xf32>
    %cst_12 = arith.constant 0.000000e+00 : f32
    %25 = vector.broadcast %cst_12 : f32 to vector<1x4x128xf32>
    %26 = arith.maximumf %24, %25 : vector<1x4x128xf32>
    %c0_13 = arith.constant 0 : index
    %c0_14 = arith.constant 0 : index
    %c0_15 = arith.constant 0 : index
    %27 = vector.load %arg5[%c0_13, %c0_14, %c0_15] : memref<1x4x128xf32, #tpu.memory_space<vmem>>, vector<1x4x128xf32>
    tpu.vector_store %arg5[%c0_13, %c0_14, %c0_15], %26 {strides = array<i32>} : memref<1x4x128xf32, #tpu.memory_space<vmem>>, vector<1x4x128xf32>,
    return
  }
  func.func @transform_0(%arg0: i32) -> (i32, i32, i32) {
    %c0_i32 = arith.constant 0 : i32
    %c0_i32_0 = arith.constant 0 : i32
    %c0_i32_1 = arith.constant 0 : i32
    return %arg0, %c0_i32, %c0_i32_0 : i32, i32, i32
  }
  func.func @transform_1(%arg0: i32) -> (i32, i32) {
    %c0_i32 = arith.constant 0 : i32
    %c0_i32_0 = arith.constant 0 : i32
    %c0_i32_1 = arith.constant 0 : i32
    return %c0_i32, %c0_i32_0 : i32, i32
  }
  func.func @transform_2(%arg0: i32) -> (i32, i32) {
    %c0_i32 = arith.constant 0 : i32
    %c0_i32_0 = arith.constant 0 : i32
    %c0_i32_1 = arith.constant 0 : i32
    return %c0_i32, %c0_i32_0 : i32, i32
  }
  func.func @transform_3(%arg0: i32) -> (i32, i32) {
    %c0_i32 = arith.constant 0 : i32
    %c0_i32_0 = arith.constant 0 : i32
    %c0_i32_1 = arith.constant 0 : i32
    return %c0_i32, %c0_i32_0 : i32, i32
  }
  func.func @transform_4(%arg0: i32) -> (i32, i32, i32) {
    %c0_i32 = arith.constant 0 : i32
    %c0_i32_0 = arith.constant 0 : i32
    %c0_i32_1 = arith.constant 0 : i32
    return %arg0, %c0_i32, %c0_i32_0 : i32, i32, i32
  }
}

module attributes {stable_mosaic.version = 11 : i64} {
  func.func @conv_pool_stats_kernel(%arg0: i32, %arg1: i32, %arg2: memref<1x16x1x32xbf16, #tpu.memory_space<vmem>>, %arg3: memref<9x32x128xbf16, #tpu.memory_space<vmem>>, %arg4: memref<1x1x128xf32, #tpu.memory_space<vmem>>, %arg5: memref<2x128xf32, #tpu.memory_space<vmem>>) attributes {dimension_semantics = [#tpu.dimension_semantics<parallel>, #tpu.dimension_semantics<arbitrary>], iteration_bounds = array<i64: 1, 2>, scalar_prefetch = 0 : i64, scratch_operands = 0 : i64, tpu.core_type = #tpu.core_type<tc>, window_params = [{transform_indices = @transform_0, window_bounds = array<i64: 1, 16, 1, 32>}, {transform_indices = @transform_1, window_bounds = array<i64: 9, 32, 128>}, {transform_indices = @transform_2, window_bounds = array<i64: 1, 1, 128>}, {transform_indices = @transform_3, window_bounds = array<i64: 2, 128>}]} {
    %c0 = arith.constant 0 : index
    %c0_0 = arith.constant 0 : index
    %c0_1 = arith.constant 0 : index
    %0 = vector.load %arg3[%c0, %c0_0, %c0_1] : memref<9x32x128xbf16, #tpu.memory_space<vmem>>, vector<1x32x128xbf16>
    %1 = vector.shape_cast %0 : vector<1x32x128xbf16> to vector<32x128xbf16>
    %c1 = arith.constant 1 : index
    %c0_2 = arith.constant 0 : index
    %c0_3 = arith.constant 0 : index
    %2 = vector.load %arg3[%c1, %c0_2, %c0_3] : memref<9x32x128xbf16, #tpu.memory_space<vmem>>, vector<1x32x128xbf16>
    %3 = vector.shape_cast %2 : vector<1x32x128xbf16> to vector<32x128xbf16>
    %c2 = arith.constant 2 : index
    %c0_4 = arith.constant 0 : index
    %c0_5 = arith.constant 0 : index
    %4 = vector.load %arg3[%c2, %c0_4, %c0_5] : memref<9x32x128xbf16, #tpu.memory_space<vmem>>, vector<1x32x128xbf16>
    %5 = vector.shape_cast %4 : vector<1x32x128xbf16> to vector<32x128xbf16>
    %c3 = arith.constant 3 : index
    %c0_6 = arith.constant 0 : index
    %c0_7 = arith.constant 0 : index
    %6 = vector.load %arg3[%c3, %c0_6, %c0_7] : memref<9x32x128xbf16, #tpu.memory_space<vmem>>, vector<1x32x128xbf16>
    %7 = vector.shape_cast %6 : vector<1x32x128xbf16> to vector<32x128xbf16>
    %c4 = arith.constant 4 : index
    %c0_8 = arith.constant 0 : index
    %c0_9 = arith.constant 0 : index
    %8 = vector.load %arg3[%c4, %c0_8, %c0_9] : memref<9x32x128xbf16, #tpu.memory_space<vmem>>, vector<1x32x128xbf16>
    %9 = vector.shape_cast %8 : vector<1x32x128xbf16> to vector<32x128xbf16>
    %c5 = arith.constant 5 : index
    %c0_10 = arith.constant 0 : index
    %c0_11 = arith.constant 0 : index
    %10 = vector.load %arg3[%c5, %c0_10, %c0_11] : memref<9x32x128xbf16, #tpu.memory_space<vmem>>, vector<1x32x128xbf16>
    %11 = vector.shape_cast %10 : vector<1x32x128xbf16> to vector<32x128xbf16>
    %c6 = arith.constant 6 : index
    %c0_12 = arith.constant 0 : index
    %c0_13 = arith.constant 0 : index
    %12 = vector.load %arg3[%c6, %c0_12, %c0_13] : memref<9x32x128xbf16, #tpu.memory_space<vmem>>, vector<1x32x128xbf16>
    %13 = vector.shape_cast %12 : vector<1x32x128xbf16> to vector<32x128xbf16>
    %c7 = arith.constant 7 : index
    %c0_14 = arith.constant 0 : index
    %c0_15 = arith.constant 0 : index
    %14 = vector.load %arg3[%c7, %c0_14, %c0_15] : memref<9x32x128xbf16, #tpu.memory_space<vmem>>, vector<1x32x128xbf16>
    %15 = vector.shape_cast %14 : vector<1x32x128xbf16> to vector<32x128xbf16>
    %c8 = arith.constant 8 : index
    %c0_16 = arith.constant 0 : index
    %c0_17 = arith.constant 0 : index
    %16 = vector.load %arg3[%c8, %c0_16, %c0_17] : memref<9x32x128xbf16, #tpu.memory_space<vmem>>, vector<1x32x128xbf16>
    %17 = vector.shape_cast %16 : vector<1x32x128xbf16> to vector<32x128xbf16>
    %cst = arith.constant 0.000000e+00 : f32
    %18 = vector.broadcast %cst : f32 to vector<1x128xf32>
    %cst_18 = arith.constant 0.000000e+00 : f32
    %19 = vector.broadcast %cst_18 : f32 to vector<1x128xf32>
    %cst_19 = arith.constant 0.000000e+00 : f32
    %20 = vector.broadcast %cst_19 : f32 to vector<1x128xf32>
    %c0_20 = arith.constant 0 : index
    %c0_21 = arith.constant 0 : index
    %c0_22 = arith.constant 0 : index
    %c0_23 = arith.constant 0 : index
    %21 = vector.load %arg2[%c0_20, %c0_21, %c0_22, %c0_23] : memref<1x16x1x32xbf16, #tpu.memory_space<vmem>>, vector<1x1x1x32xbf16>
    %22 = vector.shape_cast %21 : vector<1x1x1x32xbf16> to vector<1x32xbf16>
    %cst_24 = arith.constant dense<0.000000e+00> : vector<1x128xf32>
    %23 = tpu.matmul %22, %1, %cst_24 {dimension_numbers = #tpu.dot_dimension_numbers<[1], [0], [0], [1], [0, 0, 1, 1], [], []>} : vector<1x32xbf16>, vector<32x128xbf16>, vector<1x128xf32> -> vector<1x128xf32>
    %24 = arith.addf %20, %23 : vector<1x128xf32>
    %c0_25 = arith.constant 0 : index
    %c4_26 = arith.constant 4 : index
    %c0_27 = arith.constant 0 : index
    %c0_28 = arith.constant 0 : index
    %25 = vector.load %arg2[%c0_25, %c4_26, %c0_27, %c0_28] : memref<1x16x1x32xbf16, #tpu.memory_space<vmem>>, vector<1x1x1x32xbf16>
    %26 = vector.shape_cast %25 : vector<1x1x1x32xbf16> to vector<1x32xbf16>
    %cst_29 = arith.constant dense<0.000000e+00> : vector<1x128xf32>
    %27 = tpu.matmul %26, %3, %cst_29 {dimension_numbers = #tpu.dot_dimension_numbers<[1], [0], [0], [1], [0, 0, 1, 1], [], []>} : vector<1x32xbf16>, vector<32x128xbf16>, vector<1x128xf32> -> vector<1x128xf32>
    %28 = arith.addf %24, %27 : vector<1x128xf32>
    %c0_30 = arith.constant 0 : index
    %c1_31 = arith.constant 1 : index
    %c0_32 = arith.constant 0 : index
    %c0_33 = arith.constant 0 : index
    %29 = vector.load %arg2[%c0_30, %c1_31, %c0_32, %c0_33] : memref<1x16x1x32xbf16, #tpu.memory_space<vmem>>, vector<1x1x1x32xbf16>
    %30 = vector.shape_cast %29 : vector<1x1x1x32xbf16> to vector<1x32xbf16>
    %cst_34 = arith.constant dense<0.000000e+00> : vector<1x128xf32>
    %31 = tpu.matmul %30, %5, %cst_34 {dimension_numbers = #tpu.dot_dimension_numbers<[1], [0], [0], [1], [0, 0, 1, 1], [], []>} : vector<1x32xbf16>, vector<32x128xbf16>, vector<1x128xf32> -> vector<1x128xf32>
    %32 = arith.addf %28, %31 : vector<1x128xf32>
    %c0_35 = arith.constant 0 : index
    %c8_36 = arith.constant 8 : index
    %c0_37 = arith.constant 0 : index
    %c0_38 = arith.constant 0 : index
    %33 = vector.load %arg2[%c0_35, %c8_36, %c0_37, %c0_38] : memref<1x16x1x32xbf16, #tpu.memory_space<vmem>>, vector<1x1x1x32xbf16>
    %34 = vector.shape_cast %33 : vector<1x1x1x32xbf16> to vector<1x32xbf16>
    %cst_39 = arith.constant dense<0.000000e+00> : vector<1x128xf32>
    %35 = tpu.matmul %34, %7, %cst_39 {dimension_numbers = #tpu.dot_dimension_numbers<[1], [0], [0], [1], [0, 0, 1, 1], [], []>} : vector<1x32xbf16>, vector<32x128xbf16>, vector<1x128xf32> -> vector<1x128xf32>
    %36 = arith.addf %32, %35 : vector<1x128xf32>
    %c0_40 = arith.constant 0 : index
    %c12 = arith.constant 12 : index
    %c0_41 = arith.constant 0 : index
    %c0_42 = arith.constant 0 : index
    %37 = vector.load %arg2[%c0_40, %c12, %c0_41, %c0_42] : memref<1x16x1x32xbf16, #tpu.memory_space<vmem>>, vector<1x1x1x32xbf16>
    %38 = vector.shape_cast %37 : vector<1x1x1x32xbf16> to vector<1x32xbf16>
    %cst_43 = arith.constant dense<0.000000e+00> : vector<1x128xf32>
    %39 = tpu.matmul %38, %9, %cst_43 {dimension_numbers = #tpu.dot_dimension_numbers<[1], [0], [0], [1], [0, 0, 1, 1], [], []>} : vector<1x32xbf16>, vector<32x128xbf16>, vector<1x128xf32> -> vector<1x128xf32>
    %40 = arith.addf %36, %39 : vector<1x128xf32>
    %c0_44 = arith.constant 0 : index
    %c9 = arith.constant 9 : index
    %c0_45 = arith.constant 0 : index
    %c0_46 = arith.constant 0 : index
    %41 = vector.load %arg2[%c0_44, %c9, %c0_45, %c0_46] : memref<1x16x1x32xbf16, #tpu.memory_space<vmem>>, vector<1x1x1x32xbf16>
    %42 = vector.shape_cast %41 : vector<1x1x1x32xbf16> to vector<1x32xbf16>
    %cst_47 = arith.constant dense<0.000000e+00> : vector<1x128xf32>
    %43 = tpu.matmul %42, %11, %cst_47 {dimension_numbers = #tpu.dot_dimension_numbers<[1], [0], [0], [1], [0, 0, 1, 1], [], []>} : vector<1x32xbf16>, vector<32x128xbf16>, vector<1x128xf32> -> vector<1x128xf32>
    %44 = arith.addf %40, %43 : vector<1x128xf32>
    %c0_48 = arith.constant 0 : index
    %c2_49 = arith.constant 2 : index
    %c0_50 = arith.constant 0 : index
    %c0_51 = arith.constant 0 : index
    %45 = vector.load %arg2[%c0_48, %c2_49, %c0_50, %c0_51] : memref<1x16x1x32xbf16, #tpu.memory_space<vmem>>, vector<1x1x1x32xbf16>
    %46 = vector.shape_cast %45 : vector<1x1x1x32xbf16> to vector<1x32xbf16>
    %cst_52 = arith.constant dense<0.000000e+00> : vector<1x128xf32>
    %47 = tpu.matmul %46, %13, %cst_52 {dimension_numbers = #tpu.dot_dimension_numbers<[1], [0], [0], [1], [0, 0, 1, 1], [], []>} : vector<1x32xbf16>, vector<32x128xbf16>, vector<1x128xf32> -> vector<1x128xf32>
    %48 = arith.addf %44, %47 : vector<1x128xf32>
    %c0_53 = arith.constant 0 : index
    %c6_54 = arith.constant 6 : index
    %c0_55 = arith.constant 0 : index
    %c0_56 = arith.constant 0 : index
    %49 = vector.load %arg2[%c0_53, %c6_54, %c0_55, %c0_56] : memref<1x16x1x32xbf16, #tpu.memory_space<vmem>>, vector<1x1x1x32xbf16>
    %50 = vector.shape_cast %49 : vector<1x1x1x32xbf16> to vector<1x32xbf16>
    %cst_57 = arith.constant dense<0.000000e+00> : vector<1x128xf32>
    %51 = tpu.matmul %50, %15, %cst_57 {dimension_numbers = #tpu.dot_dimension_numbers<[1], [0], [0], [1], [0, 0, 1, 1], [], []>} : vector<1x32xbf16>, vector<32x128xbf16>, vector<1x128xf32> -> vector<1x128xf32>
    %52 = arith.addf %48, %51 : vector<1x128xf32>
    %c0_58 = arith.constant 0 : index
    %c3_59 = arith.constant 3 : index
    %c0_60 = arith.constant 0 : index
    %c0_61 = arith.constant 0 : index
    %53 = vector.load %arg2[%c0_58, %c3_59, %c0_60, %c0_61] : memref<1x16x1x32xbf16, #tpu.memory_space<vmem>>, vector<1x1x1x32xbf16>
    %54 = vector.shape_cast %53 : vector<1x1x1x32xbf16> to vector<1x32xbf16>
    %cst_62 = arith.constant dense<0.000000e+00> : vector<1x128xf32>
    %55 = tpu.matmul %54, %17, %cst_62 {dimension_numbers = #tpu.dot_dimension_numbers<[1], [0], [0], [1], [0, 0, 1, 1], [], []>} : vector<1x32xbf16>, vector<32x128xbf16>, vector<1x128xf32> -> vector<1x128xf32>
    %56 = arith.addf %52, %55 : vector<1x128xf32>
    %cst_63 = arith.constant dense<0.000000e+00> : vector<128xf32>
    %57 = vector.multi_reduction <add>, %56, %cst_63 [0] : vector<1x128xf32> to vector<128xf32>
    %58 = vector.shape_cast %57 : vector<128xf32> to vector<1x128xf32>
    %59 = arith.addf %18, %58 : vector<1x128xf32>
    %60 = arith.mulf %56, %56 : vector<1x128xf32>
    %cst_64 = arith.constant dense<0.000000e+00> : vector<128xf32>
    %61 = vector.multi_reduction <add>, %60, %cst_64 [0] : vector<1x128xf32> to vector<128xf32>
    %62 = vector.shape_cast %61 : vector<128xf32> to vector<1x128xf32>
    %63 = arith.addf %19, %62 : vector<1x128xf32>
    %cst_65 = arith.constant 0.000000e+00 : f32
    %64 = vector.broadcast %cst_65 : f32 to vector<1x128xf32>
    %c0_66 = arith.constant 0 : index
    %c4_67 = arith.constant 4 : index
    %c0_68 = arith.constant 0 : index
    %c0_69 = arith.constant 0 : index
    %65 = vector.load %arg2[%c0_66, %c4_67, %c0_68, %c0_69] : memref<1x16x1x32xbf16, #tpu.memory_space<vmem>>, vector<1x1x1x32xbf16>
    %66 = vector.shape_cast %65 : vector<1x1x1x32xbf16> to vector<1x32xbf16>
    %cst_70 = arith.constant dense<0.000000e+00> : vector<1x128xf32>
    %67 = tpu.matmul %66, %1, %cst_70 {dimension_numbers = #tpu.dot_dimension_numbers<[1], [0], [0], [1], [0, 0, 1, 1], [], []>} : vector<1x32xbf16>, vector<32x128xbf16>, vector<1x128xf32> -> vector<1x128xf32>
    %68 = arith.addf %64, %67 : vector<1x128xf32>
    %c0_71 = arith.constant 0 : index
    %c1_72 = arith.constant 1 : index
    %c0_73 = arith.constant 0 : index
    %c0_74 = arith.constant 0 : index
    %69 = vector.load %arg2[%c0_71, %c1_72, %c0_73, %c0_74] : memref<1x16x1x32xbf16, #tpu.memory_space<vmem>>, vector<1x1x1x32xbf16>
    %70 = vector.shape_cast %69 : vector<1x1x1x32xbf16> to vector<1x32xbf16>
    %cst_75 = arith.constant dense<0.000000e+00> : vector<1x128xf32>
    %71 = tpu.matmul %70, %3, %cst_75 {dimension_numbers = #tpu.dot_dimension_numbers<[1], [0], [0], [1], [0, 0, 1, 1], [], []>} : vector<1x32xbf16>, vector<32x128xbf16>, vector<1x128xf32> -> vector<1x128xf32>
    %72 = arith.addf %68, %71 : vector<1x128xf32>
    %c0_76 = arith.constant 0 : index
    %c5_77 = arith.constant 5 : index
    %c0_78 = arith.constant 0 : index
    %c0_79 = arith.constant 0 : index
    %73 = vector.load %arg2[%c0_76, %c5_77, %c0_78, %c0_79] : memref<1x16x1x32xbf16, #tpu.memory_space<vmem>>, vector<1x1x1x32xbf16>
    %74 = vector.shape_cast %73 : vector<1x1x1x32xbf16> to vector<1x32xbf16>
    %cst_80 = arith.constant dense<0.000000e+00> : vector<1x128xf32>
    %75 = tpu.matmul %74, %5, %cst_80 {dimension_numbers = #tpu.dot_dimension_numbers<[1], [0], [0], [1], [0, 0, 1, 1], [], []>} : vector<1x32xbf16>, vector<32x128xbf16>, vector<1x128xf32> -> vector<1x128xf32>
    %76 = arith.addf %72, %75 : vector<1x128xf32>
    %c0_81 = arith.constant 0 : index
    %c12_82 = arith.constant 12 : index
    %c0_83 = arith.constant 0 : index
    %c0_84 = arith.constant 0 : index
    %77 = vector.load %arg2[%c0_81, %c12_82, %c0_83, %c0_84] : memref<1x16x1x32xbf16, #tpu.memory_space<vmem>>, vector<1x1x1x32xbf16>
    %78 = vector.shape_cast %77 : vector<1x1x1x32xbf16> to vector<1x32xbf16>
    %cst_85 = arith.constant dense<0.000000e+00> : vector<1x128xf32>
    %79 = tpu.matmul %78, %7, %cst_85 {dimension_numbers = #tpu.dot_dimension_numbers<[1], [0], [0], [1], [0, 0, 1, 1], [], []>} : vector<1x32xbf16>, vector<32x128xbf16>, vector<1x128xf32> -> vector<1x128xf32>
    %80 = arith.addf %76, %79 : vector<1x128xf32>
    %c0_86 = arith.constant 0 : index
    %c9_87 = arith.constant 9 : index
    %c0_88 = arith.constant 0 : index
    %c0_89 = arith.constant 0 : index
    %81 = vector.load %arg2[%c0_86, %c9_87, %c0_88, %c0_89] : memref<1x16x1x32xbf16, #tpu.memory_space<vmem>>, vector<1x1x1x32xbf16>
    %82 = vector.shape_cast %81 : vector<1x1x1x32xbf16> to vector<1x32xbf16>
    %cst_90 = arith.constant dense<0.000000e+00> : vector<1x128xf32>
    %83 = tpu.matmul %82, %9, %cst_90 {dimension_numbers = #tpu.dot_dimension_numbers<[1], [0], [0], [1], [0, 0, 1, 1], [], []>} : vector<1x32xbf16>, vector<32x128xbf16>, vector<1x128xf32> -> vector<1x128xf32>
    %84 = arith.addf %80, %83 : vector<1x128xf32>
    %c0_91 = arith.constant 0 : index
    %c13 = arith.constant 13 : index
    %c0_92 = arith.constant 0 : index
    %c0_93 = arith.constant 0 : index
    %85 = vector.load %arg2[%c0_91, %c13, %c0_92, %c0_93] : memref<1x16x1x32xbf16, #tpu.memory_space<vmem>>, vector<1x1x1x32xbf16>
    %86 = vector.shape_cast %85 : vector<1x1x1x32xbf16> to vector<1x32xbf16>
    %cst_94 = arith.constant dense<0.000000e+00> : vector<1x128xf32>
    %87 = tpu.matmul %86, %11, %cst_94 {dimension_numbers = #tpu.dot_dimension_numbers<[1], [0], [0], [1], [0, 0, 1, 1], [], []>} : vector<1x32xbf16>, vector<32x128xbf16>, vector<1x128xf32> -> vector<1x128xf32>
    %88 = arith.addf %84, %87 : vector<1x128xf32>
    %c0_95 = arith.constant 0 : index
    %c6_96 = arith.constant 6 : index
    %c0_97 = arith.constant 0 : index
    %c0_98 = arith.constant 0 : index
    %89 = vector.load %arg2[%c0_95, %c6_96, %c0_97, %c0_98] : memref<1x16x1x32xbf16, #tpu.memory_space<vmem>>, vector<1x1x1x32xbf16>
    %90 = vector.shape_cast %89 : vector<1x1x1x32xbf16> to vector<1x32xbf16>
    %cst_99 = arith.constant dense<0.000000e+00> : vector<1x128xf32>
    %91 = tpu.matmul %90, %13, %cst_99 {dimension_numbers = #tpu.dot_dimension_numbers<[1], [0], [0], [1], [0, 0, 1, 1], [], []>} : vector<1x32xbf16>, vector<32x128xbf16>, vector<1x128xf32> -> vector<1x128xf32>
    %92 = arith.addf %88, %91 : vector<1x128xf32>
    %c0_100 = arith.constant 0 : index
    %c3_101 = arith.constant 3 : index
    %c0_102 = arith.constant 0 : index
    %c0_103 = arith.constant 0 : index
    %93 = vector.load %arg2[%c0_100, %c3_101, %c0_102, %c0_103] : memref<1x16x1x32xbf16, #tpu.memory_space<vmem>>, vector<1x1x1x32xbf16>
    %94 = vector.shape_cast %93 : vector<1x1x1x32xbf16> to vector<1x32xbf16>
    %cst_104 = arith.constant dense<0.000000e+00> : vector<1x128xf32>
    %95 = tpu.matmul %94, %15, %cst_104 {dimension_numbers = #tpu.dot_dimension_numbers<[1], [0], [0], [1], [0, 0, 1, 1], [], []>} : vector<1x32xbf16>, vector<32x128xbf16>, vector<1x128xf32> -> vector<1x128xf32>
    %96 = arith.addf %92, %95 : vector<1x128xf32>
    %c0_105 = arith.constant 0 : index
    %c7_106 = arith.constant 7 : index
    %c0_107 = arith.constant 0 : index
    %c0_108 = arith.constant 0 : index
    %97 = vector.load %arg2[%c0_105, %c7_106, %c0_107, %c0_108] : memref<1x16x1x32xbf16, #tpu.memory_space<vmem>>, vector<1x1x1x32xbf16>
    %98 = vector.shape_cast %97 : vector<1x1x1x32xbf16> to vector<1x32xbf16>
    %cst_109 = arith.constant dense<0.000000e+00> : vector<1x128xf32>
    %99 = tpu.matmul %98, %17, %cst_109 {dimension_numbers = #tpu.dot_dimension_numbers<[1], [0], [0], [1], [0, 0, 1, 1], [], []>} : vector<1x32xbf16>, vector<32x128xbf16>, vector<1x128xf32> -> vector<1x128xf32>
    %100 = arith.addf %96, %99 : vector<1x128xf32>
    %cst_110 = arith.constant dense<0.000000e+00> : vector<128xf32>
    %101 = vector.multi_reduction <add>, %100, %cst_110 [0] : vector<1x128xf32> to vector<128xf32>
    %102 = vector.shape_cast %101 : vector<128xf32> to vector<1x128xf32>
    %103 = arith.addf %59, %102 : vector<1x128xf32>
    %104 = arith.mulf %100, %100 : vector<1x128xf32>
    %cst_111 = arith.constant dense<0.000000e+00> : vector<128xf32>
    %105 = vector.multi_reduction <add>, %104, %cst_111 [0] : vector<1x128xf32> to vector<128xf32>
    %106 = vector.shape_cast %105 : vector<128xf32> to vector<1x128xf32>
    %107 = arith.addf %63, %106 : vector<1x128xf32>
    %108 = arith.maximumf %56, %100 : vector<1x128xf32>
    %cst_112 = arith.constant 0.000000e+00 : f32
    %109 = vector.broadcast %cst_112 : f32 to vector<1x128xf32>
    %c0_113 = arith.constant 0 : index
    %c8_114 = arith.constant 8 : index
    %c0_115 = arith.constant 0 : index
    %c0_116 = arith.constant 0 : index
    %110 = vector.load %arg2[%c0_113, %c8_114, %c0_115, %c0_116] : memref<1x16x1x32xbf16, #tpu.memory_space<vmem>>, vector<1x1x1x32xbf16>
    %111 = vector.shape_cast %110 : vector<1x1x1x32xbf16> to vector<1x32xbf16>
    %cst_117 = arith.constant dense<0.000000e+00> : vector<1x128xf32>
    %112 = tpu.matmul %111, %1, %cst_117 {dimension_numbers = #tpu.dot_dimension_numbers<[1], [0], [0], [1], [0, 0, 1, 1], [], []>} : vector<1x32xbf16>, vector<32x128xbf16>, vector<1x128xf32> -> vector<1x128xf32>
    %113 = arith.addf %109, %112 : vector<1x128xf32>
    %c0_118 = arith.constant 0 : index
    %c12_119 = arith.constant 12 : index
    %c0_120 = arith.constant 0 : index
    %c0_121 = arith.constant 0 : index
    %114 = vector.load %arg2[%c0_118, %c12_119, %c0_120, %c0_121] : memref<1x16x1x32xbf16, #tpu.memory_space<vmem>>, vector<1x1x1x32xbf16>
    %115 = vector.shape_cast %114 : vector<1x1x1x32xbf16> to vector<1x32xbf16>
    %cst_122 = arith.constant dense<0.000000e+00> : vector<1x128xf32>
    %116 = tpu.matmul %115, %3, %cst_122 {dimension_numbers = #tpu.dot_dimension_numbers<[1], [0], [0], [1], [0, 0, 1, 1], [], []>} : vector<1x32xbf16>, vector<32x128xbf16>, vector<1x128xf32> -> vector<1x128xf32>
    %117 = arith.addf %113, %116 : vector<1x128xf32>
    %c0_123 = arith.constant 0 : index
    %c9_124 = arith.constant 9 : index
    %c0_125 = arith.constant 0 : index
    %c0_126 = arith.constant 0 : index
    %118 = vector.load %arg2[%c0_123, %c9_124, %c0_125, %c0_126] : memref<1x16x1x32xbf16, #tpu.memory_space<vmem>>, vector<1x1x1x32xbf16>
    %119 = vector.shape_cast %118 : vector<1x1x1x32xbf16> to vector<1x32xbf16>
    %cst_127 = arith.constant dense<0.000000e+00> : vector<1x128xf32>
    %120 = tpu.matmul %119, %5, %cst_127 {dimension_numbers = #tpu.dot_dimension_numbers<[1], [0], [0], [1], [0, 0, 1, 1], [], []>} : vector<1x32xbf16>, vector<32x128xbf16>, vector<1x128xf32> -> vector<1x128xf32>
    %121 = arith.addf %117, %120 : vector<1x128xf32>
    %c0_128 = arith.constant 0 : index
    %c2_129 = arith.constant 2 : index
    %c0_130 = arith.constant 0 : index
    %c0_131 = arith.constant 0 : index
    %122 = vector.load %arg2[%c0_128, %c2_129, %c0_130, %c0_131] : memref<1x16x1x32xbf16, #tpu.memory_space<vmem>>, vector<1x1x1x32xbf16>
    %123 = vector.shape_cast %122 : vector<1x1x1x32xbf16> to vector<1x32xbf16>
    %cst_132 = arith.constant dense<0.000000e+00> : vector<1x128xf32>
    %124 = tpu.matmul %123, %7, %cst_132 {dimension_numbers = #tpu.dot_dimension_numbers<[1], [0], [0], [1], [0, 0, 1, 1], [], []>} : vector<1x32xbf16>, vector<32x128xbf16>, vector<1x128xf32> -> vector<1x128xf32>
    %125 = arith.addf %121, %124 : vector<1x128xf32>
    %c0_133 = arith.constant 0 : index
    %c6_134 = arith.constant 6 : index
    %c0_135 = arith.constant 0 : index
    %c0_136 = arith.constant 0 : index
    %126 = vector.load %arg2[%c0_133, %c6_134, %c0_135, %c0_136] : memref<1x16x1x32xbf16, #tpu.memory_space<vmem>>, vector<1x1x1x32xbf16>
    %127 = vector.shape_cast %126 : vector<1x1x1x32xbf16> to vector<1x32xbf16>
    %cst_137 = arith.constant dense<0.000000e+00> : vector<1x128xf32>
    %128 = tpu.matmul %127, %9, %cst_137 {dimension_numbers = #tpu.dot_dimension_numbers<[1], [0], [0], [1], [0, 0, 1, 1], [], []>} : vector<1x32xbf16>, vector<32x128xbf16>, vector<1x128xf32> -> vector<1x128xf32>
    %129 = arith.addf %125, %128 : vector<1x128xf32>
    %c0_138 = arith.constant 0 : index
    %c3_139 = arith.constant 3 : index
    %c0_140 = arith.constant 0 : index
    %c0_141 = arith.constant 0 : index
    %130 = vector.load %arg2[%c0_138, %c3_139, %c0_140, %c0_141] : memref<1x16x1x32xbf16, #tpu.memory_space<vmem>>, vector<1x1x1x32xbf16>
    %131 = vector.shape_cast %130 : vector<1x1x1x32xbf16> to vector<1x32xbf16>
    %cst_142 = arith.constant dense<0.000000e+00> : vector<1x128xf32>
    %132 = tpu.matmul %131, %11, %cst_142 {dimension_numbers = #tpu.dot_dimension_numbers<[1], [0], [0], [1], [0, 0, 1, 1], [], []>} : vector<1x32xbf16>, vector<32x128xbf16>, vector<1x128xf32> -> vector<1x128xf32>
    %133 = arith.addf %129, %132 : vector<1x128xf32>
    %c0_143 = arith.constant 0 : index
    %c10 = arith.constant 10 : index
    %c0_144 = arith.constant 0 : index
    %c0_145 = arith.constant 0 : index
    %134 = vector.load %arg2[%c0_143, %c10, %c0_144, %c0_145] : memref<1x16x1x32xbf16, #tpu.memory_space<vmem>>, vector<1x1x1x32xbf16>
    %135 = vector.shape_cast %134 : vector<1x1x1x32xbf16> to vector<1x32xbf16>
    %cst_146 = arith.constant dense<0.000000e+00> : vector<1x128xf32>
    %136 = tpu.matmul %135, %13, %cst_146 {dimension_numbers = #tpu.dot_dimension_numbers<[1], [0], [0], [1], [0, 0, 1, 1], [], []>} : vector<1x32xbf16>, vector<32x128xbf16>, vector<1x128xf32> -> vector<1x128xf32>
    %137 = arith.addf %133, %136 : vector<1x128xf32>
    %c0_147 = arith.constant 0 : index
    %c14 = arith.constant 14 : index
    %c0_148 = arith.constant 0 : index
    %c0_149 = arith.constant 0 : index
    %138 = vector.load %arg2[%c0_147, %c14, %c0_148, %c0_149] : memref<1x16x1x32xbf16, #tpu.memory_space<vmem>>, vector<1x1x1x32xbf16>
    %139 = vector.shape_cast %138 : vector<1x1x1x32xbf16> to vector<1x32xbf16>
    %cst_150 = arith.constant dense<0.000000e+00> : vector<1x128xf32>
    %140 = tpu.matmul %139, %15, %cst_150 {dimension_numbers = #tpu.dot_dimension_numbers<[1], [0], [0], [1], [0, 0, 1, 1], [], []>} : vector<1x32xbf16>, vector<32x128xbf16>, vector<1x128xf32> -> vector<1x128xf32>
    %141 = arith.addf %137, %140 : vector<1x128xf32>
    %c0_151 = arith.constant 0 : index
    %c11 = arith.constant 11 : index
    %c0_152 = arith.constant 0 : index
    %c0_153 = arith.constant 0 : index
    %142 = vector.load %arg2[%c0_151, %c11, %c0_152, %c0_153] : memref<1x16x1x32xbf16, #tpu.memory_space<vmem>>, vector<1x1x1x32xbf16>
    %143 = vector.shape_cast %142 : vector<1x1x1x32xbf16> to vector<1x32xbf16>
    %cst_154 = arith.constant dense<0.000000e+00> : vector<1x128xf32>
    %144 = tpu.matmul %143, %17, %cst_154 {dimension_numbers = #tpu.dot_dimension_numbers<[1], [0], [0], [1], [0, 0, 1, 1], [], []>} : vector<1x32xbf16>, vector<32x128xbf16>, vector<1x128xf32> -> vector<1x128xf32>
    %145 = arith.addf %141, %144 : vector<1x128xf32>
    %cst_155 = arith.constant dense<0.000000e+00> : vector<128xf32>
    %146 = vector.multi_reduction <add>, %145, %cst_155 [0] : vector<1x128xf32> to vector<128xf32>
    %147 = vector.shape_cast %146 : vector<128xf32> to vector<1x128xf32>
    %148 = arith.addf %103, %147 : vector<1x128xf32>
    %149 = arith.mulf %145, %145 : vector<1x128xf32>
    %cst_156 = arith.constant dense<0.000000e+00> : vector<128xf32>
    %150 = vector.multi_reduction <add>, %149, %cst_156 [0] : vector<1x128xf32> to vector<128xf32>
    %151 = vector.shape_cast %150 : vector<128xf32> to vector<1x128xf32>
    %152 = arith.addf %107, %151 : vector<1x128xf32>
    %153 = arith.maximumf %108, %145 : vector<1x128xf32>
    %cst_157 = arith.constant 0.000000e+00 : f32
    %154 = vector.broadcast %cst_157 : f32 to vector<1x128xf32>
    %c0_158 = arith.constant 0 : index
    %c12_159 = arith.constant 12 : index
    %c0_160 = arith.constant 0 : index
    %c0_161 = arith.constant 0 : index
    %155 = vector.load %arg2[%c0_158, %c12_159, %c0_160, %c0_161] : memref<1x16x1x32xbf16, #tpu.memory_space<vmem>>, vector<1x1x1x32xbf16>
    %156 = vector.shape_cast %155 : vector<1x1x1x32xbf16> to vector<1x32xbf16>
    %cst_162 = arith.constant dense<0.000000e+00> : vector<1x128xf32>
    %157 = tpu.matmul %156, %1, %cst_162 {dimension_numbers = #tpu.dot_dimension_numbers<[1], [0], [0], [1], [0, 0, 1, 1], [], []>} : vector<1x32xbf16>, vector<32x128xbf16>, vector<1x128xf32> -> vector<1x128xf32>
    %158 = arith.addf %154, %157 : vector<1x128xf32>
    %c0_163 = arith.constant 0 : index
    %c9_164 = arith.constant 9 : index
    %c0_165 = arith.constant 0 : index
    %c0_166 = arith.constant 0 : index
    %159 = vector.load %arg2[%c0_163, %c9_164, %c0_165, %c0_166] : memref<1x16x1x32xbf16, #tpu.memory_space<vmem>>, vector<1x1x1x32xbf16>
    %160 = vector.shape_cast %159 : vector<1x1x1x32xbf16> to vector<1x32xbf16>
    %cst_167 = arith.constant dense<0.000000e+00> : vector<1x128xf32>
    %161 = tpu.matmul %160, %3, %cst_167 {dimension_numbers = #tpu.dot_dimension_numbers<[1], [0], [0], [1], [0, 0, 1, 1], [], []>} : vector<1x32xbf16>, vector<32x128xbf16>, vector<1x128xf32> -> vector<1x128xf32>
    %162 = arith.addf %158, %161 : vector<1x128xf32>
    %c0_168 = arith.constant 0 : index
    %c13_169 = arith.constant 13 : index
    %c0_170 = arith.constant 0 : index
    %c0_171 = arith.constant 0 : index
    %163 = vector.load %arg2[%c0_168, %c13_169, %c0_170, %c0_171] : memref<1x16x1x32xbf16, #tpu.memory_space<vmem>>, vector<1x1x1x32xbf16>
    %164 = vector.shape_cast %163 : vector<1x1x1x32xbf16> to vector<1x32xbf16>
    %cst_172 = arith.constant dense<0.000000e+00> : vector<1x128xf32>
    %165 = tpu.matmul %164, %5, %cst_172 {dimension_numbers = #tpu.dot_dimension_numbers<[1], [0], [0], [1], [0, 0, 1, 1], [], []>} : vector<1x32xbf16>, vector<32x128xbf16>, vector<1x128xf32> -> vector<1x128xf32>
    %166 = arith.addf %162, %165 : vector<1x128xf32>
    %c0_173 = arith.constant 0 : index
    %c6_174 = arith.constant 6 : index
    %c0_175 = arith.constant 0 : index
    %c0_176 = arith.constant 0 : index
    %167 = vector.load %arg2[%c0_173, %c6_174, %c0_175, %c0_176] : memref<1x16x1x32xbf16, #tpu.memory_space<vmem>>, vector<1x1x1x32xbf16>
    %168 = vector.shape_cast %167 : vector<1x1x1x32xbf16> to vector<1x32xbf16>
    %cst_177 = arith.constant dense<0.000000e+00> : vector<1x128xf32>
    %169 = tpu.matmul %168, %7, %cst_177 {dimension_numbers = #tpu.dot_dimension_numbers<[1], [0], [0], [1], [0, 0, 1, 1], [], []>} : vector<1x32xbf16>, vector<32x128xbf16>, vector<1x128xf32> -> vector<1x128xf32>
    %170 = arith.addf %166, %169 : vector<1x128xf32>
    %c0_178 = arith.constant 0 : index
    %c3_179 = arith.constant 3 : index
    %c0_180 = arith.constant 0 : index
    %c0_181 = arith.constant 0 : index
    %171 = vector.load %arg2[%c0_178, %c3_179, %c0_180, %c0_181] : memref<1x16x1x32xbf16, #tpu.memory_space<vmem>>, vector<1x1x1x32xbf16>
    %172 = vector.shape_cast %171 : vector<1x1x1x32xbf16> to vector<1x32xbf16>
    %cst_182 = arith.constant dense<0.000000e+00> : vector<1x128xf32>
    %173 = tpu.matmul %172, %9, %cst_182 {dimension_numbers = #tpu.dot_dimension_numbers<[1], [0], [0], [1], [0, 0, 1, 1], [], []>} : vector<1x32xbf16>, vector<32x128xbf16>, vector<1x128xf32> -> vector<1x128xf32>
    %174 = arith.addf %170, %173 : vector<1x128xf32>
    %c0_183 = arith.constant 0 : index
    %c7_184 = arith.constant 7 : index
    %c0_185 = arith.constant 0 : index
    %c0_186 = arith.constant 0 : index
    %175 = vector.load %arg2[%c0_183, %c7_184, %c0_185, %c0_186] : memref<1x16x1x32xbf16, #tpu.memory_space<vmem>>, vector<1x1x1x32xbf16>
    %176 = vector.shape_cast %175 : vector<1x1x1x32xbf16> to vector<1x32xbf16>
    %cst_187 = arith.constant dense<0.000000e+00> : vector<1x128xf32>
    %177 = tpu.matmul %176, %11, %cst_187 {dimension_numbers = #tpu.dot_dimension_numbers<[1], [0], [0], [1], [0, 0, 1, 1], [], []>} : vector<1x32xbf16>, vector<32x128xbf16>, vector<1x128xf32> -> vector<1x128xf32>
    %178 = arith.addf %174, %177 : vector<1x128xf32>
    %c0_188 = arith.constant 0 : index
    %c14_189 = arith.constant 14 : index
    %c0_190 = arith.constant 0 : index
    %c0_191 = arith.constant 0 : index
    %179 = vector.load %arg2[%c0_188, %c14_189, %c0_190, %c0_191] : memref<1x16x1x32xbf16, #tpu.memory_space<vmem>>, vector<1x1x1x32xbf16>
    %180 = vector.shape_cast %179 : vector<1x1x1x32xbf16> to vector<1x32xbf16>
    %cst_192 = arith.constant dense<0.000000e+00> : vector<1x128xf32>
    %181 = tpu.matmul %180, %13, %cst_192 {dimension_numbers = #tpu.dot_dimension_numbers<[1], [0], [0], [1], [0, 0, 1, 1], [], []>} : vector<1x32xbf16>, vector<32x128xbf16>, vector<1x128xf32> -> vector<1x128xf32>
    %182 = arith.addf %178, %181 : vector<1x128xf32>
    %c0_193 = arith.constant 0 : index
    %c11_194 = arith.constant 11 : index
    %c0_195 = arith.constant 0 : index
    %c0_196 = arith.constant 0 : index
    %183 = vector.load %arg2[%c0_193, %c11_194, %c0_195, %c0_196] : memref<1x16x1x32xbf16, #tpu.memory_space<vmem>>, vector<1x1x1x32xbf16>
    %184 = vector.shape_cast %183 : vector<1x1x1x32xbf16> to vector<1x32xbf16>
    %cst_197 = arith.constant dense<0.000000e+00> : vector<1x128xf32>
    %185 = tpu.matmul %184, %15, %cst_197 {dimension_numbers = #tpu.dot_dimension_numbers<[1], [0], [0], [1], [0, 0, 1, 1], [], []>} : vector<1x32xbf16>, vector<32x128xbf16>, vector<1x128xf32> -> vector<1x128xf32>
    %186 = arith.addf %182, %185 : vector<1x128xf32>
    %c0_198 = arith.constant 0 : index
    %c15 = arith.constant 15 : index
    %c0_199 = arith.constant 0 : index
    %c0_200 = arith.constant 0 : index
    %187 = vector.load %arg2[%c0_198, %c15, %c0_199, %c0_200] : memref<1x16x1x32xbf16, #tpu.memory_space<vmem>>, vector<1x1x1x32xbf16>
    %188 = vector.shape_cast %187 : vector<1x1x1x32xbf16> to vector<1x32xbf16>
    %cst_201 = arith.constant dense<0.000000e+00> : vector<1x128xf32>
    %189 = tpu.matmul %188, %17, %cst_201 {dimension_numbers = #tpu.dot_dimension_numbers<[1], [0], [0], [1], [0, 0, 1, 1], [], []>} : vector<1x32xbf16>, vector<32x128xbf16>, vector<1x128xf32> -> vector<1x128xf32>
    %190 = arith.addf %186, %189 : vector<1x128xf32>
    %cst_202 = arith.constant dense<0.000000e+00> : vector<128xf32>
    %191 = vector.multi_reduction <add>, %190, %cst_202 [0] : vector<1x128xf32> to vector<128xf32>
    %192 = vector.shape_cast %191 : vector<128xf32> to vector<1x128xf32>
    %193 = arith.addf %148, %192 : vector<1x128xf32>
    %194 = arith.mulf %190, %190 : vector<1x128xf32>
    %cst_203 = arith.constant dense<0.000000e+00> : vector<128xf32>
    %195 = vector.multi_reduction <add>, %194, %cst_203 [0] : vector<1x128xf32> to vector<128xf32>
    %196 = vector.shape_cast %195 : vector<128xf32> to vector<1x128xf32>
    %197 = arith.addf %152, %196 : vector<1x128xf32>
    %198 = arith.maximumf %153, %190 : vector<1x128xf32>
    %c0_204 = arith.constant 0 : index
    %c0_205 = arith.constant 0 : index
    %c0_206 = arith.constant 0 : index
    %199 = vector.load %arg4[%c0_204, %c0_205, %c0_206] : memref<1x1x128xf32, #tpu.memory_space<vmem>>, vector<1x1x128xf32>
    %200 = vector.shape_cast %199 : vector<1x1x128xf32> to vector<1x128xf32>
    %201 = vector.shape_cast %198 : vector<1x128xf32> to vector<1x1x128xf32>
    tpu.vector_store %arg4[%c0_204, %c0_205, %c0_206], %201 {strides = array<i32>} : memref<1x1x128xf32, #tpu.memory_space<vmem>>, vector<1x1x128xf32>,
    %c0_i32 = arith.constant 0 : i32
    %202 = arith.cmpi eq, %arg1, %c0_i32 : i32
    %203 = arith.extui %202 : i1 to i32
    %c0_i32_207 = arith.constant 0 : i32
    %204 = arith.cmpi ne, %203, %c0_i32_207 : i32
    scf.if %204 {
      %cst_212 = arith.constant 0.000000e+00 : f32
      %209 = vector.broadcast %cst_212 : f32 to vector<2x128xf32>
      %c0_213 = arith.constant 0 : index
      %c0_214 = arith.constant 0 : index
      %210 = vector.load %arg5[%c0_213, %c0_214] : memref<2x128xf32, #tpu.memory_space<vmem>>, vector<2x128xf32>
      tpu.vector_store %arg5[%c0_213, %c0_214], %209 {strides = array<i32>} : memref<2x128xf32, #tpu.memory_space<vmem>>, vector<2x128xf32>,
    } else {
    }
    %c0_208 = arith.constant 0 : index
    %c0_209 = arith.constant 0 : index
    %205 = vector.load %arg5[%c0_208, %c0_209] : memref<2x128xf32, #tpu.memory_space<vmem>>, vector<2x128xf32>
    %206 = tpu.concatenate %193, %197 in 0 : vector<1x128xf32>, vector<1x128xf32> -> vector<2x128xf32>
    %207 = arith.addf %205, %206 : vector<2x128xf32>
    %c0_210 = arith.constant 0 : index
    %c0_211 = arith.constant 0 : index
    %208 = vector.load %arg5[%c0_210, %c0_211] : memref<2x128xf32, #tpu.memory_space<vmem>>, vector<2x128xf32>
    tpu.vector_store %arg5[%c0_210, %c0_211], %207 {strides = array<i32>} : memref<2x128xf32, #tpu.memory_space<vmem>>, vector<2x128xf32>,
    return
  }
  func.func @transform_0(%arg0: i32, %arg1: i32) -> (i32, i32, i32, i32) {
    %c0_i32 = arith.constant 0 : i32
    %c0_i32_0 = arith.constant 0 : i32
    %c0_i32_1 = arith.constant 0 : i32
    %c0_i32_2 = arith.constant 0 : i32
    return %arg1, %c0_i32, %c0_i32_0, %c0_i32_1 : i32, i32, i32, i32
  }
  func.func @transform_1(%arg0: i32, %arg1: i32) -> (i32, i32, i32) {
    %c0_i32 = arith.constant 0 : i32
    %c0_i32_0 = arith.constant 0 : i32
    %c0_i32_1 = arith.constant 0 : i32
    return %c0_i32, %c0_i32_0, %arg0 : i32, i32, i32
  }
  func.func @transform_2(%arg0: i32, %arg1: i32) -> (i32, i32, i32) {
    %c0_i32 = arith.constant 0 : i32
    %c0_i32_0 = arith.constant 0 : i32
    return %arg1, %c0_i32, %arg0 : i32, i32, i32
  }
  func.func @transform_3(%arg0: i32, %arg1: i32) -> (i32, i32) {
    %c0_i32 = arith.constant 0 : i32
    %c0_i32_0 = arith.constant 0 : i32
    return %c0_i32, %arg0 : i32, i32
  }
}

module attributes {stable_mosaic.version = 11 : i64} {
  func.func @bn_relu_kernel(%arg0: i32, %arg1: memref<1x1x128xf32, #tpu.memory_space<vmem>>, %arg2: memref<2x128xf32, #tpu.memory_space<vmem>>, %arg3: memref<1x128xf32, #tpu.memory_space<vmem>>, %arg4: memref<1x128xf32, #tpu.memory_space<vmem>>, %arg5: memref<1x1x128xf32, #tpu.memory_space<vmem>>) attributes {dimension_semantics = [#tpu.dimension_semantics<parallel>], iteration_bounds = array<i64: 2>, scalar_prefetch = 0 : i64, scratch_operands = 0 : i64, tpu.core_type = #tpu.core_type<tc>, window_params = [{transform_indices = @transform_0, window_bounds = array<i64: 1, 1, 128>}, {pipeline_mode = #tpu.pipeline_mode<synchronous>, transform_indices = @transform_1, window_bounds = array<i64: 2, 128>}, {pipeline_mode = #tpu.pipeline_mode<synchronous>, transform_indices = @transform_2, window_bounds = array<i64: 1, 128>}, {pipeline_mode = #tpu.pipeline_mode<synchronous>, transform_indices = @transform_3, window_bounds = array<i64: 1, 128>}, {transform_indices = @transform_4, window_bounds = array<i64: 1, 1, 128>}]} {
    %c0 = arith.constant 0 : index
    %c0_0 = arith.constant 0 : index
    %0 = vector.load %arg2[%c0, %c0_0] : memref<2x128xf32, #tpu.memory_space<vmem>>, vector<1x128xf32>
    %cst = arith.constant 1.250000e-01 : f32
    %1 = vector.broadcast %cst : f32 to vector<1x128xf32>
    %2 = arith.mulf %0, %1 : vector<1x128xf32>
    %c1 = arith.constant 1 : index
    %c0_1 = arith.constant 0 : index
    %3 = vector.load %arg2[%c1, %c0_1] : memref<2x128xf32, #tpu.memory_space<vmem>>, vector<1x128xf32>
    %cst_2 = arith.constant 1.250000e-01 : f32
    %4 = vector.broadcast %cst_2 : f32 to vector<1x128xf32>
    %5 = arith.mulf %3, %4 : vector<1x128xf32>
    %6 = arith.mulf %2, %2 : vector<1x128xf32>
    %7 = arith.subf %5, %6 : vector<1x128xf32>
    %cst_3 = arith.constant 0.000000e+00 : f32
    %8 = vector.broadcast %cst_3 : f32 to vector<1x128xf32>
    %9 = arith.maximumf %7, %8 : vector<1x128xf32>
    %c0_4 = arith.constant 0 : index
    %c0_5 = arith.constant 0 : index
    %10 = vector.load %arg3[%c0_4, %c0_5] : memref<1x128xf32, #tpu.memory_space<vmem>>, vector<1x128xf32>
    %cst_6 = arith.constant 9.99999974E-6 : f32
    %11 = vector.broadcast %cst_6 : f32 to vector<1x128xf32>
    %12 = arith.addf %9, %11 : vector<1x128xf32>
    %13 = math.rsqrt %12 : vector<1x128xf32>
    %14 = arith.mulf %10, %13 : vector<1x128xf32>
    %c0_7 = arith.constant 0 : index
    %c0_8 = arith.constant 0 : index
    %15 = vector.load %arg4[%c0_7, %c0_8] : memref<1x128xf32, #tpu.memory_space<vmem>>, vector<1x128xf32>
    %16 = arith.mulf %2, %14 : vector<1x128xf32>
    %17 = arith.subf %15, %16 : vector<1x128xf32>
    %c0_9 = arith.constant 0 : index
    %c0_10 = arith.constant 0 : index
    %c0_11 = arith.constant 0 : index
    %18 = vector.load %arg1[%c0_9, %c0_10, %c0_11] : memref<1x1x128xf32, #tpu.memory_space<vmem>>, vector<1x1x128xf32>
    %19 = vector.shape_cast %14 : vector<1x128xf32> to vector<1x1x128xf32>
    %20 = arith.mulf %18, %19 : vector<1x1x128xf32>
    %21 = vector.shape_cast %17 : vector<1x128xf32> to vector<1x1x128xf32>
    %22 = arith.addf %20, %21 : vector<1x1x128xf32>
    %cst_12 = arith.constant 0.000000e+00 : f32
    %23 = vector.broadcast %cst_12 : f32 to vector<1x1x128xf32>
    %24 = arith.maximumf %22, %23 : vector<1x1x128xf32>
    %c0_13 = arith.constant 0 : index
    %c0_14 = arith.constant 0 : index
    %c0_15 = arith.constant 0 : index
    %25 = vector.load %arg5[%c0_13, %c0_14, %c0_15] : memref<1x1x128xf32, #tpu.memory_space<vmem>>, vector<1x1x128xf32>
    tpu.vector_store %arg5[%c0_13, %c0_14, %c0_15], %24 {strides = array<i32>} : memref<1x1x128xf32, #tpu.memory_space<vmem>>, vector<1x1x128xf32>,
    return
  }
  func.func @transform_0(%arg0: i32) -> (i32, i32, i32) {
    %c0_i32 = arith.constant 0 : i32
    %c0_i32_0 = arith.constant 0 : i32
    %c0_i32_1 = arith.constant 0 : i32
    return %arg0, %c0_i32, %c0_i32_0 : i32, i32, i32
  }
  func.func @transform_1(%arg0: i32) -> (i32, i32) {
    %c0_i32 = arith.constant 0 : i32
    %c0_i32_0 = arith.constant 0 : i32
    %c0_i32_1 = arith.constant 0 : i32
    return %c0_i32, %c0_i32_0 : i32, i32
  }
  func.func @transform_2(%arg0: i32) -> (i32, i32) {
    %c0_i32 = arith.constant 0 : i32
    %c0_i32_0 = arith.constant 0 : i32
    %c0_i32_1 = arith.constant 0 : i32
    return %c0_i32, %c0_i32_0 : i32, i32
  }
  func.func @transform_3(%arg0: i32) -> (i32, i32) {
    %c0_i32 = arith.constant 0 : i32
    %c0_i32_0 = arith.constant 0 : i32
    %c0_i32_1 = arith.constant 0 : i32
    return %c0_i32, %c0_i32_0 : i32, i32
  }
  func.func @transform_4(%arg0: i32) -> (i32, i32, i32) {
    %c0_i32 = arith.constant 0 : i32
    %c0_i32_0 = arith.constant 0 : i32
    %c0_i32_1 = arith.constant 0 : i32
    return %arg0, %c0_i32, %c0_i32_0 : i32, i32, i32
  }
}

</mosaic_0001>

<bundles_post_ra>
// kernel: convnet_forward.9
= control target key start
LH: loop header
LB: loop body
LE: loop exit
PB: predicated region body
PF: predicated region fallthrough
CT: control target
= control target key end

     0   :  { %s378_s15 = smov 0   ;;  %s414_s0 = inlined_call_operand.vmem [shape: f32[2,64,128], index: 0, kind: input, shape index: {}]   ;;  %s415_s1 = inlined_call_operand.vmem [shape: f32[2,128], index: 1, kind: input, shape index: {}]   ;;  %s416_s2 = inlined_call_operand.vmem [shape: f32[1,128], index: 2, kind: input, shape index: {}]   ;;  %s417_s3 = inlined_call_operand.vmem [shape: f32[1,128], index: 3, kind: input, shape index: {}]   ;;  %s418_s4 = inlined_call_operand.vmem [shape: f32[2,64,128], index: 4, kind: output, shape index: {}]  }
   0x1 LB: > { %s322_s16 = sadd.s32 4294967295, %s351_s15   ;;  %p326_p0 = scmp.ge.s32.totalorder %s351_s15, 1  ;;  %s351_s15 = sphi %s378_s15, %s14_s15  }
   0x2   : > { %p162_p1 = scmp.lt.s32.totalorder %s351_s15, 3 }
   0x4   : > { %p163_p2 = pnand %p326_p0, %p162_p1 }
   0x5   : > { %p188_p3 = scmp.lt.s32.totalorder (!%p163_p2), %s322_s16, 1 }
   0x6   : > { %166 = sbr.rel (%p163_p2) target bundleno = 60 (0x3c), region = 36 }
   0xb   : > { %v198_v0 = vld [vmem:[%s415_s1] sm:$0x1]  ;;  %v200_v1 = vld [vmem:[%s415_s1 + $0x1] sm:$0x1]  ;;  %s420_s16 = smov (!%p188_p3, %s322_s16), 1 }
   0xc   : > { %v199_v2 = vmul.f32 0.001953125, %v198_v0  ;;  %v201_v3 = vmul.f32 0.001953125, %v200_v1  ;;  %s333_s21 = sshll.u32 %s420_s16, 6  ;;  %v205_v13 = vld [vmem:[%s416_s2] sm:$0x1] }
   0xd   : > { %s192_s26 = scalar_lea.vmem %s414_s0, %s333_s21  ;;  %v218_v17 = vld [vmem:[%s417_s3] sm:$0x1]  ;;  %s197_s5 = scalar_lea.vmem %s418_s4, %s333_s21 }
   0xe   : > { %v202_v4 = vmul.f32 %v199_v2, %v199_v2  ;;  %v221_v18 = vld [vmem:[%s192_s26] sm:$0xff]  ;;  %v222_v19 = vld [vmem:[%s192_s26 + $0x8] sm:$0xff]  ;;  %v223_v20 = vld [vmem:[%s192_s26 + $0x10] sm:$0xff] }
   0xf   : > { %v224_v23 = vld [vmem:[%s192_s26 + $0x18] sm:$0xff]  ;;  %v225_v24 = vld [vmem:[%s192_s26 + $0x20] sm:$0xff]  ;;  %v226_v25 = vld [vmem:[%s192_s26 + $0x28] sm:$0xff] }
  0x10   : > { %v203_v5 = vsub.f32 %v201_v3, %v202_v4  ;;  %v227_v26 = vld [vmem:[%s192_s26 + $0x30] sm:$0xff]  ;;  %v228_v31 = vld [vmem:[%s192_s26 + $0x38] sm:$0xff] }
  0x12   : > { %v204_v6 = vmax.f32 %v203_v5, 0.0 }
  0x14   : > { %v206_v7 = vadd.f32 1e-05, %v204_v6 }
  0x16   : > { %343 = vrsqrt.f32 %v206_v7  ;;  %vm213_vm0 = vweird.f32 %v206_v7 }
  0x1c   : > { %v344_v8 = vpop.eup %343 }
  0x1d   : > { %v208_v9 = vmul.f32 %v344_v8, %v206_v7  ;;  %vm214_vm1 = vweird.f32 %v344_v8 }
  0x1e   : > { %vm215_vm2 = vmor %vm213_vm0, %vm214_vm1 }
  0x1f   : > { %v209_v10 = vmul.f32 %v344_v8, %v208_v9 }
  0x21   : > { %v210_v11 = vmul.f32 0.5, %v209_v10 }
  0x23   : > { %v211_v12 = vsub.f32 1.5, %v210_v11 }
  0x25   : > { %v212_v14 = vmul.f32 %v344_v8, %v211_v12 }
  0x27   : > { %v216_v15 = vsel %vm215_vm2, %v344_v8, %v212_v14 }
  0x28   : > { %v217_v16 = vmul.f32 %v216_v15, %v205_v13 }
  0x2a   : > { %v219_v21 = vmul.f32 %v217_v16, %v199_v2  ;;  %v230_v22 = vperm.slane %v217_v16, 0 }
  0x2c   : > { %v220_v27 = vsub.f32 %v218_v17, %v219_v21  ;;  %v232_v28 = vmul.f32 %v230_v22, %v221_v18  ;;  %v233_v29 = vmul.f32 %v230_v22, %v222_v19  ;;  %v234_v30 = vmul.f32 %v230_v22, %v223_v20 }
  0x2d   : > { %v235_v32 = vmul.f32 %v230_v22, %v224_v23  ;;  %v236_v33 = vmul.f32 %v230_v22, %v225_v24  ;;  %v237_v34 = vmul.f32 %v230_v22, %v226_v25  ;;  %v238_v36 = vmul.f32 %v230_v22, %v227_v26 }
  0x2e   : > { %v241_v35 = vperm.slane %v220_v27, 0  ;;  %v239_v37 = vmul.f32 %v230_v22, %v228_v31 }
  0x30   : > { %v243_v38 = vadd.f32 %v241_v35, %v232_v28  ;;  %v244_v39 = vadd.f32 %v241_v35, %v233_v29  ;;  %v245_v40 = vadd.f32 %v241_v35, %v234_v30  ;;  %v246_v41 = vadd.f32 %v241_v35, %v235_v32 }
  0x31   : > { %v247_v42 = vadd.f32 %v241_v35, %v236_v33  ;;  %v248_v43 = vadd.f32 %v241_v35, %v237_v34  ;;  %v249_v47 = vadd.f32 %v241_v35, %v238_v36  ;;  %v250_v49 = vadd.f32 %v241_v35, %v239_v37 }
  0x32   : > { %v251_v44 = vmax.f32 %v243_v38, 0.0  ;;  %v252_v45 = vmax.f32 %v244_v39, 0.0  ;;  %v253_v46 = vmax.f32 %v245_v40, 0.0  ;;  %v254_v48 = vmax.f32 %v246_v41, 0.0 }
  0x33   : > { %v255_v50 = vmax.f32 %v247_v42, 0.0  ;;  %v256_v51 = vmax.f32 %v248_v43, 0.0  ;;  %v257_v52 = vmax.f32 %v249_v47, 0.0  ;;  %v258_v53 = vmax.f32 %v250_v49, 0.0 }
  0x34   : > { %259 = vst [vmem:[%s197_s5] sm:$0xff] %v251_v44 }
  0x35   : > { %260 = vst [vmem:[%s197_s5 + $0x8] sm:$0xff] %v252_v45 }
  0x36   : > { %261 = vst [vmem:[%s197_s5 + $0x10] sm:$0xff] %v253_v46 }
  0x37   : > { %262 = vst [vmem:[%s197_s5 + $0x18] sm:$0xff] %v254_v48 }
  0x38   : > { %263 = vst [vmem:[%s197_s5 + $0x20] sm:$0xff] %v255_v50 }
  0x39   : > { %264 = vst [vmem:[%s197_s5 + $0x28] sm:$0xff] %v256_v51 }
  0x3a   : > { %265 = vst [vmem:[%s197_s5 + $0x30] sm:$0xff] %v257_v52 }
  0x3b   : > { %266 = vst [vmem:[%s197_s5 + $0x38] sm:$0xff] %v258_v53 }
  0x3c PF: > { %s14_s15 = sadd.s32 1, %s351_s15  }
  0x3d   : > { %p11_p4 = scmp.ge.s32.totalorder %s14_s15, 4  }
  0x3f   :  { %13 = sbr.rel (!%p11_p4) target bundleno = 1 (0x1), region = 66 }

// kernel: convnet_forward.8
= control target key start
LH: loop header
LB: loop body
LE: loop exit
PB: predicated region body
PF: predicated region fallthrough
CT: control target
= control target key end

     0   :  { %s3186_s12 = smov 0   ;;  %s3188_s13 = smov 0   ;;  %s4144_s0 = inlined_call_operand.vmem [shape: bf16[2,16,64,3], index: 0, kind: input, shape index: {}]   ;;  %s4145_s1 = inlined_call_operand.vmem [shape: bf16[9,3,128], index: 1, kind: input, shape index: {}]   ;;  %s4146_s2 = inlined_call_operand.vmem [shape: f32[2,64,128], index: 2, kind: output, shape index: {0}]   ;;  %s4147_s3 = inlined_call_operand.vmem [shape: f32[2,128], index: 3, kind: output, shape index: {1}]  }
   0x1   :  { %s3190_s14 = smov 0  }
   0x2 LB: > { %s23_s15 = sadd.s32 1, %s3158_s13  ;;  %p2503_p0 = scmp.ge.s32.totalorder %s3162_s14, 1  ;;  %s3162_s14 = sphi %s3190_s14, %s14_s14   ;;  %s3158_s13 = sphi %s3188_s13, %s4163_s13   ;;  %s3154_s12 = sphi %s3186_s12, %s4162_s12  }
   0x3   : > { %p24_p1 = scmp.ge.s32.totalorder %s23_s15, 2  ;;  %p163_p2 = scmp.lt.s32.totalorder %s3162_s14, 3 }
   0x5   : > { %s4165_s15 = smov (%p24_p1, %s23_s15), 0  ;;  %p164_p3 = pnand %p2503_p0, %p163_p2 }
   0x7   : > { %167 = sbr.rel (%p164_p3) target bundleno = 754 (0x2f2), region = 28 }
   0xc   : > { %v2508_v0 = vld [vmem:[%s4145_s1 + $0x2] sm:$0x3]  ;;  %vm287_vm0 = vcmask 1040384   ;;  %vm288_vm1 = vcmask 1041408   ;;  %p198_p4 = scmp.lt.s32.totalorder %s3154_s12, 1  ;;  %v3164_v1 = vmov 65535  }
   0xd   : > { %v289_v2 = vsel %vm287_vm0, 4294967295, %v3164_v1  ;;  %v220_v3 = vld [vmem:[%s4145_s1] sm:$0x3]  ;;  %v2509_v4 = vld [vmem:[%s4145_s1 + $0x4] sm:$0x3]  ;;  %vm274_vm2 = vcmask 23552  }
   0xe   : > { %v290_v5 = vsel %vm288_vm1, %v289_v2, 0  ;;  %v2510_v6 = vld [vmem:[%s4145_s1 + $0x6] sm:$0x3]  ;;  %s3221_s24 = scalar_select %p198_p4, %s3154_s12, 1  ;;  %v2513_v7 = vld [vmem:[%s4145_s1 + $0xc] sm:$0x3] }
   0xf   : > { %v3226_v8 = vand.u32 %v2508_v0, %v290_v5  ;;  %v3228_v9 = vand.u32 %v290_v5, %v220_v3  ;;  %v3230_v10 = vand.u32 %v2509_v4, %v290_v5  ;;  %v3232_v11 = vand.u32 %v2510_v6, %v290_v5  ;;  %v2511_v12 = vld [vmem:[%s4145_s1 + $0x8] sm:$0x3]  ;;  %v2514_v13 = vld [vmem:[%s4145_s1 + $0xe] sm:$0x3]  ;;  %v2512_v14 = vld [vmem:[%s4145_s1 + $0xa] sm:$0x3] }
  0x10   : > { %s3040_s6 = sshll.u32 %s3221_s24, 9  ;;  %v3244_v15 = vand.u32 %v2513_v7, %v290_v5  ;;  %v3246_v16 = vand.u32 %v2511_v12, %v290_v5  ;;  %v3264_v20 = vand.u32 %v2514_v13, %v290_v5  ;;  %v3266_v21 = vand.u32 %v2512_v14, %v290_v5  ;;  %v2515_v31 = vld [vmem:[%s4145_s1 + $0x10] sm:$0x3]  ;;  %s3041_s16 = sshll.u32 %s3221_s24, 6 }
  0x11   : > { %301 = vmatpush.bf16.msra.mxu0 %v3226_v8  ;;  %365 = vmatpush.bf16.msra.mxu1 %v3228_v9  ;;  %s3253_s9 = scalar_lea.vmem %s4144_s0, %s3040_s6  ;;  %v3322_v32 = vand.u32 %v2515_v31, %v290_v5  ;;  %s4083_s19 = scalar_lea.vmem %s4146_s2, %s3041_s16 }
  0x12   : > { %438 = vmatpush.bf16.msra.mxu2 %v3230_v10  ;;  %519 = vmatpush.bf16.msra.mxu3 %v3232_v11  ;;  %v3258_v17 = vld [vmem:[%s3253_s9 + $0x80] sm:$0xff]  ;;  %v3286_v23 = vld [vmem:[%s3253_s9 + $0x88] sm:$0xff]  ;;  %v3303_v27 = vld [vmem:[%s3253_s9 + $0x90] sm:$0xff]  ;;  %p3036_p5 = scmp.ne.s32.totalorder %s3154_s12, 0 }
  0x13   : > { %v3042_v18 = vld [vmem:[%s3253_s9] sm:$0xff]  ;;  %v3043_v24 = vld [vmem:[%s3253_s9 + $0x8] sm:$0xff]  ;;  %v3044_v28 = vld [vmem:[%s3253_s9 + $0x10] sm:$0xff] }
  0x14   : > { %v3262_v19 = vld [vmem:[%s3253_s9 + $0x20] sm:$0xff]  ;;  %2540 = vmatmul.msk.bf16.vlgmr.msra.gmra.mxu0 %vm274_vm2, %v3258_v17  ;;  %2560 = vmatmul.msk.bf16.vlgmr.msra.gmra.mxu1 %vm274_vm2, %v3042_v18  ;;  %v3290_v25 = vld [vmem:[%s3253_s9 + $0x28] sm:$0xff]  ;;  %v3307_v29 = vld [vmem:[%s3253_s9 + $0x30] sm:$0xff] }
  0x15   : > { %v3269_v22 = vld [vmem:[%s3253_s9 + $0x100] sm:$0xff]  ;;  %600 = vmatpush.bf16.msrb.mxu0 %v3246_v16  ;;  %2588 = vmatmul.msk.bf16.vlgmr.msra.gmra.mxu2 %vm274_vm2, %v3262_v19  ;;  %v3293_v26 = vld [vmem:[%s3253_s9 + $0x108] sm:$0xff]  ;;  %v3310_v30 = vld [vmem:[%s3253_s9 + $0x110] sm:$0xff] }
  0x16   : > { %762 = vmatpush.bf16.msrb.mxu2 %v3244_v15  ;;  %2616 = vmatmul.msk.bf16.vlgmr.msra.gmra.mxu3 %vm274_vm2, %v3269_v22  ;;  %v3326_v33 = vld [vmem:[%s3253_s9 + $0x98] sm:$0xff]  ;;  %v3343_v37 = vld [vmem:[%s3253_s9 + $0x180] sm:$0xff]  ;;  %v3367_v41 = vld [vmem:[%s3253_s9 + $0x188] sm:$0xff] }
  0x17   : > { %843 = vmatpush.bf16.msrb.mxu3 %v3264_v20  ;;  %681 = vmatpush.bf16.msrb.mxu1 %v3266_v21  ;;  %v3045_v34 = vld [vmem:[%s3253_s9 + $0x18] sm:$0xff]  ;;  %v3346_v38 = vld [vmem:[%s3253_s9 + $0x120] sm:$0xff]  ;;  %v3370_v42 = vld [vmem:[%s3253_s9 + $0x128] sm:$0xff] }
  0x18   : > { %v3330_v35 = vld [vmem:[%s3253_s9 + $0x38] sm:$0xff]  ;;  %v3349_v39 = vld [vmem:[%s3253_s9 + $0x40] sm:$0xff]  ;;  %v3373_v43 = vld [vmem:[%s3253_s9 + $0x48] sm:$0xff] }
  0x19   : > { %924 = vmatpush.bf16.msra.mxu0 %v3322_v32  ;;  %v3333_v36 = vld [vmem:[%s3253_s9 + $0x118] sm:$0xff]  ;;  %v3352_v40 = vld [vmem:[%s3253_s9 + $0xc0] sm:$0xff]  ;;  %v3376_v44 = vld [vmem:[%s3253_s9 + $0xc8] sm:$0xff] }
  0x1a   : > { %1026 = vmatpush.bf16.msra.mxu2 %v3228_v9  ;;  %v3387_v45 = vld [vmem:[%s3253_s9 + $0x190] sm:$0xff]  ;;  %v3407_v49 = vld [vmem:[%s3253_s9 + $0x198] sm:$0xff]  ;;  %v3427_v53 = vld [vmem:[%s3253_s9 + $0x60] sm:$0xff] }
  0x1b   : > { %1096 = vmatpush.bf16.msra.mxu3 %v3230_v10  ;;  %997 = vmatpush.bf16.msra.mxu1 %v3226_v8  ;;  %v3390_v46 = vld [vmem:[%s3253_s9 + $0x130] sm:$0xff]  ;;  %v3410_v50 = vld [vmem:[%s3253_s9 + $0x138] sm:$0xff]  ;;  %v3078_v56 = vld [vmem:[%s3253_s9 + $0xa0] sm:$0xff] }
  0x1c   : > { %v3393_v47 = vld [vmem:[%s3253_s9 + $0x50] sm:$0xff]  ;;  %v3413_v51 = vld [vmem:[%s3253_s9 + $0x58] sm:$0xff]  ;;  %v3444_v3 = vld [vmem:[%s3253_s9 + $0x68] sm:$0xff] }
  0x1d   : > { %v3396_v48 = vld [vmem:[%s3253_s9 + $0xd0] sm:$0xff]  ;;  %v3416_v52 = vld [vmem:[%s3253_s9 + $0xd8] sm:$0xff]  ;;  %v3079_v7 = vld [vmem:[%s3253_s9 + $0xa8] sm:$0xff] }
  0x24   : > { %2541 = vmatmul.msk.bf16.gmra.mxu0 %vm274_vm2, %v3286_v23  ;;  %2561 = vmatmul.msk.bf16.gmra.mxu1 %vm274_vm2, %v3043_v24 }
  0x25   : > { %2589 = vmatmul.msk.bf16.gmra.mxu2 %vm274_vm2, %v3290_v25 }
  0x26   : > { %2617 = vmatmul.msk.bf16.gmra.mxu3 %vm274_vm2, %v3293_v26 }
  0x34   : > { %2542 = vmatmul.msk.bf16.gmra.mxu0 %vm274_vm2, %v3303_v27  ;;  %2562 = vmatmul.msk.bf16.gmra.mxu1 %vm274_vm2, %v3044_v28 }
  0x35   : > { %2590 = vmatmul.msk.bf16.gmra.mxu2 %vm274_vm2, %v3307_v29 }
  0x36   : > { %2618 = vmatmul.msk.bf16.gmra.mxu3 %vm274_vm2, %v3310_v30 }
  0x44   : > { %2543 = vmatmul.msk.bf16.gmra.mxu0 %vm274_vm2, %v3326_v33  ;;  %2563 = vmatmul.msk.bf16.gmra.mxu1 %vm274_vm2, %v3045_v34 }
  0x45   : > { %2591 = vmatmul.msk.bf16.gmra.mxu2 %vm274_vm2, %v3330_v35 }
  0x46   : > { %2619 = vmatmul.msk.bf16.gmra.mxu3 %vm274_vm2, %v3333_v36 }
  0x54   : > { %2644 = vmatmul.msk.bf16.vlgmr.msrb.gmra.mxu0 %vm274_vm2, %v3343_v37  ;;  %2672 = vmatmul.msk.bf16.vlgmr.msrb.gmra.mxu1 %vm274_vm2, %v3346_v38 }
  0x55   : > { %2700 = vmatmul.msk.bf16.vlgmr.msrb.gmra.mxu2 %vm274_vm2, %v3349_v39  ;;  %1133 = vmatpush.bf16.msrb.mxu0 %v3232_v11 }
  0x56   : > { %2728 = vmatmul.msk.bf16.vlgmr.msrb.gmra.mxu3 %vm274_vm2, %v3352_v40  ;;  %1248 = vmatpush.bf16.msrb.mxu2 %v3266_v21 }
  0x57   : > { %1285 = vmatpush.bf16.msrb.mxu3 %v3244_v15  ;;  %1170 = vmatpush.bf16.msrb.mxu1 %v3246_v16 }
  0x64   : > { %2645 = vmatmul.msk.bf16.gmra.mxu0 %vm274_vm2, %v3367_v41  ;;  %2673 = vmatmul.msk.bf16.gmra.mxu1 %vm274_vm2, %v3370_v42 }
  0x65   : > { %2701 = vmatmul.msk.bf16.gmra.mxu2 %vm274_vm2, %v3373_v43 }
  0x66   : > { %2729 = vmatmul.msk.bf16.gmra.mxu3 %vm274_vm2, %v3376_v44 }
  0x74   : > { %2646 = vmatmul.msk.bf16.gmra.mxu0 %vm274_vm2, %v3387_v45  ;;  %2674 = vmatmul.msk.bf16.gmra.mxu1 %vm274_vm2, %v3390_v46 }
  0x75   : > { %2702 = vmatmul.msk.bf16.gmra.mxu2 %vm274_vm2, %v3393_v47 }
  0x76   : > { %2730 = vmatmul.msk.bf16.gmra.mxu3 %vm274_vm2, %v3396_v48 }
  0x84   : > { %2647 = vmatmul.msk.bf16.gmra.mxu0 %vm274_vm2, %v3407_v49  ;;  %2675 = vmatmul.msk.bf16.gmra.mxu1 %vm274_vm2, %v3410_v50 }
  0x85   : > { %2703 = vmatmul.msk.bf16.gmra.mxu2 %vm274_vm2, %v3413_v51 }
  0x86   : > { %2731 = vmatmul.msk.bf16.gmra.mxu3 %vm274_vm2, %v3416_v52 }
  0x91   : > { %v303_v54 = vpop.f32.mrf.mxu0  ;;  %v367_v55 = vpop.f32.mrf.mxu1 }
  0x92   : > { %v368_v57 = vadd.f32 %v367_v55, %v303_v54  ;;  %v3459_v55 = vld [vmem:[%s3253_s9 + $0x70] sm:$0xff] }
  0x94   : > { %2756 = vmatmul.msk.bf16.vlgmr.msra.gmra.mxu0 %vm274_vm2, %v3427_v53  ;;  %2760 = vmatmul.msk.bf16.vlgmr.msra.gmra.mxu1 %vm274_vm2, %v3262_v19 }
  0x95   : > { %2764 = vmatmul.msk.bf16.vlgmr.msra.gmra.mxu2 %vm274_vm2, %v3258_v17  ;;  %1322 = vmatpush.bf16.msra.mxu0 %v3264_v20 }
  0x96   : > { %2792 = vmatmul.msk.bf16.vlgmr.msra.gmra.mxu3 %vm274_vm2, %v3078_v56  ;;  %1481 = vmatpush.bf16.msra.mxu2 %v3226_v8 }
  0x97   : > { %1510 = vmatpush.bf16.msra.mxu3 %v3228_v9  ;;  %1400 = vmatpush.bf16.msra.mxu1 %v3322_v32 }
  0x98   : > { %v440_v58 = vpop.f32.mrf.mxu2 }
  0x99   : > { %v521_v59 = vpop.f32.mrf.mxu3  ;;  %v460_v60 = vadd.f32 %v440_v58, %v368_v57  ;;  %v305_v61 = vpop.f32.mrf.mxu0  ;;  %v3080_v58 = vld [vmem:[%s3253_s9 + $0xb0] sm:$0xff] }
  0x9a   : > { %v369_v62 = vpop.f32.mrf.mxu1 }
  0x9b   : > { %v370_v63 = vadd.f32 %v369_v62, %v305_v61  ;;  %v3441_v0 = vadd.f32 %v521_v59, %v460_v60 }
  0xa0   : > { %v442_v1 = vpop.f32.mrf.mxu2 }
  0xa1   : > { %v523_v2 = vpop.f32.mrf.mxu3  ;;  %v461_v4 = vadd.f32 %v442_v1, %v370_v63  ;;  %v308_v5 = vpop.f32.mrf.mxu0 }
  0xa2   : > { %v372_v6 = vpop.f32.mrf.mxu1 }
  0xa3   : > { %v373_v12 = vadd.f32 %v372_v6, %v308_v5  ;;  %v3447_v13 = vadd.f32 %v523_v2, %v461_v4 }
  0xa4   : > { %2757 = vmatmul.msk.bf16.gmra.mxu0 %vm274_vm2, %v3444_v3  ;;  %2761 = vmatmul.msk.bf16.gmra.mxu1 %vm274_vm2, %v3290_v25 }
  0xa5   : > { %2765 = vmatmul.msk.bf16.gmra.mxu2 %vm274_vm2, %v3286_v23 }
  0xa6   : > { %2793 = vmatmul.msk.bf16.gmra.mxu3 %vm274_vm2, %v3079_v7  ;;  %v3474_v7 = vld [vmem:[%s3253_s9 + $0x78] sm:$0xff] }
  0xa8   : > { %v445_v14 = vpop.f32.mrf.mxu2 }
  0xa9   : > { %v526_v17 = vpop.f32.mrf.mxu3  ;;  %v462_v18 = vadd.f32 %v445_v14, %v373_v12  ;;  %v310_v19 = vpop.f32.mrf.mxu0 }
  0xaa   : > { %v374_v24 = vpop.f32.mrf.mxu1 }
  0xab   : > { %v375_v28 = vadd.f32 %v374_v24, %v310_v19  ;;  %v3456_v31 = vadd.f32 %v526_v17, %v462_v18  ;;  %v3081_v17 = vld [vmem:[%s3253_s9 + $0xb8] sm:$0xff] }
  0xb0   : > { %v447_v34 = vpop.f32.mrf.mxu2 }
  0xb1   : > { %v528_v54 = vpop.f32.mrf.mxu3  ;;  %v463_v56 = vadd.f32 %v447_v34, %v375_v28  ;;  %v313_v25 = vpop.f32.mrf.mxu0 }
  0xb2   : > { %v377_v57 = vpop.f32.mrf.mxu1 }
  0xb3   : > { %v378_v23 = vadd.f32 %v377_v57, %v313_v25  ;;  %v3462_v59 = vadd.f32 %v528_v54, %v463_v56 }
  0xb4   : > { %2758 = vmatmul.msk.bf16.gmra.mxu0 %vm274_vm2, %v3459_v55  ;;  %2762 = vmatmul.msk.bf16.gmra.mxu1 %vm274_vm2, %v3307_v29 }
  0xb5   : > { %2766 = vmatmul.msk.bf16.gmra.mxu2 %vm274_vm2, %v3303_v27 }
  0xb6   : > { %2794 = vmatmul.msk.bf16.gmra.mxu3 %vm274_vm2, %v3080_v58 }
  0xb8   : > { %v450_v60 = vpop.f32.mrf.mxu2 }
  0xb9   : > { %v531_v61 = vpop.f32.mrf.mxu3  ;;  %v464_v62 = vadd.f32 %v450_v60, %v378_v23  ;;  %v315_v63 = vpop.f32.mrf.mxu0 }
  0xba   : > { %v379_v1 = vpop.f32.mrf.mxu1 }
  0xbb   : > { %v380_v2 = vadd.f32 %v379_v1, %v315_v63  ;;  %v3471_v4 = vadd.f32 %v531_v61, %v464_v62  ;;  %v3489_v62 = vld [vmem:[%s3253_s9 + $0x1a0] sm:$0xff] }
  0xc0   : > { %v452_v5 = vpop.f32.mrf.mxu2 }
  0xc1   : > { %v533_v6 = vpop.f32.mrf.mxu3  ;;  %v465_v12 = vadd.f32 %v452_v5, %v380_v2  ;;  %v318_v29 = vpop.f32.mrf.mxu0 }
  0xc2   : > { %v382_v14 = vpop.f32.mrf.mxu1 }
  0xc3   : > { %v383_v18 = vadd.f32 %v382_v14, %v318_v29  ;;  %v3477_v27 = vadd.f32 %v533_v6, %v465_v12 }
  0xc4   : > { %2759 = vmatmul.msk.bf16.gmra.mxu0 %vm274_vm2, %v3474_v7  ;;  %2763 = vmatmul.msk.bf16.gmra.mxu1 %vm274_vm2, %v3330_v35 }
  0xc5   : > { %2767 = vmatmul.msk.bf16.gmra.mxu2 %vm274_vm2, %v3326_v33 }
  0xc6   : > { %2795 = vmatmul.msk.bf16.gmra.mxu3 %vm274_vm2, %v3081_v17 }
  0xc8   : > { %v455_v19 = vpop.f32.mrf.mxu2 }
  0xc9   : > { %v536_v24 = vpop.f32.mrf.mxu3  ;;  %v466_v28 = vadd.f32 %v455_v19, %v383_v18  ;;  %v320_v34 = vpop.f32.mrf.mxu0 }
  0xca   : > { %v384_v54 = vpop.f32.mrf.mxu1 }
  0xcb   : > { %v385_v56 = vadd.f32 %v384_v54, %v320_v34  ;;  %v3486_v25 = vadd.f32 %v536_v24, %v466_v28  ;;  %v3510_v34 = vld [vmem:[%s3253_s9 + $0x1a8] sm:$0xff] }
  0xd0   : > { %v457_v57 = vpop.f32.mrf.mxu2 }
  0xd1   : > { %v538_v58 = vpop.f32.mrf.mxu3  ;;  %v467_v23 = vadd.f32 %v457_v57, %v385_v56  ;;  %v602_v60 = vpop.f32.mrf.mxu0 }
  0xd2   : > { %v683_v61 = vpop.f32.mrf.mxu1  ;;  %v622_v35 = vadd.f32 %v602_v60, %v3441_v0 }
  0xd3   : > { %v3492_v33 = vadd.f32 %v538_v58, %v467_v23 }
  0xd4   : > { %v703_v63 = vadd.f32 %v683_v61, %v622_v35  ;;  %2796 = vmatmul.msk.bf16.vlgmr.msrb.gmra.mxu0 %vm274_vm2, %v3343_v37  ;;  %2800 = vmatmul.msk.bf16.vlgmr.msrb.gmra.mxu1 %vm274_vm2, %v3346_v38 }
  0xd5   : > { %2828 = vmatmul.msk.bf16.vlgmr.msrb.gmra.mxu2 %vm274_vm2, %v3489_v62  ;;  %1539 = vmatpush.bf16.msrb.mxu0 %v3230_v10 }
  0xd6   : > { %2832 = vmatmul.msk.bf16.vlgmr.msrb.gmra.mxu3 %vm274_vm2, %v3352_v40  ;;  %1613 = vmatpush.bf16.msrb.mxu2 %v3246_v16 }
  0xd7   : > { %1650 = vmatpush.bf16.msrb.mxu3 %v3266_v21  ;;  %1576 = vmatpush.bf16.msrb.mxu1 %v3232_v11 }
  0xd8   : > { %v764_v0 = vpop.f32.mrf.mxu2 }
  0xd9   : > { %v845_v1 = vpop.f32.mrf.mxu3  ;;  %v784_v2 = vadd.f32 %v764_v0, %v703_v63  ;;  %v604_v5 = vpop.f32.mrf.mxu0 }
  0xda   : > { %v685_v6 = vpop.f32.mrf.mxu1  ;;  %v623_v12 = vadd.f32 %v604_v5, %v3447_v13 }
  0xdb   : > { %v3507_v29 = vadd.f32 %v845_v1, %v784_v2 }
  0xdc   : > { %v704_v14 = vadd.f32 %v685_v6, %v623_v12  ;;  %v3527_v12 = vld [vmem:[%s3253_s9 + $0x1b0] sm:$0xff] }
  0xe0   : > { %v766_v17 = vpop.f32.mrf.mxu2 }
  0xe1   : > { %v847_v18 = vpop.f32.mrf.mxu3  ;;  %v785_v19 = vadd.f32 %v766_v17, %v704_v14  ;;  %v607_v24 = vpop.f32.mrf.mxu0 }
  0xe2   : > { %v688_v28 = vpop.f32.mrf.mxu1  ;;  %v624_v54 = vadd.f32 %v607_v24, %v3456_v31 }
  0xe3   : > { %v3513_v56 = vadd.f32 %v847_v18, %v785_v19 }
  0xe4   : > { %v705_v57 = vadd.f32 %v688_v28, %v624_v54  ;;  %2797 = vmatmul.msk.bf16.gmra.mxu0 %vm274_vm2, %v3367_v41  ;;  %2801 = vmatmul.msk.bf16.gmra.mxu1 %vm274_vm2, %v3370_v42 }
  0xe5   : > { %2829 = vmatmul.msk.bf16.gmra.mxu2 %vm274_vm2, %v3510_v34 }
  0xe6   : > { %2833 = vmatmul.msk.bf16.gmra.mxu3 %vm274_vm2, %v3376_v44 }
  0xe8   : > { %v769_v13 = vpop.f32.mrf.mxu2 }
  0xe9   : > { %v850_v58 = vpop.f32.mrf.mxu3  ;;  %v786_v23 = vadd.f32 %v769_v13, %v705_v57  ;;  %v609_v31 = vpop.f32.mrf.mxu0 }
  0xea   : > { %v690_v60 = vpop.f32.mrf.mxu1  ;;  %v625_v61 = vadd.f32 %v609_v31, %v3462_v59 }
  0xeb   : > { %v3524_v35 = vadd.f32 %v850_v58, %v786_v23 }
  0xec   : > { %v706_v63 = vadd.f32 %v690_v60, %v625_v61 }
  0xf0   : > { %v771_v0 = vpop.f32.mrf.mxu2 }
  0xf1   : > { %v852_v1 = vpop.f32.mrf.mxu3  ;;  %v787_v2 = vadd.f32 %v771_v0, %v706_v63  ;;  %v612_v5 = vpop.f32.mrf.mxu0  ;;  %v3544_v63 = vld [vmem:[%s3253_s9 + $0x1b8] sm:$0xff] }
  0xf2   : > { %v693_v6 = vpop.f32.mrf.mxu1  ;;  %v626_v14 = vadd.f32 %v612_v5, %v3471_v4 }
  0xf3   : > { %v3530_v17 = vadd.f32 %v852_v1, %v787_v2 }
  0xf4   : > { %v707_v18 = vadd.f32 %v693_v6, %v626_v14  ;;  %2798 = vmatmul.msk.bf16.gmra.mxu0 %vm274_vm2, %v3387_v45  ;;  %2802 = vmatmul.msk.bf16.gmra.mxu1 %vm274_vm2, %v3390_v46 }
  0xf5   : > { %2830 = vmatmul.msk.bf16.gmra.mxu2 %vm274_vm2, %v3527_v12 }
  0xf6   : > { %2834 = vmatmul.msk.bf16.gmra.mxu3 %vm274_vm2, %v3396_v48 }
  0xf8   : > { %v774_v59 = vpop.f32.mrf.mxu2 }
  0xf9   : > { %v855_v19 = vpop.f32.mrf.mxu3  ;;  %v788_v24 = vadd.f32 %v774_v59, %v707_v18  ;;  %v614_v4 = vpop.f32.mrf.mxu0 }
  0xfa   : > { %v695_v28 = vpop.f32.mrf.mxu1  ;;  %v627_v54 = vadd.f32 %v614_v4, %v3477_v27 }
  0xfb   : > { %v3541_v57 = vadd.f32 %v855_v19, %v788_v24 }
  0xfc   : > { %v708_v13 = vadd.f32 %v695_v28, %v627_v54  ;;  %v3561_v28 = vld [vmem:[%s3253_s9 + $0xe0] sm:$0xff] }
 0x100   : > { %v776_v58 = vpop.f32.mrf.mxu2 }
 0x101   : > { %v857_v23 = vpop.f32.mrf.mxu3  ;;  %v789_v31 = vadd.f32 %v776_v58, %v708_v13  ;;  %v617_v60 = vpop.f32.mrf.mxu0 }
 0x102   : > { %v698_v61 = vpop.f32.mrf.mxu1  ;;  %v628_v0 = vadd.f32 %v617_v60, %v3486_v25 }
 0x103   : > { %v3547_v1 = vadd.f32 %v857_v23, %v789_v31 }
 0x104   : > { %v709_v2 = vadd.f32 %v698_v61, %v628_v0  ;;  %2799 = vmatmul.msk.bf16.gmra.mxu0 %vm274_vm2, %v3407_v49  ;;  %2803 = vmatmul.msk.bf16.gmra.mxu1 %vm274_vm2, %v3410_v50 }
 0x105   : > { %2831 = vmatmul.msk.bf16.gmra.mxu2 %vm274_vm2, %v3544_v63 }
 0x106   : > { %2835 = vmatmul.msk.bf16.gmra.mxu3 %vm274_vm2, %v3416_v52 }
 0x108   : > { %v779_v27 = vpop.f32.mrf.mxu2 }
 0x109   : > { %v860_v5 = vpop.f32.mrf.mxu3  ;;  %v790_v6 = vadd.f32 %v779_v27, %v709_v2  ;;  %v619_v25 = vpop.f32.mrf.mxu0 }
 0x10a   : > { %v700_v14 = vpop.f32.mrf.mxu1  ;;  %v629_v18 = vadd.f32 %v619_v25, %v3492_v33 }
 0x10b   : > { %v3558_v59 = vadd.f32 %v860_v5, %v790_v6 }
 0x10c   : > { %v710_v19 = vadd.f32 %v700_v14, %v629_v18  ;;  %v3592_v14 = vld [vmem:[%s3253_s9 + $0xe8] sm:$0xff] }
 0x110   : > { %v781_v24 = vpop.f32.mrf.mxu2 }
 0x111   : > { %v862_v4 = vpop.f32.mrf.mxu3  ;;  %v791_v54 = vadd.f32 %v781_v24, %v710_v19  ;;  %v926_v13 = vpop.f32.mrf.mxu0 }
 0x112   : > { %v999_v58 = vpop.f32.mrf.mxu1  ;;  %v3564_v23 = vadd.f32 %v926_v13, %v3507_v29 }
 0x113   : > { %v3566_v31 = vadd.f32 %v862_v4, %v791_v54 }
 0x114   : > { %2836 = vmatmul.msk.bf16.vlgmr.msra.gmra.mxu0 %vm274_vm2, %v3427_v53  ;;  %2864 = vmatmul.msk.bf16.vlgmr.msra.gmra.mxu1 %vm274_vm2, %v3561_v28 }
 0x115   : > { %2868 = vmatmul.msk.bf16.vlgmr.msra.gmra.mxu2 %vm274_vm2, %v3343_v37  ;;  %1728 = vmatpush.bf16.msra.mxu0 %v3244_v15 }
 0x116   : > { %2872 = vmatmul.msk.bf16.vlgmr.msra.gmra.mxu3 %vm274_vm2, %v3269_v22  ;;  %1884 = vmatpush.bf16.msra.mxu2 %v3322_v32  ;;  %v968_v22 = vmul.f32 %v3564_v23, %v3564_v23 }
 0x117   : > { %1965 = vmatpush.bf16.msra.mxu3 %v3226_v8  ;;  %1806 = vmatpush.bf16.msra.mxu1 %v3264_v20 }
 0x118   : > { %v1028_v33 = vpop.f32.mrf.mxu2 }
 0x119   : > { %v1098_v29 = vpop.f32.mrf.mxu3  ;;  %v1029_v60 = vadd.f32 %v1028_v33, %v999_v58  ;;  %v928_v61 = vpop.f32.mrf.mxu0 }
 0x11a   : > { %v1001_v0 = vpop.f32.mrf.mxu1  ;;  %v3581_v2 = vadd.f32 %v928_v61, %v3513_v56 }
 0x11b   : > { %v3583_v37 = vadd.f32 %v1098_v29, %v1029_v60 }
 0x11c   : > { %v954_v27 = vadd.f32 %v3581_v2, %v3564_v23  ;;  %v969_v8 = vmul.f32 %v3581_v2, %v3581_v2 }
 0x11e   : > { %v976_v5 = vadd.f32 %v969_v8, %v968_v22 }
 0x120   : > { %v1030_v6 = vpop.f32.mrf.mxu2 }
 0x121   : > { %v1100_v25 = vpop.f32.mrf.mxu3  ;;  %v1031_v18 = vadd.f32 %v1030_v6, %v1001_v0  ;;  %v931_v19 = vpop.f32.mrf.mxu0 }
 0x122   : > { %v1004_v56 = vpop.f32.mrf.mxu1  ;;  %v3595_v24 = vadd.f32 %v931_v19, %v3524_v35 }
 0x123   : > { %v3597_v4 = vadd.f32 %v1100_v25, %v1031_v18 }
 0x124   : > { %v955_v54 = vadd.f32 %v954_v27, %v3595_v24  ;;  %v970_v13 = vmul.f32 %v3595_v24, %v3595_v24  ;;  %2837 = vmatmul.msk.bf16.gmra.mxu0 %vm274_vm2, %v3444_v3  ;;  %2865 = vmatmul.msk.bf16.gmra.mxu1 %vm274_vm2, %v3592_v14 }
 0x125   : > { %2869 = vmatmul.msk.bf16.gmra.mxu2 %vm274_vm2, %v3367_v41 }
 0x126   : > { %2873 = vmatmul.msk.bf16.gmra.mxu3 %vm274_vm2, %v3293_v26  ;;  %v977_v35 = vadd.f32 %v976_v5, %v970_v13  ;;  %v3619_v26 = vld [vmem:[%s3253_s9 + $0xf0] sm:$0xff] }
 0x128   : > { %v1033_v58 = vpop.f32.mrf.mxu2 }
 0x129   : > { %v1103_v33 = vpop.f32.mrf.mxu3  ;;  %v1034_v29 = vadd.f32 %v1033_v58, %v1004_v56  ;;  %v933_v60 = vpop.f32.mrf.mxu0 }
 0x12a   : > { %v1006_v61 = vpop.f32.mrf.mxu1  ;;  %v3611_v0 = vadd.f32 %v933_v60, %v3530_v17 }
 0x12b   : > { %v3613_v22 = vadd.f32 %v1103_v33, %v1034_v29 }
 0x12c   : > { %v956_v27 = vadd.f32 %v955_v54, %v3611_v0  ;;  %v971_v8 = vmul.f32 %v3611_v0, %v3611_v0 }
 0x12e   : > { %v978_v41 = vadd.f32 %v977_v35, %v971_v8 }
 0x130   : > { %v1035_v6 = vpop.f32.mrf.mxu2 }
 0x131   : > { %v1105_v25 = vpop.f32.mrf.mxu3  ;;  %v1036_v5 = vadd.f32 %v1035_v6, %v1006_v61  ;;  %v936_v18 = vpop.f32.mrf.mxu0 }
 0x132   : > { %v1009_v19 = vpop.f32.mrf.mxu1  ;;  %v3622_v56 = vadd.f32 %v936_v18, %v3541_v57 }
 0x133   : > { %v3624_v17 = vadd.f32 %v1105_v25, %v1036_v5 }
 0x134   : > { %v957_v13 = vadd.f32 %v956_v27, %v3622_v56  ;;  %v972_v54 = vmul.f32 %v3622_v56, %v3622_v56  ;;  %2838 = vmatmul.msk.bf16.gmra.mxu0 %vm274_vm2, %v3459_v55  ;;  %2866 = vmatmul.msk.bf16.gmra.mxu1 %vm274_vm2, %v3619_v26 }
 0x135   : > { %2870 = vmatmul.msk.bf16.gmra.mxu2 %vm274_vm2, %v3387_v45 }
 0x136   : > { %2874 = vmatmul.msk.bf16.gmra.mxu3 %vm274_vm2, %v3310_v30  ;;  %v979_v57 = vadd.f32 %v978_v41, %v972_v54  ;;  %v3646_v30 = vld [vmem:[%s3253_s9 + $0xf8] sm:$0xff] }
 0x138   : > { %v1038_v35 = vpop.f32.mrf.mxu2 }
 0x139   : > { %v1108_v58 = vpop.f32.mrf.mxu3  ;;  %v1039_v33 = vadd.f32 %v1038_v35, %v1009_v19  ;;  %v938_v29 = vpop.f32.mrf.mxu0 }
 0x13a   : > { %v1011_v60 = vpop.f32.mrf.mxu1  ;;  %v3638_v61 = vadd.f32 %v938_v29, %v3547_v1 }
 0x13b   : > { %v3640_v27 = vadd.f32 %v1108_v58, %v1039_v33 }
 0x13c   : > { %v958_v8 = vadd.f32 %v957_v13, %v3638_v61  ;;  %v973_v6 = vmul.f32 %v3638_v61, %v3638_v61 }
 0x13e   : > { %v980_v45 = vadd.f32 %v979_v57, %v973_v6 }
 0x140   : > { %v1040_v25 = vpop.f32.mrf.mxu2 }
 0x141   : > { %v1110_v5 = vpop.f32.mrf.mxu3  ;;  %v1041_v41 = vadd.f32 %v1040_v25, %v1011_v60  ;;  %v941_v18 = vpop.f32.mrf.mxu0 }
 0x142   : > { %v1014_v19 = vpop.f32.mrf.mxu1  ;;  %v3649_v54 = vadd.f32 %v941_v18, %v3558_v59 }
 0x143   : > { %v3651_v1 = vadd.f32 %v1110_v5, %v1041_v41 }
 0x144   : > { %v959_v35 = vadd.f32 %v958_v8, %v3649_v54  ;;  %v974_v13 = vmul.f32 %v3649_v54, %v3649_v54  ;;  %2839 = vmatmul.msk.bf16.gmra.mxu0 %vm274_vm2, %v3474_v7  ;;  %2867 = vmatmul.msk.bf16.gmra.mxu1 %vm274_vm2, %v3646_v30 }
 0x145   : > { %2871 = vmatmul.msk.bf16.gmra.mxu2 %vm274_vm2, %v3407_v49 }
 0x146   : > { %2875 = vmatmul.msk.bf16.gmra.mxu3 %vm274_vm2, %v3333_v36  ;;  %v981_v59 = vadd.f32 %v980_v45, %v974_v13 }
 0x148   : > { %v1043_v57 = vpop.f32.mrf.mxu2 }
 0x149   : > { %v1113_v58 = vpop.f32.mrf.mxu3  ;;  %v1044_v33 = vadd.f32 %v1043_v57, %v1014_v19  ;;  %v943_v29 = vpop.f32.mrf.mxu0 }
 0x14a   : > { %v1016_v60 = vpop.f32.mrf.mxu1  ;;  %v3665_v8 = vadd.f32 %v943_v29, %v3566_v31 }
 0x14b   : > { %v3667_v6 = vadd.f32 %v1113_v58, %v1044_v33 }
 0x14c   : > { %v3670_v25 = vadd.f32 %v959_v35, %v3665_v8  ;;  %v975_v49 = vmul.f32 %v3665_v8, %v3665_v8 }
 0x14e   : > { %v3674_v5 = vadd.f32 %v981_v59, %v975_v49 }
 0x150   : > { %v1045_v36 = vpop.f32.mrf.mxu2 }
 0x151   : > { %v1115_v45 = vpop.f32.mrf.mxu3  ;;  %v1046_v41 = vadd.f32 %v1045_v36, %v1016_v60  ;;  %v1135_v18 = vpop.f32.mrf.mxu0 }
 0x152   : > { %v1172_v19 = vpop.f32.mrf.mxu1  ;;  %v1155_v13 = vadd.f32 %v1135_v18, %v3583_v37 }
 0x153   : > { %v3677_v57 = vadd.f32 %v1115_v45, %v1046_v41 }
 0x154   : > { %v1192_v31 = vadd.f32 %v1172_v19, %v1155_v13  ;;  %2876 = vmatmul.msk.bf16.vlgmr.msrb.gmra.mxu0 %vm274_vm2, %v3346_v38  ;;  %2880 = vmatmul.msk.bf16.vlgmr.msrb.gmra.mxu1 %vm274_vm2, %v3349_v39 }
 0x155   : > { %2884 = vmatmul.msk.bf16.vlgmr.msrb.gmra.mxu2 %vm274_vm2, %v3352_v40  ;;  %1994 = vmatpush.bf16.msrb.mxu0 %v3228_v9 }
 0x156   : > { %2888 = vmatmul.msk.bf16.vlgmr.msrb.gmra.mxu3 %vm274_vm2, %v3427_v53  ;;  %2060 = vmatpush.bf16.msrb.mxu2 %v3232_v11 }
 0x157   : > { %2097 = vmatpush.bf16.msrb.mxu3 %v3246_v16  ;;  %2023 = vmatpush.bf16.msrb.mxu1 %v3230_v10 }
 0x158   : > { %v1250_v37 = vpop.f32.mrf.mxu2 }
 0x159   : > { %v1287_v35 = vpop.f32.mrf.mxu3  ;;  %v1270_v59 = vadd.f32 %v1250_v37, %v1192_v31  ;;  %v1137_v58 = vpop.f32.mrf.mxu0 }
 0x15a   : > { %v1174_v33 = vpop.f32.mrf.mxu1  ;;  %v1156_v39 = vadd.f32 %v1137_v58, %v3597_v4 }
 0x15b   : > { %v3692_v29 = vadd.f32 %v1287_v35, %v1270_v59 }
 0x15c   : > { %v1193_v40 = vadd.f32 %v1174_v33, %v1156_v39 }
 0x160   : > { %v1252_v60 = vpop.f32.mrf.mxu2 }
 0x161   : > { %v1289_v49 = vpop.f32.mrf.mxu3  ;;  %v1271_v36 = vadd.f32 %v1252_v60, %v1193_v40  ;;  %v1140_v11 = vpop.f32.mrf.mxu0 }
 0x162   : > { %v1177_v45 = vpop.f32.mrf.mxu1  ;;  %v1157_v9 = vadd.f32 %v1140_v11, %v3613_v22 }
 0x163   : > { %v3695_v16 = vadd.f32 %v1289_v49, %v1271_v36 }
 0x164   : > { %v1194_v10 = vadd.f32 %v1177_v45, %v1157_v9  ;;  %2877 = vmatmul.msk.bf16.gmra.mxu0 %vm274_vm2, %v3370_v42  ;;  %2881 = vmatmul.msk.bf16.gmra.mxu1 %vm274_vm2, %v3373_v43 }
 0x165   : > { %2885 = vmatmul.msk.bf16.gmra.mxu2 %vm274_vm2, %v3376_v44 }
 0x166   : > { %2889 = vmatmul.msk.bf16.gmra.mxu3 %vm274_vm2, %v3444_v3 }
 0x168   : > { %v1255_v4 = vpop.f32.mrf.mxu2 }
 0x169   : > { %v1292_v41 = vpop.f32.mrf.mxu3  ;;  %v1272_v18 = vadd.f32 %v1255_v4, %v1194_v10  ;;  %v1142_v19 = vpop.f32.mrf.mxu0 }
 0x16a   : > { %v1179_v22 = vpop.f32.mrf.mxu1  ;;  %v1158_v13 = vadd.f32 %v1142_v19, %v3624_v17 }
 0x16b   : > { %v3706_v31 = vadd.f32 %v1292_v41, %v1272_v18 }
 0x16c   : > { %v1195_v37 = vadd.f32 %v1179_v22, %v1158_v13 }
 0x170   : > { %v1257_v35 = vpop.f32.mrf.mxu2 }
 0x171   : > { %v1294_v59 = vpop.f32.mrf.mxu3  ;;  %v1273_v58 = vadd.f32 %v1257_v35, %v1195_v37  ;;  %v1145_v43 = vpop.f32.mrf.mxu0 }
 0x172   : > { %v1182_v33 = vpop.f32.mrf.mxu1  ;;  %v1159_v44 = vadd.f32 %v1145_v43, %v3640_v27 }
 0x173   : > { %v3709_v39 = vadd.f32 %v1294_v59, %v1273_v58 }
 0x174   : > { %v1196_v40 = vadd.f32 %v1182_v33, %v1159_v44  ;;  %2878 = vmatmul.msk.bf16.gmra.mxu0 %vm274_vm2, %v3390_v46  ;;  %2882 = vmatmul.msk.bf16.gmra.mxu1 %vm274_vm2, %v3393_v47 }
 0x175   : > { %2886 = vmatmul.msk.bf16.gmra.mxu2 %vm274_vm2, %v3396_v48 }
 0x176   : > { %2890 = vmatmul.msk.bf16.gmra.mxu3 %vm274_vm2, %v3459_v55 }
 0x178   : > { %v1260_v17 = vpop.f32.mrf.mxu2 }
 0x179   : > { %v1297_v60 = vpop.f32.mrf.mxu3  ;;  %v1274_v49 = vadd.f32 %v1260_v17, %v1196_v40  ;;  %v1147_v36 = vpop.f32.mrf.mxu0  ;;  %v3738_v40 = vld [vmem:[%s3253_s9 + $0x1c0] sm:$0xff] }
 0x17a   : > { %v1184_v27 = vpop.f32.mrf.mxu1  ;;  %v1160_v11 = vadd.f32 %v1147_v36, %v3651_v1 }
 0x17b   : > { %v3720_v45 = vadd.f32 %v1297_v60, %v1274_v49  ;;  %v3741_v49 = vld [vmem:[%s3253_s9 + $0x160] sm:$0xff] }
 0x17c   : > { %v1197_v9 = vadd.f32 %v1184_v27, %v1160_v11 }
 0x180   : > { %v1262_v10 = vpop.f32.mrf.mxu2 }
 0x181   : > { %v1299_v4 = vpop.f32.mrf.mxu3  ;;  %v1275_v41 = vadd.f32 %v1262_v10, %v1197_v9  ;;  %v1150_v47 = vpop.f32.mrf.mxu0 }
 0x182   : > { %v1187_v18 = vpop.f32.mrf.mxu1  ;;  %v1161_v48 = vadd.f32 %v1150_v47, %v3667_v6 }
 0x183   : > { %v3723_v19 = vadd.f32 %v1299_v4, %v1275_v41 }
 0x184   : > { %v1198_v22 = vadd.f32 %v1187_v18, %v1161_v48  ;;  %2879 = vmatmul.msk.bf16.gmra.mxu0 %vm274_vm2, %v3410_v50  ;;  %2883 = vmatmul.msk.bf16.gmra.mxu1 %vm274_vm2, %v3413_v51  ;;  %v3090_v51 = vld [vmem:[%s3253_s9 + $0x140] sm:$0xff] }
 0x185   : > { %2887 = vmatmul.msk.bf16.gmra.mxu2 %vm274_vm2, %v3416_v52 }
 0x186   : > { %2891 = vmatmul.msk.bf16.gmra.mxu3 %vm274_vm2, %v3474_v7 }
 0x188   : > { %v1265_v1 = vpop.f32.mrf.mxu2 }
 0x189   : > { %v1302_v6 = vpop.f32.mrf.mxu3  ;;  %v1276_v13 = vadd.f32 %v1265_v1, %v1198_v22  ;;  %v1152_v37 = vpop.f32.mrf.mxu0  ;;  %v3091_v1 = vld [vmem:[%s3253_s9 + $0x148] sm:$0xff] }
 0x18a   : > { %v1189_v35 = vpop.f32.mrf.mxu1  ;;  %v1162_v59 = vadd.f32 %v1152_v37, %v3677_v57 }
 0x18b   : > { %v3734_v58 = vadd.f32 %v1302_v6, %v1276_v13  ;;  %v3776_v6 = vld [vmem:[%s3253_s9 + $0x1c8] sm:$0xff] }
 0x18c   : > { %v1199_v43 = vadd.f32 %v1189_v35, %v1162_v59  ;;  %v3781_v35 = vld [vmem:[%s3253_s9 + $0x168] sm:$0xff] }
 0x190   : > { %v1267_v33 = vpop.f32.mrf.mxu2 }
 0x191   : > { %v1304_v44 = vpop.f32.mrf.mxu3  ;;  %v1277_v52 = vadd.f32 %v1267_v33, %v1199_v43  ;;  %v1324_v17 = vpop.f32.mrf.mxu0 }
 0x192   : > { %v1402_v60 = vpop.f32.mrf.mxu1  ;;  %v1344_v36 = vadd.f32 %v1324_v17, %v3692_v29 }
 0x193   : > { %v3744_v27 = vadd.f32 %v1304_v44, %v1277_v52 }
 0x194   : > { %v3746_v11 = vadd.f32 %v1402_v60, %v1344_v36  ;;  %2916 = vmatmul.msk.bf16.vlgmr.msra.gmra.mxu0 %vm274_vm2, %v3090_v51  ;;  %2944 = vmatmul.msk.bf16.vlgmr.msra.gmra.mxu1 %vm274_vm2, %v3738_v40 }
 0x195   : > { %2972 = vmatmul.msk.bf16.vlgmr.msra.gmra.mxu2 %vm274_vm2, %v3741_v49  ;;  %2134 = vmatpush.bf16.msra.mxu0 %v3266_v21 }
 0x196   : > { %2976 = vmatmul.msk.bf16.vlgmr.msra.gmra.mxu3 %vm274_vm2, %v3346_v38  ;;  %2208 = vmatpush.bf16.msra.mxu2 %v3264_v20  ;;  %v1444_v20 = vmul.f32 %v3746_v11, %v3746_v11 }
 0x197   : > { %2286 = vmatpush.bf16.msra.mxu3 %v3322_v32  ;;  %2171 = vmatpush.bf16.msra.mxu1 %v3244_v15 }
 0x198   : > { %v1483_v29 = vpop.f32.mrf.mxu2 }
 0x199   : > { %v1512_v9 = vpop.f32.mrf.mxu3  ;;  %v1326_v4 = vpop.f32.mrf.mxu0 }
 0x19a   : > { %v3761_v10 = vadd.f32 %v1512_v9, %v1483_v29  ;;  %v1404_v38 = vpop.f32.mrf.mxu1  ;;  %v1345_v41 = vadd.f32 %v1326_v4, %v3695_v16 }
 0x19c   : > { %v3764_v47 = vadd.f32 %v1404_v38, %v1345_v41 }
 0x19e   : > { %v1430_v21 = vadd.f32 %v3764_v47, %v3746_v11  ;;  %v1445_v15 = vmul.f32 %v3764_v47, %v3764_v47 }
 0x1a0   : > { %v1452_v18 = vadd.f32 %v1445_v15, %v1444_v20  ;;  %v1485_v48 = vpop.f32.mrf.mxu2 }
 0x1a1   : > { %v1514_v22 = vpop.f32.mrf.mxu3  ;;  %v1329_v13 = vpop.f32.mrf.mxu0 }
 0x1a2   : > { %v3778_v16 = vadd.f32 %v1514_v22, %v1485_v48  ;;  %v1407_v37 = vpop.f32.mrf.mxu1  ;;  %v1346_v59 = vadd.f32 %v1329_v13, %v3706_v31  ;;  %v3810_v48 = vld [vmem:[%s3253_s9 + $0x1d0] sm:$0xff] }
 0x1a3   : > { %v3815_v13 = vld [vmem:[%s3253_s9 + $0x170] sm:$0xff] }
 0x1a4   : > { %v3784_v43 = vadd.f32 %v1407_v37, %v1346_v59  ;;  %2917 = vmatmul.msk.bf16.gmra.mxu0 %vm274_vm2, %v3091_v1  ;;  %2945 = vmatmul.msk.bf16.gmra.mxu1 %vm274_vm2, %v3776_v6 }
 0x1a5   : > { %2973 = vmatmul.msk.bf16.gmra.mxu2 %vm274_vm2, %v3781_v35 }
 0x1a6   : > { %2977 = vmatmul.msk.bf16.gmra.mxu3 %vm274_vm2, %v3370_v42  ;;  %v1431_v33 = vadd.f32 %v1430_v21, %v3784_v43  ;;  %v1446_v44 = vmul.f32 %v3784_v43, %v3784_v43 }
 0x1a8   : > { %v1453_v51 = vadd.f32 %v1452_v18, %v1446_v44  ;;  %v1488_v52 = vpop.f32.mrf.mxu2  ;;  %v3092_v18 = vld [vmem:[%s3253_s9 + $0x150] sm:$0xff] }
 0x1a9   : > { %v1517_v17 = vpop.f32.mrf.mxu3  ;;  %v1331_v36 = vpop.f32.mrf.mxu0 }
 0x1aa   : > { %v3798_v60 = vadd.f32 %v1517_v17, %v1488_v52  ;;  %v1409_v29 = vpop.f32.mrf.mxu1  ;;  %v1347_v42 = vadd.f32 %v1331_v36, %v3709_v39 }
 0x1ac   : > { %v3801_v9 = vadd.f32 %v1409_v29, %v1347_v42 }
 0x1ae   : > { %v1432_v4 = vadd.f32 %v1431_v33, %v3801_v9  ;;  %v1447_v38 = vmul.f32 %v3801_v9, %v3801_v9 }
 0x1b0   : > { %v1454_v20 = vadd.f32 %v1453_v51, %v1447_v38  ;;  %v1490_v21 = vpop.f32.mrf.mxu2 }
 0x1b1   : > { %v1519_v15 = vpop.f32.mrf.mxu3  ;;  %v1334_v1 = vpop.f32.mrf.mxu0 }
 0x1b2   : > { %v3812_v22 = vadd.f32 %v1519_v15, %v1490_v21  ;;  %v1412_v39 = vpop.f32.mrf.mxu1  ;;  %v1348_v37 = vadd.f32 %v1334_v1, %v3720_v45 }
 0x1b4   : > { %v3818_v59 = vadd.f32 %v1412_v39, %v1348_v37  ;;  %2918 = vmatmul.msk.bf16.gmra.mxu0 %vm274_vm2, %v3092_v18  ;;  %2946 = vmatmul.msk.bf16.gmra.mxu1 %vm274_vm2, %v3810_v48  ;;  %v3093_v39 = vld [vmem:[%s3253_s9 + $0x158] sm:$0xff] }
 0x1b5   : > { %2974 = vmatmul.msk.bf16.gmra.mxu2 %vm274_vm2, %v3815_v13  ;;  %v3844_v37 = vld [vmem:[%s3253_s9 + $0x1d8] sm:$0xff] }
 0x1b6   : > { %2978 = vmatmul.msk.bf16.gmra.mxu3 %vm274_vm2, %v3390_v46  ;;  %v1433_v33 = vadd.f32 %v1432_v4, %v3818_v59  ;;  %v1448_v44 = vmul.f32 %v3818_v59, %v3818_v59 }
 0x1b8   : > { %v1455_v51 = vadd.f32 %v1454_v20, %v1448_v44  ;;  %v1493_v52 = vpop.f32.mrf.mxu2 }
 0x1b9   : > { %v1522_v17 = vpop.f32.mrf.mxu3  ;;  %v1336_v29 = vpop.f32.mrf.mxu0 }
 0x1ba   : > { %v3832_v36 = vadd.f32 %v1522_v17, %v1493_v52  ;;  %v1414_v42 = vpop.f32.mrf.mxu1  ;;  %v1349_v46 = vadd.f32 %v1336_v29, %v3723_v19  ;;  %v3849_v17 = vld [vmem:[%s3253_s9 + $0x178] sm:$0xff] }
 0x1bc   : > { %v3835_v38 = vadd.f32 %v1414_v42, %v1349_v46 }
 0x1be   : > { %v1434_v4 = vadd.f32 %v1433_v33, %v3835_v38  ;;  %v1449_v21 = vmul.f32 %v3835_v38, %v3835_v38 }
 0x1c0   : > { %v1456_v20 = vadd.f32 %v1455_v51, %v1449_v21  ;;  %v1495_v18 = vpop.f32.mrf.mxu2  ;;  %v961_v51 = vrot.slane %v3670_v25, 4  ;;  %v983_v21 = vrot.slane %v3674_v5, 4 }
 0x1c1   : > { %v1524_v1 = vpop.f32.mrf.mxu3  ;;  %v1339_v52 = vpop.f32.mrf.mxu0 }
 0x1c2   : > { %v3846_v44 = vadd.f32 %v1524_v1, %v1495_v18  ;;  %v1417_v19 = vpop.f32.mrf.mxu1  ;;  %v1350_v33 = vadd.f32 %v1339_v52, %v3734_v58 }
 0x1c4   : > { %v3852_v29 = vadd.f32 %v1417_v19, %v1350_v33  ;;  %2919 = vmatmul.msk.bf16.gmra.mxu0 %vm274_vm2, %v3093_v39  ;;  %2947 = vmatmul.msk.bf16.gmra.mxu1 %vm274_vm2, %v3844_v37 }
 0x1c5   : > { %2975 = vmatmul.msk.bf16.gmra.mxu2 %vm274_vm2, %v3849_v17 }
 0x1c6   : > { %4150 = vst [vmem:[#allocation2_spill] sm:$0xff] %v3852_v29  ;;  %2979 = vmatmul.msk.bf16.gmra.mxu3 %vm274_vm2, %v3410_v50  ;;  %v1435_v42 = vadd.f32 %v1434_v4, %v3852_v29  ;;  %v1450_v58 = vmul.f32 %v3852_v29, %v3852_v29  ;;  %v962_v50 = vadd.f32 %v961_v51, %v3670_v25 }
 0x1c7   : > { %v984_v4 = vadd.f32 %v983_v21, %v3674_v5 }
 0x1c8   : > { %v1457_v18 = vadd.f32 %v1456_v20, %v1450_v58  ;;  %v1498_v1 = vpop.f32.mrf.mxu2  ;;  %v963_v41 = vrot.slane %v962_v50, 2 }
 0x1c9   : > { %v1527_v39 = vpop.f32.mrf.mxu3  ;;  %v1341_v19 = vpop.f32.mrf.mxu0 }
 0x1ca   : > { %v3868_v52 = vadd.f32 %v1527_v39, %v1498_v1  ;;  %v1419_v33 = vpop.f32.mrf.mxu1  ;;  %v1351_v15 = vadd.f32 %v1341_v19, %v3744_v27  ;;  %v985_v1 = vrot.slane %v984_v4, 2  ;;  %v964_v21 = vadd.f32 %v963_v41, %v962_v50 }
 0x1cc   : > { %v3873_v45 = vadd.f32 %v1419_v33, %v1351_v15  ;;  %v986_v32 = vadd.f32 %v985_v1, %v984_v4  ;;  %v965_v41 = vrot.slane %v964_v21, 1 }
 0x1ce   : > { %4151 = vst [vmem:[#allocation3_spill] sm:$0xff] %v3873_v45  ;;  %v1436_v46 = vadd.f32 %v1435_v42, %v3873_v45  ;;  %v1451_v20 = vmul.f32 %v3873_v45, %v3873_v45  ;;  %v3132_v45 = vld [vmem:[%s3253_s9 + $0x180] sm:$0xff] }
 0x1d0   : > { %v1437_v39 = vrot.slane %v1436_v46, 4  ;;  %v1458_v31 = vadd.f32 %v1457_v18, %v1451_v20  ;;  %v1500_v25 = vpop.f32.mrf.mxu2  ;;  %v3133_v18 = vld [vmem:[%s3253_s9 + $0xc0] sm:$0xff] }
 0x1d1   : > { %v1529_v27 = vpop.f32.mrf.mxu3  ;;  %v1541_v5 = vpop.f32.mrf.mxu0 }
 0x1d2   : > { %v3880_v51 = vadd.f32 %v1529_v27, %v1500_v25  ;;  %v1578_v15 = vpop.f32.mrf.mxu1  ;;  %v1438_v19 = vadd.f32 %v1437_v39, %v1436_v46  ;;  %v1459_v42 = vrot.slane %v1458_v31, 4  ;;  %v1561_v33 = vadd.f32 %v1541_v5, %v3761_v10 }
 0x1d3   : > { %v987_v10 = vrot.slane %v986_v32, 1  ;;  %v966_v27 = vadd.f32 %v965_v41, %v964_v21 }
 0x1d4   : > { %v1439_v57 = vrot.slane %v1438_v19, 2  ;;  %v1460_v29 = vadd.f32 %v1459_v42, %v1458_v31  ;;  %v1598_v58 = vadd.f32 %v1578_v15, %v1561_v33  ;;  %2980 = vmatmul.msk.bf16.vlgmr.msrb.gmra.mxu0 %vm274_vm2, %v3132_v45  ;;  %2984 = vmatmul.msk.bf16.vlgmr.msrb.gmra.mxu1 %vm274_vm2, %v3489_v62 }
 0x1d5   : > { %2988 = vmatmul.msk.bf16.vlgmr.msrb.gmra.mxu2 %vm274_vm2, %v3133_v18 }
 0x1d6   : > { %2992 = vmatmul.msk.bf16.vlgmr.msrb.gmra.mxu3 %vm274_vm2, %v3427_v53  ;;  %v1440_v46 = vadd.f32 %v1439_v57, %v1438_v19  ;;  %v1461_v50 = vrot.slane %v1460_v29, 2  ;;  %v988_v53 = vadd.f32 %v987_v10, %v986_v32  ;;  %v3135_v32 = vld [vmem:[%s3253_s9 + $0xc8] sm:$0xff] }
 0x1d8   : > { %v1441_v4 = vrot.slane %v1440_v46, 1  ;;  %v1462_v20 = vadd.f32 %v1461_v50, %v1460_v29  ;;  %v1615_v31 = vpop.f32.mrf.mxu2 }
 0x1d9   : > { %v1652_v1 = vpop.f32.mrf.mxu3  ;;  %v1635_v39 = vadd.f32 %v1615_v31, %v1598_v58  ;;  %v1543_v25 = vpop.f32.mrf.mxu0 }
 0x1da   : > { %v1580_v45 = vpop.f32.mrf.mxu1  ;;  %v1442_v5 = vadd.f32 %v1441_v4, %v1440_v46  ;;  %v1463_v62 = vrot.slane %v1462_v20, 1  ;;  %v1562_v15 = vadd.f32 %v1543_v25, %v3778_v16  ;;  %v3134_v4 = vld [vmem:[%s3253_s9 + $0x188] sm:$0xff] }
 0x1db   : > { %v3892_v42 = vadd.f32 %v1652_v1, %v1635_v39 }
 0x1dc   : > { %v3894_v57 = vadd.f32 %v1442_v5, %v966_v27  ;;  %v1464_v19 = vadd.f32 %v1463_v62, %v1462_v20  ;;  %v1599_v33 = vadd.f32 %v1580_v45, %v1562_v15 }
 0x1de   : > { %v3896_v29 = vadd.f32 %v1464_v19, %v988_v53 }
 0x1e0   : > { %v1617_v18 = vpop.f32.mrf.mxu2 }
 0x1e1   : > { %v1654_v58 = vpop.f32.mrf.mxu3  ;;  %v1636_v50 = vadd.f32 %v1617_v18, %v1599_v33  ;;  %v1546_v31 = vpop.f32.mrf.mxu0  ;;  %v3136_v18 = vld [vmem:[%s3253_s9 + $0x190] sm:$0xff] }
 0x1e2   : > { %v1583_v21 = vpop.f32.mrf.mxu1  ;;  %v1563_v41 = vadd.f32 %v1546_v31, %v3798_v60 }
 0x1e3   : > { %v3899_v46 = vadd.f32 %v1654_v58, %v1636_v50 }
 0x1e4   : > { %v1600_v16 = vadd.f32 %v1583_v21, %v1563_v41  ;;  %2981 = vmatmul.msk.bf16.gmra.mxu0 %vm274_vm2, %v3134_v4  ;;  %2985 = vmatmul.msk.bf16.gmra.mxu1 %vm274_vm2, %v3510_v34 }
 0x1e5   : > { %2989 = vmatmul.msk.bf16.gmra.mxu2 %vm274_vm2, %v3135_v32 }
 0x1e6   : > { %2993 = vmatmul.msk.bf16.gmra.mxu3 %vm274_vm2, %v3444_v3 }
 0x1e8   : > { %v1620_v10 = vpop.f32.mrf.mxu2 }
 0x1e9   : > { %v1657_v20 = vpop.f32.mrf.mxu3  ;;  %v1637_v1 = vadd.f32 %v1620_v10, %v1600_v16  ;;  %v1548_v60 = vpop.f32.mrf.mxu0 }
 0x1ea   : > { %v1585_v39 = vpop.f32.mrf.mxu1  ;;  %v1564_v25 = vadd.f32 %v1548_v60, %v3812_v22  ;;  %v3137_v22 = vld [vmem:[%s3253_s9 + $0xd0] sm:$0xff] }
 0x1eb   : > { %v3910_v45 = vadd.f32 %v1657_v20, %v1637_v1 }
 0x1ec   : > { %v1601_v27 = vadd.f32 %v1585_v39, %v1564_v25  ;;  %v3138_v25 = vld [vmem:[%s3253_s9 + $0x198] sm:$0xff] }
 0x1f0   : > { %v1622_v5 = vpop.f32.mrf.mxu2 }
 0x1f1   : > { %v1659_v34 = vpop.f32.mrf.mxu3  ;;  %v1638_v62 = vadd.f32 %v1622_v5, %v1601_v27  ;;  %v1551_v15 = vpop.f32.mrf.mxu0 }
 0x1f2   : > { %v1588_v53 = vpop.f32.mrf.mxu1  ;;  %v1565_v19 = vadd.f32 %v1551_v15, %v3832_v36 }
 0x1f3   : > { %v3913_v3 = vadd.f32 %v1659_v34, %v1638_v62 }
 0x1f4   : > { %v1602_v33 = vadd.f32 %v1588_v53, %v1565_v19  ;;  %2982 = vmatmul.msk.bf16.gmra.mxu0 %vm274_vm2, %v3136_v18  ;;  %2986 = vmatmul.msk.bf16.gmra.mxu1 %vm274_vm2, %v3527_v12 }
 0x1f5   : > { %2990 = vmatmul.msk.bf16.gmra.mxu2 %vm274_vm2, %v3137_v22 }
 0x1f6   : > { %2994 = vmatmul.msk.bf16.gmra.mxu3 %vm274_vm2, %v3459_v55 }
 0x1f8   : > { %v1625_v58 = vpop.f32.mrf.mxu2 }
 0x1f9   : > { %v1662_v50 = vpop.f32.mrf.mxu3  ;;  %v1639_v31 = vadd.f32 %v1625_v58, %v1602_v33  ;;  %v1553_v36 = vpop.f32.mrf.mxu0 }
 0x1fa   : > { %v1590_v21 = vpop.f32.mrf.mxu1  ;;  %v1566_v41 = vadd.f32 %v1553_v36, %v3846_v44  ;;  %v3139_v44 = vld [vmem:[%s3253_s9 + $0xd8] sm:$0xff] }
 0x1fb   : > { %v3924_v16 = vadd.f32 %v1662_v50, %v1639_v31  ;;  %v3102_v50 = vld [vmem:[%s3253_s9 + $0x1e0] sm:$0xff] }
 0x1fc   : > { %v1603_v4 = vadd.f32 %v1590_v21, %v1566_v41 }
 0x200   : > { %v1627_v32 = vpop.f32.mrf.mxu2 }
 0x201   : > { %v1664_v12 = vpop.f32.mrf.mxu3  ;;  %v1640_v10 = vadd.f32 %v1627_v32, %v1603_v4  ;;  %v1556_v20 = vpop.f32.mrf.mxu0 }
 0x202   : > { %v1593_v1 = vpop.f32.mrf.mxu1  ;;  %v1567_v60 = vadd.f32 %v1556_v20, %v3868_v52 }
 0x203   : > { %v3927_v55 = vadd.f32 %v1664_v12, %v1640_v10 }
 0x204   : > { %v1604_v39 = vadd.f32 %v1593_v1, %v1567_v60  ;;  %2983 = vmatmul.msk.bf16.gmra.mxu0 %vm274_vm2, %v3138_v25  ;;  %2987 = vmatmul.msk.bf16.gmra.mxu1 %vm274_vm2, %v3544_v63 }
 0x205   : > { %2991 = vmatmul.msk.bf16.gmra.mxu2 %vm274_vm2, %v3139_v44 }
 0x206   : > { %2995 = vmatmul.msk.bf16.gmra.mxu3 %vm274_vm2, %v3474_v7 }
 0x208   : > { %v1630_v27 = vpop.f32.mrf.mxu2 }
 0x209   : > { %v1667_v5 = vpop.f32.mrf.mxu3  ;;  %v1641_v34 = vadd.f32 %v1630_v27, %v1604_v39  ;;  %v1558_v52 = vpop.f32.mrf.mxu0  ;;  %v3103_v39 = vld [vmem:[%s3253_s9 + $0x1e8] sm:$0xff] }
 0x20a   : > { %v1595_v62 = vpop.f32.mrf.mxu1  ;;  %v1568_v15 = vadd.f32 %v1558_v52, %v3880_v51 }
 0x20b   : > { %v3938_v53 = vadd.f32 %v1667_v5, %v1641_v34 }
 0x20c   : > { %v1605_v19 = vadd.f32 %v1595_v62, %v1568_v15 }
 0x210   : > { %v1632_v33 = vpop.f32.mrf.mxu2 }
 0x211   : > { %v1669_v18 = vpop.f32.mrf.mxu3  ;;  %v1642_v63 = vadd.f32 %v1632_v33, %v1605_v19  ;;  %v1730_v22 = vpop.f32.mrf.mxu0 }
 0x212   : > { %v1808_v58 = vpop.f32.mrf.mxu1  ;;  %v1750_v31 = vadd.f32 %v1730_v22, %v3892_v42 }
 0x213   : > { %v3942_v36 = vadd.f32 %v1669_v18, %v1642_v63 }
 0x214   : > { %v1828_v7 = vadd.f32 %v1808_v58, %v1750_v31  ;;  %2996 = vmatmul.msk.bf16.vlgmr.msra.gmra.mxu0 %vm274_vm2, %v3561_v28  ;;  %3000 = vmatmul.msk.bf16.vlgmr.msra.gmra.mxu1 %vm274_vm2, %v3738_v40  ;;  %v4152_v28 = vmax.f32 %v3564_v23, %v3746_v11 }
 0x215   : > { %3004 = vmatmul.msk.bf16.vlgmr.msra.gmra.mxu2 %vm274_vm2, %v3741_v49 }
 0x216   : > { %3032 = vmatmul.msk.bf16.vlgmr.msra.gmra.mxu3 %vm274_vm2, %v3102_v50 }
 0x218   : > { %v1886_v51 = vpop.f32.mrf.mxu2 }
 0x219   : > { %v3951_v21 = vpop.f32.mrf.mxu3  ;;  %v1906_v41 = vadd.f32 %v1886_v51, %v1828_v7  ;;  %v1732_v42 = vpop.f32.mrf.mxu0  ;;  %v3104_v7 = vld [vmem:[%s3253_s9 + $0x1f0] sm:$0xff] }
 0x21a   : > { %v1810_v4 = vpop.f32.mrf.mxu1  ;;  %v1751_v32 = vadd.f32 %v1732_v42, %v3899_v46  ;;  %v4153_v46 = vmax.f32 %v3581_v2, %v3764_v47  ;;  %v4155_v42 = vmax.f32 %v3611_v0, %v3801_v9 }
 0x21b   : > { %v3957_v12 = vmax.f32 %v4152_v28, %v1906_v41  ;;  %v1928_v44 = vmul.f32 %v1906_v41, %v1906_v41 }
 0x21c   : > { %v1829_v40 = vadd.f32 %v1810_v4, %v1751_v32 }
 0x220   : > { %v1888_v10 = vpop.f32.mrf.mxu2 }
 0x221   : > { %v3959_v20 = vpop.f32.mrf.mxu3  ;;  %v1907_v49 = vadd.f32 %v1888_v10, %v1829_v40  ;;  %v1735_v1 = vpop.f32.mrf.mxu0 }
 0x222   : > { %v1813_v60 = vpop.f32.mrf.mxu1  ;;  %v1752_v25 = vadd.f32 %v1735_v1, %v3910_v45 }
 0x223   : > { %v1914_v27 = vadd.f32 %v1907_v49, %v1906_v41  ;;  %v1929_v5 = vmul.f32 %v1907_v49, %v1907_v49  ;;  %v3966_v34 = vmax.f32 %v4153_v46, %v1907_v49 }
 0x224   : > { %v1830_v23 = vadd.f32 %v1813_v60, %v1752_v25  ;;  %2997 = vmatmul.msk.bf16.gmra.mxu0 %vm274_vm2, %v3592_v14  ;;  %3001 = vmatmul.msk.bf16.gmra.mxu1 %vm274_vm2, %v3776_v6  ;;  %v4154_v6 = vmax.f32 %v3595_v24, %v3784_v43 }
 0x225   : > { %v1936_v11 = vadd.f32 %v1929_v5, %v1928_v44  ;;  %3005 = vmatmul.msk.bf16.gmra.mxu2 %vm274_vm2, %v3781_v35  ;;  %v3105_v5 = vld [vmem:[%s3253_s9 + $0x1f8] sm:$0xff] }
 0x226   : > { %3033 = vmatmul.msk.bf16.gmra.mxu3 %vm274_vm2, %v3103_v39 }
 0x228   : > { %v1891_v45 = vpop.f32.mrf.mxu2 }
 0x229   : > { %v3975_v52 = vpop.f32.mrf.mxu3  ;;  %v1908_v2 = vadd.f32 %v1891_v45, %v1830_v23  ;;  %v1737_v47 = vpop.f32.mrf.mxu0 }
 0x22a   : > { %v1815_v62 = vpop.f32.mrf.mxu1  ;;  %v1753_v15 = vadd.f32 %v1737_v47, %v3913_v3 }
 0x22b   : > { %v1915_v19 = vadd.f32 %v1914_v27, %v1908_v2  ;;  %v1930_v14 = vmul.f32 %v1908_v2, %v1908_v2  ;;  %v3981_v33 = vmax.f32 %v4154_v6, %v1908_v2 }
 0x22c   : > { %v1831_v18 = vadd.f32 %v1815_v62, %v1753_v15 }
 0x22d   : > { %v1937_v35 = vadd.f32 %v1936_v11, %v1930_v14  ;;  %v4157_v11 = vmax.f32 %v3638_v61, %v3835_v38 }
 0x230   : > { %v1893_v63 = vpop.f32.mrf.mxu2 }
 0x231   : > { %v3983_v22 = vpop.f32.mrf.mxu3  ;;  %v1909_v58 = vadd.f32 %v1893_v63, %v1831_v18  ;;  %v1740_v50 = vpop.f32.mrf.mxu0 }
 0x232   : > { %v1818_v31 = vpop.f32.mrf.mxu1  ;;  %v1754_v51 = vadd.f32 %v1740_v50, %v3924_v16 }
 0x233   : > { %v1916_v41 = vadd.f32 %v1915_v19, %v1909_v58  ;;  %v1931_v3 = vmul.f32 %v1909_v58, %v1909_v58  ;;  %v3990_v4 = vmax.f32 %v4155_v42, %v1909_v58 }
 0x234   : > { %v1832_v24 = vadd.f32 %v1818_v31, %v1754_v51  ;;  %2998 = vmatmul.msk.bf16.gmra.mxu0 %vm274_vm2, %v3619_v26  ;;  %3002 = vmatmul.msk.bf16.gmra.mxu1 %vm274_vm2, %v3810_v48  ;;  %v4156_v48 = vmax.f32 %v3622_v56, %v3818_v59  ;;  %v4160_v51 = vld [vmem:[#allocation3_spill] sm:$0xff] }
 0x235   : > { %v1938_v43 = vadd.f32 %v1937_v35, %v1931_v3  ;;  %3006 = vmatmul.msk.bf16.gmra.mxu2 %vm274_vm2, %v3815_v13 }
 0x236   : > { %3034 = vmatmul.msk.bf16.gmra.mxu3 %vm274_vm2, %v3104_v7 }
 0x238   : > { %v1896_v16 = vpop.f32.mrf.mxu2 }
 0x239   : > { %v3999_v32 = vpop.f32.mrf.mxu3  ;;  %v1910_v0 = vadd.f32 %v1896_v16, %v1832_v24  ;;  %v1742_v9 = vpop.f32.mrf.mxu0 }
 0x23a   : > { %v1820_v28 = vpop.f32.mrf.mxu1  ;;  %v1755_v40 = vadd.f32 %v1742_v9, %v3927_v55 }
 0x23b   : > { %v1917_v10 = vadd.f32 %v1916_v41, %v1910_v0  ;;  %v1932_v26 = vmul.f32 %v1910_v0, %v1910_v0  ;;  %v4005_v49 = vmax.f32 %v4156_v48, %v1910_v0 }
 0x23c   : > { %v1833_v1 = vadd.f32 %v1820_v28, %v1755_v40 }
 0x23d   : > { %v1939_v13 = vadd.f32 %v1938_v43, %v1932_v26 }
 0x240   : > { %v1898_v60 = vpop.f32.mrf.mxu2 }
 0x241   : > { %v4007_v39 = vpop.f32.mrf.mxu3  ;;  %v1911_v25 = vadd.f32 %v1898_v60, %v1833_v1  ;;  %v1745_v44 = vpop.f32.mrf.mxu0 }
 0x242   : > { %v1823_v27 = vpop.f32.mrf.mxu1  ;;  %v1756_v46 = vadd.f32 %v1745_v44, %v3938_v53 }
 0x243   : > { %v1918_v23 = vadd.f32 %v1917_v10, %v1911_v25  ;;  %v1933_v55 = vmul.f32 %v1911_v25, %v1911_v25  ;;  %v4014_v45 = vmax.f32 %v4157_v11, %v1911_v25 }
 0x244   : > { %v1834_v56 = vadd.f32 %v1823_v27, %v1756_v46  ;;  %2999 = vmatmul.msk.bf16.gmra.mxu0 %vm274_vm2, %v3646_v30  ;;  %3003 = vmatmul.msk.bf16.gmra.mxu1 %vm274_vm2, %v3844_v37  ;;  %v4158_v30 = vld [vmem:[#allocation2_spill] sm:$0xff] }
 0x245   : > { %v1940_v59 = vadd.f32 %v1939_v13, %v1933_v55  ;;  %3007 = vmatmul.msk.bf16.gmra.mxu2 %vm274_vm2, %v3849_v17  ;;  %v4159_v14 = vmax.f32 %v3649_v54, %v4158_v30 }
 0x246   : > { %3035 = vmatmul.msk.bf16.gmra.mxu3 %vm274_vm2, %v3105_v5 }
 0x248   : > { %v1901_v53 = vpop.f32.mrf.mxu2 }
 0x249   : > { %v4023_v2 = vpop.f32.mrf.mxu3  ;;  %v1912_v47 = vadd.f32 %v1901_v53, %v1834_v56  ;;  %v1747_v61 = vpop.f32.mrf.mxu0 }
 0x24a   : > { %v1825_v38 = vpop.f32.mrf.mxu1  ;;  %v1757_v62 = vadd.f32 %v1747_v61, %v3942_v36  ;;  %v4161_v36 = vmax.f32 %v3665_v8, %v4160_v51 }
 0x24b   : > { %v1919_v15 = vadd.f32 %v1918_v23, %v1912_v47  ;;  %v1934_v19 = vmul.f32 %v1912_v47, %v1912_v47  ;;  %v4029_v37 = vmax.f32 %v4159_v14, %v1912_v47 }
 0x24c   : > { %v1835_v6 = vadd.f32 %v1825_v38, %v1757_v62 }
 0x24d   : > { %v1941_v18 = vadd.f32 %v1940_v59, %v1934_v19 }
 0x250   : > { %v1903_v17 = vpop.f32.mrf.mxu2 }
 0x251   : > { %v4031_v35 = vpop.f32.mrf.mxu3  ;;  %v1913_v63 = vadd.f32 %v1903_v17, %v1835_v6  ;;  %v1996_v58 = vpop.f32.mrf.mxu0 }
 0x252   : > { %v2025_v50 = vpop.f32.mrf.mxu1 }
 0x253   : > { %v1920_v31 = vadd.f32 %v1919_v15, %v1913_v63  ;;  %v1935_v7 = vmul.f32 %v1913_v63, %v1913_v63  ;;  %v4036_v41 = vmax.f32 %v4161_v36, %v1913_v63 }
 0x255   : > { %v1921_v3 = vrot.slane %v1920_v31, 4  ;;  %v1942_v42 = vadd.f32 %v1941_v18, %v1935_v7  ;;  %v1997_v18 = vadd.f32 %v1996_v58, %v3951_v21 }
 0x257   : > { %v1922_v54 = vadd.f32 %v1921_v3, %v1920_v31  ;;  %v1943_v24 = vrot.slane %v1942_v42, 4  ;;  %v2045_v51 = vadd.f32 %v2025_v50, %v1997_v18 }
 0x258   : > { %v2062_v43 = vpop.f32.mrf.mxu2 }
 0x259   : > { %v2099_v16 = vpop.f32.mrf.mxu3  ;;  %v1923_v0 = vrot.slane %v1922_v54, 2  ;;  %v1944_v9 = vadd.f32 %v1943_v24, %v1942_v42  ;;  %v1998_v28 = vpop.f32.mrf.mxu0  ;;  %v2082_v36 = vadd.f32 %v2062_v43, %v2045_v51 }
 0x25a   : > { %v2027_v40 = vpop.f32.mrf.mxu1  ;;  %v1999_v3 = vadd.f32 %v1998_v28, %v3959_v20 }
 0x25b   : > { %v1924_v10 = vadd.f32 %v1923_v0, %v1922_v54  ;;  %v1945_v26 = vrot.slane %v1944_v9, 2  ;;  %v2119_v24 = vadd.f32 %v2099_v16, %v2082_v36 }
 0x25c   : > { %v2046_v58 = vadd.f32 %v2027_v40, %v1999_v3 }
 0x25d   : > { %v1925_v48 = vrot.slane %v1924_v10, 1  ;;  %v1946_v1 = vadd.f32 %v1945_v26, %v1944_v9 }
 0x25f   : > { %v1926_v13 = vadd.f32 %v1925_v48, %v1924_v10  ;;  %v1947_v60 = vrot.slane %v1946_v1, 1 }
 0x260   : > { %v2064_v25 = vpop.f32.mrf.mxu2 }
 0x261   : > { %v2101_v8 = vpop.f32.mrf.mxu3  ;;  %v4039_v44 = vadd.f32 %v1926_v13, %v3894_v57  ;;  %v1948_v27 = vadd.f32 %v1947_v60, %v1946_v1  ;;  %v2001_v5 = vpop.f32.mrf.mxu0  ;;  %v2083_v10 = vadd.f32 %v2064_v25, %v2046_v58 }
 0x262   : > { %v2030_v46 = vpop.f32.mrf.mxu1  ;;  %v2002_v26 = vadd.f32 %v2001_v5, %v3975_v52 }
 0x263   : > { %v4042_v23 = vadd.f32 %v1948_v27, %v3896_v29  ;;  %v2120_v50 = vadd.f32 %v2101_v8, %v2083_v10 }
 0x264   : > { %v2047_v28 = vadd.f32 %v2030_v46, %v2002_v26 }
 0x268   : > { %v2067_v55 = vpop.f32.mrf.mxu2 }
 0x269   : > { %v2104_v11 = vpop.f32.mrf.mxu3  ;;  %v2003_v56 = vpop.f32.mrf.mxu0  ;;  %v2084_v16 = vadd.f32 %v2067_v55, %v2047_v28 }
 0x26a   : > { %v2032_v59 = vpop.f32.mrf.mxu1  ;;  %v2004_v40 = vadd.f32 %v2003_v56, %v3983_v22 }
 0x26b   : > { %v2121_v51 = vadd.f32 %v2104_v11, %v2084_v16 }
 0x270   : > { %v2069_v53 = vpop.f32.mrf.mxu2 }
 0x271   : > { %v4044_v47 = vpop.f32.mrf.mxu3  ;;  %v2006_v61 = vpop.f32.mrf.mxu0 }
 0x272   : > { %v4046_v38 = vpop.f32.mrf.mxu1  ;;  %v2007_v22 = vadd.f32 %v2006_v61, %v3999_v32 }
 0x278   : > { %v4048_v62 = vpop.f32.mrf.mxu2 }
 0x279   : > { %v4050_v57 = vpop.f32.mrf.mxu3  ;;  %v4052_v15 = vpop.f32.mrf.mxu0 }
 0x27a   : > { %v4054_v19 = vpop.f32.mrf.mxu1  ;;  %v2009_v61 = vadd.f32 %v4052_v15, %v4007_v39 }
 0x280   : > { %v4056_v29 = vpop.f32.mrf.mxu2 }
 0x281   : > { %v4058_v30 = vpop.f32.mrf.mxu3  ;;  %v4060_v14 = vpop.f32.mrf.mxu0 }
 0x282   : > { %v4062_v6 = vpop.f32.mrf.mxu1  ;;  %v2012_v15 = vadd.f32 %v4060_v14, %v4023_v2 }
 0x288   : > { %v4065_v17 = vpop.f32.mrf.mxu2 }
 0x289   : > { %v4067_v63 = vpop.f32.mrf.mxu3  ;;  %v4069_v31 = vpop.f32.mrf.mxu0 }
 0x28a   : > { %v4071_v7 = vpop.f32.mrf.mxu1  ;;  %v2014_v14 = vadd.f32 %v4069_v31, %v4031_v35 }
 0x290   : > { %v4074_v42 = vpop.f32.mrf.mxu2 }
 0x291   : > { %v4076_v54 = vpop.f32.mrf.mxu3  ;;  %v2136_v0 = vpop.f32.mrf.mxu0 }
 0x292   : > { %v2173_v21 = vpop.f32.mrf.mxu1  ;;  %v2156_v9 = vadd.f32 %v2136_v0, %v2119_v24  ;;  %v2048_v24 = vadd.f32 %v2032_v59, %v2004_v40 }
 0x294   : > { %v2193_v48 = vadd.f32 %v2173_v21, %v2156_v9  ;;  %v2085_v58 = vadd.f32 %v2069_v53, %v2048_v24  ;;  %v2049_v53 = vadd.f32 %v4046_v38, %v2007_v22 }
 0x298   : > { %v2210_v1 = vpop.f32.mrf.mxu2 }
 0x299   : > { %v2288_v13 = vpop.f32.mrf.mxu3  ;;  %v2230_v43 = vadd.f32 %v2210_v1, %v2193_v48  ;;  %v2138_v60 = vpop.f32.mrf.mxu0  ;;  %v2122_v1 = vadd.f32 %v4044_v47, %v2085_v58 }
 0x29a   : > { %v2175_v20 = vpop.f32.mrf.mxu1  ;;  %v2157_v18 = vadd.f32 %v2138_v60, %v2120_v50 }
 0x29b   : > { %v2308_v27 = vadd.f32 %v2288_v13, %v2230_v43 }
 0x29c   : > { %v2194_v25 = vadd.f32 %v2175_v20, %v2157_v18  ;;  %v2086_v20 = vadd.f32 %v4048_v62, %v2049_v53  ;;  %v2050_v62 = vadd.f32 %v4054_v19, %v2009_v61 }
 0x29d   : > { %v2352_v52 = vmax.f32 %v3957_v12, %v2308_v27  ;;  %v2330_v9 = vmul.f32 %v2308_v27, %v2308_v27 }
 0x29f   : > { %2360 = vst [vmem:[%s4083_s19] sm:$0xff] %v2352_v52  ;;  %v2123_v52 = vadd.f32 %v4050_v57, %v2086_v20 }
 0x2a0   : > { %v2212_v8 = vpop.f32.mrf.mxu2 }
 0x2a1   : > { %v2290_v5 = vpop.f32.mrf.mxu3  ;;  %v2231_v46 = vadd.f32 %v2212_v8, %v2194_v25  ;;  %v2141_v36 = vpop.f32.mrf.mxu0 }
 0x2a2   : > { %v2178_v3 = vpop.f32.mrf.mxu1  ;;  %v2158_v21 = vadd.f32 %v2141_v36, %v2121_v51 }
 0x2a3   : > { %v2309_v0 = vadd.f32 %v2290_v5, %v2231_v46 }
 0x2a4   : > { %v2195_v26 = vadd.f32 %v2178_v3, %v2158_v21 }
 0x2a5   : > { %v2316_v10 = vadd.f32 %v2309_v0, %v2308_v27  ;;  %v2331_v55 = vmul.f32 %v2309_v0, %v2309_v0  ;;  %v2353_v12 = vmax.f32 %v3966_v34, %v2309_v0 }
 0x2a7   : > { %v2338_v56 = vadd.f32 %v2331_v55, %v2330_v9  ;;  %2361 = vst [vmem:[%s4083_s19 + $0x8] sm:$0xff] %v2353_v12 }
 0x2a8   : > { %v2215_v48 = vpop.f32.mrf.mxu2 }
 0x2a9   : > { %v2293_v11 = vpop.f32.mrf.mxu3  ;;  %v2232_v13 = vadd.f32 %v2215_v48, %v2195_v26  ;;  %v2143_v59 = vpop.f32.mrf.mxu0 }
 0x2aa   : > { %v2180_v50 = vpop.f32.mrf.mxu1  ;;  %v2159_v60 = vadd.f32 %v2143_v59, %v2122_v1  ;;  %v2052_v1 = vadd.f32 %v4071_v7, %v2014_v14 }
 0x2ab   : > { %v2310_v43 = vadd.f32 %v2293_v11, %v2232_v13 }
 0x2ac   : > { %v2196_v18 = vadd.f32 %v2180_v50, %v2159_v60 }
 0x2ad   : > { %v2317_v34 = vadd.f32 %v2316_v10, %v2310_v43  ;;  %v2332_v28 = vmul.f32 %v2310_v43, %v2310_v43  ;;  %v2354_v32 = vmax.f32 %v3981_v33, %v2310_v43  ;;  %v2087_v33 = vadd.f32 %v4056_v29, %v2050_v62 }
 0x2ae   : > { %v2051_v29 = vadd.f32 %v4062_v6, %v2012_v15 }
 0x2af   : > { %v2339_v27 = vadd.f32 %v2338_v56, %v2332_v28  ;;  %2362 = vst [vmem:[%s4083_s19 + $0x10] sm:$0xff] %v2354_v32  ;;  %v2124_v0 = vadd.f32 %v4058_v30, %v2087_v33 }
 0x2b0   : > { %v2217_v47 = vpop.f32.mrf.mxu2 }
 0x2b1   : > { %v2295_v16 = vpop.f32.mrf.mxu3  ;;  %v2233_v38 = vadd.f32 %v2217_v47, %v2196_v18  ;;  %v2146_v40 = vpop.f32.mrf.mxu0 }
 0x2b2   : > { %v2183_v25 = vpop.f32.mrf.mxu1  ;;  %v2160_v5 = vadd.f32 %v2146_v40, %v2123_v52 }
 0x2b3   : > { %v2311_v8 = vadd.f32 %v2295_v16, %v2233_v38 }
 0x2b4   : > { %v2197_v3 = vadd.f32 %v2183_v25, %v2160_v5 }
 0x2b5   : > { %v2318_v51 = vadd.f32 %v2317_v34, %v2311_v8  ;;  %v2333_v46 = vmul.f32 %v2311_v8, %v2311_v8  ;;  %v2355_v39 = vmax.f32 %v3990_v4, %v2311_v8  ;;  %v2088_v4 = vadd.f32 %v4065_v17, %v2051_v29 }
 0x2b7   : > { %v2340_v36 = vadd.f32 %v2339_v27, %v2333_v46  ;;  %2363 = vst [vmem:[%s4083_s19 + $0x18] sm:$0xff] %v2355_v39  ;;  %v2125_v48 = vadd.f32 %v4067_v63, %v2088_v4 }
 0x2b8   : > { %v2220_v57 = vpop.f32.mrf.mxu2 }
 0x2b9   : > { %v2298_v24 = vpop.f32.mrf.mxu3  ;;  %v2234_v19 = vadd.f32 %v2220_v57, %v2197_v3  ;;  %v2148_v21 = vpop.f32.mrf.mxu0 }
 0x2ba   : > { %v2185_v58 = vpop.f32.mrf.mxu1  ;;  %v2161_v10 = vadd.f32 %v2148_v21, %v2124_v0 }
 0x2bb   : > { %v2312_v9 = vadd.f32 %v2298_v24, %v2234_v19 }
 0x2bc   : > { %v2198_v30 = vadd.f32 %v2185_v58, %v2161_v10 }
 0x2bd   : > { %v2319_v55 = vadd.f32 %v2318_v51, %v2312_v9  ;;  %v2334_v12 = vmul.f32 %v2312_v9, %v2312_v9  ;;  %v2356_v2 = vmax.f32 %v4005_v49, %v2312_v9  ;;  %v2089_v49 = vadd.f32 %v4074_v42, %v2052_v1 }
 0x2bf   : > { %v2341_v22 = vadd.f32 %v2340_v36, %v2334_v12  ;;  %2364 = vst [vmem:[%s4083_s19 + $0x20] sm:$0xff] %v2356_v2  ;;  %v2126_v63 = vadd.f32 %v4076_v54, %v2089_v49 }
 0x2c0   : > { %v2222_v56 = vpop.f32.mrf.mxu2 }
 0x2c1   : > { %v2300_v26 = vpop.f32.mrf.mxu3  ;;  %v2235_v6 = vadd.f32 %v2222_v56, %v2198_v30  ;;  %v2151_v11 = vpop.f32.mrf.mxu0 }
 0x2c2   : > { %v2162_v13 = vadd.f32 %v2151_v11, %v2125_v48  ;;  %v2188_v59 = vpop.f32.mrf.mxu1 }
 0x2c3   : > { %v2313_v17 = vadd.f32 %v2300_v26, %v2235_v6 }
 0x2c4   : > { %v2199_v43 = vadd.f32 %v2188_v59, %v2162_v13 }
 0x2c5   : > { %v2320_v50 = vadd.f32 %v2319_v55, %v2313_v17  ;;  %v2335_v53 = vmul.f32 %v2313_v17, %v2313_v17  ;;  %v2357_v35 = vmax.f32 %v4014_v45, %v2313_v17 }
 0x2c7   : > { %v2342_v31 = vadd.f32 %v2341_v22, %v2335_v53  ;;  %2365 = vst [vmem:[%s4083_s19 + $0x28] sm:$0xff] %v2357_v35 }
 0x2c8   : > { %v2225_v60 = vpop.f32.mrf.mxu2 }
 0x2c9   : > { %v2303_v20 = vpop.f32.mrf.mxu3  ;;  %v2236_v34 = vadd.f32 %v2225_v60, %v2199_v43  ;;  %v2153_v28 = vpop.f32.mrf.mxu0 }
 0x2ca   : > { %v2163_v32 = vadd.f32 %v2153_v28, %v2126_v63  ;;  %v2190_v18 = vpop.f32.mrf.mxu1 }
 0x2cb   : > { %v2314_v7 = vadd.f32 %v2303_v20, %v2236_v34 }
 0x2cc   : > { %v2200_v45 = vadd.f32 %v2190_v18, %v2163_v32 }
 0x2cd   : > { %v2321_v61 = vadd.f32 %v2320_v50, %v2314_v7  ;;  %v2336_v27 = vmul.f32 %v2314_v7, %v2314_v7  ;;  %v2358_v42 = vmax.f32 %v4029_v37, %v2314_v7 }
 0x2cf   : > { %v2343_v47 = vadd.f32 %v2342_v31, %v2336_v27  ;;  %2366 = vst [vmem:[%s4083_s19 + $0x30] sm:$0xff] %v2358_v42 }
 0x2d0   : > { %v2227_v16 = vpop.f32.mrf.mxu2 }
 0x2d1   : > { %v2237_v52 = vadd.f32 %v2227_v16, %v2200_v45  ;;  %v2305_v38 = vpop.f32.mrf.mxu3 }
 0x2d3   : > { %v2315_v40 = vadd.f32 %v2305_v38, %v2237_v52 }
 0x2d5   : > { %v2322_v25 = vadd.f32 %v2321_v61, %v2315_v40  ;;  %v2337_v62 = vmul.f32 %v2315_v40, %v2315_v40  ;;  %v2359_v54 = vmax.f32 %v4036_v41, %v2315_v40 }
 0x2d7   : > { %v2323_v8 = vrot.slane %v2322_v25, 4  ;;  %v2344_v5 = vadd.f32 %v2343_v47, %v2337_v62  ;;  %2367 = vst [vmem:[%s4083_s19 + $0x38] sm:$0xff] %v2359_v54 }
 0x2d9   : > { %v2324_v33 = vadd.f32 %v2323_v8, %v2322_v25  ;;  %v2345_v51 = vrot.slane %v2344_v5, 4 }
 0x2db   : > { %v2325_v46 = vrot.slane %v2324_v33, 2  ;;  %v2346_v39 = vadd.f32 %v2345_v51, %v2344_v5 }
 0x2dd   : > { %v2326_v37 = vadd.f32 %v2325_v46, %v2324_v33  ;;  %v2347_v15 = vrot.slane %v2346_v39, 2 }
 0x2df   : > { %v2327_v36 = vrot.slane %v2326_v37, 1  ;;  %v2348_v3 = vadd.f32 %v2347_v15, %v2346_v39 }
 0x2e1   : > { %v2328_v57 = vadd.f32 %v2327_v36, %v2326_v37  ;;  %v2349_v24 = vrot.slane %v2348_v3, 1  ;;  %2371 = sbr.rel (%p3036_p5) target bundleno = 744 (0x2e8), region = 32 }
 0x2e3   : > { %v2329_v0 = vadd.f32 %v2328_v57, %v4039_v44  ;;  %v2350_v19 = vadd.f32 %v2349_v24, %v2348_v3 }
 0x2e5   : > { %v2351_v21 = vadd.f32 %v2350_v19, %v4042_v23 }
 0x2e6   : > { %v3165_v41 = vmov 0.0  }
 0x2e7   : > { %2372 = vst [vmem:[%s4147_s3] sm:$0x3] %v3165_v41 }
 0x2e8 PF: > { %v2374_v29 = vsel %vm287_vm0, %v2329_v0, %v2351_v21 }
 0x2ee   : > { %v2373_v58 = vld [vmem:[%s4147_s3] sm:$0x3] }
 0x2ef   : > { %v2375_v9 = vadd.f32 %v2374_v29, %v2373_v58 }
 0x2f1   : > { %2376 = vst [vmem:[%s4147_s3] sm:$0x3] %v2375_v9 }
 0x2f2 PF: > { %s14_s14 = sadd.s32 1, %s3162_s14   ;;  %s4162_s12 = smov %s3158_s13 }
 0x2f3   : > { %p11_p6 = scmp.ge.s32.totalorder %s14_s14, 4   ;;  %s4163_s13 = smov %s4165_s15 }
 0x2f5   :  { %13 = sbr.rel (!%p11_p6) target bundleno = 2 (0x2), region = 100 }

// kernel: convnet_forward.11
= control target key start
LH: loop header
LB: loop body
LE: loop exit
PB: predicated region body
PF: predicated region fallthrough
CT: control target
= control target key end

     0   :  { %s348_s15 = smov 0   ;;  %s377_s0 = inlined_call_operand.vmem [shape: f32[2,16,128], index: 0, kind: input, shape index: {}]   ;;  %s378_s1 = inlined_call_operand.vmem [shape: f32[2,128], index: 1, kind: input, shape index: {}]   ;;  %s379_s2 = inlined_call_operand.vmem [shape: f32[1,128], index: 2, kind: input, shape index: {}]   ;;  %s380_s3 = inlined_call_operand.vmem [shape: f32[1,128], index: 3, kind: input, shape index: {}]   ;;  %s381_s4 = inlined_call_operand.vmem [shape: f32[2,16,128], index: 4, kind: output, shape index: {}]  }
   0x1 LB: > { %s292_s16 = sadd.s32 4294967295, %s321_s15   ;;  %p296_p0 = scmp.ge.s32.totalorder %s321_s15, 1  ;;  %s321_s15 = sphi %s348_s15, %s14_s15  }
   0x2   : > { %p162_p1 = scmp.lt.s32.totalorder %s321_s15, 3 }
   0x4   : > { %p163_p2 = pnand %p296_p0, %p162_p1 }
   0x5   : > { %p188_p3 = scmp.lt.s32.totalorder (!%p163_p2), %s292_s16, 1 }
   0x6   : > { %166 = sbr.rel (%p163_p2) target bundleno = 54 (0x36), region = 36 }
   0xb   : > { %v198_v0 = vld [vmem:[%s378_s1] sm:$0x1]  ;;  %v200_v1 = vld [vmem:[%s378_s1 + $0x1] sm:$0x1]  ;;  %s383_s16 = smov (!%p188_p3, %s292_s16), 1 }
   0xc   : > { %v199_v2 = vmul.f32 0.0078125, %v198_v0  ;;  %v201_v3 = vmul.f32 0.0078125, %v200_v1  ;;  %s303_s21 = sshll.u32 %s383_s16, 4  ;;  %v205_v13 = vld [vmem:[%s379_s2] sm:$0x1] }
   0xd   : > { %s192_s26 = scalar_lea.vmem %s377_s0, %s303_s21  ;;  %v218_v17 = vld [vmem:[%s380_s3] sm:$0x1]  ;;  %s197_s5 = scalar_lea.vmem %s381_s4, %s303_s21 }
   0xe   : > { %v202_v4 = vmul.f32 %v199_v2, %v199_v2  ;;  %v221_v18 = vld [vmem:[%s192_s26] sm:$0xff]  ;;  %v222_v19 = vld [vmem:[%s192_s26 + $0x8] sm:$0xff] }
  0x10   : > { %v203_v5 = vsub.f32 %v201_v3, %v202_v4 }
  0x12   : > { %v204_v6 = vmax.f32 %v203_v5, 0.0 }
  0x14   : > { %v206_v7 = vadd.f32 1e-05, %v204_v6 }
  0x16   : > { %313 = vrsqrt.f32 %v206_v7  ;;  %vm213_vm0 = vweird.f32 %v206_v7 }
  0x1c   : > { %v314_v8 = vpop.eup %313 }
  0x1d   : > { %v208_v9 = vmul.f32 %v314_v8, %v206_v7  ;;  %vm214_vm1 = vweird.f32 %v314_v8 }
  0x1e   : > { %vm215_vm2 = vmor %vm213_vm0, %vm214_vm1 }
  0x1f   : > { %v209_v10 = vmul.f32 %v314_v8, %v208_v9 }
  0x21   : > { %v210_v11 = vmul.f32 0.5, %v209_v10 }
  0x23   : > { %v211_v12 = vsub.f32 1.5, %v210_v11 }
  0x25   : > { %v212_v14 = vmul.f32 %v314_v8, %v211_v12 }
  0x27   : > { %v216_v15 = vsel %vm215_vm2, %v314_v8, %v212_v14 }
  0x28   : > { %v217_v16 = vmul.f32 %v216_v15, %v205_v13 }
  0x2a   : > { %v219_v20 = vmul.f32 %v217_v16, %v199_v2  ;;  %v224_v21 = vperm.slane %v217_v16, 0 }
  0x2c   : > { %v220_v22 = vsub.f32 %v218_v17, %v219_v20  ;;  %v226_v23 = vmul.f32 %v224_v21, %v221_v18  ;;  %v227_v24 = vmul.f32 %v224_v21, %v222_v19 }
  0x2e   : > { %v229_v25 = vperm.slane %v220_v22, 0 }
  0x30   : > { %v231_v26 = vadd.f32 %v229_v25, %v226_v23  ;;  %v232_v27 = vadd.f32 %v229_v25, %v227_v24 }
  0x32   : > { %v233_v28 = vmax.f32 %v231_v26, 0.0  ;;  %v234_v29 = vmax.f32 %v232_v27, 0.0 }
  0x34   : > { %235 = vst [vmem:[%s197_s5] sm:$0xff] %v233_v28 }
  0x35   : > { %236 = vst [vmem:[%s197_s5 + $0x8] sm:$0xff] %v234_v29 }
  0x36 PF: > { %s14_s15 = sadd.s32 1, %s321_s15  }
  0x37   : > { %p11_p4 = scmp.ge.s32.totalorder %s14_s15, 4  }
  0x39   :  { %13 = sbr.rel (!%p11_p4) target bundleno = 1 (0x1), region = 66 }

// kernel: convnet_forward.10
= control target key start
LH: loop header
LB: loop body
LE: loop exit
PB: predicated region body
PF: predicated region fallthrough
CT: control target
= control target key end

     0   :  { %s1540_s12 = smov 0   ;;  %s1542_s13 = smov 0   ;;  %s1762_s0 = inlined_call_operand.vmem [shape: bf16[2,16,16,16], index: 0, kind: input, shape index: {}]   ;;  %s1763_s1 = inlined_call_operand.vmem [shape: bf16[9,16,128], index: 1, kind: input, shape index: {}]   ;;  %s1764_s2 = inlined_call_operand.vmem [shape: f32[2,16,128], index: 2, kind: output, shape index: {0}]   ;;  %s1765_s3 = inlined_call_operand.vmem [shape: f32[2,128], index: 3, kind: output, shape index: {1}]  }
   0x1   :  { %s1544_s14 = smov 0  }
   0x2 LB: > { %s23_s15 = sadd.s32 1, %s1513_s13  ;;  %p1252_p0 = scmp.ge.s32.totalorder %s1517_s14, 1  ;;  %s1517_s14 = sphi %s1544_s14, %s14_s14   ;;  %s1513_s13 = sphi %s1542_s13, %s1767_s13   ;;  %s1509_s12 = sphi %s1540_s12, %s1766_s12  }
   0x3   : > { %p24_p1 = scmp.ge.s32.totalorder %s23_s15, 2  ;;  %p163_p2 = scmp.lt.s32.totalorder %s1517_s14, 3 }
   0x5   : > { %s1769_s15 = smov (%p24_p1, %s23_s15), 0  ;;  %p164_p3 = pnand %p1252_p0, %p163_p2 }
   0x6   : > { %p198_p4 = scmp.lt.s32.totalorder (!%p164_p3), %s1509_s12, 1  ;;  %p1439_p5 = scmp.ne.s32.totalorder (!%p164_p3), %s1509_s12, 0 }
   0x7   : > { %167 = sbr.rel (%p164_p3) target bundleno = 321 (0x141), region = 28 }
   0xc   : > { %v1563_v0 = vld [vmem:[%s1763_s1 + $0x8] sm:$0xff]  ;;  %v1568_v1 = vld [vmem:[%s1763_s1] sm:$0xff]  ;;  %v1573_v2 = vld [vmem:[%s1763_s1 + $0x10] sm:$0xff]  ;;  %s1594_s28 = scalar_select %p198_p4, %s1509_s12, 1  ;;  %vm262_vm0 = vcmask 130048  }
   0xd   : > { %v1579_v3 = vld [vmem:[%s1763_s1 + $0x18] sm:$0xff]  ;;  %v1584_v4 = vld [vmem:[%s1763_s1 + $0x30] sm:$0xff]  ;;  %v1589_v5 = vld [vmem:[%s1763_s1 + $0x20] sm:$0xff]  ;;  %273 = vmatpush.bf16.msra.mxu0 %v1563_v0  ;;  %301 = vmatpush.bf16.msra.mxu1 %v1568_v1 }
   0xe   : > { %v1599_v6 = vld [vmem:[%s1763_s1 + $0x38] sm:$0xff]  ;;  %v1604_v7 = vld [vmem:[%s1763_s1 + $0x28] sm:$0xff]  ;;  %332 = vmatpush.bf16.msra.mxu2 %v1573_v2  ;;  %365 = vmatpush.bf16.msra.mxu3 %v1579_v3  ;;  %s1443_s6 = sshll.u32 %s1594_s28, 7  ;;  %v1621_v8 = vld [vmem:[%s1763_s1 + $0x40] sm:$0xff]  ;;  %s1444_s16 = sshll.u32 %s1594_s28, 4 }
   0xf   : > { %s1614_s9 = scalar_lea.vmem %s1762_s0, %s1443_s6  ;;  %s214_s19 = scalar_lea.vmem %s1764_s2, %s1444_s16 }
  0x10   : > { %v1455_v9 = vld [vmem:[%s1614_s9 + $0x20] sm:$0xff]  ;;  %v1456_v11 = vld [vmem:[%s1614_s9 + $0x8] sm:$0xff]  ;;  %v1460_v15 = vld [vmem:[%s1614_s9 + $0x10] sm:$0xff] }
  0x11   : > { %398 = vmatpush.bf16.msrb.mxu0 %v1589_v5  ;;  %431 = vmatpush.bf16.msrb.mxu1 %v1604_v7  ;;  %v1454_v10 = vld [vmem:[%s1614_s9] sm:$0xff]  ;;  %v1459_v14 = vld [vmem:[%s1614_s9 + $0x48] sm:$0xff]  ;;  %v1461_v16 = vld [vmem:[%s1614_s9 + $0x30] sm:$0xff] }
  0x12   : > { %464 = vmatpush.bf16.msrb.mxu2 %v1584_v4  ;;  %497 = vmatpush.bf16.msrb.mxu3 %v1599_v6  ;;  %v1457_v12 = vld [vmem:[%s1614_s9 + $0x40] sm:$0xff]  ;;  %v1462_v17 = vld [vmem:[%s1614_s9 + $0x18] sm:$0xff]  ;;  %v1463_v18 = vld [vmem:[%s1614_s9 + $0x28] sm:$0xff] }
  0x13   : > { %1283 = vmatmul.msk.bf16.vlgmr.msra.gmra.mxu0 %vm262_vm0, %v1455_v9  ;;  %1292 = vmatmul.msk.bf16.vlgmr.msra.gmra.mxu1 %vm262_vm0, %v1454_v10  ;;  %v1458_v13 = vld [vmem:[%s1614_s9 + $0x60] sm:$0xff]  ;;  %v1464_v19 = vld [vmem:[%s1614_s9 + $0x68] sm:$0xff]  ;;  %v1465_v20 = vld [vmem:[%s1614_s9 + $0x38] sm:$0xff] }
  0x14   : > { %1303 = vmatmul.msk.bf16.vlgmr.msra.gmra.mxu2 %vm262_vm0, %v1456_v11  ;;  %1314 = vmatmul.msk.bf16.vlgmr.msra.gmra.mxu3 %vm262_vm0, %v1457_v12  ;;  %v1466_v21 = vld [vmem:[%s1614_s9 + $0x50] sm:$0xff]  ;;  %v1468_v23 = vld [vmem:[%s1614_s9 + $0x58] sm:$0xff] }
  0x15   : > { %530 = vmatpush.bf16.msra.mxu0 %v1621_v8  ;;  %564 = vmatpush.bf16.msra.mxu1 %v1563_v0  ;;  %v1467_v22 = vld [vmem:[%s1614_s9 + $0x70] sm:$0xff]  ;;  %v1469_v26 = vld [vmem:[%s1614_s9 + $0x78] sm:$0xff] }
  0x16   : > { %578 = vmatpush.bf16.msra.mxu2 %v1568_v1  ;;  %603 = vmatpush.bf16.msra.mxu3 %v1573_v2 }
  0x23   : > { %1325 = vmatmul.msk.bf16.vlgmr.msrb.gmra.mxu0 %vm262_vm0, %v1458_v13  ;;  %1336 = vmatmul.msk.bf16.vlgmr.msrb.gmra.mxu1 %vm262_vm0, %v1459_v14 }
  0x24   : > { %1347 = vmatmul.msk.bf16.vlgmr.msrb.gmra.mxu2 %vm262_vm0, %v1460_v15  ;;  %1358 = vmatmul.msk.bf16.vlgmr.msrb.gmra.mxu3 %vm262_vm0, %v1461_v16 }
  0x25   : > { %662 = vmatpush.bf16.msrb.mxu2 %v1604_v7  ;;  %619 = vmatpush.bf16.msrb.mxu0 %v1579_v3 }
  0x26   : > { %678 = vmatpush.bf16.msrb.mxu3 %v1584_v4  ;;  %635 = vmatpush.bf16.msrb.mxu1 %v1589_v5 }
  0x33   : > { %1369 = vmatmul.msk.bf16.vlgmr.msra.gmra.mxu0 %vm262_vm0, %v1462_v17  ;;  %1370 = vmatmul.msk.bf16.vlgmr.msra.gmra.mxu1 %vm262_vm0, %v1456_v11 }
  0x34   : > { %1371 = vmatmul.msk.bf16.vlgmr.msra.gmra.mxu2 %vm262_vm0, %v1455_v9  ;;  %1378 = vmatmul.msk.bf16.vlgmr.msra.gmra.mxu3 %vm262_vm0, %v1463_v18 }
  0x35   : > { %757 = vmatpush.bf16.msra.mxu2 %v1563_v0  ;;  %694 = vmatpush.bf16.msra.mxu0 %v1599_v6 }
  0x36   : > { %771 = vmatpush.bf16.msra.mxu3 %v1568_v1  ;;  %721 = vmatpush.bf16.msra.mxu1 %v1621_v8 }
  0x43   : > { %1379 = vmatmul.msk.bf16.vlgmr.msrb.gmra.mxu0 %vm262_vm0, %v1458_v13  ;;  %1380 = vmatmul.msk.bf16.vlgmr.msrb.gmra.mxu1 %vm262_vm0, %v1459_v14 }
  0x44   : > { %1387 = vmatmul.msk.bf16.vlgmr.msrb.gmra.mxu2 %vm262_vm0, %v1464_v19  ;;  %1388 = vmatmul.msk.bf16.vlgmr.msrb.gmra.mxu3 %vm262_vm0, %v1461_v16 }
  0x45   : > { %817 = vmatpush.bf16.msrb.mxu2 %v1589_v5  ;;  %785 = vmatpush.bf16.msrb.mxu0 %v1573_v2 }
  0x46   : > { %833 = vmatpush.bf16.msrb.mxu3 %v1604_v7  ;;  %801 = vmatpush.bf16.msrb.mxu1 %v1579_v3 }
  0x53   : > { %1389 = vmatmul.msk.bf16.vlgmr.msra.gmra.mxu0 %vm262_vm0, %v1462_v17  ;;  %1396 = vmatmul.msk.bf16.vlgmr.msra.gmra.mxu1 %vm262_vm0, %v1465_v20 }
  0x54   : > { %1397 = vmatmul.msk.bf16.vlgmr.msra.gmra.mxu2 %vm262_vm0, %v1458_v13  ;;  %1398 = vmatmul.msk.bf16.vlgmr.msra.gmra.mxu3 %vm262_vm0, %v1457_v12 }
  0x55   : > { %914 = vmatpush.bf16.msra.mxu2 %v1621_v8  ;;  %860 = vmatpush.bf16.msra.mxu0 %v1584_v4 }
  0x56   : > { %950 = vmatpush.bf16.msra.mxu3 %v1563_v0  ;;  %887 = vmatpush.bf16.msra.mxu1 %v1599_v6 }
  0x63   : > { %1399 = vmatmul.msk.bf16.vlgmr.msrb.gmra.mxu0 %vm262_vm0, %v1459_v14  ;;  %1400 = vmatmul.msk.bf16.vlgmr.msrb.gmra.mxu1 %vm262_vm0, %v1460_v15 }
  0x64   : > { %1401 = vmatmul.msk.bf16.vlgmr.msrb.gmra.mxu2 %vm262_vm0, %v1461_v16  ;;  %1402 = vmatmul.msk.bf16.vlgmr.msrb.gmra.mxu3 %vm262_vm0, %v1462_v17 }
  0x65   : > { %994 = vmatpush.bf16.msrb.mxu2 %v1579_v3  ;;  %964 = vmatpush.bf16.msrb.mxu0 %v1568_v1 }
  0x66   : > { %1010 = vmatpush.bf16.msrb.mxu3 %v1589_v5  ;;  %978 = vmatpush.bf16.msrb.mxu1 %v1573_v2 }
  0x73   : > { %1409 = vmatmul.msk.bf16.vlgmr.msra.gmra.mxu0 %vm262_vm0, %v1466_v21  ;;  %1416 = vmatmul.msk.bf16.vlgmr.msra.gmra.mxu1 %vm262_vm0, %v1467_v22 }
  0x74   : > { %1423 = vmatmul.msk.bf16.vlgmr.msra.gmra.mxu2 %vm262_vm0, %v1468_v23  ;;  %1424 = vmatmul.msk.bf16.vlgmr.msra.gmra.mxu3 %vm262_vm0, %v1459_v14 }
  0x75   : > { %1058 = vmatpush.bf16.msra.mxu2 %v1599_v6  ;;  %1026 = vmatpush.bf16.msra.mxu0 %v1604_v7 }
  0x76   : > { %1085 = vmatpush.bf16.msra.mxu3 %v1621_v8  ;;  %1042 = vmatpush.bf16.msra.mxu1 %v1584_v4 }
  0x83   : > { %1425 = vmatmul.msk.bf16.vlgmr.msrb.gmra.mxu0 %vm262_vm0, %v1458_v13  ;;  %1426 = vmatmul.msk.bf16.vlgmr.msrb.gmra.mxu1 %vm262_vm0, %v1464_v19 }
  0x84   : > { %1427 = vmatmul.msk.bf16.vlgmr.msrb.gmra.mxu2 %vm262_vm0, %v1461_v16  ;;  %1428 = vmatmul.msk.bf16.vlgmr.msrb.gmra.mxu3 %vm262_vm0, %v1462_v17 }
  0x90   : > { %v275_v24 = vpop.f32.mrf.mxu0  ;;  %v303_v25 = vpop.f32.mrf.mxu1 }
  0x91   : > { %v304_v27 = vadd.f32 %v303_v25, %v275_v24 }
  0x93   : > { %1429 = vmatmul.msk.bf16.vlgmr.msra.gmra.mxu0 %vm262_vm0, %v1465_v20  ;;  %1430 = vmatmul.msk.bf16.vlgmr.msra.gmra.mxu1 %vm262_vm0, %v1467_v22 }
  0x94   : > { %1431 = vmatmul.msk.bf16.vlgmr.msra.gmra.mxu2 %vm262_vm0, %v1468_v23  ;;  %1438 = vmatmul.msk.bf16.vlgmr.msra.gmra.mxu3 %vm262_vm0, %v1469_v26 }
  0x97   : > { %v334_v28 = vpop.f32.mrf.mxu2  ;;  %v367_v29 = vpop.f32.mrf.mxu3 }
  0x98   : > { %v339_v30 = vadd.f32 %v334_v28, %v304_v27  ;;  %v277_v31 = vpop.f32.mrf.mxu0  ;;  %v305_v32 = vpop.f32.mrf.mxu1 }
  0x99   : > { %v306_v33 = vadd.f32 %v305_v32, %v277_v31 }
  0x9a   : > { %v372_v34 = vadd.f32 %v367_v29, %v339_v30 }
  0x9f   : > { %v336_v35 = vpop.f32.mrf.mxu2  ;;  %v369_v36 = vpop.f32.mrf.mxu3 }
  0xa0   : > { %v340_v37 = vadd.f32 %v336_v35, %v306_v33  ;;  %v400_v38 = vpop.f32.mrf.mxu0  ;;  %v433_v39 = vpop.f32.mrf.mxu1 }
  0xa1   : > { %v405_v40 = vadd.f32 %v400_v38, %v372_v34 }
  0xa2   : > { %v373_v41 = vadd.f32 %v369_v36, %v340_v37 }
  0xa3   : > { %v438_v42 = vadd.f32 %v433_v39, %v405_v40 }
  0xa7   : > { %v466_v43 = vpop.f32.mrf.mxu2  ;;  %v499_v44 = vpop.f32.mrf.mxu3 }
  0xa8   : > { %v471_v45 = vadd.f32 %v466_v43, %v438_v42  ;;  %v402_v46 = vpop.f32.mrf.mxu0  ;;  %v435_v47 = vpop.f32.mrf.mxu1 }
  0xa9   : > { %v406_v48 = vadd.f32 %v402_v46, %v373_v41 }
  0xaa   : > { %v504_v49 = vadd.f32 %v499_v44, %v471_v45 }
  0xab   : > { %v439_v50 = vadd.f32 %v435_v47, %v406_v48 }
  0xaf   : > { %v468_v51 = vpop.f32.mrf.mxu2  ;;  %v501_v52 = vpop.f32.mrf.mxu3 }
  0xb0   : > { %v472_v53 = vadd.f32 %v468_v51, %v439_v50  ;;  %v532_v54 = vpop.f32.mrf.mxu0  ;;  %v566_v55 = vpop.f32.mrf.mxu1 }
  0xb1   : > { %v1703_v56 = vadd.f32 %v532_v54, %v504_v49 }
  0xb2   : > { %v505_v57 = vadd.f32 %v501_v52, %v472_v53 }
  0xb3   : > { %v547_v1 = vmul.f32 %v1703_v56, %v1703_v56 }
  0xb7   : > { %v580_v58 = vpop.f32.mrf.mxu2  ;;  %v605_v59 = vpop.f32.mrf.mxu3 }
  0xb8   : > { %v581_v60 = vadd.f32 %v580_v58, %v566_v55  ;;  %v534_v61 = vpop.f32.mrf.mxu0  ;;  %v568_v62 = vpop.f32.mrf.mxu1 }
  0xb9   : > { %v1705_v63 = vadd.f32 %v534_v61, %v505_v57 }
  0xba   : > { %v610_v0 = vadd.f32 %v605_v59, %v581_v60 }
  0xbb   : > { %v539_v2 = vadd.f32 %v1705_v63, %v1703_v56  ;;  %v548_v3 = vmul.f32 %v1705_v63, %v1705_v63 }
  0xbd   : > { %v549_v4 = vadd.f32 %v548_v3, %v547_v1  ;;  %v540_v29 = vrot.slane %v539_v2, 4 }
  0xbf   : > { %v582_v5 = vpop.f32.mrf.mxu2  ;;  %v607_v6 = vpop.f32.mrf.mxu3  ;;  %v550_v31 = vrot.slane %v549_v4, 4  ;;  %v541_v34 = vadd.f32 %v540_v29, %v539_v2 }
  0xc0   : > { %v583_v7 = vadd.f32 %v582_v5, %v568_v62  ;;  %v621_v8 = vpop.f32.mrf.mxu0  ;;  %v637_v9 = vpop.f32.mrf.mxu1 }
  0xc1   : > { %v626_v10 = vadd.f32 %v621_v8, %v610_v0  ;;  %v551_v38 = vadd.f32 %v550_v31, %v549_v4  ;;  %v542_v40 = vrot.slane %v541_v34, 2 }
  0xc2   : > { %v611_v11 = vadd.f32 %v607_v6, %v583_v7 }
  0xc3   : > { %v642_v12 = vadd.f32 %v637_v9, %v626_v10  ;;  %v552_v45 = vrot.slane %v551_v38, 2  ;;  %v543_v52 = vadd.f32 %v542_v40, %v541_v34 }
  0xc5   : > { %v553_v55 = vadd.f32 %v552_v45, %v551_v38  ;;  %v544_v59 = vrot.slane %v543_v52, 1 }
  0xc7   : > { %v664_v13 = vpop.f32.mrf.mxu2  ;;  %v680_v14 = vpop.f32.mrf.mxu3  ;;  %v554_v62 = vrot.slane %v553_v55, 1  ;;  %v545_v6 = vadd.f32 %v544_v59, %v543_v52 }
  0xc8   : > { %v669_v15 = vadd.f32 %v664_v13, %v642_v12  ;;  %v623_v16 = vpop.f32.mrf.mxu0  ;;  %v639_v17 = vpop.f32.mrf.mxu1 }
  0xc9   : > { %v627_v18 = vadd.f32 %v623_v16, %v611_v11  ;;  %v555_v9 = vadd.f32 %v554_v62, %v553_v55 }
  0xca   : > { %v685_v19 = vadd.f32 %v680_v14, %v669_v15 }
  0xcb   : > { %v643_v20 = vadd.f32 %v639_v17, %v627_v18 }
  0xcf   : > { %v666_v21 = vpop.f32.mrf.mxu2  ;;  %v682_v22 = vpop.f32.mrf.mxu3 }
  0xd0   : > { %v670_v23 = vadd.f32 %v666_v21, %v643_v20  ;;  %v696_v24 = vpop.f32.mrf.mxu0  ;;  %v723_v25 = vpop.f32.mrf.mxu1 }
  0xd1   : > { %v701_v26 = vadd.f32 %v696_v24, %v685_v19 }
  0xd2   : > { %v686_v27 = vadd.f32 %v682_v22, %v670_v23 }
  0xd3   : > { %v1713_v28 = vadd.f32 %v723_v25, %v701_v26 }
  0xd5   : > { %v748_v30 = vmax.f32 %v1703_v56, %v1713_v28  ;;  %v738_v41 = vmul.f32 %v1713_v28, %v1713_v28 }
  0xd7   : > { %v759_v32 = vpop.f32.mrf.mxu2  ;;  %v773_v33 = vpop.f32.mrf.mxu3 }
  0xd8   : > { %v698_v35 = vpop.f32.mrf.mxu0  ;;  %v725_v36 = vpop.f32.mrf.mxu1  ;;  %v774_v22 = vadd.f32 %v773_v33, %v759_v32 }
  0xd9   : > { %v702_v37 = vadd.f32 %v698_v35, %v686_v27 }
  0xdb   : > { %v1717_v39 = vadd.f32 %v725_v36, %v702_v37 }
  0xdd   : > { %v730_v42 = vadd.f32 %v1717_v39, %v1713_v28  ;;  %v739_v43 = vmul.f32 %v1717_v39, %v1717_v39  ;;  %v749_v44 = vmax.f32 %v1705_v63, %v1717_v39 }
  0xdf   : > { %v731_v46 = vrot.slane %v730_v42, 4  ;;  %v740_v47 = vadd.f32 %v739_v43, %v738_v41  ;;  %v761_v48 = vpop.f32.mrf.mxu2  ;;  %v775_v49 = vpop.f32.mrf.mxu3 }
  0xe0   : > { %v787_v50 = vpop.f32.mrf.mxu0  ;;  %v803_v51 = vpop.f32.mrf.mxu1  ;;  %v776_v21 = vadd.f32 %v775_v49, %v761_v48 }
  0xe1   : > { %v732_v53 = vadd.f32 %v731_v46, %v730_v42  ;;  %v741_v54 = vrot.slane %v740_v47, 4  ;;  %v792_v24 = vadd.f32 %v787_v50, %v774_v22 }
  0xe3   : > { %v733_v57 = vrot.slane %v732_v53, 2  ;;  %v742_v58 = vadd.f32 %v741_v54, %v740_v47  ;;  %v808_v34 = vadd.f32 %v803_v51, %v792_v24 }
  0xe5   : > { %v734_v60 = vadd.f32 %v733_v57, %v732_v53  ;;  %v743_v61 = vrot.slane %v742_v58, 2 }
  0xe7   : > { %v735_v0 = vrot.slane %v734_v60, 1  ;;  %v744_v1 = vadd.f32 %v743_v61, %v742_v58  ;;  %v819_v2 = vpop.f32.mrf.mxu2  ;;  %v835_v3 = vpop.f32.mrf.mxu3 }
  0xe8   : > { %v789_v4 = vpop.f32.mrf.mxu0  ;;  %v805_v5 = vpop.f32.mrf.mxu1  ;;  %v824_v36 = vadd.f32 %v819_v2, %v808_v34 }
  0xe9   : > { %v736_v7 = vadd.f32 %v735_v0, %v734_v60  ;;  %v745_v8 = vrot.slane %v744_v1, 1  ;;  %v793_v23 = vadd.f32 %v789_v4, %v776_v21 }
  0xea   : > { %v840_v42 = vadd.f32 %v835_v3, %v824_v36 }
  0xeb   : > { %v1727_v10 = vadd.f32 %v736_v7, %v545_v6  ;;  %v746_v11 = vadd.f32 %v745_v8, %v744_v1  ;;  %v809_v27 = vadd.f32 %v805_v5, %v793_v23 }
  0xed   : > { %v1729_v12 = vadd.f32 %v746_v11, %v555_v9 }
  0xef   : > { %v821_v13 = vpop.f32.mrf.mxu2  ;;  %v837_v14 = vpop.f32.mrf.mxu3 }
  0xf0   : > { %v862_v15 = vpop.f32.mrf.mxu0  ;;  %v889_v16 = vpop.f32.mrf.mxu1  ;;  %v825_v35 = vadd.f32 %v821_v13, %v809_v27 }
  0xf1   : > { %v867_v47 = vadd.f32 %v862_v15, %v840_v42 }
  0xf2   : > { %v841_v37 = vadd.f32 %v837_v14, %v825_v35 }
  0xf3   : > { %v894_v49 = vadd.f32 %v889_v16, %v867_v47 }
  0xf7   : > { %v916_v17 = vpop.f32.mrf.mxu2  ;;  %v952_v18 = vpop.f32.mrf.mxu3 }
  0xf8   : > { %v864_v19 = vpop.f32.mrf.mxu0  ;;  %v891_v20 = vpop.f32.mrf.mxu1  ;;  %v921_v51 = vadd.f32 %v916_v17, %v894_v49 }
  0xf9   : > { %v868_v43 = vadd.f32 %v864_v19, %v841_v37 }
  0xfa   : > { %v931_v0 = vmul.f32 %v921_v51, %v921_v51  ;;  %v941_v11 = vmax.f32 %v748_v30, %v921_v51 }
  0xfb   : > { %v895_v33 = vadd.f32 %v891_v20, %v868_v43 }
  0xff   : > { %v918_v25 = vpop.f32.mrf.mxu2  ;;  %v954_v26 = vpop.f32.mrf.mxu3 }
 0x100   : > { %v966_v29 = vpop.f32.mrf.mxu0  ;;  %v980_v31 = vpop.f32.mrf.mxu1  ;;  %v922_v50 = vadd.f32 %v918_v25, %v895_v33 }
 0x101   : > { %v967_v38 = vadd.f32 %v966_v29, %v952_v18 }
 0x102   : > { %v932_v58 = vmul.f32 %v922_v50, %v922_v50  ;;  %v923_v61 = vadd.f32 %v922_v50, %v921_v51  ;;  %v942_v56 = vmax.f32 %v749_v44, %v922_v50 }
 0x103   : > { %v985_v32 = vadd.f32 %v980_v31, %v967_v38 }
 0x104   : > { %v933_v2 = vadd.f32 %v932_v58, %v931_v0  ;;  %v924_v4 = vrot.slane %v923_v61, 4 }
 0x106   : > { %v934_v13 = vrot.slane %v933_v2, 4  ;;  %v925_v16 = vadd.f32 %v924_v4, %v923_v61 }
 0x107   : > { %v996_v40 = vpop.f32.mrf.mxu2  ;;  %v1012_v41 = vpop.f32.mrf.mxu3 }
 0x108   : > { %v968_v45 = vpop.f32.mrf.mxu0  ;;  %v982_v46 = vpop.f32.mrf.mxu1  ;;  %v1001_v48 = vadd.f32 %v996_v40, %v985_v32  ;;  %v935_v19 = vadd.f32 %v934_v13, %v933_v2  ;;  %v926_v21 = vrot.slane %v925_v16, 2 }
 0x109   : > { %v969_v52 = vadd.f32 %v968_v45, %v954_v26 }
 0x10a   : > { %v1017_v55 = vadd.f32 %v1012_v41, %v1001_v48  ;;  %v936_v25 = vrot.slane %v935_v19, 2  ;;  %v927_v30 = vadd.f32 %v926_v21, %v925_v16 }
 0x10b   : > { %v986_v59 = vadd.f32 %v982_v46, %v969_v52 }
 0x10c   : > { %v937_v34 = vadd.f32 %v936_v25, %v935_v19  ;;  %v928_v37 = vrot.slane %v927_v30, 1 }
 0x10e   : > { %v938_v41 = vrot.slane %v937_v34, 1  ;;  %v929_v45 = vadd.f32 %v928_v37, %v927_v30 }
 0x10f   : > { %v998_v53 = vpop.f32.mrf.mxu2  ;;  %v1014_v54 = vpop.f32.mrf.mxu3 }
 0x110   : > { %v1028_v57 = vpop.f32.mrf.mxu0  ;;  %v1044_v62 = vpop.f32.mrf.mxu1  ;;  %v1002_v1 = vadd.f32 %v998_v53, %v986_v59  ;;  %v939_v39 = vadd.f32 %v938_v41, %v937_v34  ;;  %v930_v32 = vadd.f32 %v929_v45, %v1727_v10 }
 0x111   : > { %v1033_v60 = vadd.f32 %v1028_v57, %v1017_v55 }
 0x112   : > { %v1018_v7 = vadd.f32 %v1014_v54, %v1002_v1  ;;  %v940_v49 = vadd.f32 %v939_v39, %v1729_v12 }
 0x113   : > { %v1049_v3 = vadd.f32 %v1044_v62, %v1033_v60 }
 0x117   : > { %v1060_v5 = vpop.f32.mrf.mxu2  ;;  %v1087_v6 = vpop.f32.mrf.mxu3 }
 0x118   : > { %v1065_v8 = vadd.f32 %v1060_v5, %v1049_v3  ;;  %v1030_v9 = vpop.f32.mrf.mxu0  ;;  %v1046_v18 = vpop.f32.mrf.mxu1 }
 0x119   : > { %v1034_v15 = vadd.f32 %v1030_v9, %v1018_v7 }
 0x11a   : > { %v1092_v14 = vadd.f32 %v1087_v6, %v1065_v8 }
 0x11b   : > { %v1050_v20 = vadd.f32 %v1046_v18, %v1034_v15 }
 0x11c   : > { %v1112_v17 = vmax.f32 %v941_v11, %v1092_v14  ;;  %v1102_v26 = vmul.f32 %v1092_v14, %v1092_v14 }
 0x11e   : > { %1114 = vst [vmem:[%s214_s19] sm:$0xff] %v1112_v17 }
 0x11f   : > { %v1062_v22 = vpop.f32.mrf.mxu2  ;;  %v1089_v24 = vpop.f32.mrf.mxu3 }
 0x120   : > { %v1066_v23 = vadd.f32 %v1062_v22, %v1050_v20 }
 0x122   : > { %v1093_v28 = vadd.f32 %v1089_v24, %v1066_v23 }
 0x124   : > { %v1094_v27 = vadd.f32 %v1093_v28, %v1092_v14  ;;  %v1103_v29 = vmul.f32 %v1093_v28, %v1093_v28  ;;  %v1113_v31 = vmax.f32 %v942_v56, %v1093_v28 }
 0x126   : > { %v1095_v35 = vrot.slane %v1094_v27, 4  ;;  %v1104_v36 = vadd.f32 %v1103_v29, %v1102_v26  ;;  %1115 = vst [vmem:[%s214_s19 + $0x8] sm:$0xff] %v1113_v31 }
 0x128   : > { %v1096_v38 = vadd.f32 %v1095_v35, %v1094_v27  ;;  %v1105_v40 = vrot.slane %v1104_v36, 4 }
 0x12a   : > { %v1097_v42 = vrot.slane %v1096_v38, 2  ;;  %v1106_v43 = vadd.f32 %v1105_v40, %v1104_v36 }
 0x12c   : > { %v1098_v46 = vadd.f32 %v1097_v42, %v1096_v38  ;;  %v1107_v63 = vrot.slane %v1106_v43, 2 }
 0x12e   : > { %v1099_v44 = vrot.slane %v1098_v46, 1  ;;  %v1108_v47 = vadd.f32 %v1107_v63, %v1106_v43 }
 0x130   : > { %v1100_v33 = vadd.f32 %v1099_v44, %v1098_v46  ;;  %v1109_v48 = vrot.slane %v1108_v47, 1  ;;  %1119 = sbr.rel (%p1439_p5) target bundleno = 311 (0x137), region = 32 }
 0x132   : > { %v1101_v50 = vadd.f32 %v1100_v33, %v930_v32  ;;  %v1110_v52 = vadd.f32 %v1109_v48, %v1108_v47 }
 0x134   : > { %v1111_v53 = vadd.f32 %v1110_v52, %v940_v49 }
 0x135   : > { %v1519_v54 = vmov 0.0  }
 0x136   : > { %1120 = vst [vmem:[%s1765_s3] sm:$0x3] %v1519_v54 }
 0x137 PF: > { %vm1122_vm1 = vcmask 1040384  }
 0x138   : > { %v1123_v51 = vsel %vm1122_vm1, %v1101_v50, %v1111_v53 }
 0x13d   : > { %v1121_v10 = vld [vmem:[%s1765_s3] sm:$0x3] }
 0x13e   : > { %v1124_v55 = vadd.f32 %v1123_v51, %v1121_v10 }
 0x140   : > { %1125 = vst [vmem:[%s1765_s3] sm:$0x3] %v1124_v55 }
 0x141 PF: > { %s14_s14 = sadd.s32 1, %s1517_s14   ;;  %s1766_s12 = smov %s1513_s13 }
 0x142   : > { %p11_p6 = scmp.ge.s32.totalorder %s14_s14, 4   ;;  %s1767_s13 = smov %s1769_s15 }
 0x144   :  { %13 = sbr.rel (!%p11_p6) target bundleno = 2 (0x2), region = 100 }

// kernel: convnet_forward.13
= control target key start
LH: loop header
LB: loop body
LE: loop exit
PB: predicated region body
PF: predicated region fallthrough
CT: control target
= control target key end

     0   :  { %s332_s15 = smov 0   ;;  %s361_s0 = inlined_call_operand.vmem [shape: f32[2,4,128], index: 0, kind: input, shape index: {}]   ;;  %s362_s1 = inlined_call_operand.vmem [shape: f32[2,128], index: 1, kind: input, shape index: {}]   ;;  %s363_s2 = inlined_call_operand.vmem [shape: f32[1,128], index: 2, kind: input, shape index: {}]   ;;  %s364_s3 = inlined_call_operand.vmem [shape: f32[1,128], index: 3, kind: input, shape index: {}]   ;;  %s365_s4 = inlined_call_operand.vmem [shape: f32[2,4,128], index: 4, kind: output, shape index: {}]  }
   0x1 LB: > { %s280_s16 = sadd.s32 4294967295, %s305_s15   ;;  %p284_p0 = scmp.ge.s32.totalorder %s305_s15, 1  ;;  %s305_s15 = sphi %s332_s15, %s14_s15  }
   0x2   : > { %p161_p1 = scmp.lt.s32.totalorder %s305_s15, 3 }
   0x4   : > { %p162_p2 = pnand %p284_p0, %p161_p1 }
   0x5   : > { %p185_p3 = scmp.lt.s32.totalorder (!%p162_p2), %s280_s16, 1 }
   0x6   : > { %165 = sbr.rel (%p162_p2) target bundleno = 53 (0x35), region = 36 }
   0xb   : > { %v193_v0 = vld [vmem:[%s362_s1] sm:$0x1]  ;;  %v195_v1 = vld [vmem:[%s362_s1 + $0x1] sm:$0x1]  ;;  %s367_s16 = smov (!%p185_p3, %s280_s16), 1 }
   0xc   : > { %v194_v2 = vmul.f32 0.03125, %v193_v0  ;;  %v196_v3 = vmul.f32 0.03125, %v195_v1  ;;  %s285_s21 = sshll.u32 %s367_s16, 2  ;;  %v200_v13 = vld [vmem:[%s363_s2] sm:$0x1] }
   0xd   : > { %s188_s26 = scalar_lea.vmem %s361_s0, %s285_s21  ;;  %v213_v17 = vld [vmem:[%s364_s3] sm:$0x1]  ;;  %s192_s5 = scalar_lea.vmem %s365_s4, %s285_s21 }
   0xe   : > { %v197_v4 = vmul.f32 %v194_v2, %v194_v2  ;;  %v216_v18 = vld [vmem:[%s188_s26] sm:$0xf] }
  0x10   : > { %v198_v5 = vsub.f32 %v196_v3, %v197_v4 }
  0x12   : > { %v199_v6 = vmax.f32 %v198_v5, 0.0 }
  0x14   : > { %v201_v7 = vadd.f32 1e-05, %v199_v6 }
  0x16   : > { %297 = vrsqrt.f32 %v201_v7  ;;  %vm208_vm0 = vweird.f32 %v201_v7 }
  0x1c   : > { %v298_v8 = vpop.eup %297 }
  0x1d   : > { %v203_v9 = vmul.f32 %v298_v8, %v201_v7  ;;  %vm209_vm1 = vweird.f32 %v298_v8 }
  0x1e   : > { %vm210_vm2 = vmor %vm208_vm0, %vm209_vm1 }
  0x1f   : > { %v204_v10 = vmul.f32 %v298_v8, %v203_v9 }
  0x21   : > { %v205_v11 = vmul.f32 0.5, %v204_v10 }
  0x23   : > { %v206_v12 = vsub.f32 1.5, %v205_v11 }
  0x25   : > { %v207_v14 = vmul.f32 %v298_v8, %v206_v12 }
  0x27   : > { %v211_v15 = vsel %vm210_vm2, %v298_v8, %v207_v14 }
  0x28   : > { %v212_v16 = vmul.f32 %v211_v15, %v200_v13 }
  0x2a   : > { %v214_v19 = vmul.f32 %v212_v16, %v194_v2  ;;  %v218_v20 = vperm.slane %v212_v16, 0 }
  0x2c   : > { %v215_v21 = vsub.f32 %v213_v17, %v214_v19  ;;  %v220_v22 = vmul.f32 %v218_v20, %v216_v18 }
  0x2e   : > { %v222_v23 = vperm.slane %v215_v21, 0 }
  0x30   : > { %v224_v24 = vadd.f32 %v222_v23, %v220_v22 }
  0x32   : > { %v225_v25 = vmax.f32 %v224_v24, 0.0 }
  0x34   : > { %226 = vst [vmem:[%s192_s5] sm:$0xf] %v225_v25 }
  0x35 PF: > { %s14_s15 = sadd.s32 1, %s305_s15  }
  0x36   : > { %p11_p4 = scmp.ge.s32.totalorder %s14_s15, 4  }
  0x38   :  { %13 = sbr.rel (!%p11_p4) target bundleno = 1 (0x1), region = 66 }

// kernel: convnet_forward.12
= control target key start
LH: loop header
LB: loop body
LE: loop exit
PB: predicated region body
PF: predicated region fallthrough
CT: control target
= control target key end

     0   :  { %s1268_s12 = smov 0   ;;  %s1270_s13 = smov 0   ;;  %s1483_s0 = inlined_call_operand.vmem [shape: bf16[2,16,4,16], index: 0, kind: input, shape index: {}]   ;;  %s1484_s1 = inlined_call_operand.vmem [shape: bf16[9,16,128], index: 1, kind: input, shape index: {}]   ;;  %s1485_s2 = inlined_call_operand.vmem [shape: f32[2,4,128], index: 2, kind: output, shape index: {0}]   ;;  %s1486_s3 = inlined_call_operand.vmem [shape: f32[2,128], index: 3, kind: output, shape index: {1}]  }
   0x1   :  { %s1272_s14 = smov 0  }
   0x2 LB: > { %s23_s15 = sadd.s32 1, %s1241_s13  ;;  %p1077_p0 = scmp.ge.s32.totalorder %s1245_s14, 1  ;;  %s1245_s14 = sphi %s1272_s14, %s14_s14   ;;  %s1241_s13 = sphi %s1270_s13, %s1488_s13   ;;  %s1237_s12 = sphi %s1268_s12, %s1487_s12  }
   0x3   : > { %p24_p1 = scmp.ge.s32.totalorder %s23_s15, 2  ;;  %p163_p2 = scmp.lt.s32.totalorder %s1245_s14, 3 }
   0x5   : > { %s1490_s15 = smov (%p24_p1, %s23_s15), 0  ;;  %p164_p3 = pnand %p1077_p0, %p163_p2 }
   0x6   : > { %p197_p4 = scmp.lt.s32.totalorder (!%p164_p3), %s1237_s12, 1  ;;  %p1184_p5 = scmp.ne.s32.totalorder (!%p164_p3), %s1237_s12, 0 }
   0x7   : > { %167 = sbr.rel (%p164_p3) target bundleno = 312 (0x138), region = 28 }
   0xc   : > { %v1291_v0 = vld [vmem:[%s1484_s1 + $0x8] sm:$0xff]  ;;  %v1296_v1 = vld [vmem:[%s1484_s1] sm:$0xff]  ;;  %v1301_v2 = vld [vmem:[%s1484_s1 + $0x10] sm:$0xff]  ;;  %s1322_s28 = scalar_select %p197_p4, %s1237_s12, 1  ;;  %vm253_vm0 = vcmask 130048   ;;  %vm467_vm1 = vcmask 1043456  }
   0xd   : > { %v1307_v3 = vld [vmem:[%s1484_s1 + $0x18] sm:$0xff]  ;;  %v1312_v4 = vld [vmem:[%s1484_s1 + $0x30] sm:$0xff]  ;;  %v1317_v5 = vld [vmem:[%s1484_s1 + $0x20] sm:$0xff]  ;;  %264 = vmatpush.bf16.msra.mxu0 %v1291_v0  ;;  %286 = vmatpush.bf16.msra.mxu1 %v1296_v1 }
   0xe   : > { %v1327_v6 = vld [vmem:[%s1484_s1 + $0x38] sm:$0xff]  ;;  %v1332_v7 = vld [vmem:[%s1484_s1 + $0x28] sm:$0xff]  ;;  %310 = vmatpush.bf16.msra.mxu2 %v1301_v2  ;;  %335 = vmatpush.bf16.msra.mxu3 %v1307_v3  ;;  %s1188_s6 = sshll.u32 %s1322_s28, 5  ;;  %v1349_v8 = vld [vmem:[%s1484_s1 + $0x40] sm:$0xff]  ;;  %s1080_s16 = sshll.u32 %s1322_s28, 2 }
   0xf   : > { %s1342_s9 = scalar_lea.vmem %s1483_s0, %s1188_s6  ;;  %s212_s19 = scalar_lea.vmem %s1485_s2, %s1080_s16 }
  0x10   : > { %v1097_v9 = vld [vmem:[%s1342_s9 + $0x8] sm:$0x3]  ;;  %v244_v10 = vld [vmem:[%s1342_s9] sm:$0x3]  ;;  %v1108_v11 = vld [vmem:[%s1342_s9 + $0x2] sm:$0x3] }
  0x11   : > { %360 = vmatpush.bf16.msrb.mxu0 %v1317_v5  ;;  %385 = vmatpush.bf16.msrb.mxu1 %v1332_v7  ;;  %v1114_v12 = vld [vmem:[%s1342_s9 + $0x10] sm:$0x3]  ;;  %v1120_v13 = vld [vmem:[%s1342_s9 + $0x18] sm:$0x3]  ;;  %v1126_v14 = vld [vmem:[%s1342_s9 + $0x12] sm:$0x3] }
  0x12   : > { %410 = vmatpush.bf16.msrb.mxu2 %v1312_v4  ;;  %435 = vmatpush.bf16.msrb.mxu3 %v1327_v6  ;;  %v1132_v15 = vld [vmem:[%s1342_s9 + $0x4] sm:$0x3]  ;;  %v1138_v16 = vld [vmem:[%s1342_s9 + $0xc] sm:$0x3]  ;;  %v1144_v17 = vld [vmem:[%s1342_s9 + $0x6] sm:$0x3] }
  0x13   : > { %1102 = vmatmul.msk.bf16.vlgmr.msra.gmra.mxu0 %vm253_vm0, %v1097_v9  ;;  %1107 = vmatmul.msk.bf16.vlgmr.msra.gmra.mxu1 %vm253_vm0, %v244_v10  ;;  %v1152_v18 = vld [vmem:[%s1342_s9 + $0xa] sm:$0x3]  ;;  %v1156_v19 = vld [vmem:[%s1342_s9 + $0x1a] sm:$0x3]  ;;  %v1160_v20 = vld [vmem:[%s1342_s9 + $0xe] sm:$0x3] }
  0x14   : > { %1113 = vmatmul.msk.bf16.vlgmr.msra.gmra.mxu2 %vm253_vm0, %v1108_v11  ;;  %1119 = vmatmul.msk.bf16.vlgmr.msra.gmra.mxu3 %vm253_vm0, %v1114_v12  ;;  %v1168_v21 = vld [vmem:[%s1342_s9 + $0x14] sm:$0x3]  ;;  %v1170_v22 = vld [vmem:[%s1342_s9 + $0x1c] sm:$0x3]  ;;  %v1172_v23 = vld [vmem:[%s1342_s9 + $0x16] sm:$0x3] }
  0x15   : > { %460 = vmatpush.bf16.msra.mxu0 %v1349_v8  ;;  %492 = vmatpush.bf16.msra.mxu1 %v1291_v0  ;;  %v1182_v27 = vld [vmem:[%s1342_s9 + $0x1e] sm:$0x3] }
  0x16   : > { %505 = vmatpush.bf16.msra.mxu2 %v1296_v1  ;;  %523 = vmatpush.bf16.msra.mxu3 %v1301_v2 }
  0x23   : > { %1125 = vmatmul.msk.bf16.vlgmr.msrb.gmra.mxu0 %vm253_vm0, %v1120_v13  ;;  %1131 = vmatmul.msk.bf16.vlgmr.msrb.gmra.mxu1 %vm253_vm0, %v1126_v14 }
  0x24   : > { %1137 = vmatmul.msk.bf16.vlgmr.msrb.gmra.mxu2 %vm253_vm0, %v1132_v15  ;;  %1143 = vmatmul.msk.bf16.vlgmr.msrb.gmra.mxu3 %vm253_vm0, %v1138_v16 }
  0x25   : > { %570 = vmatpush.bf16.msrb.mxu2 %v1332_v7  ;;  %537 = vmatpush.bf16.msrb.mxu0 %v1307_v3 }
  0x26   : > { %584 = vmatpush.bf16.msrb.mxu3 %v1312_v4  ;;  %551 = vmatpush.bf16.msrb.mxu1 %v1317_v5 }
  0x33   : > { %1149 = vmatmul.msk.bf16.vlgmr.msra.gmra.mxu0 %vm253_vm0, %v1144_v17  ;;  %1150 = vmatmul.msk.bf16.vlgmr.msra.gmra.mxu1 %vm253_vm0, %v1108_v11 }
  0x34   : > { %1151 = vmatmul.msk.bf16.vlgmr.msra.gmra.mxu2 %vm253_vm0, %v1097_v9  ;;  %1153 = vmatmul.msk.bf16.vlgmr.msra.gmra.mxu3 %vm253_vm0, %v1152_v18 }
  0x35   : > { %649 = vmatpush.bf16.msra.mxu2 %v1291_v0  ;;  %598 = vmatpush.bf16.msra.mxu0 %v1327_v6 }
  0x36   : > { %662 = vmatpush.bf16.msra.mxu3 %v1296_v1  ;;  %617 = vmatpush.bf16.msra.mxu1 %v1349_v8 }
  0x43   : > { %1154 = vmatmul.msk.bf16.vlgmr.msrb.gmra.mxu0 %vm253_vm0, %v1120_v13  ;;  %1155 = vmatmul.msk.bf16.vlgmr.msrb.gmra.mxu1 %vm253_vm0, %v1126_v14 }
  0x44   : > { %1157 = vmatmul.msk.bf16.vlgmr.msrb.gmra.mxu2 %vm253_vm0, %v1156_v19  ;;  %1158 = vmatmul.msk.bf16.vlgmr.msrb.gmra.mxu3 %vm253_vm0, %v1138_v16 }
  0x45   : > { %703 = vmatpush.bf16.msrb.mxu2 %v1317_v5  ;;  %675 = vmatpush.bf16.msrb.mxu0 %v1301_v2 }
  0x46   : > { %717 = vmatpush.bf16.msrb.mxu3 %v1332_v7  ;;  %689 = vmatpush.bf16.msrb.mxu1 %v1307_v3 }
  0x53   : > { %1159 = vmatmul.msk.bf16.vlgmr.msra.gmra.mxu0 %vm253_vm0, %v1144_v17  ;;  %1161 = vmatmul.msk.bf16.vlgmr.msra.gmra.mxu1 %vm253_vm0, %v1160_v20 }
  0x54   : > { %1162 = vmatmul.msk.bf16.vlgmr.msra.gmra.mxu2 %vm253_vm0, %v1120_v13  ;;  %1163 = vmatmul.msk.bf16.vlgmr.msra.gmra.mxu3 %vm253_vm0, %v1114_v12 }
  0x55   : > { %774 = vmatpush.bf16.msra.mxu2 %v1349_v8  ;;  %736 = vmatpush.bf16.msra.mxu0 %v1312_v4 }
  0x56   : > { %806 = vmatpush.bf16.msra.mxu3 %v1291_v0  ;;  %755 = vmatpush.bf16.msra.mxu1 %v1327_v6 }
  0x63   : > { %1164 = vmatmul.msk.bf16.vlgmr.msrb.gmra.mxu0 %vm253_vm0, %v1126_v14  ;;  %1165 = vmatmul.msk.bf16.vlgmr.msrb.gmra.mxu1 %vm253_vm0, %v1132_v15 }
  0x64   : > { %1166 = vmatmul.msk.bf16.vlgmr.msrb.gmra.mxu2 %vm253_vm0, %v1138_v16  ;;  %1167 = vmatmul.msk.bf16.vlgmr.msrb.gmra.mxu3 %vm253_vm0, %v1144_v17 }
  0x65   : > { %846 = vmatpush.bf16.msrb.mxu2 %v1307_v3  ;;  %819 = vmatpush.bf16.msrb.mxu0 %v1296_v1 }
  0x66   : > { %860 = vmatpush.bf16.msrb.mxu3 %v1317_v5  ;;  %832 = vmatpush.bf16.msrb.mxu1 %v1301_v2 }
  0x73   : > { %1169 = vmatmul.msk.bf16.vlgmr.msra.gmra.mxu0 %vm253_vm0, %v1168_v21  ;;  %1171 = vmatmul.msk.bf16.vlgmr.msra.gmra.mxu1 %vm253_vm0, %v1170_v22 }
  0x74   : > { %1173 = vmatmul.msk.bf16.vlgmr.msra.gmra.mxu2 %vm253_vm0, %v1172_v23  ;;  %1174 = vmatmul.msk.bf16.vlgmr.msra.gmra.mxu3 %vm253_vm0, %v1126_v14 }
  0x75   : > { %902 = vmatpush.bf16.msra.mxu2 %v1327_v6  ;;  %874 = vmatpush.bf16.msra.mxu0 %v1332_v7 }
  0x76   : > { %921 = vmatpush.bf16.msra.mxu3 %v1349_v8  ;;  %888 = vmatpush.bf16.msra.mxu1 %v1312_v4 }
  0x83   : > { %1175 = vmatmul.msk.bf16.vlgmr.msrb.gmra.mxu0 %vm253_vm0, %v1120_v13  ;;  %1176 = vmatmul.msk.bf16.vlgmr.msrb.gmra.mxu1 %vm253_vm0, %v1156_v19 }
  0x84   : > { %1177 = vmatmul.msk.bf16.vlgmr.msrb.gmra.mxu2 %vm253_vm0, %v1138_v16  ;;  %1178 = vmatmul.msk.bf16.vlgmr.msrb.gmra.mxu3 %vm253_vm0, %v1144_v17 }
  0x90   : > { %v266_v24 = vpop.f32.mrf.mxu0  ;;  %v288_v25 = vpop.f32.mrf.mxu1 }
  0x91   : > { %v289_v26 = vadd.f32 %v288_v25, %v266_v24 }
  0x93   : > { %1179 = vmatmul.msk.bf16.vlgmr.msra.gmra.mxu0 %vm253_vm0, %v1160_v20  ;;  %1180 = vmatmul.msk.bf16.vlgmr.msra.gmra.mxu1 %vm253_vm0, %v1170_v22 }
  0x94   : > { %1181 = vmatmul.msk.bf16.vlgmr.msra.gmra.mxu2 %vm253_vm0, %v1172_v23  ;;  %1183 = vmatmul.msk.bf16.vlgmr.msra.gmra.mxu3 %vm253_vm0, %v1182_v27 }
  0x97   : > { %v312_v28 = vpop.f32.mrf.mxu2  ;;  %v337_v29 = vpop.f32.mrf.mxu3 }
  0x98   : > { %v316_v30 = vadd.f32 %v312_v28, %v289_v26  ;;  %v268_v31 = vpop.f32.mrf.mxu0  ;;  %v290_v32 = vpop.f32.mrf.mxu1 }
  0x9a   : > { %v341_v33 = vadd.f32 %v337_v29, %v316_v30 }
  0x9f   : > { %v314_v34 = vpop.f32.mrf.mxu2  ;;  %v339_v35 = vpop.f32.mrf.mxu3 }
  0xa0   : > { %v362_v36 = vpop.f32.mrf.mxu0  ;;  %v387_v37 = vpop.f32.mrf.mxu1 }
  0xa1   : > { %v366_v38 = vadd.f32 %v362_v36, %v341_v33 }
  0xa3   : > { %v391_v39 = vadd.f32 %v387_v37, %v366_v38 }
  0xa7   : > { %v412_v40 = vpop.f32.mrf.mxu2  ;;  %v437_v41 = vpop.f32.mrf.mxu3 }
  0xa8   : > { %v416_v42 = vadd.f32 %v412_v40, %v391_v39  ;;  %v364_v43 = vpop.f32.mrf.mxu0  ;;  %v389_v44 = vpop.f32.mrf.mxu1 }
  0xaa   : > { %v441_v45 = vadd.f32 %v437_v41, %v416_v42 }
  0xaf   : > { %v414_v46 = vpop.f32.mrf.mxu2  ;;  %v439_v47 = vpop.f32.mrf.mxu3 }
  0xb0   : > { %v462_v48 = vpop.f32.mrf.mxu0  ;;  %v494_v49 = vpop.f32.mrf.mxu1 }
  0xb1   : > { %v1431_v50 = vadd.f32 %v462_v48, %v441_v45 }
  0xb3   : > { %v476_v63 = vmul.f32 %v1431_v50, %v1431_v50  ;;  %v468_v5 = vsel %vm467_vm1, %v1431_v50, 0.0 }
  0xb4   : > { %v469_v8 = vrot.slane %v468_v5, 4 }
  0xb5   : > { %v477_v7 = vsel %vm467_vm1, %v476_v63, 0.0 }
  0xb6   : > { %v478_v9 = vrot.slane %v477_v7, 4  ;;  %v470_v12 = vadd.f32 %v469_v8, %v468_v5 }
  0xb7   : > { %v507_v51 = vpop.f32.mrf.mxu2  ;;  %v525_v52 = vpop.f32.mrf.mxu3 }
  0xb8   : > { %v508_v53 = vadd.f32 %v507_v51, %v494_v49  ;;  %v464_v54 = vpop.f32.mrf.mxu0  ;;  %v496_v55 = vpop.f32.mrf.mxu1  ;;  %v479_v16 = vadd.f32 %v478_v9, %v477_v7  ;;  %v471_v18 = vrot.slane %v470_v12, 2 }
  0xba   : > { %v529_v56 = vadd.f32 %v525_v52, %v508_v53  ;;  %v480_v22 = vrot.slane %v479_v16, 2  ;;  %v472_v27 = vadd.f32 %v471_v18, %v470_v12 }
  0xbc   : > { %v481_v32 = vadd.f32 %v480_v22, %v479_v16  ;;  %v473_v35 = vrot.slane %v472_v27, 1 }
  0xbe   : > { %v482_v38 = vrot.slane %v481_v32, 1  ;;  %v474_v43 = vadd.f32 %v473_v35, %v472_v27 }
  0xbf   : > { %v509_v57 = vpop.f32.mrf.mxu2  ;;  %v527_v58 = vpop.f32.mrf.mxu3 }
  0xc0   : > { %v539_v59 = vpop.f32.mrf.mxu0  ;;  %v553_v60 = vpop.f32.mrf.mxu1  ;;  %v483_v48 = vadd.f32 %v482_v38, %v481_v32 }
  0xc1   : > { %v543_v61 = vadd.f32 %v539_v59, %v529_v56 }
  0xc3   : > { %v557_v62 = vadd.f32 %v553_v60, %v543_v61 }
  0xc7   : > { %v572_v0 = vpop.f32.mrf.mxu2  ;;  %v586_v1 = vpop.f32.mrf.mxu3 }
  0xc8   : > { %v576_v2 = vadd.f32 %v572_v0, %v557_v62  ;;  %v541_v3 = vpop.f32.mrf.mxu0  ;;  %v555_v4 = vpop.f32.mrf.mxu1 }
  0xca   : > { %v590_v6 = vadd.f32 %v586_v1, %v576_v2 }
  0xcf   : > { %v574_v10 = vpop.f32.mrf.mxu2  ;;  %v588_v11 = vpop.f32.mrf.mxu3 }
  0xd0   : > { %v600_v13 = vpop.f32.mrf.mxu0  ;;  %v619_v14 = vpop.f32.mrf.mxu1 }
  0xd1   : > { %v604_v15 = vadd.f32 %v600_v13, %v590_v6 }
  0xd3   : > { %v1438_v17 = vadd.f32 %v619_v14, %v604_v15 }
  0xd5   : > { %v624_v19 = vsel %vm467_vm1, %v1438_v17, 0.0  ;;  %v632_v20 = vmul.f32 %v1438_v17, %v1438_v17  ;;  %v641_v21 = vmax.f32 %v1431_v50, %v1438_v17 }
  0xd6   : > { %v625_v23 = vrot.slane %v624_v19, 4 }
  0xd7   : > { %v633_v24 = vsel %vm467_vm1, %v632_v20, 0.0  ;;  %v651_v25 = vpop.f32.mrf.mxu2  ;;  %v664_v26 = vpop.f32.mrf.mxu3 }
  0xd8   : > { %v626_v28 = vadd.f32 %v625_v23, %v624_v19  ;;  %v634_v29 = vrot.slane %v633_v24, 4  ;;  %v602_v30 = vpop.f32.mrf.mxu0  ;;  %v621_v31 = vpop.f32.mrf.mxu1  ;;  %v665_v61 = vadd.f32 %v664_v26, %v651_v25 }
  0xda   : > { %v627_v33 = vrot.slane %v626_v28, 2  ;;  %v635_v34 = vadd.f32 %v634_v29, %v633_v24 }
  0xdc   : > { %v628_v36 = vadd.f32 %v627_v33, %v626_v28  ;;  %v636_v37 = vrot.slane %v635_v34, 2 }
  0xde   : > { %v629_v39 = vrot.slane %v628_v36, 1  ;;  %v637_v40 = vadd.f32 %v636_v37, %v635_v34 }
  0xdf   : > { %v653_v41 = vpop.f32.mrf.mxu2  ;;  %v666_v42 = vpop.f32.mrf.mxu3 }
  0xe0   : > { %v630_v44 = vadd.f32 %v629_v39, %v628_v36  ;;  %v638_v45 = vrot.slane %v637_v40, 1  ;;  %v677_v46 = vpop.f32.mrf.mxu0  ;;  %v691_v47 = vpop.f32.mrf.mxu1 }
  0xe1   : > { %v681_v62 = vadd.f32 %v677_v46, %v665_v61 }
  0xe2   : > { %v1447_v49 = vadd.f32 %v630_v44, %v474_v43  ;;  %v639_v51 = vadd.f32 %v638_v45, %v637_v40 }
  0xe3   : > { %v695_v1 = vadd.f32 %v691_v47, %v681_v62 }
  0xe4   : > { %v1449_v52 = vadd.f32 %v639_v51, %v483_v48 }
  0xe7   : > { %v705_v53 = vpop.f32.mrf.mxu2  ;;  %v719_v54 = vpop.f32.mrf.mxu3 }
  0xe8   : > { %v679_v55 = vpop.f32.mrf.mxu0  ;;  %v693_v56 = vpop.f32.mrf.mxu1  ;;  %v709_v4 = vadd.f32 %v705_v53, %v695_v1 }
  0xea   : > { %v723_v5 = vadd.f32 %v719_v54, %v709_v4 }
  0xef   : > { %v707_v57 = vpop.f32.mrf.mxu2  ;;  %v721_v58 = vpop.f32.mrf.mxu3 }
  0xf0   : > { %v738_v59 = vpop.f32.mrf.mxu0  ;;  %v757_v60 = vpop.f32.mrf.mxu1 }
  0xf1   : > { %v742_v8 = vadd.f32 %v738_v59, %v723_v5 }
  0xf3   : > { %v761_v11 = vadd.f32 %v757_v60, %v742_v8 }
  0xf7   : > { %v776_v63 = vpop.f32.mrf.mxu2  ;;  %v808_v0 = vpop.f32.mrf.mxu3 }
  0xf8   : > { %v740_v2 = vpop.f32.mrf.mxu0  ;;  %v759_v3 = vpop.f32.mrf.mxu1  ;;  %v780_v12 = vadd.f32 %v776_v63, %v761_v11 }
  0xfa   : > { %v789_v19 = vmul.f32 %v780_v12, %v780_v12  ;;  %v781_v22 = vsel %vm467_vm1, %v780_v12, 0.0  ;;  %v798_v43 = vmax.f32 %v641_v21, %v780_v12 }
  0xfb   : > { %v782_v25 = vrot.slane %v781_v22, 4 }
  0xfc   : > { %v790_v24 = vsel %vm467_vm1, %v789_v19, 0.0 }
  0xfd   : > { %v791_v31 = vrot.slane %v790_v24, 4  ;;  %v783_v33 = vadd.f32 %v782_v25, %v781_v22 }
  0xff   : > { %v778_v6 = vpop.f32.mrf.mxu2  ;;  %v810_v7 = vpop.f32.mrf.mxu3  ;;  %v792_v34 = vadd.f32 %v791_v31, %v790_v24  ;;  %v784_v36 = vrot.slane %v783_v33, 2 }
 0x100   : > { %v821_v9 = vpop.f32.mrf.mxu0  ;;  %v834_v10 = vpop.f32.mrf.mxu1 }
 0x101   : > { %v822_v13 = vadd.f32 %v821_v9, %v808_v0  ;;  %v793_v42 = vrot.slane %v792_v34, 2  ;;  %v785_v45 = vadd.f32 %v784_v36, %v783_v33 }
 0x103   : > { %v838_v20 = vadd.f32 %v834_v10, %v822_v13  ;;  %v794_v51 = vadd.f32 %v793_v42, %v792_v34  ;;  %v786_v55 = vrot.slane %v785_v45, 1 }
 0x105   : > { %v795_v21 = vrot.slane %v794_v51, 1  ;;  %v787_v60 = vadd.f32 %v786_v55, %v785_v45 }
 0x107   : > { %v848_v14 = vpop.f32.mrf.mxu2  ;;  %v862_v15 = vpop.f32.mrf.mxu3  ;;  %v796_v63 = vadd.f32 %v795_v21, %v794_v51  ;;  %v788_v2 = vadd.f32 %v787_v60, %v1447_v49 }
 0x108   : > { %v823_v16 = vpop.f32.mrf.mxu0  ;;  %v836_v18 = vpop.f32.mrf.mxu1  ;;  %v852_v23 = vadd.f32 %v848_v14, %v838_v20 }
 0x109   : > { %v797_v5 = vadd.f32 %v796_v63, %v1449_v52 }
 0x10a   : > { %v866_v28 = vadd.f32 %v862_v15, %v852_v23 }
 0x10f   : > { %v850_v26 = vpop.f32.mrf.mxu2  ;;  %v864_v27 = vpop.f32.mrf.mxu3 }
 0x110   : > { %v876_v29 = vpop.f32.mrf.mxu0  ;;  %v890_v30 = vpop.f32.mrf.mxu1 }
 0x111   : > { %v880_v32 = vadd.f32 %v876_v29, %v866_v28 }
 0x113   : > { %v894_v35 = vadd.f32 %v890_v30, %v880_v32 }
 0x117   : > { %v904_v37 = vpop.f32.mrf.mxu2  ;;  %v923_v38 = vpop.f32.mrf.mxu3 }
 0x118   : > { %v908_v39 = vadd.f32 %v904_v37, %v894_v35  ;;  %v878_v40 = vpop.f32.mrf.mxu0  ;;  %v892_v41 = vpop.f32.mrf.mxu1 }
 0x11a   : > { %v927_v44 = vadd.f32 %v923_v38, %v908_v39 }
 0x11c   : > { %v928_v46 = vsel %vm467_vm1, %v927_v44, 0.0  ;;  %v936_v47 = vmul.f32 %v927_v44, %v927_v44  ;;  %v945_v48 = vmax.f32 %v798_v43, %v927_v44 }
 0x11d   : > { %v929_v53 = vrot.slane %v928_v46, 4 }
 0x11e   : > { %v937_v54 = vsel %vm467_vm1, %v936_v47, 0.0  ;;  %946 = vst [vmem:[%s212_s19] sm:$0xf] %v945_v48 }
 0x11f   : > { %v930_v56 = vadd.f32 %v929_v53, %v928_v46  ;;  %v938_v57 = vrot.slane %v937_v54, 4  ;;  %v906_v50 = vpop.f32.mrf.mxu2  ;;  %v925_v17 = vpop.f32.mrf.mxu3 }
 0x121   : > { %v931_v58 = vrot.slane %v930_v56, 2  ;;  %v939_v59 = vadd.f32 %v938_v57, %v937_v54 }
 0x123   : > { %v932_v61 = vadd.f32 %v931_v58, %v930_v56  ;;  %v940_v62 = vrot.slane %v939_v59, 2 }
 0x125   : > { %v933_v0 = vrot.slane %v932_v61, 1  ;;  %v941_v1 = vadd.f32 %v940_v62, %v939_v59 }
 0x127   : > { %v934_v3 = vadd.f32 %v933_v0, %v932_v61  ;;  %v942_v4 = vrot.slane %v941_v1, 1  ;;  %950 = sbr.rel (%p1184_p5) target bundleno = 302 (0x12e), region = 32 }
 0x129   : > { %v935_v6 = vadd.f32 %v934_v3, %v788_v2  ;;  %v943_v7 = vadd.f32 %v942_v4, %v941_v1 }
 0x12b   : > { %v944_v8 = vadd.f32 %v943_v7, %v797_v5 }
 0x12c   : > { %v1247_v9 = vmov 0.0  }
 0x12d   : > { %951 = vst [vmem:[%s1486_s3] sm:$0x3] %v1247_v9 }
 0x12e PF: > { %vm953_vm2 = vcmask 1040384  }
 0x12f   : > { %v954_v10 = vsel %vm953_vm2, %v935_v6, %v944_v8 }
 0x134   : > { %v952_v49 = vld [vmem:[%s1486_s3] sm:$0x3] }
 0x135   : > { %v955_v11 = vadd.f32 %v954_v10, %v952_v49 }
 0x137   : > { %956 = vst [vmem:[%s1486_s3] sm:$0x3] %v955_v11 }
 0x138 PF: > { %s14_s14 = sadd.s32 1, %s1245_s14   ;;  %s1487_s12 = smov %s1241_s13 }
 0x139   : > { %p11_p6 = scmp.ge.s32.totalorder %s14_s14, 4   ;;  %s1488_s13 = smov %s1490_s15 }
 0x13b   :  { %13 = sbr.rel (!%p11_p6) target bundleno = 2 (0x2), region = 100 }

// kernel: convnet_forward.15
= control target key start
LH: loop header
LB: loop body
LE: loop exit
PB: predicated region body
PF: predicated region fallthrough
CT: control target
= control target key end

     0   :  { %9 = vsyncpa [#allocation3], 0  ;;  %s515_s0 = inlined_call_operand.vmem [shape: f32[2,1,128], index: 0, kind: input, shape index: {}]   ;;  %s516_s1 = inlined_call_operand.vmem [shape: f32[2,128], index: 1, kind: input, shape index: {}]   ;;  %s517_s2 = inlined_call_operand.vmem [shape: f32[1,128], index: 2, kind: input, shape index: {}]   ;;  %s518_s3 = inlined_call_operand.vmem [shape: f32[1,128], index: 3, kind: input, shape index: {}]   ;;  %s519_s4 = inlined_call_operand.hbm [shape: f32[2,1,128], index: 4, kind: output, shape index: {}]  }
   0x1   :  { %11 = vsyncpa [#allocation3 + $0x1], 0  ;;  %s418_s15 = smov 0   ;;  %s420_s16 = smov 0  }
   0x2   :  { %s422_s17 = smov 0   ;;  %s424_s18 = smov 0  }
   0x3 LB: > { %s439_s19 = sadd.s32 4294967295, %s391_s18   ;;  %s282_s20 = sadd.s32 4294967294, %s391_s18   ;;  %s391_s18 = sphi %s424_s18, %s525_s18   ;;  %s387_s17 = sphi %s422_s17, %s524_s17   ;;  %s383_s16 = sphi %s420_s16, %s523_s16   ;;  %s379_s15 = sphi %s418_s15, %s522_s15  }
   0x4   : > { %s443_s21 = sadd.s32 1, %s391_s18   ;;  %s113_s22 = sadd.s32 1, %s387_s17 }
   0x5   : > { %s110_s23 = ssub.s32 %s391_s18, %s443_s21  ;;  %p123_p0 = scmp.ne.s32.totalorder %s387_s17, %s383_s16 }
   0x6   : > { %p111_p1 = scmp.eq.s32.totalorder %s110_s23, 0  ;;  %p124_p2 = scmp.eq.s32.totalorder %s439_s19, 1 }
   0x7   : > { %p129_p3 = scmp.ne.s32.totalorder %s383_s16, %s379_s15  ;;  %p130_p4 = scmp.eq.s32.totalorder %s282_s20, 1 }
   0x8   : > { %s454_s24 = scalar_select %p111_p1, %s387_s17, %s113_s22  }
   0x9   : > { %p456_p5 = por %p124_p2, %p123_p0  ;;  %p460_p6 = por %p130_p4, %p129_p3 }
   0xa   : > { %p285_p7 = scmp.ge.s32.totalorder %s391_s18, 1  ;;  %p163_p8 = scmp.lt.s32.totalorder %s391_s18, 3 }
   0xc   : > { %p164_p9 = pnand %p285_p7, %p163_p8 }
   0xd   : > { %p186_p10 = scmp.lt.s32.totalorder (!%p164_p9), %s439_s19, 1  ;;  %s184_s11 = sand.u32 (!%p164_p9), 1, %s383_s16  }
   0xe   : > { %167 = sbr.rel (%p164_p9) target bundleno = 61 (0x3d), region = 36  ;;  %s226_s22 = scalar_lea.hbm (!%p164_p9), %s519_s4, %s439_s19 }
   0xf   : > { %s185_s23 = scalar_lea.vmem (!%p164_p9), [#allocation2], %s184_s11  ;;  %s230_s28 = sshll.u32 (!%p164_p9), %s226_s22, 4  ;;  %s231_s28 = int_to_ptr.hbm [resolvable:$true] %s230_s28 }
  0x10   : > { %s228_s27 = sshll.u32 (!%p164_p9), %s185_s23, 4  ;;  %s218_s29 = scalar_lea.sflag (!%p164_p9), [#allocation3], %s184_s11  ;;  %s229_s27 = int_to_ptr.vmem [resolvable:$true] %s228_s27 }
  0x11   : > { %s343_s30 = sshra.s32 (!%p164_p9), %s231_s28, 4  ;;  %s344_s30 = int_to_ptr.hbm [resolvable:$true] %s343_s30 }
  0x12   : > { %p350_p0 = scmp.lt.s32.totalorder (!%p164_p9), %s344_s30, %s519_s4 }
  0x13   : > { %v189_v0 = vld [vmem:[%s516_s1] sm:$0x1]  ;;  %v191_v1 = vld [vmem:[%s516_s1 + $0x1] sm:$0x1]  ;;  %s187_s5 = scalar_select %p186_p10, %s439_s19, 1 }
  0x14   : > { %v190_v2 = vmul.f32 0.125, %v189_v0  ;;  %v192_v3 = vmul.f32 0.125, %v191_v1  ;;  %v196_v13 = vld [vmem:[%s517_s2] sm:$0x1]  ;;  %s349_s19 = scalar_lea.hbm %s519_s4, 2 }
  0x15   : > { %s188_s8 = scalar_lea.vmem %s515_s0, %s187_s5  ;;  %v209_v18 = vld [vmem:[%s518_s3] sm:$0x1]  ;;  %s345_s5 = scalar_lea.hbm %s344_s30, 1 }
  0x16   : > { %v193_v4 = vmul.f32 %v190_v2, %v190_v2  ;;  %v212_v16 = vld [vmem:[%s188_s8] sm:$0x1]  ;;  %p346_p11 = scmp.ne.s32.totalorder %s344_s30, %s345_s5  ;;  %p351_p1 = scmp.lt.s32.totalorder %s349_s19, %s345_s5 }
  0x18   : > { %v194_v5 = vsub.f32 %v192_v3, %v193_v4  ;;  %p347_p12 = pnand %p346_p11, %p456_p5  ;;  %p352_p2 = por %p351_p1, %p350_p0 }
  0x1a   : > { %v195_v6 = vmax.f32 %v194_v5, 0.0  ;;  %p348_p13 = pneg %p347_p12 }
  0x1c   : > { %v197_v7 = vadd.f32 1e-05, %v195_v6  ;;  %p353_p3 = pnand %p352_p2, %p348_p13 }
  0x1e   : > { %327 = vrsqrt.f32 %v197_v7  ;;  %vm204_vm0 = vweird.f32 %v197_v7 }
  0x24   : > { %v328_v8 = vpop.eup %327 }
  0x25   : > { %v199_v9 = vmul.f32 %v328_v8, %v197_v7  ;;  %vm205_vm1 = vweird.f32 %v328_v8 }
  0x26   : > { %vm206_vm2 = vmor %vm204_vm0, %vm205_vm1 }
  0x27   : > { %v200_v10 = vmul.f32 %v328_v8, %v199_v9 }
  0x29   : > { %v201_v11 = vmul.f32 0.5, %v200_v10 }
  0x2b   : > { %v202_v12 = vsub.f32 1.5, %v201_v11 }
  0x2d   : > { %v203_v14 = vmul.f32 %v328_v8, %v202_v12 }
  0x2f   : > { %v207_v15 = vsel %vm206_vm2, %v328_v8, %v203_v14 }
  0x30   : > { %v208_v17 = vmul.f32 %v207_v15, %v196_v13 }
  0x32   : > { %v210_v19 = vmul.f32 %v208_v17, %v190_v2  ;;  %v213_v20 = vmul.f32 %v212_v16, %v208_v17 }
  0x34   : > { %v211_v21 = vsub.f32 %v209_v18, %v210_v19 }
  0x36   : > { %v214_v22 = vadd.f32 %v213_v20, %v211_v21 }
  0x38   : > { %v215_v23 = vmax.f32 %v214_v22, 0.0 }
  0x3a   : > { %216 = vst [vmem:[%s185_s23] sm:$0x1] %v215_v23 }
  0x3b   : > { %356 = shalt.err (!%p353_p3)
}
  0x3c   : > { %288 = dma.vmem_to_hbm [thread:$0]  (%p456_p5), %s229_s27, 16, %s231_s28, %s218_s29  }
  0x3d PF: > { %p294_p4 = scmp.ge.s32.totalorder %s391_s18, 2  ;;  %s242_s10 = sand.u32 1, %s379_s15  }
  0x3e   : > { %s243_s11 = scalar_lea.sflag [#allocation3], %s242_s10 }
  0x3f   : > { %p291_p7 = pnand %p294_p4, %p460_p6 }
  0x41   : > { %p292_p8 = pneg %p291_p7 }
  0x43   : > { %374 = dma.done.wait (%p292_p8), %s243_s11, 16  }
  0x44   : > { %376 = vsyncadd (%p292_p8), %s243_s11, 4294967280  ;;  %p14_p9 = scmp.ge.s32.totalorder %s443_s21, 4   ;;  %s522_s15 = smov %s383_s16 }
  0x45   : > { %s523_s16 = smov %s387_s17  ;;  %s524_s17 = smov %s454_s24 }
  0x46   : > { %s525_s18 = smov %s443_s21  ;;  %16 = sbr.rel (!%p14_p9) target bundleno = 3 (0x3), region = 71 }
  0x4b   :  { %248 = vsyncpa [#allocation3], 1 }
  0x4c   :  { %250 = vsyncpa [#allocation3 + $0x1], 1 }

// kernel: convnet_forward.14
= control target key start
LH: loop header
LB: loop body
LE: loop exit
PB: predicated region body
PF: predicated region fallthrough
CT: control target
= control target key end

     0   :  { %s1341_s12 = smov 0   ;;  %s1343_s13 = smov 0   ;;  %s1642_s0 = inlined_call_operand.vmem [shape: bf16[2,16,1,32], index: 0, kind: input, shape index: {}]   ;;  %s1643_s1 = inlined_call_operand.vmem [shape: bf16[9,32,128], index: 1, kind: input, shape index: {}]   ;;  %s1644_s2 = inlined_call_operand.vmem [shape: f32[2,1,128], index: 2, kind: output, shape index: {0}]   ;;  %s1645_s3 = inlined_call_operand.vmem [shape: f32[2,128], index: 3, kind: output, shape index: {1}]  }
   0x1   :  { %s1345_s14 = smov 0  }
   0x2 LB: > { %s23_s15 = sadd.s32 1, %s1314_s13  ;;  %p1092_p0 = scmp.ge.s32.totalorder %s1318_s14, 1  ;;  %s1318_s14 = sphi %s1345_s14, %s14_s14   ;;  %s1314_s13 = sphi %s1343_s13, %s1647_s13   ;;  %s1310_s12 = sphi %s1341_s12, %s1646_s12  }
   0x3   : > { %p24_p1 = scmp.ge.s32.totalorder %s23_s15, 2  ;;  %p162_p2 = scmp.lt.s32.totalorder %s1318_s14, 3 }
   0x5   : > { %s1649_s15 = smov (%p24_p1, %s23_s15), 0  ;;  %p163_p3 = pnand %p1092_p0, %p162_p2 }
   0x6   : > { %p194_p4 = scmp.lt.s32.totalorder (!%p163_p3), %s1310_s12, 1  ;;  %p1249_p5 = scmp.ne.s32.totalorder (!%p163_p3), %s1310_s12, 0 }
   0x7   : > { %166 = sbr.rel (%p163_p3) target bundleno = 301 (0x12d), region = 28 }
   0xc   : > { %v1364_v0 = vld [vmem:[%s1643_s1 + $0x18] sm:$0xff]  ;;  %v1369_v1 = vld [vmem:[%s1643_s1 + $0x8] sm:$0xff]  ;;  %v1387_v4 = vld [vmem:[%s1643_s1 + $0x10] sm:$0xff]  ;;  %s1395_s28 = scalar_select %p194_p4, %s1310_s12, 1  ;;  %vm272_vm0 = vcmask 261120  }
   0xd   : > { %v1374_v2 = vld [vmem:[%s1643_s1 + $0x28] sm:$0xff]  ;;  %v1380_v3 = vld [vmem:[%s1643_s1 + $0x38] sm:$0xff]  ;;  %282 = vmatpush.bf16.msra.mxu0 %v1364_v0  ;;  %310 = vmatpush.bf16.msra.mxu1 %v1369_v1  ;;  %v1392_v5 = vld [vmem:[%s1643_s1] sm:$0xff] }
   0xe   : > { %340 = vmatpush.bf16.msra.mxu2 %v1374_v2  ;;  %371 = vmatpush.bf16.msra.mxu3 %v1380_v3  ;;  %v1402_v6 = vld [vmem:[%s1643_s1 + $0x20] sm:$0xff]  ;;  %v1407_v7 = vld [vmem:[%s1643_s1 + $0x30] sm:$0xff]  ;;  %s1093_s6 = sshll.u32 %s1395_s28, 4  ;;  %v1413_v8 = vld [vmem:[%s1643_s1 + $0x68] sm:$0xff]  ;;  %s207_s10 = scalar_lea.vmem %s1644_s2, %s1395_s28 }
   0xf   : > { %v1418_v9 = vld [vmem:[%s1643_s1 + $0x78] sm:$0xff]  ;;  %s1423_s17 = scalar_lea.vmem %s1642_s0, %s1093_s6  ;;  %v1432_v12 = vld [vmem:[%s1643_s1 + $0x48] sm:$0xff]  ;;  %v1450_v16 = vld [vmem:[%s1643_s1 + $0x60] sm:$0xff] }
  0x10   : > { %v1126_v10 = vld [vmem:[%s1423_s17 + $0x4] sm:$0x1]  ;;  %v257_v11 = vld [vmem:[%s1423_s17] sm:$0x1]  ;;  %v1145_v13 = vld [vmem:[%s1423_s17 + $0x1] sm:$0x1] }
  0x11   : > { %283 = vmatpush.bf16.msra.mxu0 %v1387_v4  ;;  %311 = vmatpush.bf16.msra.mxu1 %v1392_v5  ;;  %v1438_v14 = vld [vmem:[%s1423_s17 + $0x8] sm:$0x1]  ;;  %v1443_v15 = vld [vmem:[%s1643_s1 + $0x58] sm:$0xff]  ;;  %v1455_v17 = vld [vmem:[%s1643_s1 + $0x70] sm:$0xff] }
  0x12   : > { %341 = vmatpush.bf16.msra.mxu2 %v1402_v6  ;;  %372 = vmatpush.bf16.msra.mxu3 %v1407_v7  ;;  %v1467_v18 = vld [vmem:[%s1643_s1 + $0x40] sm:$0xff]  ;;  %v1472_v19 = vld [vmem:[%s1643_s1 + $0x50] sm:$0xff]  ;;  %v1479_v20 = vld [vmem:[%s1643_s1 + $0x88] sm:$0xff] }
  0x13   : > { %v1490_v21 = vld [vmem:[%s1643_s1 + $0x80] sm:$0xff]  ;;  %v1497_v22 = vld [vmem:[%s1423_s17 + $0xc] sm:$0x1]  ;;  %v1500_v23 = vld [vmem:[%s1423_s17 + $0x9] sm:$0x1] }
  0x14   : > { %1135 = vmatmul.msk.bf16.vlgmr.msra.gmra.mxu0 %vm272_vm0, %v1126_v10  ;;  %1144 = vmatmul.msk.bf16.vlgmr.msra.gmra.mxu1 %vm272_vm0, %v257_v11  ;;  %v1185_v24 = vld [vmem:[%s1423_s17 + $0x2] sm:$0x1]  ;;  %v1504_v25 = vld [vmem:[%s1423_s17 + $0x6] sm:$0x1]  ;;  %v1522_v26 = vld [vmem:[%s1423_s17 + $0x3] sm:$0x1] }
  0x15   : > { %1154 = vmatmul.msk.bf16.vlgmr.msra.gmra.mxu2 %vm272_vm0, %v1145_v13  ;;  %1164 = vmatmul.msk.bf16.vlgmr.msra.gmra.mxu3 %vm272_vm0, %v1438_v14  ;;  %v1217_v27 = vld [vmem:[%s1423_s17 + $0x5] sm:$0x1]  ;;  %v1221_v28 = vld [vmem:[%s1423_s17 + $0xd] sm:$0x1]  ;;  %v1225_v29 = vld [vmem:[%s1423_s17 + $0x7] sm:$0x1] }
  0x16   : > { %464 = vmatpush.bf16.msrb.mxu2 %v1413_v8  ;;  %495 = vmatpush.bf16.msrb.mxu3 %v1418_v9  ;;  %v1233_v30 = vld [vmem:[%s1423_s17 + $0xa] sm:$0x1]  ;;  %v1235_v31 = vld [vmem:[%s1423_s17 + $0xe] sm:$0x1]  ;;  %v1237_v32 = vld [vmem:[%s1423_s17 + $0xb] sm:$0x1] }
  0x17   : > { %402 = vmatpush.bf16.msrb.mxu0 %v1432_v12  ;;  %433 = vmatpush.bf16.msrb.mxu1 %v1443_v15  ;;  %v1247_v36 = vld [vmem:[%s1423_s17 + $0xf] sm:$0x1] }
  0x1a   : > { %465 = vmatpush.bf16.msrb.mxu2 %v1450_v16  ;;  %496 = vmatpush.bf16.msrb.mxu3 %v1455_v17 }
  0x1b   : > { %403 = vmatpush.bf16.msrb.mxu0 %v1467_v18  ;;  %434 = vmatpush.bf16.msrb.mxu1 %v1472_v19 }
  0x1e   : > { %558 = vmatpush.bf16.msra.mxu2 %v1369_v1  ;;  %576 = vmatpush.bf16.msra.mxu3 %v1374_v2 }
  0x1f   : > { %526 = vmatpush.bf16.msra.mxu0 %v1479_v20  ;;  %545 = vmatpush.bf16.msra.mxu1 %v1364_v0 }
  0x22   : > { %559 = vmatpush.bf16.msra.mxu2 %v1392_v5  ;;  %577 = vmatpush.bf16.msra.mxu3 %v1402_v6 }
  0x23   : > { %527 = vmatpush.bf16.msra.mxu0 %v1490_v21  ;;  %546 = vmatpush.bf16.msra.mxu1 %v1387_v4 }
  0x24   : > { %1174 = vmatmul.msk.bf16.vlgmr.msrb.gmra.mxu0 %vm272_vm0, %v1497_v22  ;;  %1184 = vmatmul.msk.bf16.vlgmr.msrb.gmra.mxu1 %vm272_vm0, %v1500_v23 }
  0x25   : > { %1194 = vmatmul.msk.bf16.vlgmr.msrb.gmra.mxu2 %vm272_vm0, %v1185_v24  ;;  %1204 = vmatmul.msk.bf16.vlgmr.msrb.gmra.mxu3 %vm272_vm0, %v1504_v25 }
  0x26   : > { %623 = vmatpush.bf16.msrb.mxu2 %v1443_v15  ;;  %637 = vmatpush.bf16.msrb.mxu3 %v1413_v8 }
  0x27   : > { %590 = vmatpush.bf16.msrb.mxu0 %v1380_v3  ;;  %604 = vmatpush.bf16.msrb.mxu1 %v1432_v12 }
  0x2a   : > { %624 = vmatpush.bf16.msrb.mxu2 %v1472_v19  ;;  %638 = vmatpush.bf16.msrb.mxu3 %v1450_v16 }
  0x2b   : > { %591 = vmatpush.bf16.msrb.mxu0 %v1407_v7  ;;  %605 = vmatpush.bf16.msrb.mxu1 %v1467_v18 }
  0x34   : > { %1214 = vmatmul.msk.bf16.vlgmr.msra.gmra.mxu0 %vm272_vm0, %v1522_v26  ;;  %1215 = vmatmul.msk.bf16.vlgmr.msra.gmra.mxu1 %vm272_vm0, %v1145_v13 }
  0x35   : > { %1216 = vmatmul.msk.bf16.vlgmr.msra.gmra.mxu2 %vm272_vm0, %v1126_v10  ;;  %1218 = vmatmul.msk.bf16.vlgmr.msra.gmra.mxu3 %vm272_vm0, %v1217_v27 }
  0x36   : > { %690 = vmatpush.bf16.msra.mxu2 %v1364_v0  ;;  %703 = vmatpush.bf16.msra.mxu3 %v1369_v1 }
  0x37   : > { %651 = vmatpush.bf16.msra.mxu0 %v1418_v9  ;;  %670 = vmatpush.bf16.msra.mxu1 %v1479_v20 }
  0x3a   : > { %691 = vmatpush.bf16.msra.mxu2 %v1387_v4  ;;  %704 = vmatpush.bf16.msra.mxu3 %v1392_v5 }
  0x3b   : > { %652 = vmatpush.bf16.msra.mxu0 %v1455_v17  ;;  %671 = vmatpush.bf16.msra.mxu1 %v1490_v21 }
  0x44   : > { %1219 = vmatmul.msk.bf16.vlgmr.msrb.gmra.mxu0 %vm272_vm0, %v1497_v22  ;;  %1220 = vmatmul.msk.bf16.vlgmr.msrb.gmra.mxu1 %vm272_vm0, %v1500_v23 }
  0x45   : > { %1222 = vmatmul.msk.bf16.vlgmr.msrb.gmra.mxu2 %vm272_vm0, %v1221_v28  ;;  %1223 = vmatmul.msk.bf16.vlgmr.msrb.gmra.mxu3 %vm272_vm0, %v1504_v25 }
  0x46   : > { %744 = vmatpush.bf16.msrb.mxu2 %v1432_v12  ;;  %758 = vmatpush.bf16.msrb.mxu3 %v1443_v15 }
  0x47   : > { %716 = vmatpush.bf16.msrb.mxu0 %v1374_v2  ;;  %730 = vmatpush.bf16.msrb.mxu1 %v1380_v3 }
  0x4a   : > { %745 = vmatpush.bf16.msrb.mxu2 %v1467_v18  ;;  %759 = vmatpush.bf16.msrb.mxu3 %v1472_v19 }
  0x4b   : > { %717 = vmatpush.bf16.msrb.mxu0 %v1402_v6  ;;  %731 = vmatpush.bf16.msrb.mxu1 %v1407_v7 }
  0x54   : > { %1224 = vmatmul.msk.bf16.vlgmr.msra.gmra.mxu0 %vm272_vm0, %v1522_v26  ;;  %1226 = vmatmul.msk.bf16.vlgmr.msra.gmra.mxu1 %vm272_vm0, %v1225_v29 }
  0x55   : > { %1227 = vmatmul.msk.bf16.vlgmr.msra.gmra.mxu2 %vm272_vm0, %v1497_v22  ;;  %1228 = vmatmul.msk.bf16.vlgmr.msra.gmra.mxu3 %vm272_vm0, %v1438_v14 }
  0x56   : > { %815 = vmatpush.bf16.msra.mxu2 %v1479_v20  ;;  %835 = vmatpush.bf16.msra.mxu3 %v1364_v0 }
  0x57   : > { %777 = vmatpush.bf16.msra.mxu0 %v1413_v8  ;;  %796 = vmatpush.bf16.msra.mxu1 %v1418_v9 }
  0x5a   : > { %816 = vmatpush.bf16.msra.mxu2 %v1490_v21  ;;  %836 = vmatpush.bf16.msra.mxu3 %v1387_v4 }
  0x5b   : > { %778 = vmatpush.bf16.msra.mxu0 %v1450_v16  ;;  %797 = vmatpush.bf16.msra.mxu1 %v1455_v17 }
  0x64   : > { %1229 = vmatmul.msk.bf16.vlgmr.msrb.gmra.mxu0 %vm272_vm0, %v1500_v23  ;;  %1230 = vmatmul.msk.bf16.vlgmr.msrb.gmra.mxu1 %vm272_vm0, %v1185_v24 }
  0x65   : > { %1231 = vmatmul.msk.bf16.vlgmr.msrb.gmra.mxu2 %vm272_vm0, %v1504_v25  ;;  %1232 = vmatmul.msk.bf16.vlgmr.msrb.gmra.mxu3 %vm272_vm0, %v1522_v26 }
  0x66   : > { %875 = vmatpush.bf16.msrb.mxu2 %v1380_v3  ;;  %889 = vmatpush.bf16.msrb.mxu3 %v1432_v12 }
  0x67   : > { %848 = vmatpush.bf16.msrb.mxu0 %v1369_v1  ;;  %861 = vmatpush.bf16.msrb.mxu1 %v1374_v2 }
  0x6a   : > { %876 = vmatpush.bf16.msrb.mxu2 %v1407_v7  ;;  %890 = vmatpush.bf16.msrb.mxu3 %v1467_v18 }
  0x6b   : > { %849 = vmatpush.bf16.msrb.mxu0 %v1392_v5  ;;  %862 = vmatpush.bf16.msrb.mxu1 %v1402_v6 }
  0x74   : > { %1234 = vmatmul.msk.bf16.vlgmr.msra.gmra.mxu0 %vm272_vm0, %v1233_v30  ;;  %1236 = vmatmul.msk.bf16.vlgmr.msra.gmra.mxu1 %vm272_vm0, %v1235_v31 }
  0x75   : > { %1238 = vmatmul.msk.bf16.vlgmr.msra.gmra.mxu2 %vm272_vm0, %v1237_v32  ;;  %1239 = vmatmul.msk.bf16.vlgmr.msra.gmra.mxu3 %vm272_vm0, %v1500_v23 }
  0x76   : > { %931 = vmatpush.bf16.msra.mxu2 %v1418_v9  ;;  %950 = vmatpush.bf16.msra.mxu3 %v1479_v20 }
  0x77   : > { %903 = vmatpush.bf16.msra.mxu0 %v1443_v15  ;;  %917 = vmatpush.bf16.msra.mxu1 %v1413_v8 }
  0x7a   : > { %932 = vmatpush.bf16.msra.mxu2 %v1455_v17  ;;  %951 = vmatpush.bf16.msra.mxu3 %v1490_v21 }
  0x7b   : > { %904 = vmatpush.bf16.msra.mxu0 %v1472_v19  ;;  %918 = vmatpush.bf16.msra.mxu1 %v1450_v16 }
  0x84   : > { %1240 = vmatmul.msk.bf16.vlgmr.msrb.gmra.mxu0 %vm272_vm0, %v1497_v22  ;;  %1241 = vmatmul.msk.bf16.vlgmr.msrb.gmra.mxu1 %vm272_vm0, %v1221_v28 }
  0x85   : > { %1242 = vmatmul.msk.bf16.vlgmr.msrb.gmra.mxu2 %vm272_vm0, %v1504_v25  ;;  %1243 = vmatmul.msk.bf16.vlgmr.msrb.gmra.mxu3 %vm272_vm0, %v1522_v26 }
  0x91   : > { %v285_v33 = vpop.f32.mrf.mxu0  ;;  %v313_v34 = vpop.f32.mrf.mxu1 }
  0x92   : > { %v314_v35 = vadd.f32 %v313_v34, %v285_v33 }
  0x94   : > { %1244 = vmatmul.msk.bf16.vlgmr.msra.gmra.mxu0 %vm272_vm0, %v1225_v29  ;;  %1245 = vmatmul.msk.bf16.vlgmr.msra.gmra.mxu1 %vm272_vm0, %v1235_v31 }
  0x95   : > { %1246 = vmatmul.msk.bf16.vlgmr.msra.gmra.mxu2 %vm272_vm0, %v1237_v32  ;;  %1248 = vmatmul.msk.bf16.vlgmr.msra.gmra.mxu3 %vm272_vm0, %v1247_v36 }
  0x98   : > { %v343_v37 = vpop.f32.mrf.mxu2  ;;  %v374_v38 = vpop.f32.mrf.mxu3 }
  0x99   : > { %v347_v39 = vadd.f32 %v343_v37, %v314_v35  ;;  %v287_v40 = vpop.f32.mrf.mxu0  ;;  %v315_v41 = vpop.f32.mrf.mxu1 }
  0x9b   : > { %v378_v42 = vadd.f32 %v374_v38, %v347_v39 }
  0xa0   : > { %v345_v43 = vpop.f32.mrf.mxu2  ;;  %v376_v44 = vpop.f32.mrf.mxu3 }
  0xa1   : > { %v405_v45 = vpop.f32.mrf.mxu0  ;;  %v436_v46 = vpop.f32.mrf.mxu1 }
  0xa2   : > { %v409_v47 = vadd.f32 %v405_v45, %v378_v42 }
  0xa4   : > { %v440_v48 = vadd.f32 %v436_v46, %v409_v47 }
  0xa8   : > { %v467_v49 = vpop.f32.mrf.mxu2  ;;  %v498_v50 = vpop.f32.mrf.mxu3 }
  0xa9   : > { %v471_v51 = vadd.f32 %v467_v49, %v440_v48  ;;  %v407_v52 = vpop.f32.mrf.mxu0  ;;  %v438_v53 = vpop.f32.mrf.mxu1 }
  0xab   : > { %v502_v54 = vadd.f32 %v498_v50, %v471_v51 }
  0xb0   : > { %v469_v55 = vpop.f32.mrf.mxu2  ;;  %v500_v56 = vpop.f32.mrf.mxu3 }
  0xb1   : > { %v529_v57 = vpop.f32.mrf.mxu0  ;;  %v548_v58 = vpop.f32.mrf.mxu1 }
  0xb2   : > { %v1613_v59 = vadd.f32 %v529_v57, %v502_v54 }
  0xb4   : > { %v536_v20 = vmul.f32 %v1613_v59, %v1613_v59 }
  0xb8   : > { %v561_v60 = vpop.f32.mrf.mxu2  ;;  %v579_v61 = vpop.f32.mrf.mxu3 }
  0xb9   : > { %v562_v62 = vadd.f32 %v561_v60, %v548_v58  ;;  %v531_v63 = vpop.f32.mrf.mxu0  ;;  %v550_v0 = vpop.f32.mrf.mxu1 }
  0xbb   : > { %v583_v1 = vadd.f32 %v579_v61, %v562_v62 }
  0xc0   : > { %v563_v2 = vpop.f32.mrf.mxu2  ;;  %v581_v3 = vpop.f32.mrf.mxu3 }
  0xc1   : > { %v593_v4 = vpop.f32.mrf.mxu0  ;;  %v607_v5 = vpop.f32.mrf.mxu1 }
  0xc2   : > { %v597_v6 = vadd.f32 %v593_v4, %v583_v1 }
  0xc4   : > { %v611_v7 = vadd.f32 %v607_v5, %v597_v6 }
  0xc8   : > { %v626_v8 = vpop.f32.mrf.mxu2  ;;  %v640_v9 = vpop.f32.mrf.mxu3 }
  0xc9   : > { %v630_v10 = vadd.f32 %v626_v8, %v611_v7  ;;  %v595_v11 = vpop.f32.mrf.mxu0  ;;  %v609_v12 = vpop.f32.mrf.mxu1 }
  0xcb   : > { %v644_v13 = vadd.f32 %v640_v9, %v630_v10 }
  0xd0   : > { %v628_v14 = vpop.f32.mrf.mxu2  ;;  %v642_v15 = vpop.f32.mrf.mxu3 }
  0xd1   : > { %v654_v16 = vpop.f32.mrf.mxu0  ;;  %v673_v17 = vpop.f32.mrf.mxu1 }
  0xd2   : > { %v658_v18 = vadd.f32 %v654_v16, %v644_v13 }
  0xd4   : > { %v677_v19 = vadd.f32 %v673_v17, %v658_v18 }
  0xd6   : > { %v679_v21 = vadd.f32 %v677_v19, %v1613_v59  ;;  %v680_v22 = vmul.f32 %v677_v19, %v677_v19  ;;  %v683_v23 = vmax.f32 %v1613_v59, %v677_v19 }
  0xd8   : > { %v682_v24 = vadd.f32 %v680_v22, %v536_v20  ;;  %v693_v25 = vpop.f32.mrf.mxu2  ;;  %v706_v26 = vpop.f32.mrf.mxu3 }
  0xd9   : > { %v656_v27 = vpop.f32.mrf.mxu0  ;;  %v675_v28 = vpop.f32.mrf.mxu1  ;;  %v707_v47 = vadd.f32 %v706_v26, %v693_v25 }
  0xe0   : > { %v695_v29 = vpop.f32.mrf.mxu2  ;;  %v708_v30 = vpop.f32.mrf.mxu3 }
  0xe1   : > { %v719_v31 = vpop.f32.mrf.mxu0  ;;  %v733_v32 = vpop.f32.mrf.mxu1 }
  0xe2   : > { %v723_v50 = vadd.f32 %v719_v31, %v707_v47 }
  0xe4   : > { %v737_v51 = vadd.f32 %v733_v32, %v723_v50 }
  0xe8   : > { %v747_v33 = vpop.f32.mrf.mxu2  ;;  %v761_v34 = vpop.f32.mrf.mxu3 }
  0xe9   : > { %v721_v35 = vpop.f32.mrf.mxu0  ;;  %v735_v36 = vpop.f32.mrf.mxu1  ;;  %v751_v55 = vadd.f32 %v747_v33, %v737_v51 }
  0xeb   : > { %v765_v59 = vadd.f32 %v761_v34, %v751_v55 }
  0xf0   : > { %v749_v37 = vpop.f32.mrf.mxu2  ;;  %v763_v38 = vpop.f32.mrf.mxu3 }
  0xf1   : > { %v780_v39 = vpop.f32.mrf.mxu0  ;;  %v799_v40 = vpop.f32.mrf.mxu1 }
  0xf2   : > { %v784_v61 = vadd.f32 %v780_v39, %v765_v59 }
  0xf4   : > { %v803_v3 = vadd.f32 %v799_v40, %v784_v61 }
  0xf8   : > { %v818_v41 = vpop.f32.mrf.mxu2  ;;  %v838_v42 = vpop.f32.mrf.mxu3 }
  0xf9   : > { %v782_v43 = vpop.f32.mrf.mxu0  ;;  %v801_v44 = vpop.f32.mrf.mxu1  ;;  %v822_v5 = vadd.f32 %v818_v41, %v803_v3 }
  0xfb   : > { %v825_v9 = vmul.f32 %v822_v5, %v822_v5  ;;  %v824_v13 = vadd.f32 %v822_v5, %v679_v21  ;;  %v828_v14 = vmax.f32 %v683_v23, %v822_v5 }
  0xfd   : > { %v827_v16 = vadd.f32 %v825_v9, %v682_v24 }
 0x100   : > { %v820_v45 = vpop.f32.mrf.mxu2  ;;  %v840_v46 = vpop.f32.mrf.mxu3 }
 0x101   : > { %v851_v48 = vpop.f32.mrf.mxu0  ;;  %v864_v49 = vpop.f32.mrf.mxu1 }
 0x102   : > { %v852_v52 = vadd.f32 %v851_v48, %v838_v42 }
 0x104   : > { %v868_v58 = vadd.f32 %v864_v49, %v852_v52 }
 0x108   : > { %v878_v53 = vpop.f32.mrf.mxu2  ;;  %v892_v54 = vpop.f32.mrf.mxu3 }
 0x109   : > { %v853_v56 = vpop.f32.mrf.mxu0  ;;  %v866_v57 = vpop.f32.mrf.mxu1  ;;  %v882_v60 = vadd.f32 %v878_v53, %v868_v58 }
 0x10b   : > { %v896_v0 = vadd.f32 %v892_v54, %v882_v60 }
 0x110   : > { %v880_v62 = vpop.f32.mrf.mxu2  ;;  %v894_v63 = vpop.f32.mrf.mxu3 }
 0x111   : > { %v906_v1 = vpop.f32.mrf.mxu0  ;;  %v920_v2 = vpop.f32.mrf.mxu1 }
 0x112   : > { %v910_v4 = vadd.f32 %v906_v1, %v896_v0 }
 0x114   : > { %v924_v6 = vadd.f32 %v920_v2, %v910_v4 }
 0x118   : > { %v934_v7 = vpop.f32.mrf.mxu2  ;;  %v953_v8 = vpop.f32.mrf.mxu3 }
 0x119   : > { %v938_v10 = vadd.f32 %v934_v7, %v924_v6  ;;  %v908_v11 = vpop.f32.mrf.mxu0  ;;  %v922_v12 = vpop.f32.mrf.mxu1 }
 0x11b   : > { %v957_v15 = vadd.f32 %v953_v8, %v938_v10 }
 0x11c   : > { %968 = sbr.rel (%p1249_p5) target bundleno = 291 (0x123), region = 32 }
 0x11d   : > { %v959_v17 = vadd.f32 %v957_v15, %v824_v13  ;;  %v960_v18 = vmul.f32 %v957_v15, %v957_v15  ;;  %v963_v19 = vmax.f32 %v828_v14, %v957_v15 }
 0x11f   : > { %v962_v20 = vadd.f32 %v960_v18, %v827_v16  ;;  %964 = vst [vmem:[%s207_s10] sm:$0x1] %v963_v19 }
 0x120   : > { %v936_v22 = vpop.f32.mrf.mxu2  ;;  %v955_v25 = vpop.f32.mrf.mxu3 }
 0x121   : > { %v1320_v26 = vmov 0.0  }
 0x122   : > { %969 = vst [vmem:[%s1645_s3] sm:$0x3] %v1320_v26 }
 0x123 PF: > { %v972_v23 = vrot.slane %v962_v20, 7  ;;  %vm974_vm1 = vcmask 1040384  }
 0x125   : > { %v975_v24 = vsel %vm974_vm1, %v959_v17, %v972_v23 }
 0x129   : > { %v970_v21 = vld [vmem:[%s1645_s3] sm:$0x3] }
 0x12a   : > { %v976_v27 = vadd.f32 %v975_v24, %v970_v21 }
 0x12c   : > { %977 = vst [vmem:[%s1645_s3] sm:$0x3] %v976_v27 }
 0x12d PF: > { %s14_s14 = sadd.s32 1, %s1318_s14   ;;  %s1646_s12 = smov %s1314_s13 }
 0x12e   : > { %p11_p6 = scmp.ge.s32.totalorder %s14_s14, 4   ;;  %s1647_s13 = smov %s1649_s15 }
 0x130   :  { %13 = sbr.rel (!%p11_p6) target bundleno = 2 (0x2), region = 100 }

</bundles_post_ra>
